<compile_context>
chip_gen: v6e
topology: v6e:2x2x1
jax: 0.10.0
libtpu: 0.0.40
codegen_flags: <defaults>
</compile_context>

<pallas_src>
import functools

import jax
import jax.numpy as jnp
from jax.experimental import pallas as pl
from jax.experimental.pallas import tpu as pltpu


def _round_up(x, m):
    return (x + m - 1) // m * m


# ---------------------------------------------------------------------------
# In-kernel helpers
# ---------------------------------------------------------------------------
def _reflect_pad_into(scr, v, H, W):
    """Write v (H, W, C) into scr (H+2, W+2, C) with ReflectionPad2d(1) semantics."""
    scr[pl.ds(1, H), pl.ds(1, W), :] = v                      # interior
    scr[pl.ds(0, 1), pl.ds(1, W), :] = v[1:2]                 # top row    <- row 1
    scr[pl.ds(H + 1, 1), pl.ds(1, W), :] = v[H - 2:H - 1]     # bottom row <- row H-2
    # columns: reflect the already row-padded slab (RHS is loaded before the write,
    # so the corners come out right).  Keep this load-before-store ordering.
    scr[:, pl.ds(0, 1), :] = scr[:, pl.ds(2, 1), :]
    scr[:, pl.ds(W + 1, 1), :] = scr[:, pl.ds(W - 1, 1), :]


def _build_im2col(pad_scr, col_scr, H, W, C):
    """Scatter the 9 shifted views of the padded bf16 tile into one (H*W, 9*C) slab."""
    for t in range(9):
        dy, dx = t // 3, t % 3
        a = pad_scr[pl.ds(dy, H), pl.ds(dx, W), :]            # (H, W, C) bf16
        col_scr[:, pl.ds(t * C, C)] = a.reshape(H * W, C)


# ---------------------------------------------------------------------------
# Fused ResidualBlockDown kernel (one grid step = one batch image)
# ---------------------------------------------------------------------------
def _rbd_kernel(x_ref, w1_ref, b1_ref, w2_ref, b2_ref, wl_ref, bl_ref, o_ref,
                pad_x, col1, pad_y, col2, *, H, W, Cin, Cp, Cout):
    Hh, Wh = H // 2, W // 2
    x = x_ref[0]                                              # (H, W, Cin) bf16, raw x

    # right branch: relu -> reflect pad -> conv_r1 (single K = 9*Cin matmul) -> relu
    _reflect_pad_into(pad_x, jnp.maximum(x, 0), H, W)
    _build_im2col(pad_x, col1, H, W, Cin)
    y1 = jnp.dot(col1[...], w1_ref[...],
                 preferred_element_type=jnp.float32) + b1_ref[...]
    y1 = jnp.maximum(y1, 0.0).astype(jnp.bfloat16)            # (H*W, Cp) bf16

    # reflect pad -> conv_r2 (single K = 9*Cp matmul, f32 accumulation)
    _reflect_pad_into(pad_y, y1.reshape(H, W, Cp), H, W)
    _build_im2col(pad_y, col2, H, W, Cp)
    y2 = jnp.dot(col2[...], w2_ref[...],
                 preferred_element_type=jnp.float32) + b2_ref[...]

    # left branch: 1x1 conv on the raw residual (shares the resident x tile)
    yl = jnp.dot(x.reshape(H * W, Cin), wl_ref[...],
                 preferred_element_type=jnp.float32) + bl_ref[...]

    # avg_pool2d(2) of both branches + add.  Pooling is linear, so
    # pool(y2) + pool(yl) == pool(y2 + yl): pool the sum once, on values
    # (no scratch round-trip, no strided masked reloads).
    s = (y2 + yl) * 0.25                                      # (H*W, Cp) f32
    s = s.reshape(H * Wh, 2, Cp)
    s = s[:, 0, :] + s[:, 1, :]                               # pooled along W -> (H*Wh, Cp)
    s = s.reshape(Hh, 2, Wh, Cp)
    pooled = s[:, 0] + s[:, 1]                                # pooled along H -> (Hh, Wh, Cp)
    o_ref[0] = pooled[:, :, :Cout].astype(o_ref.dtype)        # only real channels hit HBM


# ---------------------------------------------------------------------------
# Wrapper (layout + parameter packing in plain JAX)
# ---------------------------------------------------------------------------
def _pack_conv3x3(w, cin_pad, cout_pad):
    # torch (Cout, Cin, 3, 3) -> (9*cin_pad, cout_pad) bf16, im2col row order (dy, dx, cin)
    cout, cin, kh, kw = w.shape
    t = jnp.transpose(w, (2, 3, 1, 0))                        # (kh, kw, cin, cout)
    t = jnp.pad(t, ((0, 0), (0, 0), (0, cin_pad - cin), (0, cout_pad - cout)))
    return t.reshape(kh * kw * cin_pad, cout_pad).astype(jnp.bfloat16)


def _pack_conv1x1(w, cout_pad):
    cout, cin = w.shape[0], w.shape[1]
    t = w.reshape(cout, cin).T                                # (cin, cout)
    return jnp.pad(t, ((0, 0), (0, cout_pad - cout))).astype(jnp.bfloat16)


def _pack_bias(b, cout_pad):
    return jnp.pad(b, (0, cout_pad - b.shape[0])).reshape(1, cout_pad).astype(jnp.float32)


def residual_block_down(x_nchw, params):
    w1, b1, w2, b2, wl, bl = (params[k] for k in ("w1", "b1", "w2", "b2", "wl", "bl"))
    N, Cin, H, W = x_nchw.shape
    assert H % 2 == 0 and W % 2 == 0 and H >= 2 and W >= 2, \
        "ResidualBlockDown kernel assumes even spatial dims >= 2 (avg_pool2d(2) + reflect pad)"
    Cout = w1.shape[0]
    Cp = _round_up(Cout, 128)                                 # lane-dense matmul N dim
    Hh, Wh = H // 2, W // 2

    # x only feeds bf16 MXU matmuls -> cast once here (halves input DMA + pad_x footprint).
    x = jnp.transpose(x_nchw, (0, 2, 3, 1)).astype(jnp.bfloat16)    # NHWC bf16

    w1_p = _pack_conv3x3(w1, Cin, Cp)        # (9*Cin, Cp) bf16
    w2_p = _pack_conv3x3(w2, Cp, Cp)         # (9*Cp,  Cp) bf16
    wl_p = _pack_conv1x1(wl, Cp)             # (Cin,   Cp) bf16
    b1_p, b2_p, bl_p = _pack_bias(b1, Cp), _pack_bias(b2, Cp), _pack_bias(bl, Cp)

    # VMEM budget: scratch slabs + double-buffered blocks, clamped to a safe range.
    bpe = 2  # bf16
    scratch_bytes = ((H + 2) * (W + 2) * Cin * bpe + H * W * 9 * Cin * bpe +
                     (H + 2) * (W + 2) * Cp * bpe + H * W * 9 * Cp * bpe)
    block_bytes = 2 * (H * W * Cin * bpe + Hh * Wh * Cout * 4 +
                       w1_p.size * bpe + w2_p.size * bpe + wl_p.size * bpe + 3 * Cp * 4)
    vmem_limit = int(min(96 * 2**20, max(32 * 2**20,
                                         scratch_bytes + block_bytes + 8 * 2**20)))

    kernel = functools.partial(_rbd_kernel, H=H, W=W, Cin=Cin, Cp=Cp, Cout=Cout)
    # TODO(synk): for large images, tile H with a 2-row halo (grid=(N, H//TH)) so the
    # per-step working set stays under v7x's 64 MiB VMEM and each core gets >=2 steps.
    out = pl.pallas_call(
        kernel,
        out_shape=jax.ShapeDtypeStruct((N, Hh, Wh, Cout), jnp.float32),
        grid=(N,),
        in_specs=[
            pl.BlockSpec((1, H, W, Cin), lambda b: (b, 0, 0, 0)),   # x: one image / step
            pl.BlockSpec((9 * Cin, Cp), lambda b: (0, 0)),          # weights stay resident
            pl.BlockSpec((1, Cp), lambda b: (0, 0)),
            pl.BlockSpec((9 * Cp, Cp), lambda b: (0, 0)),
            pl.BlockSpec((1, Cp), lambda b: (0, 0)),
            pl.BlockSpec((Cin, Cp), lambda b: (0, 0)),
            pl.BlockSpec((1, Cp), lambda b: (0, 0)),
        ],
        out_specs=pl.BlockSpec((1, Hh, Wh, Cout), lambda b: (b, 0, 0, 0)),
        scratch_shapes=[
            pltpu.VMEM((H + 2, W + 2, Cin), jnp.bfloat16),   # reflect-padded relu(x)
            pltpu.VMEM((H * W, 9 * Cin), jnp.bfloat16),      # conv_r1 im2col slab
            pltpu.VMEM((H + 2, W + 2, Cp), jnp.bfloat16),    # reflect-padded relu(y1)
            pltpu.VMEM((H * W, 9 * Cp), jnp.bfloat16),       # conv_r2 im2col slab
        ],
        compiler_params=pltpu.CompilerParams(
            dimension_semantics=("parallel",),               # megacore: split batch
            vmem_limit_bytes=vmem_limit,
        ),
    )(x, w1_p, b1_p, w2_p, b2_p, wl_p, bl_p)

    return jnp.transpose(out, (0, 3, 1, 2))                  # NHWC -> NCHW


# ---------------------------------------------------------------------------
# Parameter prep: spectral normalization (parameter setup, not the forward hot path)
# ---------------------------------------------------------------------------
def spectral_normalize(w, n_iter=50):
    wm = w.reshape(w.shape[0], -1).astype(jnp.float32)

    def body(_, v):
        u = wm @ v
        u = u / (jnp.linalg.norm(u) + 1e-12)
        v = wm.T @ u
        v = v / (jnp.linalg.norm(v) + 1e-12)
        return v

    v0 = jnp.ones((wm.shape[1],), jnp.float32) / jnp.sqrt(wm.shape[1])
    v = jax.lax.fori_loop(0, n_iter, body, v0)
    u = wm @ v
    u = u / (jnp.linalg.norm(u) + 1e-12)
    sigma = u @ (wm @ v)
    return w / sigma


# ---------------------------------------------------------------------------
# Pure-JAX f32 reference (correctness check)
# ---------------------------------------------------------------------------
def _reflect_pad(x, p):
    if p == 0:
        return x
    return jnp.pad(x, ((0, 0), (p, p), (p, p), (0, 0)), mode="reflect")


def _conv_ref(x, w, b, pad):
    xp = _reflect_pad(x, pad)
    y = jax.lax.conv_general_dilated(
        xp, jnp.transpose(w, (2, 3, 1, 0)), window_strides=(1, 1), padding="VALID",
        dimension_numbers=("NHWC", "HWIO", "NHWC"))
    return y + b


def residual_block_down_ref(x_nchw, params):
    w1, b1, w2, b2, wl, bl = (params[k] for k in ("w1", "b1", "w2", "b2", "wl", "bl"))
    x = jnp.transpose(x_nchw, (0, 2, 3, 1)).astype(jnp.float32)

    out = jnp.maximum(x, 0.0)
    out = _conv_ref(out, w1, b1, 1)
    out = jnp.maximum(out, 0.0)
    out = _conv_ref(out, w2, b2, 1)
    n, h, w, c = out.shape
    out = out.reshape(n, h // 2, 2, w // 2, 2, c).mean(axis=(2, 4))

    res = _conv_ref(x, wl, bl, 0)
    res = res.reshape(n, h // 2, 2, w // 2, 2, c).mean(axis=(2, 4))
    return jnp.transpose(res + out, (0, 3, 1, 2))


if __name__ == "__main__":
    key = jax.random.PRNGKey(0)
    kx, k1, kb1, k2, kb2, kl, kbl = jax.random.split(key, 7)

    N, Cin, Cout, H, W, K = 2, 4, 8, 16, 16, 3
    x = jax.random.normal(kx, (N, Cin, H, W), jnp.float32)

    params = {
        "w1": spectral_normalize(0.1 * jax.random.normal(k1, (Cout, Cin, K, K), jnp.float32)),
        "b1": 0.1 * jax.random.normal(kb1, (Cout,), jnp.float32),
        "w2": spectral_normalize(0.1 * jax.random.normal(k2, (Cout, Cout, K, K), jnp.float32)),
        "b2": 0.1 * jax.random.normal(kb2, (Cout,), jnp.float32),
        "wl": spectral_normalize(0.1 * jax.random.normal(kl, (Cout, Cin, 1, 1), jnp.float32)),
        "bl": 0.1 * jax.random.normal(kbl, (Cout,), jnp.float32),
    }

    out = jax.block_until_ready(jax.jit(residual_block_down)(x, params))
    ref = jax.block_until_ready(residual_block_down_ref(x, params))

    assert out.shape == (N, Cout, H // 2, W // 2), out.shape
    # bf16 inputs/weights/activations with f32 MXU accumulation vs. the pure-f32 reference.
    assert bool(jnp.allclose(out, ref, atol=3e-2, rtol=3e-2))
    print("KERNEL_OK")
</pallas_src>

<mosaic_0001>
module attributes {stable_mosaic.version = 11 : i64} {
  func.func @_rbd_kernel(%arg0: i32, %arg1: memref<1x16x16x4xbf16, #tpu.memory_space<vmem>>, %arg2: memref<36x128xbf16, #tpu.memory_space<vmem>>, %arg3: memref<1x128xf32, #tpu.memory_space<vmem>>, %arg4: memref<1152x128xbf16, #tpu.memory_space<vmem>>, %arg5: memref<1x128xf32, #tpu.memory_space<vmem>>, %arg6: memref<4x128xbf16, #tpu.memory_space<vmem>>, %arg7: memref<1x128xf32, #tpu.memory_space<vmem>>, %arg8: memref<1x8x8x8xf32, #tpu.memory_space<vmem>>, %arg9: memref<18x18x4xbf16, #tpu.memory_space<vmem>>, %arg10: memref<256x36xbf16, #tpu.memory_space<vmem>>, %arg11: memref<18x18x128xbf16, #tpu.memory_space<vmem>>, %arg12: memref<256x1152xbf16, #tpu.memory_space<vmem>>) attributes {dimension_semantics = [#tpu.dimension_semantics<parallel>], iteration_bounds = array<i64: 2>, scalar_prefetch = 0 : i64, scratch_operands = 4 : i64, tpu.core_type = #tpu.core_type<tc>, window_params = [{transform_indices = @transform_0, window_bounds = array<i64: 1, 16, 16, 4>}, {pipeline_mode = #tpu.pipeline_mode<synchronous>, transform_indices = @transform_1, window_bounds = array<i64: 36, 128>}, {pipeline_mode = #tpu.pipeline_mode<synchronous>, transform_indices = @transform_2, window_bounds = array<i64: 1, 128>}, {pipeline_mode = #tpu.pipeline_mode<synchronous>, transform_indices = @transform_3, window_bounds = array<i64: 1152, 128>}, {pipeline_mode = #tpu.pipeline_mode<synchronous>, transform_indices = @transform_4, window_bounds = array<i64: 1, 128>}, {pipeline_mode = #tpu.pipeline_mode<synchronous>, transform_indices = @transform_5, window_bounds = array<i64: 4, 128>}, {pipeline_mode = #tpu.pipeline_mode<synchronous>, transform_indices = @transform_6, window_bounds = array<i64: 1, 128>}, {transform_indices = @transform_7, window_bounds = array<i64: 1, 8, 8, 8>}]} {
    %c0 = arith.constant 0 : index
    %c0_0 = arith.constant 0 : index
    %c0_1 = arith.constant 0 : index
    %c0_2 = arith.constant 0 : index
    %0 = vector.load %arg1[%c0, %c0_0, %c0_1, %c0_2] : memref<1x16x16x4xbf16, #tpu.memory_space<vmem>>, vector<1x16x16x4xbf16>
    %1 = vector.shape_cast %0 : vector<1x16x16x4xbf16> to vector<16x16x4xbf16>
    %cst = arith.constant 0.000000e+00 : bf16
    %2 = vector.broadcast %cst : bf16 to vector<16x16x4xbf16>
    %3 = arith.maximumf %1, %2 : vector<16x16x4xbf16>
    %c1 = arith.constant 1 : index
    %c1_3 = arith.constant 1 : index
    %c0_4 = arith.constant 0 : index
    %4 = vector.load %arg9[%c1, %c1_3, %c0_4] : memref<18x18x4xbf16, #tpu.memory_space<vmem>>, vector<16x16x4xbf16>
    tpu.vector_store %arg9[%c1, %c1_3, %c0_4], %3 {strides = array<i32>} : memref<18x18x4xbf16, #tpu.memory_space<vmem>>, vector<16x16x4xbf16>,
    %5 = vector.extract_strided_slice %3 {offsets = [1, 0, 0], sizes = [1, 16, 4], strides = [1, 1, 1]} : vector<16x16x4xbf16> to vector<1x16x4xbf16>
    %c0_5 = arith.constant 0 : index
    %c1_6 = arith.constant 1 : index
    %c0_7 = arith.constant 0 : index
    %6 = vector.load %arg9[%c0_5, %c1_6, %c0_7] : memref<18x18x4xbf16, #tpu.memory_space<vmem>>, vector<1x16x4xbf16>
    tpu.vector_store %arg9[%c0_5, %c1_6, %c0_7], %5 {strides = array<i32>} : memref<18x18x4xbf16, #tpu.memory_space<vmem>>, vector<1x16x4xbf16>,
    %7 = vector.extract_strided_slice %3 {offsets = [14, 0, 0], sizes = [1, 16, 4], strides = [1, 1, 1]} : vector<16x16x4xbf16> to vector<1x16x4xbf16>
    %c17 = arith.constant 17 : index
    %c1_8 = arith.constant 1 : index
    %c0_9 = arith.constant 0 : index
    %8 = vector.load %arg9[%c17, %c1_8, %c0_9] : memref<18x18x4xbf16, #tpu.memory_space<vmem>>, vector<1x16x4xbf16>
    tpu.vector_store %arg9[%c17, %c1_8, %c0_9], %7 {strides = array<i32>} : memref<18x18x4xbf16, #tpu.memory_space<vmem>>, vector<1x16x4xbf16>,
    %c0_10 = arith.constant 0 : index
    %c2 = arith.constant 2 : index
    %c0_11 = arith.constant 0 : index
    %9 = vector.load %arg9[%c0_10, %c2, %c0_11] : memref<18x18x4xbf16, #tpu.memory_space<vmem>>, vector<18x1x4xbf16>
    %c0_12 = arith.constant 0 : index
    %c0_13 = arith.constant 0 : index
    %c0_14 = arith.constant 0 : index
    %10 = vector.load %arg9[%c0_12, %c0_13, %c0_14] : memref<18x18x4xbf16, #tpu.memory_space<vmem>>, vector<18x1x4xbf16>
    tpu.vector_store %arg9[%c0_12, %c0_13, %c0_14], %9 {strides = array<i32>} : memref<18x18x4xbf16, #tpu.memory_space<vmem>>, vector<18x1x4xbf16>,
    %c0_15 = arith.constant 0 : index
    %c15 = arith.constant 15 : index
    %c0_16 = arith.constant 0 : index
    %11 = vector.load %arg9[%c0_15, %c15, %c0_16] : memref<18x18x4xbf16, #tpu.memory_space<vmem>>, vector<18x1x4xbf16>
    %c0_17 = arith.constant 0 : index
    %c17_18 = arith.constant 17 : index
    %c0_19 = arith.constant 0 : index
    %12 = vector.load %arg9[%c0_17, %c17_18, %c0_19] : memref<18x18x4xbf16, #tpu.memory_space<vmem>>, vector<18x1x4xbf16>
    tpu.vector_store %arg9[%c0_17, %c17_18, %c0_19], %11 {strides = array<i32>} : memref<18x18x4xbf16, #tpu.memory_space<vmem>>, vector<18x1x4xbf16>,
    %c0_20 = arith.constant 0 : index
    %c0_21 = arith.constant 0 : index
    %c0_22 = arith.constant 0 : index
    %13 = vector.load %arg9[%c0_20, %c0_21, %c0_22] : memref<18x18x4xbf16, #tpu.memory_space<vmem>>, vector<16x16x4xbf16>
    %14 = vector.shape_cast %13 : vector<16x16x4xbf16> to vector<256x4xbf16>
    %c0_23 = arith.constant 0 : index
    %c0_24 = arith.constant 0 : index
    %15 = vector.load %arg10[%c0_23, %c0_24] : memref<256x36xbf16, #tpu.memory_space<vmem>>, vector<256x4xbf16>
    tpu.vector_store %arg10[%c0_23, %c0_24], %14 {strides = array<i32>} : memref<256x36xbf16, #tpu.memory_space<vmem>>, vector<256x4xbf16>,
    %c0_25 = arith.constant 0 : index
    %c1_26 = arith.constant 1 : index
    %c0_27 = arith.constant 0 : index
    %16 = vector.load %arg9[%c0_25, %c1_26, %c0_27] : memref<18x18x4xbf16, #tpu.memory_space<vmem>>, vector<16x16x4xbf16>
    %17 = vector.shape_cast %16 : vector<16x16x4xbf16> to vector<256x4xbf16>
    %c0_28 = arith.constant 0 : index
    %c4 = arith.constant 4 : index
    %18 = vector.load %arg10[%c0_28, %c4] : memref<256x36xbf16, #tpu.memory_space<vmem>>, vector<256x4xbf16>
    tpu.vector_store %arg10[%c0_28, %c4], %17 {strides = array<i32>} : memref<256x36xbf16, #tpu.memory_space<vmem>>, vector<256x4xbf16>,
    %c0_29 = arith.constant 0 : index
    %c2_30 = arith.constant 2 : index
    %c0_31 = arith.constant 0 : index
    %19 = vector.load %arg9[%c0_29, %c2_30, %c0_31] : memref<18x18x4xbf16, #tpu.memory_space<vmem>>, vector<16x16x4xbf16>
    %20 = vector.shape_cast %19 : vector<16x16x4xbf16> to vector<256x4xbf16>
    %c0_32 = arith.constant 0 : index
    %c8 = arith.constant 8 : index
    %21 = vector.load %arg10[%c0_32, %c8] : memref<256x36xbf16, #tpu.memory_space<vmem>>, vector<256x4xbf16>
    tpu.vector_store %arg10[%c0_32, %c8], %20 {strides = array<i32>} : memref<256x36xbf16, #tpu.memory_space<vmem>>, vector<256x4xbf16>,
    %c1_33 = arith.constant 1 : index
    %c0_34 = arith.constant 0 : index
    %c0_35 = arith.constant 0 : index
    %22 = vector.load %arg9[%c1_33, %c0_34, %c0_35] : memref<18x18x4xbf16, #tpu.memory_space<vmem>>, vector<16x16x4xbf16>
    %23 = vector.shape_cast %22 : vector<16x16x4xbf16> to vector<256x4xbf16>
    %c0_36 = arith.constant 0 : index
    %c12 = arith.constant 12 : index
    %24 = vector.load %arg10[%c0_36, %c12] : memref<256x36xbf16, #tpu.memory_space<vmem>>, vector<256x4xbf16>
    tpu.vector_store %arg10[%c0_36, %c12], %23 {strides = array<i32>} : memref<256x36xbf16, #tpu.memory_space<vmem>>, vector<256x4xbf16>,
    %c1_37 = arith.constant 1 : index
    %c1_38 = arith.constant 1 : index
    %c0_39 = arith.constant 0 : index
    %25 = vector.load %arg9[%c1_37, %c1_38, %c0_39] : memref<18x18x4xbf16, #tpu.memory_space<vmem>>, vector<16x16x4xbf16>
    %26 = vector.shape_cast %25 : vector<16x16x4xbf16> to vector<256x4xbf16>
    %c0_40 = arith.constant 0 : index
    %c16 = arith.constant 16 : index
    %27 = vector.load %arg10[%c0_40, %c16] : memref<256x36xbf16, #tpu.memory_space<vmem>>, vector<256x4xbf16>
    tpu.vector_store %arg10[%c0_40, %c16], %26 {strides = array<i32>} : memref<256x36xbf16, #tpu.memory_space<vmem>>, vector<256x4xbf16>,
    %c1_41 = arith.constant 1 : index
    %c2_42 = arith.constant 2 : index
    %c0_43 = arith.constant 0 : index
    %28 = vector.load %arg9[%c1_41, %c2_42, %c0_43] : memref<18x18x4xbf16, #tpu.memory_space<vmem>>, vector<16x16x4xbf16>
    %29 = vector.shape_cast %28 : vector<16x16x4xbf16> to vector<256x4xbf16>
    %c0_44 = arith.constant 0 : index
    %c20 = arith.constant 20 : index
    %30 = vector.load %arg10[%c0_44, %c20] : memref<256x36xbf16, #tpu.memory_space<vmem>>, vector<256x4xbf16>
    tpu.vector_store %arg10[%c0_44, %c20], %29 {strides = array<i32>} : memref<256x36xbf16, #tpu.memory_space<vmem>>, vector<256x4xbf16>,
    %c2_45 = arith.constant 2 : index
    %c0_46 = arith.constant 0 : index
    %c0_47 = arith.constant 0 : index
    %31 = vector.load %arg9[%c2_45, %c0_46, %c0_47] : memref<18x18x4xbf16, #tpu.memory_space<vmem>>, vector<16x16x4xbf16>
    %32 = vector.shape_cast %31 : vector<16x16x4xbf16> to vector<256x4xbf16>
    %c0_48 = arith.constant 0 : index
    %c24 = arith.constant 24 : index
    %33 = vector.load %arg10[%c0_48, %c24] : memref<256x36xbf16, #tpu.memory_space<vmem>>, vector<256x4xbf16>
    tpu.vector_store %arg10[%c0_48, %c24], %32 {strides = array<i32>} : memref<256x36xbf16, #tpu.memory_space<vmem>>, vector<256x4xbf16>,
    %c2_49 = arith.constant 2 : index
    %c1_50 = arith.constant 1 : index
    %c0_51 = arith.constant 0 : index
    %34 = vector.load %arg9[%c2_49, %c1_50, %c0_51] : memref<18x18x4xbf16, #tpu.memory_space<vmem>>, vector<16x16x4xbf16>
    %35 = vector.shape_cast %34 : vector<16x16x4xbf16> to vector<256x4xbf16>
    %c0_52 = arith.constant 0 : index
    %c28 = arith.constant 28 : index
    %36 = vector.load %arg10[%c0_52, %c28] : memref<256x36xbf16, #tpu.memory_space<vmem>>, vector<256x4xbf16>
    tpu.vector_store %arg10[%c0_52, %c28], %35 {strides = array<i32>} : memref<256x36xbf16, #tpu.memory_space<vmem>>, vector<256x4xbf16>,
    %c2_53 = arith.constant 2 : index
    %c2_54 = arith.constant 2 : index
    %c0_55 = arith.constant 0 : index
    %37 = vector.load %arg9[%c2_53, %c2_54, %c0_55] : memref<18x18x4xbf16, #tpu.memory_space<vmem>>, vector<16x16x4xbf16>
    %38 = vector.shape_cast %37 : vector<16x16x4xbf16> to vector<256x4xbf16>
    %c0_56 = arith.constant 0 : index
    %c32 = arith.constant 32 : index
    %39 = vector.load %arg10[%c0_56, %c32] : memref<256x36xbf16, #tpu.memory_space<vmem>>, vector<256x4xbf16>
    tpu.vector_store %arg10[%c0_56, %c32], %38 {strides = array<i32>} : memref<256x36xbf16, #tpu.memory_space<vmem>>, vector<256x4xbf16>,
    %c0_57 = arith.constant 0 : index
    %c0_58 = arith.constant 0 : index
    %40 = vector.load %arg10[%c0_57, %c0_58] : memref<256x36xbf16, #tpu.memory_space<vmem>>, vector<256x36xbf16>
    %c0_59 = arith.constant 0 : index
    %c0_60 = arith.constant 0 : index
    %41 = vector.load %arg2[%c0_59, %c0_60] : memref<36x128xbf16, #tpu.memory_space<vmem>>, vector<36x128xbf16>
    %cst_61 = arith.constant dense<0.000000e+00> : vector<256x128xf32>
    %42 = tpu.matmul %40, %41, %cst_61 {dimension_numbers = #tpu.dot_dimension_numbers<[1], [0], [0], [1], [0, 0, 1, 1], [], []>} : vector<256x36xbf16>, vector<36x128xbf16>, vector<256x128xf32> -> vector<256x128xf32>
    %c0_62 = arith.constant 0 : index
    %c0_63 = arith.constant 0 : index
    %43 = vector.load %arg3[%c0_62, %c0_63] : memref<1x128xf32, #tpu.memory_space<vmem>>, vector<1x128xf32>
    %44 = vector.broadcast %43 : vector<1x128xf32> to vector<256x128xf32>
    %45 = arith.addf %42, %44 : vector<256x128xf32>
    %cst_64 = arith.constant 0.000000e+00 : f32
    %46 = vector.broadcast %cst_64 : f32 to vector<256x128xf32>
    %47 = arith.maximumf %45, %46 : vector<256x128xf32>
    %48 = arith.truncf %47 : vector<256x128xf32> to vector<256x128xbf16>
    %49 = vector.shape_cast %48 : vector<256x128xbf16> to vector<16x16x128xbf16>
    %c1_65 = arith.constant 1 : index
    %c1_66 = arith.constant 1 : index
    %c0_67 = arith.constant 0 : index
    %50 = vector.load %arg11[%c1_65, %c1_66, %c0_67] : memref<18x18x128xbf16, #tpu.memory_space<vmem>>, vector<16x16x128xbf16>
    tpu.vector_store %arg11[%c1_65, %c1_66, %c0_67], %49 {strides = array<i32>} : memref<18x18x128xbf16, #tpu.memory_space<vmem>>, vector<16x16x128xbf16>,
    %51 = vector.extract_strided_slice %49 {offsets = [1, 0, 0], sizes = [1, 16, 128], strides = [1, 1, 1]} : vector<16x16x128xbf16> to vector<1x16x128xbf16>
    %c0_68 = arith.constant 0 : index
    %c1_69 = arith.constant 1 : index
    %c0_70 = arith.constant 0 : index
    %52 = vector.load %arg11[%c0_68, %c1_69, %c0_70] : memref<18x18x128xbf16, #tpu.memory_space<vmem>>, vector<1x16x128xbf16>
    tpu.vector_store %arg11[%c0_68, %c1_69, %c0_70], %51 {strides = array<i32>} : memref<18x18x128xbf16, #tpu.memory_space<vmem>>, vector<1x16x128xbf16>,
    %53 = vector.extract_strided_slice %49 {offsets = [14, 0, 0], sizes = [1, 16, 128], strides = [1, 1, 1]} : vector<16x16x128xbf16> to vector<1x16x128xbf16>
    %c17_71 = arith.constant 17 : index
    %c1_72 = arith.constant 1 : index
    %c0_73 = arith.constant 0 : index
    %54 = vector.load %arg11[%c17_71, %c1_72, %c0_73] : memref<18x18x128xbf16, #tpu.memory_space<vmem>>, vector<1x16x128xbf16>
    tpu.vector_store %arg11[%c17_71, %c1_72, %c0_73], %53 {strides = array<i32>} : memref<18x18x128xbf16, #tpu.memory_space<vmem>>, vector<1x16x128xbf16>,
    %c0_74 = arith.constant 0 : index
    %c2_75 = arith.constant 2 : index
    %c0_76 = arith.constant 0 : index
    %55 = vector.load %arg11[%c0_74, %c2_75, %c0_76] : memref<18x18x128xbf16, #tpu.memory_space<vmem>>, vector<18x1x128xbf16>
    %c0_77 = arith.constant 0 : index
    %c0_78 = arith.constant 0 : index
    %c0_79 = arith.constant 0 : index
    %56 = vector.load %arg11[%c0_77, %c0_78, %c0_79] : memref<18x18x128xbf16, #tpu.memory_space<vmem>>, vector<18x1x128xbf16>
    tpu.vector_store %arg11[%c0_77, %c0_78, %c0_79], %55 {strides = array<i32>} : memref<18x18x128xbf16, #tpu.memory_space<vmem>>, vector<18x1x128xbf16>,
    %c0_80 = arith.constant 0 : index
    %c15_81 = arith.constant 15 : index
    %c0_82 = arith.constant 0 : index
    %57 = vector.load %arg11[%c0_80, %c15_81, %c0_82] : memref<18x18x128xbf16, #tpu.memory_space<vmem>>, vector<18x1x128xbf16>
    %c0_83 = arith.constant 0 : index
    %c17_84 = arith.constant 17 : index
    %c0_85 = arith.constant 0 : index
    %58 = vector.load %arg11[%c0_83, %c17_84, %c0_85] : memref<18x18x128xbf16, #tpu.memory_space<vmem>>, vector<18x1x128xbf16>
    tpu.vector_store %arg11[%c0_83, %c17_84, %c0_85], %57 {strides = array<i32>} : memref<18x18x128xbf16, #tpu.memory_space<vmem>>, vector<18x1x128xbf16>,
    %c0_86 = arith.constant 0 : index
    %c0_87 = arith.constant 0 : index
    %c0_88 = arith.constant 0 : index
    %59 = vector.load %arg11[%c0_86, %c0_87, %c0_88] : memref<18x18x128xbf16, #tpu.memory_space<vmem>>, vector<16x16x128xbf16>
    %60 = vector.shape_cast %59 : vector<16x16x128xbf16> to vector<256x128xbf16>
    %c0_89 = arith.constant 0 : index
    %c0_90 = arith.constant 0 : index
    %61 = vector.load %arg12[%c0_89, %c0_90] : memref<256x1152xbf16, #tpu.memory_space<vmem>>, vector<256x128xbf16>
    tpu.vector_store %arg12[%c0_89, %c0_90], %60 {strides = array<i32>} : memref<256x1152xbf16, #tpu.memory_space<vmem>>, vector<256x128xbf16>,
    %c0_91 = arith.constant 0 : index
    %c1_92 = arith.constant 1 : index
    %c0_93 = arith.constant 0 : index
    %62 = vector.load %arg11[%c0_91, %c1_92, %c0_93] : memref<18x18x128xbf16, #tpu.memory_space<vmem>>, vector<16x16x128xbf16>
    %63 = vector.shape_cast %62 : vector<16x16x128xbf16> to vector<256x128xbf16>
    %c0_94 = arith.constant 0 : index
    %c128 = arith.constant 128 : index
    %64 = vector.load %arg12[%c0_94, %c128] : memref<256x1152xbf16, #tpu.memory_space<vmem>>, vector<256x128xbf16>
    tpu.vector_store %arg12[%c0_94, %c128], %63 {strides = array<i32>} : memref<256x1152xbf16, #tpu.memory_space<vmem>>, vector<256x128xbf16>,
    %c0_95 = arith.constant 0 : index
    %c2_96 = arith.constant 2 : index
    %c0_97 = arith.constant 0 : index
    %65 = vector.load %arg11[%c0_95, %c2_96, %c0_97] : memref<18x18x128xbf16, #tpu.memory_space<vmem>>, vector<16x16x128xbf16>
    %66 = vector.shape_cast %65 : vector<16x16x128xbf16> to vector<256x128xbf16>
    %c0_98 = arith.constant 0 : index
    %c256 = arith.constant 256 : index
    %67 = vector.load %arg12[%c0_98, %c256] : memref<256x1152xbf16, #tpu.memory_space<vmem>>, vector<256x128xbf16>
    tpu.vector_store %arg12[%c0_98, %c256], %66 {strides = array<i32>} : memref<256x1152xbf16, #tpu.memory_space<vmem>>, vector<256x128xbf16>,
    %c1_99 = arith.constant 1 : index
    %c0_100 = arith.constant 0 : index
    %c0_101 = arith.constant 0 : index
    %68 = vector.load %arg11[%c1_99, %c0_100, %c0_101] : memref<18x18x128xbf16, #tpu.memory_space<vmem>>, vector<16x16x128xbf16>
    %69 = vector.shape_cast %68 : vector<16x16x128xbf16> to vector<256x128xbf16>
    %c0_102 = arith.constant 0 : index
    %c384 = arith.constant 384 : index
    %70 = vector.load %arg12[%c0_102, %c384] : memref<256x1152xbf16, #tpu.memory_space<vmem>>, vector<256x128xbf16>
    tpu.vector_store %arg12[%c0_102, %c384], %69 {strides = array<i32>} : memref<256x1152xbf16, #tpu.memory_space<vmem>>, vector<256x128xbf16>,
    %c1_103 = arith.constant 1 : index
    %c1_104 = arith.constant 1 : index
    %c0_105 = arith.constant 0 : index
    %71 = vector.load %arg11[%c1_103, %c1_104, %c0_105] : memref<18x18x128xbf16, #tpu.memory_space<vmem>>, vector<16x16x128xbf16>
    %72 = vector.shape_cast %71 : vector<16x16x128xbf16> to vector<256x128xbf16>
    %c0_106 = arith.constant 0 : index
    %c512 = arith.constant 512 : index
    %73 = vector.load %arg12[%c0_106, %c512] : memref<256x1152xbf16, #tpu.memory_space<vmem>>, vector<256x128xbf16>
    tpu.vector_store %arg12[%c0_106, %c512], %72 {strides = array<i32>} : memref<256x1152xbf16, #tpu.memory_space<vmem>>, vector<256x128xbf16>,
    %c1_107 = arith.constant 1 : index
    %c2_108 = arith.constant 2 : index
    %c0_109 = arith.constant 0 : index
    %74 = vector.load %arg11[%c1_107, %c2_108, %c0_109] : memref<18x18x128xbf16, #tpu.memory_space<vmem>>, vector<16x16x128xbf16>
    %75 = vector.shape_cast %74 : vector<16x16x128xbf16> to vector<256x128xbf16>
    %c0_110 = arith.constant 0 : index
    %c640 = arith.constant 640 : index
    %76 = vector.load %arg12[%c0_110, %c640] : memref<256x1152xbf16, #tpu.memory_space<vmem>>, vector<256x128xbf16>
    tpu.vector_store %arg12[%c0_110, %c640], %75 {strides = array<i32>} : memref<256x1152xbf16, #tpu.memory_space<vmem>>, vector<256x128xbf16>,
    %c2_111 = arith.constant 2 : index
    %c0_112 = arith.constant 0 : index
    %c0_113 = arith.constant 0 : index
    %77 = vector.load %arg11[%c2_111, %c0_112, %c0_113] : memref<18x18x128xbf16, #tpu.memory_space<vmem>>, vector<16x16x128xbf16>
    %78 = vector.shape_cast %77 : vector<16x16x128xbf16> to vector<256x128xbf16>
    %c0_114 = arith.constant 0 : index
    %c768 = arith.constant 768 : index
    %79 = vector.load %arg12[%c0_114, %c768] : memref<256x1152xbf16, #tpu.memory_space<vmem>>, vector<256x128xbf16>
    tpu.vector_store %arg12[%c0_114, %c768], %78 {strides = array<i32>} : memref<256x1152xbf16, #tpu.memory_space<vmem>>, vector<256x128xbf16>,
    %c2_115 = arith.constant 2 : index
    %c1_116 = arith.constant 1 : index
    %c0_117 = arith.constant 0 : index
    %80 = vector.load %arg11[%c2_115, %c1_116, %c0_117] : memref<18x18x128xbf16, #tpu.memory_space<vmem>>, vector<16x16x128xbf16>
    %81 = vector.shape_cast %80 : vector<16x16x128xbf16> to vector<256x128xbf16>
    %c0_118 = arith.constant 0 : index
    %c896 = arith.constant 896 : index
    %82 = vector.load %arg12[%c0_118, %c896] : memref<256x1152xbf16, #tpu.memory_space<vmem>>, vector<256x128xbf16>
    tpu.vector_store %arg12[%c0_118, %c896], %81 {strides = array<i32>} : memref<256x1152xbf16, #tpu.memory_space<vmem>>, vector<256x128xbf16>,
    %c2_119 = arith.constant 2 : index
    %c2_120 = arith.constant 2 : index
    %c0_121 = arith.constant 0 : index
    %83 = vector.load %arg11[%c2_119, %c2_120, %c0_121] : memref<18x18x128xbf16, #tpu.memory_space<vmem>>, vector<16x16x128xbf16>
    %84 = vector.shape_cast %83 : vector<16x16x128xbf16> to vector<256x128xbf16>
    %c0_122 = arith.constant 0 : index
    %c1024 = arith.constant 1024 : index
    %85 = vector.load %arg12[%c0_122, %c1024] : memref<256x1152xbf16, #tpu.memory_space<vmem>>, vector<256x128xbf16>
    tpu.vector_store %arg12[%c0_122, %c1024], %84 {strides = array<i32>} : memref<256x1152xbf16, #tpu.memory_space<vmem>>, vector<256x128xbf16>,
    %c0_123 = arith.constant 0 : index
    %c0_124 = arith.constant 0 : index
    %86 = vector.load %arg12[%c0_123, %c0_124] : memref<256x1152xbf16, #tpu.memory_space<vmem>>, vector<256x1152xbf16>
    %c0_125 = arith.constant 0 : index
    %c0_126 = arith.constant 0 : index
    %87 = vector.load %arg4[%c0_125, %c0_126] : memref<1152x128xbf16, #tpu.memory_space<vmem>>, vector<1152x128xbf16>
    %cst_127 = arith.constant dense<0.000000e+00> : vector<256x128xf32>
    %88 = tpu.matmul %86, %87, %cst_127 {dimension_numbers = #tpu.dot_dimension_numbers<[1], [0], [0], [1], [0, 0, 1, 1], [], []>} : vector<256x1152xbf16>, vector<1152x128xbf16>, vector<256x128xf32> -> vector<256x128xf32>
    %c0_128 = arith.constant 0 : index
    %c0_129 = arith.constant 0 : index
    %89 = vector.load %arg5[%c0_128, %c0_129] : memref<1x128xf32, #tpu.memory_space<vmem>>, vector<1x128xf32>
    %90 = vector.broadcast %89 : vector<1x128xf32> to vector<256x128xf32>
    %91 = arith.addf %88, %90 : vector<256x128xf32>
    %92 = vector.shape_cast %1 : vector<16x16x4xbf16> to vector<256x4xbf16>
    %c0_130 = arith.constant 0 : index
    %c0_131 = arith.constant 0 : index
    %93 = vector.load %arg6[%c0_130, %c0_131] : memref<4x128xbf16, #tpu.memory_space<vmem>>, vector<4x128xbf16>
    %cst_132 = arith.constant dense<0.000000e+00> : vector<256x128xf32>
    %94 = tpu.matmul %92, %93, %cst_132 {dimension_numbers = #tpu.dot_dimension_numbers<[1], [0], [0], [1], [0, 0, 1, 1], [], []>} : vector<256x4xbf16>, vector<4x128xbf16>, vector<256x128xf32> -> vector<256x128xf32>
    %c0_133 = arith.constant 0 : index
    %c0_134 = arith.constant 0 : index
    %95 = vector.load %arg7[%c0_133, %c0_134] : memref<1x128xf32, #tpu.memory_space<vmem>>, vector<1x128xf32>
    %96 = vector.broadcast %95 : vector<1x128xf32> to vector<256x128xf32>
    %97 = arith.addf %94, %96 : vector<256x128xf32>
    %98 = arith.addf %91, %97 : vector<256x128xf32>
    %cst_135 = arith.constant 2.500000e-01 : f32
    %99 = vector.broadcast %cst_135 : f32 to vector<256x128xf32>
    %100 = arith.mulf %98, %99 : vector<256x128xf32>
    %101 = vector.shape_cast %100 : vector<256x128xf32> to vector<128x2x128xf32>
    %102 = vector.extract_strided_slice %101 {offsets = [0, 0, 0], sizes = [128, 1, 128], strides = [1, 1, 1]} : vector<128x2x128xf32> to vector<128x1x128xf32>
    %103 = vector.shape_cast %102 : vector<128x1x128xf32> to vector<128x128xf32>
    %104 = vector.extract_strided_slice %101 {offsets = [0, 1, 0], sizes = [128, 1, 128], strides = [1, 1, 1]} : vector<128x2x128xf32> to vector<128x1x128xf32>
    %105 = vector.shape_cast %104 : vector<128x1x128xf32> to vector<128x128xf32>
    %106 = arith.addf %103, %105 : vector<128x128xf32>
    %107 = vector.shape_cast %106 : vector<128x128xf32> to vector<8x2x8x128xf32>
    %108 = vector.extract_strided_slice %107 {offsets = [0, 0, 0, 0], sizes = [8, 1, 8, 128], strides = [1, 1, 1, 1]} : vector<8x2x8x128xf32> to vector<8x1x8x128xf32>
    %109 = vector.shape_cast %108 : vector<8x1x8x128xf32> to vector<8x8x128xf32>
    %110 = vector.extract_strided_slice %107 {offsets = [0, 1, 0, 0], sizes = [8, 1, 8, 128], strides = [1, 1, 1, 1]} : vector<8x2x8x128xf32> to vector<8x1x8x128xf32>
    %111 = vector.shape_cast %110 : vector<8x1x8x128xf32> to vector<8x8x128xf32>
    %112 = arith.addf %109, %111 : vector<8x8x128xf32>
    %113 = vector.extract_strided_slice %112 {offsets = [0, 0, 0], sizes = [8, 8, 8], strides = [1, 1, 1]} : vector<8x8x128xf32> to vector<8x8x8xf32>
    %c0_136 = arith.constant 0 : index
    %c0_137 = arith.constant 0 : index
    %c0_138 = arith.constant 0 : index
    %c0_139 = arith.constant 0 : index
    %114 = vector.load %arg8[%c0_136, %c0_137, %c0_138, %c0_139] : memref<1x8x8x8xf32, #tpu.memory_space<vmem>>, vector<1x8x8x8xf32>
    %115 = vector.shape_cast %114 : vector<1x8x8x8xf32> to vector<8x8x8xf32>
    %116 = vector.shape_cast %113 : vector<8x8x8xf32> to vector<1x8x8x8xf32>
    tpu.vector_store %arg8[%c0_136, %c0_137, %c0_138, %c0_139], %116 {strides = array<i32>} : memref<1x8x8x8xf32, #tpu.memory_space<vmem>>, vector<1x8x8x8xf32>,
    return
  }
  func.func @transform_0(%arg0: i32) -> (i32, i32, i32, i32) {
    %c0_i32 = arith.constant 0 : i32
    %c0_i32_0 = arith.constant 0 : i32
    %c0_i32_1 = arith.constant 0 : i32
    %c0_i32_2 = arith.constant 0 : i32
    return %arg0, %c0_i32, %c0_i32_0, %c0_i32_1 : i32, i32, i32, i32
  }
  func.func @transform_1(%arg0: i32) -> (i32, i32) {
    %c0_i32 = arith.constant 0 : i32
    %c0_i32_0 = arith.constant 0 : i32
    %c0_i32_1 = arith.constant 0 : i32
    return %c0_i32, %c0_i32_0 : i32, i32
  }
  func.func @transform_2(%arg0: i32) -> (i32, i32) {
    %c0_i32 = arith.constant 0 : i32
    %c0_i32_0 = arith.constant 0 : i32
    %c0_i32_1 = arith.constant 0 : i32
    return %c0_i32, %c0_i32_0 : i32, i32
  }
  func.func @transform_3(%arg0: i32) -> (i32, i32) {
    %c0_i32 = arith.constant 0 : i32
    %c0_i32_0 = arith.constant 0 : i32
    %c0_i32_1 = arith.constant 0 : i32
    return %c0_i32, %c0_i32_0 : i32, i32
  }
  func.func @transform_4(%arg0: i32) -> (i32, i32) {
    %c0_i32 = arith.constant 0 : i32
    %c0_i32_0 = arith.constant 0 : i32
    %c0_i32_1 = arith.constant 0 : i32
    return %c0_i32, %c0_i32_0 : i32, i32
  }
  func.func @transform_5(%arg0: i32) -> (i32, i32) {
    %c0_i32 = arith.constant 0 : i32
    %c0_i32_0 = arith.constant 0 : i32
    %c0_i32_1 = arith.constant 0 : i32
    return %c0_i32, %c0_i32_0 : i32, i32
  }
  func.func @transform_6(%arg0: i32) -> (i32, i32) {
    %c0_i32 = arith.constant 0 : i32
    %c0_i32_0 = arith.constant 0 : i32
    %c0_i32_1 = arith.constant 0 : i32
    return %c0_i32, %c0_i32_0 : i32, i32
  }
  func.func @transform_7(%arg0: i32) -> (i32, i32, i32, i32) {
    %c0_i32 = arith.constant 0 : i32
    %c0_i32_0 = arith.constant 0 : i32
    %c0_i32_1 = arith.constant 0 : i32
    %c0_i32_2 = arith.constant 0 : i32
    return %arg0, %c0_i32, %c0_i32_0, %c0_i32_1 : i32, i32, i32, i32
  }
}

</mosaic_0001>

<bundles_post_ra>
// kernel: residual_block_down.1
= control target key start
LH: loop header
LB: loop body
LE: loop exit
PB: predicated region body
PF: predicated region fallthrough
CT: control target
= control target key end

     0   :  { %s14040_s24 = smov 0   ;;  %s18950_s0 = inlined_call_operand.vmem [shape: bf16[2,16,16,4], index: 0, kind: input, shape index: {}]   ;;  %s18951_s1 = inlined_call_operand.vmem [shape: bf16[36,128], index: 1, kind: input, shape index: {}]   ;;  %s18952_s2 = inlined_call_operand.vmem [shape: f32[1,128], index: 2, kind: input, shape index: {}]   ;;  %s18953_s3 = inlined_call_operand.vmem [shape: bf16[1152,128], index: 3, kind: input, shape index: {}]   ;;  %s18954_s4 = inlined_call_operand.vmem [shape: f32[1,128], index: 4, kind: input, shape index: {}]   ;;  %s18955_s5 = inlined_call_operand.vmem [shape: bf16[4,128], index: 5, kind: input, shape index: {}]   ;;  %s18956_s6 = inlined_call_operand.vmem [shape: f32[1,128], index: 6, kind: input, shape index: {}]   ;;  %s18957_s7 = inlined_call_operand.vmem [shape: f32[2,8,8,8], index: 7, kind: output, shape index: {}]  }
   0x1 LB: > { %s12344_s25 = sadd.s32 4294967295, %s13988_s24   ;;  %p12348_p0 = scmp.ge.s32.totalorder %s13988_s24, 1  ;;  %s13988_s24 = sphi %s14040_s24, %s17_s24  }
   0x2   : > { %p237_p1 = scmp.lt.s32.totalorder %s13988_s24, 3 }
   0x4   : > { %p238_p2 = pnand %p12348_p0, %p237_p1 }
   0x6   : > { %241 = sbr.rel (%p238_p2) target bundleno = 1587 (0x633), region = 48 }
   0xb   : > { %p269_p3 = scmp.lt.s32.totalorder %s12344_s25, 1  ;;  %vm18959_vm0 = vsmask.f32 256  ;;  %vm345_vm1 = vsmask.f32 4368  ;;  %v18963_v3 = vmov 0  }
   0xc   : > { %vm668_vm2 = vcmask 27648   ;;  %vm18960_vm3 = vsmask.f32 7938  ;;  %vm676_vm4 = vcmask 24576   ;;  %vm14070_vm5 = vmor %vm18959_vm0, %vm345_vm1  ;;  %v19039_v21 = vmov 0  ;;  %s13991_s30 = smov 12  }
   0xd   : > { %s19421_s25 = smov (!%p269_p3, %s12344_s25), 1  ;;  %v19040_v21 = vsel %vm14070_vm5, 4294967295, %v19039_v21  ;;  %v786_v24 = vld [vmem:[#allocation2] sm:$0xf]  ;;  %v671_v25 = vld [vmem:[#allocation2 + $0xc] sm:$0xf]  ;;  %vm14076_vm6 = vmand %vm668_vm2, %vm18960_vm3 }
   0xe   : > { %s12969_s26 = sshll.u32 %s19421_s25, 7  ;;  %19041 = vst [vmem:[#allocation6_spill] sm:$0xff] %v19040_v21  ;;  %v790_v31 = vld [vmem:[#allocation2 + $0x8] sm:$0x1]  ;;  %v678_v32 = vld [vmem:[#allocation2 + $0x14] sm:$0x1]  ;;  %vm14084_vm7 = vmand %vm676_vm4, %vm18959_vm0 }
   0xf   : > { %s14054_s29 = scalar_lea.vmem %s18950_s0, %s12969_s26  ;;  %v681_v40 = vld [vmem:[#allocation2 + $0x18] sm:$0xf]  ;;  %v685_v41 = vld [vmem:[#allocation2 + $0x20] sm:$0x1]  ;;  %v688_v46 = vld [vmem:[#allocation2 + $0x24] sm:$0xf] }
  0x10   : > { %v280_v0 = vld [vmem:[%s14054_s29] sm:$0xf]  ;;  %v281_v1 = vld [vmem:[%s14054_s29 + $0x4] sm:$0xf]  ;;  %v282_v2 = vld [vmem:[%s14054_s29 + $0x8] sm:$0xf] }
  0x11   : > { %v312_v4 = vmax.bf16 %v18963_v3, %v280_v0  ;;  %v313_v5 = vmax.bf16 %v18963_v3, %v281_v1  ;;  %v283_v6 = vld [vmem:[%s14054_s29 + $0xc] sm:$0xf]  ;;  %v314_v7 = vmax.bf16 %v18963_v3, %v282_v2  ;;  %v284_v8 = vld [vmem:[%s14054_s29 + $0x10] sm:$0xf]  ;;  %v285_v15 = vld [vmem:[%s14054_s29 + $0x14] sm:$0xf] }
  0x12   : > { %v315_v9 = vmax.bf16 %v18963_v3, %v283_v6  ;;  %v316_v10 = vmax.bf16 %v18963_v3, %v284_v8  ;;  %v286_v20 = vld [vmem:[%s14054_s29 + $0x18] sm:$0xf]  ;;  %v317_v33 = vmax.bf16 %v18963_v3, %v285_v15  ;;  %v287_v47 = vld [vmem:[%s14054_s29 + $0x1c] sm:$0xf]  ;;  %v692_v60 = vld [vmem:[#allocation2 + $0x2c] sm:$0x1] }
  0x13   : > { %v348_v11 = vshrl.u32 %v312_v4, 16  ;;  %v351_v12 = vshll.u32 %v312_v4, 16  ;;  %v356_v13 = vshrl.u32 %v313_v5, 16  ;;  %v359_v14 = vshll.u32 %v313_v5, 16  ;;  %v288_v0 = vld [vmem:[%s14054_s29 + $0x20] sm:$0xf]  ;;  %vm14148_vm11 = vmand %vm676_vm4, %vm18960_vm3 }
  0x14   : > { %v365_v16 = vshrl.u32 %v314_v7, 16  ;;  %v368_v17 = vshll.u32 %v314_v7, 16  ;;  %v373_v18 = vshrl.u32 %v315_v9, 16  ;;  %v376_v19 = vshll.u32 %v315_v9, 16  ;;  %s13992_s8 = smov 8   ;;  %s13993_s9 = smov 24  }
  0x15   : > { %v350_v22 = vrot.slane %v348_v11, 7  ;;  %v358_v23 = vrot.slane %v356_v13, 7  ;;  %v382_v26 = vshrl.u32 %v316_v10, 16  ;;  %v385_v27 = vshll.u32 %v316_v10, 16  ;;  %v695_v10 = vld [vmem:[#allocation2 + $0x30] sm:$0xf] }
  0x16   : > { %v367_v28 = vrot.slane %v365_v16, 7  ;;  %v375_v29 = vrot.slane %v373_v18, 7  ;;  %v318_v34 = vmax.bf16 %v18963_v3, %v286_v20  ;;  %v390_v58 = vshrl.u32 %v317_v33, 16  ;;  %s13994_s10 = smov 20   ;;  %s13995_s11 = smov 4  }
  0x17   : > { %v354_v35 = vrot.slane %v350_v22, 4  ;;  %v361_v36 = vor.u32 %v359_v14, %v358_v23  ;;  %v363_v37 = vrot.slane %v358_v23, 4  ;;  %v353_v38 = vor.u32 %v351_v12, %v350_v22  ;;  %s13996_s12 = smov 16   ;;  %s13997_s13 = smov 28  }
  0x18   : > { %v370_v42 = vor.u32 %v368_v17, %v367_v28  ;;  %v371_v43 = vrot.slane %v367_v28, 4  ;;  %v378_v44 = vor.u32 %v376_v19, %v375_v29  ;;  %v380_v45 = vrot.slane %v375_v29, 4  ;;  %s13998_s14 = smov 32   ;;  %s12970_s23 = sshll.u32 %s19421_s25, 6 }
  0x19   : > { %v362_v48 = vsel %vm14070_vm5, %v354_v35, %v361_v36  ;;  %v672_v49 = vsel %vm14076_vm6, %v353_v38, %v671_v25  ;;  %v679_v50 = vsel %vm14084_vm7, %v363_v37, %v678_v32  ;;  %v384_v51 = vrot.slane %v382_v26, 7  ;;  %s18707_s27 = scalar_lea.vmem %s18957_s7, %s12970_s23 }
  0x1a   : > { %675 = vst.msk [vmem:[#allocation2 + $0x10] sm:$0xf] %vm668_vm2, %v362_v48  ;;  %v379_v52 = vsel %vm14070_vm5, %v371_v43, %v378_v44  ;;  %v787_v53 = vsel %vm14076_vm6, %v370_v42, %v786_v24  ;;  %673 = vst [vmem:[#allocation2 + $0xc] sm:$0xf] %v672_v49  ;;  %v791_v54 = vsel %vm14084_vm7, %v380_v45, %v790_v31  ;;  %v393_v59 = vshll.u32 %v317_v33, 16 }
  0x1b   : > { %v682_v55 = vsel %vm14076_vm6, %v370_v42, %v681_v40  ;;  %680 = vst [vmem:[#allocation2 + $0x14] sm:$0x1] %v679_v50  ;;  %788 = vst [vmem:[#allocation2] sm:$0xf] %v787_v53  ;;  %v686_v56 = vsel %vm14084_vm7, %v380_v45, %v685_v41  ;;  %v387_v57 = vor.u32 %v385_v27, %v384_v51  ;;  %v399_v61 = vshrl.u32 %v318_v34, 16 }
  0x1c   : > { %789 = vst.msk [vmem:[#allocation2 + $0x4] sm:$0xf] %vm668_vm2, %v379_v52  ;;  %684 = vst.msk [vmem:[#allocation2 + $0x1c] sm:$0xf] %vm668_vm2, %v379_v52  ;;  %v402_v62 = vshll.u32 %v318_v34, 16  ;;  %v319_v63 = vmax.bf16 %v18963_v3, %v287_v47  ;;  %v388_v2 = vrot.slane %v384_v51, 4  ;;  %v14121_v19 = vmax.bf16 %v18963_v3, %v288_v0 }
  0x1d   : > { %792 = vst [vmem:[#allocation2 + $0x8] sm:$0x1] %v791_v54  ;;  %683 = vst [vmem:[#allocation2 + $0x18] sm:$0xf] %v682_v55  ;;  %v689_v1 = vsel %vm14076_vm6, %v387_v57, %v688_v46  ;;  %v392_v4 = vrot.slane %v390_v58, 7  ;;  %v401_v5 = vrot.slane %v399_v61, 7 }
  0x1e   : > { %687 = vst [vmem:[#allocation2 + $0x20] sm:$0x1] %v686_v56  ;;  %690 = vst [vmem:[#allocation2 + $0x24] sm:$0xf] %v689_v1  ;;  %v407_v6 = vshrl.u32 %v319_v63, 16  ;;  %v410_v7 = vshll.u32 %v319_v63, 16 }
  0x1f   : > { %vm1814_vm8 = vcmask 1042432   ;;  %vm1815_vm9 = vcmask 1046532   ;;  %v395_v8 = vor.u32 %v393_v59, %v392_v4  ;;  %v397_v9 = vrot.slane %v392_v4, 4  ;;  %v699_v41 = vld [vmem:[#allocation2 + $0x38] sm:$0x1] }
  0x20   : > { %v404_v11 = vor.u32 %v402_v62, %v401_v5  ;;  %v405_v12 = vrot.slane %v401_v5, 4  ;;  %v14112_v13 = vrot.slane %v407_v6, 7  ;;  %vm14128_vm10 = vmor %vm1814_vm8, %vm1815_vm9  ;;  %v416_v42 = vshrl.u32 %v14121_v19, 16 }
  0x21   : > { %v2059_v14 = vld [vmem:[#allocation2 + $0x10] sm:$0xf]  ;;  %v1721_v15 = vld [vmem:[#allocation2 + $0xc] sm:$0xe]  ;;  %v396_v17 = vsel %vm14070_vm5, %v388_v2, %v395_v8  ;;  %v693_v18 = vsel %vm14084_vm7, %v397_v9, %v692_v60  ;;  %v419_v47 = vshll.u32 %v14121_v19, 16  ;;  %vm18958_vm15 = vcmask 1041408  }
  0x22   : > { %v14114_v16 = vld [vmem:[#allocation2 + $0x10] sm:$0xf]  ;;  %2124 = vrot.lane.b32.xlu1 %v2059_v14, %s13991_s30  ;;  %v1718_v20 = vld [vmem:[#allocation2] sm:$0xe]  ;;  %691 = vst.msk [vmem:[#allocation2 + $0x28] sm:$0xf] %vm668_vm2, %v396_v17  ;;  %v696_v24 = vsel %vm14076_vm6, %v404_v11, %v695_v10  ;;  %v412_v25 = vor.u32 %v410_v7, %v14112_v13 }
  0x23   : > { %v14124_v22 = vld [vmem:[#allocation2 + $0x4] sm:$0xf]  ;;  %694 = vst [vmem:[#allocation2 + $0x2c] sm:$0x1] %v693_v18  ;;  %v12389_v26 = vrot.slane %v1718_v20, 9  ;;  %v12390_v29 = vrot.slane %v1721_v15, 9 }
  0x24   : > { %v1819_v27 = vrot.slane %v14124_v22, 5  ;;  %v2061_v28 = vld [vmem:[#allocation2 + $0x1c] sm:$0xf]  ;;  %v1826_v31 = vrot.slane %v14114_v16, 5  ;;  %697 = vst [vmem:[#allocation2 + $0x30] sm:$0xf] %v696_v24  ;;  %v413_v35 = vsel %vm14070_vm5, %v405_v12, %v412_v25 }
  0x25   : > { %v2812_v32 = vld [vmem:[#allocation2 + $0xc] sm:$0xe]  ;;  %v14138_v33 = vld [vmem:[#allocation2 + $0x10] sm:$0xf]  ;;  %v945_v34 = vld [vmem:[#allocation2 + $0x4] sm:$0x8] }
  0x26   : > { %v1820_v36 = vsel %vm14128_vm10, %v12389_v26, %v1819_v27  ;;  %v3151_v37 = vld [vmem:[#allocation2 + $0x1c] sm:$0xf]  ;;  %v1036_v40 = vld [vmem:[#allocation2 + $0x8] sm:$0x1]  ;;  %698 = vst.msk [vmem:[#allocation2 + $0x34] sm:$0xf] %vm668_vm2, %v413_v35  ;;  %2128 = vrot.lane.b32.xlu1 %v2061_v28, %s13991_s30  ;;  %v1827_v48 = vsel %vm14128_vm10, %v12390_v29, %v1826_v31 }
  0x27   : > { %1929 = vrot.lane.b32.xlu0 %v1820_v36, %s13992_s8  ;;  %v12405_v43 = vrot.slane %v2812_v32, 9  ;;  %v2910_v44 = vrot.slane %v14138_v33, 5  ;;  %v12371_v45 = vrot.slane %v945_v34, 11  ;;  %v2815_v46 = vld [vmem:[#allocation2 + $0x18] sm:$0xe]  ;;  %v414_v56 = vrot.slane %v14112_v13, 4 }
  0x28   : > { %v14162_v49 = vld [vmem:[#allocation2 + $0x1c] sm:$0xf]  ;;  %v946_v50 = vld [vmem:[#allocation2 + $0x10] sm:$0x8]  ;;  %v1039_v51 = vld [vmem:[#allocation2 + $0x14] sm:$0x1] }
  0x29   : > { %v1037_v52 = vsel %vm14148_vm11, %v12371_v45, %v1036_v40  ;;  %v12372_v53 = vrot.slane %v946_v50, 11  ;;  %v802_v54 = vld [vmem:[#allocation2 + $0xc] sm:$0x2]  ;;  %v894_v55 = vld [vmem:[#allocation2 + $0xc] sm:$0x1]  ;;  %v12406_v57 = vrot.slane %v2815_v46, 9  ;;  %v700_v1 = vsel %vm14084_vm7, %v414_v56, %v699_v41 }
  0x2a   : > { %1038 = vst [vmem:[#allocation2 + $0x8] sm:$0x1] %v1037_v52  ;;  %v12354_v58 = vrot.slane %v802_v54, 9  ;;  %v803_v59 = vld [vmem:[#allocation2 + $0x18] sm:$0x2]  ;;  %3216 = vrot.lane.b32.xlu1 %v3151_v37, %s13993_s9  ;;  %v14173_v2 = vrot.slane %v416_v42, 7  ;;  %v2911_v4 = vsel %vm14128_vm10, %v12405_v43, %v2910_v44 }
  0x2b   : > { %v897_v60 = vld [vmem:[#allocation2 + $0x18] sm:$0x1]  ;;  %1933 = vrot.lane.b32.xlu0 %v1827_v48, %s13992_s8  ;;  %v1040_v61 = vsel %vm14148_vm11, %v12372_v53, %v1039_v51  ;;  %v12355_v62 = vrot.slane %v803_v59, 9  ;;  %v947_v63 = vld [vmem:[#allocation2 + $0x1c] sm:$0x8]  ;;  %v2917_v5 = vrot.slane %v14162_v49, 5 }
  0x2c   : > { %v1042_v0 = vld [vmem:[#allocation2 + $0x20] sm:$0x1]  ;;  %1041 = vst [vmem:[#allocation2 + $0x14] sm:$0x1] %v1040_v61  ;;  %v895_v6 = vsel %vm14084_vm7, %v12354_v58, %v894_v55  ;;  %v12373_v7 = vrot.slane %v947_v63, 11  ;;  %v421_v14 = vor.u32 %v419_v47, %v14173_v2  ;;  %v1821_v18 = vrot.slane %v1819_v27, 4 }
  0x2d   : > { %v804_v8 = vld [vmem:[#allocation2 + $0x24] sm:$0x2]  ;;  %701 = vst [vmem:[#allocation2 + $0x38] sm:$0x1] %v700_v1  ;;  %896 = vst [vmem:[#allocation2 + $0xc] sm:$0x1] %v895_v6  ;;  %v898_v9 = vsel %vm14084_vm7, %v12355_v62, %v897_v60  ;;  %v2918_v19 = vsel %vm14128_vm10, %v12406_v57, %v2917_v5 }
  0x2e   : > { %v12356_v10 = vrot.slane %v804_v8, 9  ;;  %v900_v11 = vld [vmem:[#allocation2 + $0x24] sm:$0x1]  ;;  %899 = vst [vmem:[#allocation2 + $0x18] sm:$0x1] %v898_v9  ;;  %v1043_v12 = vsel %vm14148_vm11, %v12373_v7, %v1042_v0  ;;  %v1828_v32 = vrot.slane %v1826_v31, 4 }
  0x2f   : > { %v1158_v13 = vld [vmem:[#allocation2 + $0x10] sm:$0xf]  ;;  %v702_v15 = vld [vmem:[#allocation2 + $0x3c] sm:$0xf]  ;;  %3020 = vrot.lane.b32.xlu0 %v2911_v4, %s13994_s10  ;;  %1044 = vst [vmem:[#allocation2 + $0x20] sm:$0x1] %v1043_v12 }
  0x30   : > { %v901_v17 = vsel %vm14084_vm7, %v12356_v10, %v900_v11  ;;  %v1239_v24 = vshll.u32 %v1158_v13, 16  ;;  %v1243_v25 = vshrl.u32 %v1158_v13, 16  ;;  %v1155_v26 = vld [vmem:[#allocation2 + $0x4] sm:$0xf]  ;;  %v703_v28 = vsel %vm14076_vm6, %v421_v14, %v702_v15  ;;  %v2252_v34 = vld [vmem:[#allocation2 + $0x10] sm:$0xf] }
  0x31   : > { %902 = vst [vmem:[#allocation2 + $0x24] sm:$0x1] %v901_v17  ;;  %v1720_v20 = vld [vmem:[#allocation2 + $0x8] sm:$0x1]  ;;  %704 = vst [vmem:[#allocation2 + $0x3c] sm:$0xf] %v703_v28 }
  0x32   : > { %v1822_v29 = vrot.slane %v1720_v20, 5  ;;  %v2255_v35 = vld [vmem:[#allocation2 + $0x1c] sm:$0xf]  ;;  %vm1202_vm12 = vsmask.f32 3328  ;;  %v1215_v41 = vshll.u32 %v1155_v26, 16 }
  0x33   : > { %3024 = vrot.lane.b32.xlu0 %v2918_v19, %s13994_s10  ;;  %v1723_v22 = vld [vmem:[#allocation2 + $0x14] sm:$0x1]  ;;  %v1219_v42 = vshrl.u32 %v1155_v26, 16  ;;  %v14202_v43 = vrot.slane %v1239_v24, 5  ;;  %v1245_v16 = vrot.slane %v1243_v25, 4  ;;  %v2309_v31 = vshll.u32 %v2252_v34, 16 }
  0x34   : > { %v2814_v27 = vld [vmem:[#allocation2 + $0x14] sm:$0x1]  ;;  %v1823_v36 = vsel %vm14128_vm10, %v1821_v18, %v1822_v29  ;;  %v1829_v37 = vrot.slane %v1723_v22, 5  ;;  %v2058_v40 = vld [vmem:[#allocation2 + $0xc] sm:$0xf]  ;;  %v2313_v45 = vshrl.u32 %v2252_v34, 16 }
  0x35   : > { %1931 = vrot.lane.b32.xlu1 %v1823_v36, %s13992_s8  ;;  %v2912_v47 = vrot.slane %v2910_v44, 4  ;;  %v2913_v48 = vrot.slane %v2814_v27, 5  ;;  %vm1203_vm13 = vsmask.f32 7440  ;;  %v801_v49 = vld [vmem:[#allocation2] sm:$0x2]  ;;  %v1246_v58 = vor.u32 %v1245_v16, %v14202_v43 }
  0x36   : > { %v1830_v46 = vsel %vm14128_vm10, %v1828_v32, %v1829_v37  ;;  %v2817_v50 = vld [vmem:[#allocation2 + $0x20] sm:$0x1]  ;;  %v1159_v51 = vld [vmem:[#allocation2 + $0x14] sm:$0x1]  ;;  %v2333_v52 = vshll.u32 %v2255_v35, 16  ;;  %v2337_v53 = vshrl.u32 %v2255_v35, 16  ;;  %vm14230_vm14 = vmor %vm1202_vm12, %vm1203_vm13 }
  0x37   : > { %2122 = vrot.lane.b32.xlu0 %v2058_v40, %s13991_s30  ;;  %v2060_v54 = vld [vmem:[#allocation2 + $0x18] sm:$0xf]  ;;  %v2919_v55 = vrot.slane %v2917_v5, 4  ;;  %v14209_v56 = vrot.slane %v1215_v41, 5  ;;  %v1221_v57 = vrot.slane %v1219_v42, 4  ;;  %v14213_v33 = vrot.slane %v2309_v31, 5 }
  0x38   : > { %v2315_v44 = vrot.slane %v2313_v45, 4  ;;  %v1156_v59 = vld [vmem:[#allocation2 + $0x8] sm:$0x1]  ;;  %v891_v60 = vld [vmem:[#allocation2] sm:$0x1]  ;;  %v2914_v61 = vsel %vm14128_vm10, %v2912_v47, %v2913_v48  ;;  %v2920_v62 = vrot.slane %v2817_v50, 5 }
  0x39   : > { %1935 = vrot.lane.b32.xlu1 %v1830_v46, %s13992_s8  ;;  %v1249_v63 = vshll.u32 %v1159_v51, 16  ;;  %v2253_v0 = vld [vmem:[#allocation2 + $0x14] sm:$0x1]  ;;  %v12353_v1 = vrot.slane %v801_v49, 9  ;;  %v3150_v4 = vld [vmem:[#allocation2 + $0x18] sm:$0xf]  ;;  %v1222_v8 = vor.u32 %v1221_v57, %v14209_v56 }
  0x3a   : > { %v14218_v5 = vrot.slane %v2333_v52, 5  ;;  %v2339_v6 = vrot.slane %v2337_v53, 4  ;;  %v2251_v7 = vld [vmem:[#allocation2 + $0xc] sm:$0xf]  ;;  %v1225_v9 = vshll.u32 %v1156_v59, 16  ;;  %v1247_v13 = vrot.slane %v1246_v58, 4 }
  0x3b   : > { %2126 = vrot.lane.b32.xlu0 %v2060_v54, %s13991_s30  ;;  %v2256_v10 = vld [vmem:[#allocation2 + $0x20] sm:$0x1]  ;;  %v892_v11 = vsel %vm14084_vm7, %v12353_v1, %v891_v60  ;;  %v1157_v12 = vld [vmem:[#allocation2 + $0xc] sm:$0xf]  ;;  %v2316_v14 = vor.u32 %v2315_v44, %v14213_v33  ;;  %v2319_v15 = vshll.u32 %v2253_v0, 16  ;;  %v2921_v17 = vsel %vm14128_vm10, %v2919_v55, %v2920_v62 }
  0x3c   : > { %893 = vst [vmem:[#allocation2] sm:$0x1] %v892_v11  ;;  %v1251_v18 = vrot.slane %v1249_v63, 5  ;;  %v2300_v19 = vshrl.u32 %v2251_v7, 16  ;;  %v2303_v20 = vshll.u32 %v2251_v7, 16  ;;  %v2340_v25 = vor.u32 %v2339_v6, %v14218_v5 }
  0x3d   : > { %3022 = vrot.lane.b32.xlu1 %v2914_v61, %s13994_s10  ;;  %v2343_v26 = vshll.u32 %v2256_v10, 16  ;;  %v1230_v28 = vshrl.u32 %v1157_v12, 16  ;;  %v2254_v29 = vld [vmem:[#allocation2 + $0x18] sm:$0xf]  ;;  %v3152_v32 = vld [vmem:[#allocation2 + $0x24] sm:$0xf] }
  0x3e   : > { %v1223_v34 = vrot.slane %v1222_v8, 4  ;;  %v1227_v22 = vrot.slane %v1225_v9, 5  ;;  %v1233_v27 = vshll.u32 %v1157_v12, 16  ;;  %v2317_v35 = vrot.slane %v2316_v14, 4  ;;  %v3343_v37 = vld [vmem:[#allocation2 + $0x18] sm:$0xf] }
  0x3f   : > { %3214 = vrot.lane.b32.xlu0 %v3150_v4, %s13993_s9  ;;  %v2321_v36 = vrot.slane %v2319_v15, 5  ;;  %v1252_v40 = vsel %vm14230_vm14, %v1247_v13, %v1251_v18  ;;  %v2302_v41 = vrot.slane %v2300_v19, 4  ;;  %v2305_v42 = vrot.slane %v2303_v20, 5  ;;  %v3344_v48 = vld [vmem:[#allocation2 + $0x1c] sm:$0xf] }
  0x40   : > { %v2324_v16 = vshrl.u32 %v2254_v29, 16  ;;  %v2341_v31 = vrot.slane %v2340_v25, 4  ;;  %v2345_v45 = vrot.slane %v2343_v26, 5  ;;  %v1232_v46 = vrot.slane %v1230_v28, 4  ;;  %v948_v53 = vld [vmem:[#allocation2 + $0x28] sm:$0x8] }
  0x41   : > { %3026 = vrot.lane.b32.xlu1 %v2921_v17, %s13994_s10  ;;  %v2327_v47 = vshll.u32 %v2254_v29, 16  ;;  %v1228_v49 = vsel %vm14230_vm14, %v1223_v34, %v1227_v22  ;;  %v1235_v51 = vrot.slane %v1233_v27, 5  ;;  %v3392_v52 = vshrl.u32 %v3343_v37, 16  ;;  %v3346_v44 = vld [vmem:[#allocation2 + $0x24] sm:$0xf] }
  0x42   : > { %v2322_v54 = vsel %vm14230_vm14, %v2317_v35, %v2321_v36  ;;  %v3395_v58 = vshll.u32 %v3343_v37, 16  ;;  %v2306_v59 = vor.u32 %v2305_v42, %v2302_v41  ;;  %v2326_v60 = vrot.slane %v2324_v16, 4  ;;  %v1045_v63 = vld [vmem:[#allocation2 + $0x2c] sm:$0x1]  ;;  %v3347_v6 = vld [vmem:[#allocation2 + $0x28] sm:$0xf] }
  0x43   : > { %3218 = vrot.lane.b32.xlu0 %v3152_v32, %s13993_s9  ;;  %v1154_v50 = vld [vmem:[#allocation2] sm:$0xf]  ;;  %v3401_v61 = vshll.u32 %v3344_v48, 16  ;;  %v3405_v62 = vshrl.u32 %v3344_v48, 16  ;;  %v2329_v4 = vrot.slane %v2327_v47, 5  ;;  %v12374_v7 = vrot.slane %v948_v53, 11 }
  0x44   : > { %v1206_v55 = vshrl.u32 %v1154_v50, 16  ;;  %v1209_v57 = vshll.u32 %v1154_v50, 16  ;;  %v2346_v8 = vsel %vm14230_vm14, %v2341_v31, %v2345_v45  ;;  %v1236_v9 = vor.u32 %v1235_v51, %v1232_v46  ;;  %v3345_v17 = vld [vmem:[#allocation2 + $0x20] sm:$0x1]  ;;  %v3153_v35 = vld [vmem:[#allocation2 + $0x28] sm:$0xf] }
  0x45   : > { %1595 = vrot.lane.b32.xlu1 %v1252_v40, %s13995_s11  ;;  %v3394_v10 = vrot.slane %v3392_v52, 4  ;;  %v3416_v12 = vshrl.u32 %v3346_v44, 16  ;;  %v3419_v13 = vshll.u32 %v3346_v44, 16  ;;  %v1046_v14 = vsel %vm14148_vm11, %v12374_v7, %v1045_v63  ;;  %v3905_v51 = vld [vmem:[#allocation2 + $0x1c] sm:$0xf] }
  0x46   : > { %v1208_v0 = vrot.slane %v1206_v55, 4  ;;  %v1211_v1 = vrot.slane %v1209_v57, 5  ;;  %v14250_v15 = vrot.slane %v3401_v61, 5  ;;  %v3407_v18 = vrot.slane %v3405_v62, 4  ;;  %1047 = vst [vmem:[#allocation2 + $0x2c] sm:$0x1] %v1046_v14 }
  0x47   : > { %1591 = vrot.lane.b32.xlu0 %v1228_v49, %s13995_s11  ;;  %v3425_v19 = vshll.u32 %v3347_v6, 16  ;;  %v3429_v20 = vshrl.u32 %v3347_v6, 16  ;;  %v2307_v26 = vrot.slane %v2306_v59, 4  ;;  %v2330_v28 = vor.u32 %v2329_v4, %v2326_v60  ;;  %v289_v55 = vld [vmem:[%s14054_s29 + $0x24] sm:$0xf] }
  0x48   : > { %v1212_v11 = vor.u32 %v1211_v1, %v1208_v0  ;;  %v3397_v29 = vrot.slane %v3395_v58, 5  ;;  %v3411_v34 = vshll.u32 %v3345_v17, 16  ;;  %v3418_v22 = vrot.slane %v3416_v12, 4  ;;  %v3906_v57 = vld [vmem:[#allocation2 + $0x20] sm:$0x1] }
  0x49   : > { %2685 = vrot.lane.b32.xlu1 %v2322_v54, %s13996_s12  ;;  %v3421_v27 = vrot.slane %v3419_v13, 5  ;;  %v1237_v36 = vrot.slane %v1236_v9, 4  ;;  %v3408_v37 = vor.u32 %v3407_v18, %v14250_v15  ;;  %v14258_v40 = vrot.slane %v3425_v19, 5  ;;  %v3904_v54 = vld [vmem:[#allocation2 + $0x18] sm:$0xe] }
  0x4a   : > { %v1213_v25 = vrot.slane %v1212_v11, 4  ;;  %v3431_v41 = vrot.slane %v3429_v20, 4  ;;  %v2312_v42 = vsel %vm14230_vm14, %v2307_v26, %v14213_v33  ;;  %v2331_v16 = vrot.slane %v2330_v28, 4  ;;  %v1161_v33 = vld [vmem:[#allocation2 + $0x1c] sm:$0xf] }
  0x4b   : > { %v3398_v31 = vor.u32 %v3397_v29, %v3394_v10  ;;  %v3422_v45 = vor.u32 %v3421_v27, %v3418_v22  ;;  %v1242_v47 = vsel %vm14230_vm14, %v1237_v36, %v14202_v43  ;;  %v3409_v48 = vrot.slane %v3408_v37, 4  ;;  %v14273_v58 = vld [vmem:[#allocation2 + $0x28] sm:$0xf]  ;;  %v1160_v44 = vld [vmem:[#allocation2 + $0x18] sm:$0xf] }
  0x4c   : > { %v1218_v32 = vsel %vm14230_vm14, %v1213_v25, %v14209_v56  ;;  %v3413_v56 = vrot.slane %v3411_v34, 5  ;;  %v3432_v49 = vor.u32 %v3431_v41, %v14258_v40  ;;  %v2336_v52 = vsel %vm14230_vm14, %v2331_v16, %v14218_v5  ;;  %v805_v61 = vld [vmem:[#allocation2 + $0x30] sm:$0x2]  ;;  %v1164_v1 = vld [vmem:[#allocation2 + $0x28] sm:$0xf] }
  0x4d   : > { %2689 = vrot.lane.b32.xlu1 %v2346_v8, %s13996_s12  ;;  %1589 = vrot.lane.b32.xlu0 %v1218_v32, %s13995_s11  ;;  %v3348_v46 = vld [vmem:[#allocation2 + $0x2c] sm:$0x1]  ;;  %v3399_v53 = vrot.slane %v3398_v31, 4  ;;  %v3423_v43 = vrot.slane %v3422_v45, 4  ;;  %v4002_v59 = vrot.slane %v3905_v51, 5  ;;  %v1263_v60 = vshll.u32 %v1161_v33, 16 }
  0x4e   : > { %v3435_v50 = vshll.u32 %v3348_v46, 16  ;;  %v3414_v62 = vsel %vm14230_vm14, %v3409_v48, %v3413_v56  ;;  %v3433_v63 = vrot.slane %v3432_v49, 4  ;;  %v1267_v0 = vshrl.u32 %v1161_v33, 16  ;;  %v14282_v6 = vld [vmem:[#allocation2 + $0x24] sm:$0xe] }
  0x4f   : > { %v3404_v4 = vsel %vm14230_vm14, %v3399_v53, %v14250_v15  ;;  %v1254_v7 = vshrl.u32 %v1160_v44, 16  ;;  %v1257_v8 = vshll.u32 %v1160_v44, 16  ;;  %v903_v9 = vld [vmem:[#allocation2 + $0x30] sm:$0x1]  ;;  %v14285_v10 = vmax.bf16 %v18963_v3, %v289_v55  ;;  %v1163_v14 = vld [vmem:[#allocation2 + $0x24] sm:$0xf] }
  0x50   : > { %v3437_v5 = vrot.slane %v3435_v50, 5  ;;  %v12421_v11 = vrot.slane %v3904_v54, 9  ;;  %v4005_v12 = vrot.slane %v3906_v57, 5  ;;  %v4009_v13 = vrot.slane %v14273_v58, 5  ;;  %v1162_v20 = vld [vmem:[#allocation2 + $0x20] sm:$0x1] }
  0x51   : > { %3220 = vrot.lane.b32.xlu1 %v3153_v35, %s13993_s9  ;;  %2683 = vrot.lane.b32.xlu0 %v2312_v42, %s13996_s12  ;;  %v12357_v17 = vrot.slane %v805_v61, 9  ;;  %v3428_v15 = vsel %vm14230_vm14, %v3423_v43, %v14258_v40  ;;  %v4004_v18 = vrot.slane %v4002_v59, 4  ;;  %v14292_v19 = vrot.slane %v1263_v60, 5  ;;  %v3909_v28 = vld [vmem:[#allocation2 + $0x2c] sm:$0x1] }
  0x52   : > { %v1287_v25 = vshll.u32 %v1164_v1, 16  ;;  %v3438_v26 = vsel %vm14230_vm14, %v3433_v63, %v3437_v5  ;;  %v1269_v29 = vrot.slane %v1267_v0, 4  ;;  %v1291_v32 = vshrl.u32 %v1164_v1, 16  ;;  %v949_v22 = vld [vmem:[#allocation2 + $0x34] sm:$0x8] }
  0x53   : > { %v904_v34 = vsel %vm14084_vm7, %v12357_v17, %v903_v9  ;;  %v1256_v27 = vrot.slane %v1254_v7, 4  ;;  %v1259_v35 = vrot.slane %v1257_v8, 5  ;;  %v1278_v36 = vshrl.u32 %v1163_v14, 16  ;;  %v1048_v42 = vld [vmem:[#allocation2 + $0x38] sm:$0x1] }
  0x54   : > { %v1281_v37 = vshll.u32 %v1163_v14, 16  ;;  %905 = vst [vmem:[#allocation2 + $0x30] sm:$0x1] %v904_v34  ;;  %v4003_v40 = vsel %vm14128_vm10, %v12421_v11, %v4002_v59  ;;  %v12422_v41 = vrot.slane %v14282_v6, 9  ;;  %v424_v16 = vshrl.u32 %v14285_v10, 16 }
  0x55   : > { %1593 = vrot.lane.b32.xlu1 %v1242_v47, %s13995_s11  ;;  %2687 = vrot.lane.b32.xlu0 %v2336_v52, %s13996_s12  ;;  %v4011_v31 = vrot.slane %v4009_v13, 4  ;;  %v4012_v56 = vrot.slane %v3909_v28, 5  ;;  %v1273_v45 = vshll.u32 %v1162_v20, 16  ;;  %v12375_v46 = vrot.slane %v949_v22, 11  ;;  %v1165_v50 = vld [vmem:[#allocation2 + $0x2c] sm:$0x1] }
  0x56   : > { %v4006_v47 = vsel %vm14128_vm10, %v4004_v18, %v4005_v12  ;;  %v1270_v48 = vor.u32 %v1269_v29, %v14292_v19  ;;  %v14308_v49 = vrot.slane %v1287_v25, 5  ;;  %v1293_v51 = vrot.slane %v1291_v32, 4  ;;  %v806_v33 = vld [vmem:[#allocation2 + $0x3c] sm:$0x2]  ;;  %v906_v60 = vld [vmem:[#allocation2 + $0x3c] sm:$0x1] }
  0x57   : > { %v1260_v52 = vor.u32 %v1259_v35, %v1256_v27  ;;  %v1280_v53 = vrot.slane %v1278_v36, 4  ;;  %v1283_v54 = vrot.slane %v1281_v37, 5  ;;  %v1049_v55 = vsel %vm14148_vm11, %v12375_v46, %v1048_v42  ;;  %v1725_v63 = vld [vmem:[#allocation2 + $0x1c] sm:$0xf]  ;;  %v706_v7 = vld [vmem:[#allocation2 + $0x44] sm:$0x1] }
  0x58   : > { %1050 = vst [vmem:[#allocation2 + $0x38] sm:$0x1] %v1049_v55  ;;  %v426_v57 = vrot.slane %v424_v16, 7  ;;  %v4013_v58 = vsel %vm14128_vm10, %v4011_v31, %v4012_v56  ;;  %v1275_v44 = vrot.slane %v1273_v45, 5  ;;  %v1297_v43 = vshll.u32 %v1165_v50, 16 }
  0x59   : > { %3777 = vrot.lane.b32.xlu1 %v3414_v62, %s13997_s13  ;;  %3775 = vrot.lane.b32.xlu0 %v3404_v4, %s13997_s13  ;;  %v12358_v59 = vrot.slane %v806_v33, 9  ;;  %v1271_v61 = vrot.slane %v1270_v48, 4  ;;  %v1294_v62 = vor.u32 %v1293_v51, %v14308_v49  ;;  %v422_v5 = vrot.slane %v14173_v2, 4  ;;  %v1726_v25 = vld [vmem:[#allocation2 + $0x20] sm:$0x1] }
  0x5a   : > { %v427_v0 = vshll.u32 %v14285_v10, 16  ;;  %v4010_v1 = vsel %vm14128_vm10, %v12422_v41, %v4009_v13  ;;  %v1261_v4 = vrot.slane %v1260_v52, 4  ;;  %v1284_v6 = vor.u32 %v1283_v54, %v1280_v53  ;;  %v1728_v13 = vld [vmem:[#allocation2 + $0x28] sm:$0xf]  ;;  %v1727_v28 = vld [vmem:[#allocation2 + $0x24] sm:$0xe] }
  0x5b   : > { %v907_v8 = vsel %vm14084_vm7, %v12358_v59, %v906_v60  ;;  %v431_v11 = vrot.slane %v426_v57, 4  ;;  %v1299_v12 = vrot.slane %v1297_v43, 5  ;;  %v1833_v14 = vrot.slane %v1725_v63, 5  ;;  %v1729_v27 = vld [vmem:[#allocation2 + $0x2c] sm:$0x1] }
  0x5c   : > { %v429_v9 = vor.u32 %v427_v0, %v426_v57  ;;  %908 = vst [vmem:[#allocation2 + $0x3c] sm:$0x1] %v907_v8  ;;  %v1276_v2 = vsel %vm14230_vm14, %v1271_v61, %v1275_v44  ;;  %v1295_v10 = vrot.slane %v1294_v62, 4  ;;  %v1266_v18 = vsel %vm14230_vm14, %v1261_v4, %v14292_v19  ;;  %v2258_v35 = vld [vmem:[#allocation2 + $0x28] sm:$0xf] }
  0x5d   : > { %3781 = vrot.lane.b32.xlu1 %v3438_v26, %s13997_s13  ;;  %3779 = vrot.lane.b32.xlu0 %v3428_v15, %s13997_s13  ;;  %v707_v15 = vsel %vm14084_vm7, %v431_v11, %v706_v7  ;;  %v1285_v20 = vrot.slane %v1284_v6, 4  ;;  %v1724_v26 = vld [vmem:[#allocation2 + $0x18] sm:$0xe]  ;;  %v1840_v29 = vrot.slane %v1728_v13, 5  ;;  %v1835_v34 = vrot.slane %v1833_v14, 4 }
  0x5e   : > { %v430_v17 = vsel %vm14070_vm5, %v422_v5, %v429_v9  ;;  %708 = vst [vmem:[#allocation2 + $0x44] sm:$0x1] %v707_v15  ;;  %v1300_v32 = vsel %vm14230_vm14, %v1295_v10, %v1299_v12  ;;  %v1836_v22 = vrot.slane %v1726_v25, 5  ;;  %v12391_v36 = vrot.slane %v1724_v26, 9  ;;  %v1093_v37 = vld [vmem:[#allocation2 + $0x10] sm:$0xf] }
  0x5f   : > { %705 = vst.msk [vmem:[#allocation2 + $0x40] sm:$0xf] %vm668_vm2, %v430_v17  ;;  %v1290_v19 = vsel %vm14230_vm14, %v1285_v20, %v14308_v49  ;;  %v2257_v41 = vld [vmem:[#allocation2 + $0x24] sm:$0xf]  ;;  %1125 = vst.msk [vmem:[#allocation3 + $0xc] sm:$0xf] %vm668_vm2, %v1093_v37 }
  0x60   : > { %v12392_v42 = vrot.slane %v1727_v28, 9  ;;  %v1842_v16 = vrot.slane %v1840_v29, 4  ;;  %v1843_v31 = vrot.slane %v1729_v27, 5  ;;  %v2357_v56 = vshll.u32 %v2258_v35, 16  ;;  %v2261_v51 = vld [vmem:[#allocation2 + $0x34] sm:$0xf] }
  0x61   : > { %4114 = vrot.lane.b32.xlu1 %v4006_v47, %s13998_s14  ;;  %4112 = vrot.lane.b32.xlu0 %v4003_v40, %s13998_s14  ;;  %v1091_v40 = vld [vmem:[#allocation2 + $0x4] sm:$0xf]  ;;  %v1837_v45 = vsel %vm14128_vm10, %v1835_v34, %v1836_v22  ;;  %v2361_v46 = vshrl.u32 %v2258_v35, 16  ;;  %v1834_v48 = vsel %vm14128_vm10, %v12391_v36, %v1833_v14  ;;  %v2348_v49 = vshrl.u32 %v2257_v41, 16  ;;  %v2260_v52 = vld [vmem:[#allocation2 + $0x30] sm:$0xf] }
  0x62   : > { %1123 = vst.msk [vmem:[#allocation3 + $0x4] sm:$0xf] %vm668_vm2, %v1091_v40  ;;  %v2351_v50 = vshll.u32 %v2257_v41, 16  ;;  %v1841_v54 = vsel %vm14128_vm10, %v12392_v42, %v1840_v29  ;;  %v1844_v55 = vsel %vm14128_vm10, %v1842_v16, %v1843_v31  ;;  %v14355_v57 = vrot.slane %v2357_v56, 5  ;;  %v2259_v62 = vld [vmem:[#allocation2 + $0x2c] sm:$0x1] }
  0x63   : > { %v2381_v44 = vshll.u32 %v2261_v51, 16  ;;  %v2385_v43 = vshrl.u32 %v2261_v51, 16  ;;  %v2350_v60 = vrot.slane %v2348_v49, 4  ;;  %v2372_v63 = vshrl.u32 %v2260_v52, 16  ;;  %v2063_v0 = vld [vmem:[#allocation2 + $0x28] sm:$0xf] }
  0x64   : > { %v2353_v61 = vrot.slane %v2351_v50, 5  ;;  %v2375_v5 = vshll.u32 %v2260_v52, 16  ;;  %v2367_v4 = vshll.u32 %v2259_v62, 16  ;;  %v1090_v8 = vld [vmem:[#allocation2] sm:$0xf]  ;;  %vm1685_vm1 = vcmask 60448  }
  0x65   : > { %4118 = vrot.lane.b32.xlu1 %v4013_v58, %s13998_s14  ;;  %4116 = vrot.lane.b32.xlu0 %v4010_v1, %s13998_s14  ;;  %v1051_v33 = vld [vmem:[#allocation2 + $0x44] sm:$0x1]  ;;  %v2363_v58 = vrot.slane %v2361_v46, 4  ;;  %v14363_v6 = vrot.slane %v2381_v44, 5  ;;  %v2387_v7 = vrot.slane %v2385_v43, 4  ;;  %v2374_v12 = vrot.slane %v2372_v63, 4 }
  0x66   : > { %v950_v47 = vld [vmem:[#allocation2 + $0x40] sm:$0x8]  ;;  %v2062_v9 = vld [vmem:[#allocation2 + $0x24] sm:$0xf]  ;;  %v2354_v11 = vor.u32 %v2353_v61, %v2350_v60  ;;  %v2377_v14 = vrot.slane %v2375_v5, 5  ;;  %v2369_v25 = vrot.slane %v2367_v4, 5 }
  0x67   : > { %v12376_v53 = vrot.slane %v950_v47, 11  ;;  %v2364_v1 = vor.u32 %v2363_v58, %v14355_v57  ;;  %1122 = vst.msk [vmem:[#allocation3] sm:$0xf] %vm668_vm2, %v1090_v8  ;;  %v2065_v10 = vld [vmem:[#allocation2 + $0x34] sm:$0xf]  ;;  %v2388_v26 = vor.u32 %v2387_v7, %v14363_v6  ;;  %vm19023_vm4 = vcmask 93248  }
  0x68   : > { %v290_v13 = vld [vmem:[%s14054_s29 + $0x28] sm:$0xf]  ;;  %v291_v15 = vld [vmem:[%s14054_s29 + $0x2c] sm:$0xf]  ;;  %v14373_v29 = vld [vmem:[#allocation2 + $0x24] sm:$0xe]  ;;  %v2378_v22 = vor.u32 %v2377_v14, %v2374_v12 }
  0x69   : > { %1599 = vrot.lane.b32.xlu1 %v1276_v2, %s13995_s11  ;;  %1597 = vrot.lane.b32.xlu0 %v1266_v18, %s13995_s11  ;;  %v1052_v59 = vsel %vm14148_vm11, %v12376_v53, %v1051_v33  ;;  %v2262_v2 = vld [vmem:[#allocation2 + $0x38] sm:$0x1]  ;;  %v14368_v17 = vld [vmem:[#allocation2 + $0x28] sm:$0xf]  ;;  %v1092_v18 = vld [vmem:[#allocation2 + $0xc] sm:$0xf]  ;;  %v322_v35 = vmax.bf16 %v18963_v3, %v290_v13  ;;  %v323_v37 = vmax.bf16 %v18963_v3, %v291_v15 }
  0x6a   : > { %1053 = vst [vmem:[#allocation2 + $0x44] sm:$0x1] %v1052_v59  ;;  %v2365_v20 = vrot.slane %v2364_v1, 4  ;;  %v2391_v28 = vshll.u32 %v2262_v2, 16  ;;  %1124 = vst.msk [vmem:[#allocation3 + $0x8] sm:$0xf] %vm668_vm2, %v1092_v18 }
  0x6b   : > { %v2355_v34 = vrot.slane %v2354_v11, 4  ;;  %v14376_v27 = vld [vmem:[#allocation2 + $0x34] sm:$0xf]  ;;  %v2820_v36 = vld [vmem:[#allocation2 + $0x2c] sm:$0x1]  ;;  %v12407_v40 = vrot.slane %v14373_v29, 9 }
  0x6c   : > { %v2821_v41 = vld [vmem:[#allocation2 + $0x30] sm:$0xe]  ;;  %v2370_v42 = vsel %vm14230_vm14, %v2365_v20, %v2369_v25  ;;  %v2389_v16 = vrot.slane %v2388_v26, 4  ;;  %v2393_v31 = vrot.slane %v2391_v28, 5  ;;  %v2931_v56 = vrot.slane %v14376_v27, 5 }
  0x6d   : > { %1603 = vrot.lane.b32.xlu1 %v1300_v32, %s13995_s11  ;;  %1601 = vrot.lane.b32.xlu0 %v1290_v19, %s13995_s11  ;;  %v2064_v32 = vld [vmem:[#allocation2 + $0x30] sm:$0xf]  ;;  %v2924_v19 = vrot.slane %v14368_v17, 5  ;;  %v2379_v46 = vrot.slane %v2378_v22, 4  ;;  %v2927_v47 = vrot.slane %v2820_v36, 5  ;;  %v12408_v50 = vrot.slane %v2821_v41, 9 }
  0x6e   : > { %v3350_v51 = vld [vmem:[#allocation2 + $0x34] sm:$0xf]  ;;  %v436_v33 = vshll.u32 %v322_v35, 16  ;;  %v441_v52 = vshrl.u32 %v323_v37, 16  ;;  %v2823_v53 = vld [vmem:[#allocation2 + $0x38] sm:$0x1]  ;;  %v2394_v44 = vsel %vm14230_vm14, %v2389_v16, %v2393_v31 }
  0x6f   : > { %v2926_v49 = vrot.slane %v2924_v19, 4  ;;  %v1094_v58 = vld [vmem:[#allocation2 + $0x18] sm:$0xf]  ;;  %v709_v43 = vld [vmem:[#allocation2 + $0x48] sm:$0xf]  ;;  %v2384_v61 = vsel %vm14230_vm14, %v2379_v46, %v14363_v6  ;;  %v3449_v62 = vshll.u32 %v3350_v51, 16  ;;  %v2925_v20 = vsel %vm14128_vm10, %v12407_v40, %v2924_v19 }
  0x70   : > { %v443_v59 = vrot.slane %v441_v52, 7  ;;  %1126 = vst.msk [vmem:[#allocation3 + $0x10] sm:$0xf] %vm668_vm2, %v1094_v58  ;;  %v1095_v60 = vld [vmem:[#allocation2 + $0x1c] sm:$0xf]  ;;  %v2934_v1 = vrot.slane %v2823_v53, 5  ;;  %v2932_v29 = vsel %vm14128_vm10, %v12408_v50, %v2931_v56 }
  0x71   : > { %1939 = vrot.lane.b32.xlu1 %v1837_v45, %s13992_s8  ;;  %1937 = vrot.lane.b32.xlu0 %v1834_v48, %s13992_s8  ;;  %v2360_v45 = vsel %vm14230_vm14, %v2355_v34, %v14355_v57  ;;  %v433_v48 = vshrl.u32 %v322_v35, 16  ;;  %v2933_v57 = vrot.slane %v2931_v56, 4  ;;  %1127 = vst.msk [vmem:[#allocation3 + $0x14] sm:$0xf] %vm668_vm2, %v1095_v60  ;;  %v3349_v4 = vld [vmem:[#allocation2 + $0x30] sm:$0xf]  ;;  %v2928_v2 = vsel %vm14128_vm10, %v2926_v49, %v2927_v47 }
  0x72   : > { %v3453_v7 = vshrl.u32 %v3350_v51, 16  ;;  %v14400_v11 = vld [vmem:[#allocation2 + $0x3c] sm:$0xf]  ;;  %v292_v6 = vld [vmem:[%s14054_s29 + $0x30] sm:$0xf]  ;;  %v3440_v25 = vshrl.u32 %v3349_v4, 16 }
  0x73   : > { %v1096_v14 = vld [vmem:[#allocation2 + $0x24] sm:$0xf]  ;;  %v293_v15 = vld [vmem:[%s14054_s29 + $0x34] sm:$0xf]  ;;  %v1097_v18 = vld [vmem:[#allocation2 + $0x28] sm:$0xf]  ;;  %v324_v27 = vmax.bf16 %v18963_v3, %v292_v6  ;;  %v2935_v35 = vsel %vm14128_vm10, %v2933_v57, %v2934_v1 }
  0x74   : > { %1128 = vst.msk [vmem:[#allocation3 + $0x18] sm:$0xf] %vm668_vm2, %v1096_v14  ;;  %v3443_v26 = vshll.u32 %v3349_v4, 16  ;;  %v13658_v28 = vld [vmem:[%s18951_s1 + $0x10] ss:$0 sps:$4 sm:$0x33]  }
  0x75   : > { %1943 = vrot.lane.b32.xlu1 %v1844_v55, %s13992_s8  ;;  %1941 = vrot.lane.b32.xlu0 %v1841_v54, %s13992_s8  ;;  %v435_v54 = vrot.slane %v433_v48, 7  ;;  %v444_v55 = vshll.u32 %v323_v37, 16  ;;  %1129 = vst.msk [vmem:[#allocation3 + $0x1c] sm:$0xf] %vm668_vm2, %v1097_v18  ;;  %v3351_v34 = vld [vmem:[#allocation2 + $0x38] sm:$0x1]  ;;  %v14431_v37 = vmax.bf16 %v18963_v3, %v293_v15 }
  0x76   : > { %v3455_v22 = vrot.slane %v3453_v7, 4  ;;  %v3464_v19 = vshrl.u32 %v14400_v11, 16  ;;  %v450_v41 = vshrl.u32 %v324_v27, 16  ;;  %v13659_v16 = vld [vmem:[%s18951_s1 + $0x8] sm:$0xff]   ;;  %v3442_v31 = vrot.slane %v3440_v25, 4  ;;  %13637 = vmatprep.subr.msk.bf16.mxu0 %vm18958_vm15, %v13658_v28  ;;  %13638 = vmatprep.subr.msk.bf16.mxu1 %vm18958_vm15, %v13658_v28  ;;  %v13660_v60 = vld [vmem:[%s18951_s1] sm:$0xff]  }
  0x77   : > { %v438_v63 = vor.u32 %v436_v33, %v435_v54  ;;  %v439_v5 = vrot.slane %v435_v54, 4  ;;  %v446_v8 = vor.u32 %v444_v55, %v443_v59  ;;  %v3445_v56 = vrot.slane %v3443_v26, 5  ;;  %v3155_v47 = vld [vmem:[#allocation2 + $0x34] sm:$0xf]  ;;  %v3154_v51 = vld [vmem:[#allocation2 + $0x30] sm:$0xf] }
  0x78   : > { %v3467_v46 = vshll.u32 %v14400_v11, 16  ;;  %v14440_v48 = vrot.slane %v450_v41, 7  ;;  %v716_v49 = vld [vmem:[#allocation2 + $0x54] sm:$0xf]  ;;  %v4431_v50 = vsel %vm18958_vm15, %v13658_v28, 0  ;;  %v14445_v52 = vrot.slane %v3464_v19, 4 }
  0x79   : > { %2132 = vrot.lane.b32.xlu1 %v2063_v0, %s13991_s30  ;;  %2130 = vrot.lane.b32.xlu0 %v2062_v9, %s13991_s30  ;;  %v713_v0 = vld [vmem:[#allocation2 + $0x50] sm:$0x1]  ;;  %v448_v9 = vrot.slane %v443_v59, 4  ;;  %v710_v12 = vsel %vm14076_vm6, %v438_v63, %v709_v43  ;;  %v447_v13 = vsel %vm14070_vm5, %v439_v5, %v446_v8  ;;  %v458_v55 = vshrl.u32 %v14431_v37, 16  ;;  %v14456_v1 = vld [vmem:[#allocation2 + $0x30] sm:$0xe] }
  0x7a   : > { %711 = vst [vmem:[#allocation2 + $0x48] sm:$0xf] %v710_v12  ;;  %712 = vst.msk [vmem:[#allocation2 + $0x4c] sm:$0xf] %vm668_vm2, %v447_v13  ;;  %13512 = vmatpush3.bf16.msra.mxu0 %v4431_v50  ;;  %13634 = vmatpush3.bf16.msra.mxu1 %v4431_v50  ;;  %v14458_v4 = vld [vmem:[#allocation2 + $0x34] sm:$0xf] }
  0x7b   : > { %v714_v17 = vsel %vm14084_vm7, %v448_v9, %v713_v0  ;;  %13513 = vmatprep.subr.bf16.mxu0 %v13659_v16  ;;  %v461_v0 = vshll.u32 %v14431_v37, 16  ;;  %13632 = vmatprep.subr.bf16.mxu1 %v13659_v16  ;;  %v1167_v12 = vld [vmem:[#allocation2 + $0x34] sm:$0xf]  ;;  %v456_v6 = vrot.slane %v14440_v48, 4  ;;  %v460_v14 = vrot.slane %v458_v55, 7 }
  0x7c   : > { %715 = vst [vmem:[#allocation2 + $0x50] sm:$0x1] %v714_v17  ;;  %v1166_v15 = vld [vmem:[#allocation2 + $0x30] sm:$0xf]  ;;  %v4016_v28 = vrot.slane %v14458_v4, 5  ;;  %v1315_v41 = vshrl.u32 %v1167_v12, 16 }
  0x7d   : > { %2136 = vrot.lane.b32.xlu1 %v2065_v10, %s13991_s30  ;;  %2134 = vrot.lane.b32.xlu0 %v2064_v32, %s13991_s30  ;;  %v3353_v10 = vld [vmem:[#allocation2 + $0x40] sm:$0xf]  ;;  %v14423_v32 = vrot.slane %v3449_v62, 5  ;;  %v3469_v62 = vrot.slane %v3467_v46, 5  ;;  %v1169_v19 = vld [vmem:[#allocation2 + $0x3c] sm:$0xf] }
  0x7e   : > { %v3473_v36 = vshll.u32 %v3353_v10, 16  ;;  %v3477_v40 = vshrl.u32 %v3353_v10, 16  ;;  %13514 = vmatpush3.bf16.msra.mxu0 %v13659_v16  ;;  %13635 = vmatpush3.bf16.msra.mxu1 %v13659_v16  ;;  %v1305_v50 = vshll.u32 %v1166_v15, 16  ;;  %vm2218_vm8 = vcmask 126048  }
  0x7f   : > { %v3456_v33 = vor.u32 %v3455_v22, %v14423_v32  ;;  %13515 = vmatprep.subr.bf16.mxu0 %v13660_v60  ;;  %v3470_v26 = vor.u32 %v3469_v62, %v14445_v52  ;;  %v720_v22 = vld [vmem:[#allocation2 + $0x5c] sm:$0x1]  ;;  %13633 = vmatprep.subr.bf16.mxu1 %v13660_v60  ;;  %v3913_v52 = vld [vmem:[#allocation2 + $0x3c] sm:$0xe]  ;;  %vm19026_vm9 = vcmask 158848   ;;  %vm3116_vm12 = vcmask 191648  }
  0x80   : > { %v14449_v58 = vrot.slane %v3473_v36, 5  ;;  %v3479_v57 = vrot.slane %v3477_v40, 4  ;;  %v465_v36 = vrot.slane %v460_v14, 4  ;;  %v12423_v40 = vrot.slane %v14456_v1, 9  ;;  %v3915_v1 = vld [vmem:[#allocation2 + $0x44] sm:$0x1] }
  0x81   : > { %2693 = vrot.lane.b32.xlu1 %v2370_v42, %s13996_s12  ;;  %2691 = vrot.lane.b32.xlu0 %v2360_v45, %s13996_s12  ;;  %v453_v42 = vshll.u32 %v324_v27, 16  ;;  %v3459_v45 = vshll.u32 %v3351_v34, 16  ;;  %v807_v53 = vld [vmem:[#allocation2 + $0x48] sm:$0x2]  ;;  %v909_v54 = vld [vmem:[#allocation2 + $0x48] sm:$0x1]  ;;  %v463_v34 = vor.u32 %v461_v0, %v460_v14 }
  0x82   : > { %v12359_v43 = vrot.slane %v807_v53, 9  ;;  %v951_v63 = vld [vmem:[#allocation2 + $0x4c] sm:$0x8]  ;;  %v3457_v10 = vrot.slane %v3456_v33, 4  ;;  %v3480_v13 = vor.u32 %v3479_v57, %v14449_v58  ;;  %v14472_v27 = vld [vmem:[#allocation2 + $0x40] sm:$0xf]  ;;  %13516 = vmatpush3.bf16.msra.mxu0 %v13660_v60  ;;  %v721_v46 = vsel %vm14084_vm7, %v465_v36, %v720_v22  ;;  %13636 = vmatpush3.bf16.msra.mxu1 %v13660_v60 }
  0x83   : > { %v455_v59 = vor.u32 %v453_v42, %v14440_v48  ;;  %v1054_v5 = vld [vmem:[#allocation2 + $0x50] sm:$0x1]  ;;  %v12377_v8 = vrot.slane %v951_v63, 11  ;;  %v3461_v11 = vrot.slane %v3459_v45, 5  ;;  %v1170_v42 = vld [vmem:[#allocation2 + $0x40] sm:$0xf] }
  0x84   : > { %v910_v7 = vsel %vm14084_vm7, %v12359_v43, %v909_v54  ;;  %v3471_v48 = vrot.slane %v3470_v26, 4  ;;  %722 = vst [vmem:[#allocation2 + $0x5c] sm:$0x1] %v721_v46  ;;  %v4023_v53 = vrot.slane %v14472_v27, 5  ;;  %v1168_v60 = vld [vmem:[#allocation2 + $0x38] sm:$0x1] }
  0x85   : > { %2697 = vrot.lane.b32.xlu1 %v2394_v44, %s13996_s12  ;;  %2695 = vrot.lane.b32.xlu0 %v2384_v61, %s13996_s12  ;;  %v3354_v44 = vld [vmem:[#allocation2 + $0x44] sm:$0x1]  ;;  %v3446_v61 = vor.u32 %v3445_v56, %v3442_v31  ;;  %v717_v9 = vsel %vm14076_vm6, %v455_v59, %v716_v49  ;;  %911 = vst [vmem:[#allocation2 + $0x48] sm:$0x1] %v910_v7  ;;  %v3481_v56 = vrot.slane %v3480_v13, 4  ;;  %v1302_v49 = vshrl.u32 %v1166_v15, 16 }
  0x86   : > { %718 = vst [vmem:[#allocation2 + $0x54] sm:$0xf] %v717_v9  ;;  %v3483_v17 = vshll.u32 %v3354_v44, 16  ;;  %v1055_v18 = vsel %vm14148_vm11, %v12377_v8, %v1054_v5  ;;  %v464_v31 = vsel %vm14070_vm5, %v456_v6, %v463_v34  ;;  %v3462_v16 = vsel %vm14230_vm14, %v3457_v10, %v3461_v11  ;;  %v1171_v34 = vld [vmem:[#allocation2 + $0x44] sm:$0x1] }
  0x87   : > { %v3447_v25 = vrot.slane %v3446_v61, 4  ;;  %1056 = vst [vmem:[#allocation2 + $0x50] sm:$0x1] %v1055_v18  ;;  %719 = vst.msk [vmem:[#allocation2 + $0x58] sm:$0xf] %vm668_vm2, %v464_v31  ;;  %v1326_v44 = vshrl.u32 %v1169_v19, 16  ;;  %v3476_v5 = vsel %vm14230_vm14, %v3471_v48, %v14449_v58 }
  0x88   : > { %v3485_v45 = vrot.slane %v3483_v17, 5  ;;  %v1317_v61 = vrot.slane %v1315_v41, 4  ;;  %v1339_v62 = vshrl.u32 %v1170_v42, 16  ;;  %v1304_v7 = vrot.slane %v1302_v49, 4  ;;  %v14525_v41 = vld [vmem:[#allocation2 + $0x34] sm:$0xf] }
  0x89   : > { %3030 = vrot.lane.b32.xlu1 %v2928_v2, %s13994_s10  ;;  %3028 = vrot.lane.b32.xlu0 %v2925_v20, %s13994_s10  ;;  %v3157_v2 = vld [vmem:[#allocation2 + $0x40] sm:$0xf]  ;;  %v3156_v20 = vld [vmem:[#allocation2 + $0x3c] sm:$0xf]  ;;  %v1307_v8 = vrot.slane %v1305_v50, 5  ;;  %v1329_v9 = vshll.u32 %v1169_v19, 16 }
  0x8a   : > { %v3486_v59 = vsel %vm14230_vm14, %v3481_v56, %v3485_v45  ;;  %v12424_v11 = vrot.slane %v3913_v52, 9  ;;  %v1321_v10 = vshll.u32 %v1168_v60, 16  ;;  %v1328_v58 = vrot.slane %v1326_v44, 4  ;;  %v1732_v48 = vld [vmem:[#allocation2 + $0x38] sm:$0x1] }
  0x8b   : > { %v4026_v13 = vrot.slane %v3915_v1, 5  ;;  %v1341_v18 = vrot.slane %v1339_v62, 4  ;;  %v1308_v26 = vor.u32 %v1307_v8, %v1304_v7  ;;  %v1057_v27 = vld [vmem:[#allocation2 + $0x5c] sm:$0x1]  ;;  %v1345_v31 = vshll.u32 %v1171_v34, 16 }
  0x8c   : > { %v1323_v36 = vrot.slane %v1321_v10, 5  ;;  %v1847_v46 = vrot.slane %v14525_v41, 5  ;;  %v1734_v49 = vld [vmem:[#allocation2 + $0x40] sm:$0xf]  ;;  %v1730_v52 = vld [vmem:[#allocation2 + $0x30] sm:$0xe] }
  0x8d   : > { %3034 = vrot.lane.b32.xlu1 %v2935_v35, %s13994_s10  ;;  %3032 = vrot.lane.b32.xlu0 %v2932_v29, %s13994_s10  ;;  %v3912_v29 = vld [vmem:[#allocation2 + $0x38] sm:$0x1]  ;;  %v1311_v35 = vshll.u32 %v1167_v12, 16  ;;  %v808_v57 = vld [vmem:[#allocation2 + $0x54] sm:$0x2]  ;;  %v1309_v56 = vrot.slane %v1308_v26, 4 }
  0x8e   : > { %v4019_v33 = vrot.slane %v3912_v29, 5  ;;  %v912_v43 = vld [vmem:[#allocation2 + $0x54] sm:$0x1]  ;;  %v12360_v63 = vrot.slane %v808_v57, 9  ;;  %v1331_v29 = vrot.slane %v1329_v9, 5  ;;  %v1849_v60 = vrot.slane %v1847_v46, 4 }
  0x8f   : > { %v14492_v54 = vrot.slane %v1311_v35, 5  ;;  %v1854_v62 = vrot.slane %v1734_v49, 5  ;;  %v1735_v1 = vld [vmem:[#allocation2 + $0x44] sm:$0x1]  ;;  %v295_v9 = vld [vmem:[%s14054_s29 + $0x3c] sm:$0xf] }
  0x90   : > { %v913_v12 = vsel %vm14084_vm7, %v12360_v63, %v912_v43  ;;  %v1332_v45 = vor.u32 %v1331_v29, %v1328_v58  ;;  %v1733_v43 = vld [vmem:[#allocation2 + $0x3c] sm:$0xe]  ;;  %v294_v63 = vld [vmem:[%s14054_s29 + $0x38] sm:$0xf]  ;;  %v2265_v58 = vld [vmem:[#allocation2 + $0x44] sm:$0x1] }
  0x91   : > { %3224 = vrot.lane.b32.xlu1 %v3155_v47, %s13993_s9  ;;  %3222 = vrot.lane.b32.xlu0 %v3154_v51, %s13993_s9  ;;  %v3452_v47 = vsel %vm14230_vm14, %v3447_v25, %v14423_v32  ;;  %v4018_v51 = vrot.slane %v4016_v28, 4  ;;  %v1335_v32 = vshll.u32 %v1170_v42, 16  ;;  %914 = vst [vmem:[#allocation2 + $0x54] sm:$0x1] %v913_v12  ;;  %v1318_v17 = vor.u32 %v1317_v61, %v14492_v54 }
  0x92   : > { %v4017_v25 = vsel %vm14128_vm10, %v12423_v40, %v4016_v28  ;;  %v1333_v57 = vrot.slane %v1332_v45, 4  ;;  %v1850_v61 = vrot.slane %v1732_v48, 5  ;;  %v723_v48 = vld [vmem:[#allocation2 + $0x60] sm:$0xf]  ;;  %vm3310_vm13 = vcmask 224448  }
  0x93   : > { %v4020_v14 = vsel %vm14128_vm10, %v4018_v51, %v4019_v33  ;;  %v14514_v15 = vrot.slane %v1335_v32, 5  ;;  %v1319_v40 = vrot.slane %v1318_v17, 4  ;;  %v1347_v33 = vrot.slane %v1345_v31, 5  ;;  %v296_v31 = vld [vmem:[%s14054_s29 + $0x40] sm:$0xf] }
  0x94   : > { %v14475_v37 = vpop.permute.xlu1 %2124  ;;  %v1314_v32 = vsel %vm14230_vm14, %v1309_v56, %v14492_v54  ;;  %v12394_v17 = vrot.slane %v1733_v43, 9  ;;  %v1851_v29 = vsel %vm14128_vm10, %v1849_v60, %v1850_v61  ;;  %vm3871_vm15 = vcmask 257248  }
  0x95   : > { %3228 = vrot.lane.b32.xlu1 %v3157_v2, %s13993_s9  ;;  %3226 = vrot.lane.b32.xlu0 %v3156_v20, %s13993_s9  ;;  %v4025_v2 = vrot.slane %v4023_v53, 4  ;;  %v952_v20 = vld [vmem:[#allocation2 + $0x58] sm:$0x8]  ;;  %v1342_v42 = vor.u32 %v1341_v18, %v14514_v15  ;;  %v1324_v50 = vsel %vm14230_vm14, %v1319_v40, %v1323_v36  ;;  %v1856_v18 = vrot.slane %v1854_v62, 4  ;;  %v2267_v36 = vld [vmem:[#allocation2 + $0x4c] sm:$0xf] }
  0x96   : > { %v12378_v22 = vrot.slane %v952_v20, 11  ;;  %v1857_v20 = vrot.slane %v1735_v1, 5  ;;  %v2266_v40 = vld [vmem:[#allocation2 + $0x48] sm:$0xf]  ;;  %v2433_v60 = vshrl.u32 %v2267_v36, 16  ;;  %vm4208_vm0 = vcmask 290048  }
  0x97   : > { %v4027_v28 = vsel %vm14128_vm10, %v4025_v2, %v4026_v13  ;;  %v1343_v51 = vrot.slane %v1342_v42, 4  ;;  %v12393_v2 = vrot.slane %v1730_v52, 9  ;;  %v326_v13 = vmax.bf16 %v18963_v3, %v294_v63 }
  0x98   : > { %v14503_v0 = vpop.permute.xlu1 %2128  ;;  %v1058_v4 = vsel %vm14148_vm11, %v12378_v22, %v1057_v27  ;;  %v2415_v27 = vshll.u32 %v2265_v58, 16  ;;  %v1858_v56 = vsel %vm14128_vm10, %v1856_v18, %v1857_v20  ;;  %v2429_v52 = vshll.u32 %v2267_v36, 16 }
  0x99   : > { %3785 = vrot.lane.b32.xlu1 %v3462_v16, %s13997_s13  ;;  %v14495_v55 = vpop.permute.xlu0 %1929  ;;  %3783 = vrot.lane.b32.xlu0 %v3452_v47, %s13997_s13  ;;  %1059 = vst [vmem:[#allocation2 + $0x5c] sm:$0x1] %v1058_v4  ;;  %v4024_v16 = vsel %vm14128_vm10, %v12424_v11, %v4023_v53  ;;  %v2263_v53 = vld [vmem:[#allocation2 + $0x3c] sm:$0xf]  ;;  %v1348_v54 = vsel %vm14230_vm14, %v1343_v51, %v1347_v33  ;;  %v467_v42 = vshrl.u32 %v326_v13, 16  ;;  %v470_v45 = vshll.u32 %v326_v13, 16 }
  0x9a   : > { %v2396_v7 = vshrl.u32 %v2263_v53, 16  ;;  %v2399_v8 = vshll.u32 %v2263_v53, 16  ;;  %v1848_v4 = vsel %vm14128_vm10, %v12393_v2, %v1847_v46  ;;  %v1098_v51 = vld [vmem:[#allocation2 + $0x30] sm:$0xf]  ;;  %v14587_v43 = vrot.slane %v2415_v27, 5 }
  0x9b   : > { %v469_v53 = vrot.slane %v467_v42, 7  ;;  %1130 = vst.msk [vmem:[#allocation3 + $0x20] sm:$0xf] %vm668_vm2, %v1098_v51  ;;  %v2423_v1 = vshll.u32 %v2266_v40, 16  ;;  %v2066_v13 = vld [vmem:[#allocation2 + $0x3c] sm:$0xf] }
  0x9c   : > { %v14521_v35 = vpop.permute.xlu1 %3216  ;;  %v2398_v34 = vrot.slane %v2396_v7, 4  ;;  %v14602_v18 = vrot.slane %v2429_v52, 5  ;;  %v2435_v27 = vrot.slane %v2433_v60, 4  ;;  %v2068_v51 = vld [vmem:[#allocation2 + $0x48] sm:$0xf]  ;;  %vm4380_vm3 = vcmask 293888  }
  0x9d   : > { %3789 = vrot.lane.b32.xlu1 %v3486_v59, %s13997_s13  ;;  %v14508_v6 = vpop.permute.xlu0 %1933  ;;  %3787 = vrot.lane.b32.xlu0 %v3476_v5, %s13997_s13  ;;  %v2264_v59 = vld [vmem:[#allocation2 + $0x40] sm:$0xf]  ;;  %v472_v7 = vor.u32 %v470_v45, %v469_v53 }
  0x9e   : > { %v2405_v11 = vshll.u32 %v2264_v59, 16  ;;  %v2409_v10 = vshrl.u32 %v2264_v59, 16  ;;  %v2420_v59 = vshrl.u32 %v2266_v40, 16  ;;  %v2425_v40 = vrot.slane %v2423_v1, 5  ;;  %v14615_v45 = vld [vmem:[#allocation2 + $0x40] sm:$0xf] }
  0x9f   : > { %v724_v20 = vsel %vm14076_vm6, %v472_v7, %v723_v48 }
  0xa0   : > { %v14568_v22 = vrot.slane %v2405_v11, 5  ;;  %v1101_v11 = vld [vmem:[#allocation2 + $0x40] sm:$0xf]  ;;  %725 = vst [vmem:[#allocation2 + $0x60] sm:$0xf] %v724_v20 }
  0xa1   : > { %4122 = vrot.lane.b32.xlu1 %v4020_v14, %s13998_s14  ;;  %v14523_v19 = vpop.permute.xlu0 %3020  ;;  %4120 = vrot.lane.b32.xlu0 %v4017_v25, %s13998_s14  ;;  %v1338_v14 = vsel %vm14230_vm14, %v1333_v57, %v14514_v15  ;;  %v327_v25 = vmax.bf16 %v18963_v3, %v295_v9  ;;  %v2401_v15 = vrot.slane %v2399_v8, 5  ;;  %v1099_v57 = vld [vmem:[#allocation2 + $0x34] sm:$0xf]  ;;  %v473_v8 = vrot.slane %v469_v53, 4  ;;  %v727_v9 = vld [vmem:[#allocation2 + $0x68] sm:$0x1] }
  0xa2   : > { %1131 = vst.msk [vmem:[#allocation3 + $0x24] sm:$0xf] %vm668_vm2, %v1099_v57  ;;  %1133 = vst.msk [vmem:[#allocation3 + $0x2c] sm:$0xf] %vm668_vm2, %v1101_v11  ;;  %v2436_v57 = vor.u32 %v2435_v27, %v14602_v18 }
  0xa3   : > { %v475_v49 = vshrl.u32 %v327_v25, 16  ;;  %v2402_v33 = vor.u32 %v2401_v15, %v2398_v34  ;;  %v2422_v34 = vrot.slane %v2420_v59, 4  ;;  %v2268_v15 = vld [vmem:[#allocation2 + $0x50] sm:$0x1]  ;;  %v14625_v59 = vld [vmem:[#allocation2 + $0x3c] sm:$0xe] }
  0xa5   : > { %4126 = vrot.lane.b32.xlu1 %v4027_v28, %s13998_s14  ;;  %v14537_v47 = vpop.permute.xlu0 %3024  ;;  %4124 = vrot.lane.b32.xlu0 %v4024_v16, %s13998_s14  ;;  %v14574_v28 = vrot.slane %v2409_v10, 4  ;;  %v1855_v16 = vsel %vm14128_vm10, %v12394_v17, %v1854_v62  ;;  %v477_v61 = vrot.slane %v475_v49, 7  ;;  %v1100_v62 = vld [vmem:[#allocation2 + $0x3c] sm:$0xf]  ;;  %v14600_v17 = vrot.slane %v2402_v33, 4 }
  0xa6   : > { %1132 = vst.msk [vmem:[#allocation3 + $0x28] sm:$0xf] %vm668_vm2, %v1100_v62  ;;  %v730_v49 = vld [vmem:[#allocation2 + $0x6c] sm:$0xf]  ;;  %v2439_v33 = vshll.u32 %v2268_v15, 16 }
  0xa7   : > { %v14542_v44 = vpop.permute.xlu1 %1931  ;;  %v482_v10 = vrot.slane %v477_v61, 4  ;;  %v2408_v15 = vsel %vm14230_vm14, %v14600_v17, %v14568_v22 }
  0xa8   : > { %v2441_v20 = vrot.slane %v2439_v33, 5 }
  0xa9   : > { %1607 = vrot.lane.b32.xlu1 %v1324_v50, %s13995_s11  ;;  %v14549_v5 = vpop.permute.xlu0 %2122  ;;  %1605 = vrot.lane.b32.xlu0 %v1314_v32, %s13995_s11  ;;  %v297_v50 = vld [vmem:[%s14054_s29 + $0x44] sm:$0xf]  ;;  %v478_v32 = vshll.u32 %v327_v25, 16 }
  0xaa   : > { %v329_v25 = vmax.bf16 %v18963_v3, %v297_v50 }
  0xab   : > { %v14555_v12 = vpop.permute.xlu1 %1935  ;;  %v480_v2 = vor.u32 %v478_v32, %v477_v61  ;;  %v2426_v61 = vor.u32 %v2425_v40, %v2422_v34 }
  0xac   : > { %v492_v53 = vshrl.u32 %v329_v25, 16  ;;  %v495_v32 = vshll.u32 %v329_v25, 16  ;;  %v14650_v25 = vld [vmem:[#allocation2 + $0x4c] sm:$0xf] }
  0xad   : > { %1611 = vrot.lane.b32.xlu1 %v1348_v54, %s13995_s11  ;;  %v14563_v26 = vpop.permute.xlu0 %2126  ;;  %1609 = vrot.lane.b32.xlu0 %v1338_v14, %s13995_s11  ;;  %v328_v54 = vmax.bf16 %v18963_v3, %v296_v31  ;;  %v2412_v14 = vor.u32 %v14574_v28, %v14568_v22  ;;  %v481_v36 = vsel %vm14070_vm5, %v473_v8, %v480_v2  ;;  %v298_v31 = vld [vmem:[%s14054_s29 + $0x48] sm:$0xf]  ;;  %v14636_v8 = vld [vmem:[#allocation2 + $0x4c] sm:$0xf]  ;;  %v734_v2 = vld [vmem:[#allocation2 + $0x74] sm:$0x1] }
  0xae   : > { %726 = vst.msk [vmem:[#allocation2 + $0x64] sm:$0xf] %vm668_vm2, %v481_v36  ;;  %v494_v7 = vrot.slane %v492_v53, 7  ;;  %v2427_v27 = vrot.slane %v2426_v61, 4  ;;  %v3501_v53 = vshrl.u32 %v14650_v25, 16 }
  0xaf   : > { %v14570_v41 = vpop.permute.xlu1 %3022  ;;  %v484_v42 = vshrl.u32 %v328_v54, 16  ;;  %v487_v48 = vshll.u32 %v328_v54, 16  ;;  %v809_v54 = vld [vmem:[#allocation2 + $0x60] sm:$0x2]  ;;  %v3359_v61 = vld [vmem:[#allocation2 + $0x58] sm:$0xf] }
  0xb1   : > { %1947 = vrot.lane.b32.xlu1 %v1851_v29, %s13992_s8  ;;  %v14583_v46 = vpop.permute.xlu0 %3214  ;;  %1945 = vrot.lane.b32.xlu0 %v1848_v4, %s13992_s8  ;;  %v2067_v29 = vld [vmem:[#allocation2 + $0x40] sm:$0xf]  ;;  %v728_v4 = vsel %vm14084_vm7, %v482_v10, %v727_v9  ;;  %v486_v52 = vrot.slane %v484_v42, 7  ;;  %v2938_v9 = vrot.slane %v14615_v45, 5  ;;  %v14663_v42 = vld [vmem:[#allocation2 + $0x48] sm:$0xe] }
  0xb2   : > { %729 = vst [vmem:[#allocation2 + $0x68] sm:$0x1] %v728_v4  ;;  %v12410_v33 = vrot.slane %v14663_v42, 9  ;;  %v1175_v42 = vld [vmem:[#allocation2 + $0x54] sm:$0xf] }
  0xb3   : > { %v14590_v63 = vpop.permute.xlu1 %3026  ;;  %v489_v62 = vor.u32 %v487_v48, %v486_v52  ;;  %v490_v1 = vrot.slane %v486_v52, 4  ;;  %v2829_v52 = vld [vmem:[#allocation2 + $0x50] sm:$0x1] }
  0xb5   : > { %1951 = vrot.lane.b32.xlu1 %v1858_v56, %s13992_s8  ;;  %v14598_v58 = vpop.permute.xlu0 %3218  ;;  %1949 = vrot.lane.b32.xlu0 %v1855_v16, %s13992_s8  ;;  %v2069_v16 = vld [vmem:[#allocation2 + $0x4c] sm:$0xf]  ;;  %v2413_v56 = vrot.slane %v2412_v14, 4  ;;  %v731_v11 = vsel %vm14076_vm6, %v489_v62, %v730_v49  ;;  %v497_v14 = vor.u32 %v495_v32, %v494_v7  ;;  %v953_v36 = vld [vmem:[#allocation2 + $0x64] sm:$0x8]  ;;  %v3497_v49 = vshll.u32 %v14650_v25, 16 }
  0xb6   : > { %732 = vst [vmem:[#allocation2 + $0x6c] sm:$0xf] %v731_v11  ;;  %v12379_v17 = vrot.slane %v953_v36, 11  ;;  %v3521_v25 = vshll.u32 %v3359_v61, 16 }
  0xb7   : > { %v1596_v28 = vpop.permute.xlu1 %1595  ;;  %v2418_v10 = vsel %vm14230_vm14, %v2413_v56, %v14587_v43  ;;  %v12409_v43 = vrot.slane %v14625_v59, 9  ;;  %v498_v4 = vsel %vm14070_vm5, %v490_v1, %v497_v14  ;;  %v14694_v59 = vld [vmem:[#allocation2 + $0x48] sm:$0xe] }
  0xb8   : > { %1689 = vst.msk [vmem:[#allocation3 + $0xc] sm:$0xf] %vm1685_vm1, %v1596_v28 }
  0xb9   : > { %2029 = vst.msk [vmem:[#allocation3 + $0xc] sm:$0xf] %vm19023_vm4, %v14555_v12  ;;  %2140 = vrot.lane.b32.xlu1 %v2067_v29, %s13991_s30  ;;  %v1592_v50 = vpop.permute.xlu0 %1591  ;;  %2138 = vrot.lane.b32.xlu0 %v2066_v13, %s13991_s30  ;;  %v14628_v12 = vmax.bf16 %v18963_v3, %v298_v31  ;;  %v2437_v13 = vrot.slane %v2436_v57, 4  ;;  %v12361_v29 = vrot.slane %v809_v54, 9  ;;  %v2940_v31 = vrot.slane %v2938_v9, 4 }
  0xba   : > { %1687 = vst.msk [vmem:[#allocation3 + $0x4] sm:$0xf] %vm1685_vm1, %v1592_v50  ;;  %v3355_v57 = vld [vmem:[#allocation2 + $0x48] sm:$0xf]  ;;  %v2948_v54 = vrot.slane %v2829_v52, 5 }
  0xbb   : > { %2222 = vst.msk [vmem:[#allocation3 + $0xc] sm:$0xf] %vm2218_vm8, %v14503_v0  ;;  %v2686_v60 = vpop.permute.xlu1 %2685  ;;  %v14634_v0 = vld [vmem:[#allocation2 + $0x44] sm:$0x1]  ;;  %v504_v45 = vshll.u32 %v14628_v12, 16  ;;  %v2442_v48 = vsel %vm14230_vm14, %v2437_v13, %v2441_v20 }
  0xbc   : > { %2027 = vst.msk [vmem:[#allocation3 + $0x4] sm:$0xf] %vm19023_vm4, %v14542_v44  ;;  %v915_v44 = vld [vmem:[#allocation2 + $0x60] sm:$0x1]  ;;  %v2941_v40 = vrot.slane %v14634_v0, 5 }
  0xbd   : > { %2220 = vst.msk [vmem:[#allocation3 + $0x4] sm:$0xf] %vm2218_vm8, %v14475_v37  ;;  %2144 = vrot.lane.b32.xlu1 %v2069_v16, %s13991_s30  ;;  %v501_v37 = vshrl.u32 %v14628_v12, 16  ;;  %2142 = vrot.lane.b32.xlu0 %v2068_v51, %s13991_s30  ;;  %v916_v22 = vsel %vm14084_vm7, %v12361_v29, %v915_v44  ;;  %v2945_v16 = vrot.slane %v14636_v8, 5  ;;  %v14696_v12 = vld [vmem:[#allocation2 + $0x4c] sm:$0xf] }
  0xbe   : > { %2781 = vst.msk [vmem:[#allocation3 + $0x4] sm:$0xf] %vm19026_vm9, %v2686_v60  ;;  %917 = vst [vmem:[#allocation2 + $0x60] sm:$0x1] %v916_v22  ;;  %v2942_v60 = vsel %vm14128_vm10, %v2940_v31, %v2941_v40  ;;  %v810_v62 = vld [vmem:[#allocation2 + $0x6c] sm:$0x2] }
  0xbf   : > { %3118 = vst.msk [vmem:[#allocation3 + $0x4] sm:$0xf] %vm3116_vm12, %v14570_v41  ;;  %v2690_v34 = vpop.permute.xlu1 %2689  ;;  %v1060_v41 = vld [vmem:[#allocation2 + $0x68] sm:$0x1]  ;;  %v1590_v28 = vpop.permute.xlu0 %1589  ;;  %v14673_v56 = vrot.slane %v501_v37, 7  ;;  %v2947_v0 = vrot.slane %v2945_v16, 4 }
  0xc0   : > { %3312 = vst.msk [vmem:[#allocation3 + $0x4] sm:$0xf] %vm3310_vm13, %v14521_v35  ;;  %v499_v35 = vrot.slane %v494_v7, 4  ;;  %v918_v1 = vld [vmem:[#allocation2 + $0x6c] sm:$0x1]  ;;  %v14710_v44 = vrot.slane %v3497_v49, 5 }
  0xc1   : > { %2783 = vst.msk [vmem:[#allocation3 + $0xc] sm:$0xf] %vm19026_vm9, %v2690_v34  ;;  %2701 = vrot.lane.b32.xlu1 %v2418_v10, %s13996_s12  ;;  %2699 = vrot.lane.b32.xlu0 %v2408_v15, %s13996_s12  ;;  %v506_v7 = vor.u32 %v504_v45, %v14673_v56  ;;  %v12362_v11 = vrot.slane %v810_v62, 9  ;;  %v3491_v37 = vshll.u32 %v3355_v57, 16  ;;  %v3503_v10 = vrot.slane %v3501_v53, 4 }
  0xc2   : > { %733 = vst.msk [vmem:[#allocation2 + $0x70] sm:$0xf] %vm668_vm2, %v498_v4  ;;  %v735_v50 = vsel %vm14084_vm7, %v499_v35, %v734_v2  ;;  %v3488_v2 = vshrl.u32 %v3355_v57, 16  ;;  %v3358_v13 = vld [vmem:[#allocation2 + $0x54] sm:$0xf]  ;;  %v3525_v29 = vshrl.u32 %v3359_v61, 16 }
  0xc3   : > { %1686 = vst.msk [vmem:[#allocation3] sm:$0xf] %vm1685_vm1, %v1590_v28  ;;  %v3221_v51 = vpop.permute.xlu1 %3220  ;;  %736 = vst [vmem:[#allocation2 + $0x74] sm:$0x1] %v735_v50  ;;  %v2684_v32 = vpop.permute.xlu0 %2683  ;;  %v14719_v34 = vld [vmem:[#allocation2 + $0x48] sm:$0xe]  ;;  %v919_v15 = vsel %vm14084_vm7, %v12362_v11, %v918_v1 }
  0xc4   : > { %3120 = vst.msk [vmem:[#allocation3 + $0xc] sm:$0xf] %vm3116_vm12, %v14590_v63  ;;  %v1061_v63 = vsel %vm14148_vm11, %v12379_v17, %v1060_v41  ;;  %920 = vst [vmem:[#allocation2 + $0x6c] sm:$0x1] %v919_v15  ;;  %v2949_v41 = vsel %vm14128_vm10, %v2947_v0, %v2948_v54  ;;  %v3512_v4 = vshrl.u32 %v3358_v13, 16  ;;  %v3515_v28 = vshll.u32 %v3358_v13, 16 }
  0xc5   : > { %2026 = vst.msk [vmem:[#allocation3] sm:$0xf] %vm19023_vm4, %v14495_v55  ;;  %v2432_v55 = vsel %vm14230_vm14, %v2427_v27, %v14602_v18  ;;  %1062 = vst [vmem:[#allocation2 + $0x68] sm:$0x1] %v1061_v63  ;;  %2705 = vrot.lane.b32.xlu1 %v2442_v48, %s13996_s12  ;;  %v2939_v18 = vsel %vm14128_vm10, %v12409_v43, %v2938_v9  ;;  %v14712_v9 = vld [vmem:[#allocation2 + $0x4c] sm:$0xf] }
  0xc6   : > { %2219 = vst.msk [vmem:[#allocation3] sm:$0xf] %vm2218_vm8, %v14549_v5  ;;  %v737_v5 = vld [vmem:[#allocation2 + $0x78] sm:$0xf]  ;;  %2703 = vrot.lane.b32.xlu0 %v2432_v55, %s13996_s12  ;;  %v12425_v27 = vrot.slane %v14694_v59, 9  ;;  %v4030_v43 = vrot.slane %v14696_v12, 5 }
  0xc7   : > { %3314 = vst.msk [vmem:[#allocation3 + $0xc] sm:$0xf] %vm3310_vm13, %v3221_v51  ;;  %v1594_v14 = vpop.permute.xlu1 %1593  ;;  %v2688_v20 = vpop.permute.xlu0 %2687  ;;  %v1359_v36 = vshll.u32 %v14712_v9, 16  ;;  %v1172_v40 = vld [vmem:[#allocation2 + $0x48] sm:$0xf]  ;;  %v3490_v17 = vrot.slane %v3488_v2, 4 }
  0xc8   : > { %2780 = vst.msk [vmem:[#allocation3] sm:$0xf] %vm19026_vm9, %v2684_v32  ;;  %v3493_v35 = vrot.slane %v3491_v37, 5  ;;  %v1363_v31 = vshrl.u32 %v14712_v9, 16  ;;  %v3159_v45 = vld [vmem:[#allocation2 + $0x4c] sm:$0xf] }
  0xc9   : > { %3117 = vst.msk [vmem:[#allocation3] sm:$0xf] %vm3116_vm12, %v14523_v19  ;;  %v738_v19 = vsel %vm14076_vm6, %v506_v7, %v737_v5  ;;  %3038 = vrot.lane.b32.xlu1 %v2942_v60, %s13994_s10  ;;  %v954_v8 = vld [vmem:[#allocation2 + $0x70] sm:$0x8]  ;;  %v14744_v49 = vrot.slane %v3521_v25, 5  ;;  %v3527_v63 = vrot.slane %v3525_v29, 4 }
  0xca   : > { %3311 = vst.msk [vmem:[#allocation3] sm:$0xf] %vm3310_vm13, %v14583_v46  ;;  %739 = vst [vmem:[#allocation2 + $0x78] sm:$0xf] %v738_v19  ;;  %v3357_v46 = vld [vmem:[#allocation2 + $0x50] sm:$0x1]  ;;  %3036 = vrot.lane.b32.xlu0 %v2939_v18, %s13994_s10  ;;  %v3494_v60 = vor.u32 %v3493_v35, %v3490_v17 }
  0xcb   : > { %1688 = vst.msk [vmem:[#allocation3 + $0x8] sm:$0xf] %vm1685_vm1, %v1594_v14  ;;  %v3778_v22 = vpop.permute.xlu1 %3777  ;;  %v3507_v48 = vshll.u32 %v3357_v46, 16  ;;  %v12395_v50 = vrot.slane %v14719_v34, 9  ;;  %v1350_v51 = vshrl.u32 %v1172_v40, 16  ;;  %v1353_v55 = vshll.u32 %v1172_v40, 16 }
  0xcc   : > { %2028 = vst.msk [vmem:[#allocation3 + $0x8] sm:$0xf] %vm19023_vm4, %v14508_v6  ;;  %v2946_v6 = vsel %vm14128_vm10, %v12410_v33, %v2945_v16  ;;  %v3776_v16 = vpop.permute.xlu0 %3775  ;;  %v1377_v33 = vshll.u32 %v1175_v42, 16  ;;  %v1063_v52 = vld [vmem:[#allocation2 + $0x74] sm:$0x1]  ;;  %v3514_v32 = vrot.slane %v3512_v4, 4  ;;  %v3528_v9 = vor.u32 %v3527_v63, %v14744_v49 }
  0xcd   : > { %2221 = vst.msk [vmem:[#allocation3 + $0x8] sm:$0xf] %vm2218_vm8, %v14563_v26  ;;  %v3504_v26 = vor.u32 %v3503_v10, %v14710_v44  ;;  %3042 = vrot.lane.b32.xlu1 %v2949_v41, %s13994_s10  ;;  %v3158_v53 = vld [vmem:[#allocation2 + $0x48] sm:$0xf]  ;;  %v3517_v57 = vrot.slane %v3515_v28, 5  ;;  %v14754_v5 = vrot.slane %v4030_v43, 4 }
  0xce   : > { %2782 = vst.msk [vmem:[#allocation3 + $0x8] sm:$0xf] %vm19026_vm9, %v2688_v20  ;;  %3040 = vrot.lane.b32.xlu0 %v2946_v6, %s13994_s10  ;;  %v12380_v18 = vrot.slane %v954_v8, 11  ;;  %v3360_v62 = vld [vmem:[#allocation2 + $0x5c] sm:$0x1]  ;;  %v14758_v1 = vrot.slane %v1359_v36, 5 }
  0xcf   : > { %3119 = vst.msk [vmem:[#allocation3 + $0x8] sm:$0xf] %vm3116_vm12, %v14537_v47  ;;  %v1374_v47 = vshrl.u32 %v1175_v42, 16  ;;  %v14756_v61 = vrot.slane %v3504_v26, 4  ;;  %v1176_v7 = vld [vmem:[#allocation2 + $0x58] sm:$0xf]  ;;  %v3518_v15 = vor.u32 %v3517_v57, %v3514_v32 }
  0xd0   : > { %3873 = vst.msk [vmem:[#allocation3 + $0x4] sm:$0xf] %vm3871_vm15, %v3778_v22  ;;  %3872 = vst.msk [vmem:[#allocation3] sm:$0xf] %vm3871_vm15, %v3776_v16  ;;  %v3780_v0 = vpop.permute.xlu0 %3779  ;;  %v3509_v54 = vrot.slane %v3507_v48, 5  ;;  %v1365_v14 = vrot.slane %v1363_v31, 4  ;;  %v1064_v37 = vsel %vm14148_vm11, %v12380_v18, %v1063_v52 }
  0xd1   : > { %3313 = vst.msk [vmem:[#allocation3 + $0x8] sm:$0xf] %vm3310_vm13, %v14598_v58  ;;  %v3782_v58 = vpop.permute.xlu1 %3781  ;;  %v14762_v11 = vld [vmem:[#allocation2 + $0x58] sm:$0xf]  ;;  %v14764_v2 = vld [vmem:[#allocation2 + $0x4c] sm:$0xf]  ;;  %3232 = vrot.lane.b32.xlu1 %v3159_v45, %s13993_s9 }
  0xd2   : > { %3875 = vst.msk [vmem:[#allocation3 + $0xc] sm:$0xf] %vm3871_vm15, %v3782_v58  ;;  %3874 = vst.msk [vmem:[#allocation3 + $0x8] sm:$0xf] %vm3871_vm15, %v3780_v0  ;;  %v1352_v10 = vrot.slane %v1350_v51, 4  ;;  %v1355_v13 = vrot.slane %v1353_v55, 5  ;;  %3230 = vrot.lane.b32.xlu0 %v3158_v53, %s13993_s9  ;;  %v3510_v17 = vsel %vm14230_vm14, %v14756_v61, %v3509_v54  ;;  %v1366_v48 = vor.u32 %v1365_v14, %v14758_v1 }
  0xd3   : > { %v1174_v19 = vld [vmem:[#allocation2 + $0x50] sm:$0x1]  ;;  %v1376_v20 = vrot.slane %v1374_v47, 4  ;;  %v1379_v25 = vrot.slane %v1377_v33, 5  ;;  %1065 = vst [vmem:[#allocation2 + $0x74] sm:$0x1] %v1064_v37 }
  0xd4   : > { %v3161_v29 = vld [vmem:[#allocation2 + $0x58] sm:$0xf]  ;;  %v3531_v46 = vshll.u32 %v3360_v62, 16  ;;  %v1383_v36 = vshll.u32 %v1176_v7, 16  ;;  %v1387_v6 = vshrl.u32 %v1176_v7, 16  ;;  %v3495_v28 = vrot.slane %v3494_v60, 4  ;;  %v4113_v22 = vpop.permute.xlu0 %4112 }
  0xd5   : > { %v4115_v41 = vpop.permute.xlu1 %4114  ;;  %v3160_v4 = vld [vmem:[#allocation2 + $0x54] sm:$0xf]  ;;  %v14771_v40 = vld [vmem:[#allocation2 + $0x50] sm:$0x1]  ;;  %v1861_v42 = vrot.slane %v14764_v2, 5  ;;  %v4037_v26 = vrot.slane %v14762_v11, 5  ;;  %3236 = vrot.lane.b32.xlu1 %v3161_v29, %s13993_s9  ;;  %v1356_v45 = vor.u32 %v1355_v13, %v1352_v10  ;;  %v1380_v63 = vor.u32 %v1379_v25, %v1376_v20 }
  0xd6   : > { %4210 = vst.msk [vmem:[#allocation3 + $0x4] sm:$0xf] %vm4208_vm0, %v4115_v41  ;;  %v14778_v35 = vld [vmem:[#allocation2 + $0x54] sm:$0xe]  ;;  %v1369_v31 = vshll.u32 %v1174_v19, 16  ;;  %v3529_v16 = vrot.slane %v3528_v9, 4  ;;  %3234 = vrot.lane.b32.xlu0 %v3160_v4, %s13993_s9  ;;  %v3500_v57 = vsel %vm14230_vm14, %v3495_v28, %v14710_v44 }
  0xd7   : > { %v1177_v8 = vld [vmem:[#allocation2 + $0x5c] sm:$0x1]  ;;  %4209 = vst.msk [vmem:[#allocation3] sm:$0xf] %vm4208_vm0, %v4113_v22  ;;  %v299_v51 = vld [vmem:[%s14054_s29 + $0x4c] sm:$0xf]  ;;  %v4031_v22 = vsel %vm14128_vm10, %v12425_v27, %v4030_v43  ;;  %v14861_v43 = vsel %vm14128_vm10, %v12395_v50, %v1861_v42 }
  0xd8   : > { %v3519_v55 = vrot.slane %v3518_v15, 4  ;;  %v3533_v47 = vrot.slane %v3531_v46, 5  ;;  %v14786_v33 = vld [vmem:[#allocation2 + $0x5c] sm:$0x1]  ;;  %v14788_v52 = vrot.slane %v1383_v36, 5  ;;  %v1389_v53 = vrot.slane %v1387_v6, 4  ;;  %v4117_v61 = vpop.permute.xlu0 %4116 }
  0xd9   : > { %v4119_v32 = vpop.permute.xlu1 %4118  ;;  %v4033_v18 = vrot.slane %v14771_v40, 5  ;;  %v12426_v58 = vrot.slane %v14778_v35, 9  ;;  %v1393_v60 = vshll.u32 %v1177_v8, 16  ;;  %v14798_v62 = vrot.slane %v4037_v26, 4  ;;  %v14802_v0 = vld [vmem:[#allocation2 + $0x50] sm:$0x1]  ;;  %3793 = vrot.lane.b32.xlu1 %v3510_v17, %s13997_s13 }
  0xda   : > { %4212 = vst.msk [vmem:[#allocation3 + $0xc] sm:$0xf] %vm4208_vm0, %v4119_v32  ;;  %v14800_v7 = vrot.slane %v1369_v31, 5  ;;  %v2269_v54 = vld [vmem:[#allocation2 + $0x54] sm:$0xf]  ;;  %v14805_v9 = vmax.bf16 %v18963_v3, %v299_v51  ;;  %v4040_v44 = vrot.slane %v14786_v33, 5  ;;  %3791 = vrot.lane.b32.xlu0 %v3500_v57, %s13997_s13  ;;  %v3524_v19 = vsel %vm14230_vm14, %v3519_v55, %v14744_v49 }
  0xdb   : > { %4211 = vst.msk [vmem:[#allocation3 + $0x8] sm:$0xf] %vm4208_vm0, %v4117_v61  ;;  %v14810_v14 = vrot.slane %v1356_v45, 4  ;;  %v14812_v37 = vrot.slane %v1366_v48, 4  ;;  %v14814_v10 = vrot.slane %v1380_v63, 4  ;;  %v3534_v20 = vsel %vm14230_vm14, %v3529_v16, %v3533_v47 }
  0xdc   : > { %v14816_v13 = vld [vmem:[#allocation2 + $0x54] sm:$0xe]  ;;  %v1390_v25 = vor.u32 %v1389_v53, %v14788_v52  ;;  %v14827_v29 = vrot.slane %v1861_v42, 4  ;;  %v14829_v15 = vld [vmem:[#allocation2 + $0x58] sm:$0xf]  ;;  %v14831_v6 = vrot.slane %v1393_v60, 5  ;;  %v1598_v49 = vpop.permute.xlu0 %1597  ;;  %v4034_v59 = vsel %vm14128_vm10, %v14754_v5, %v4033_v18 }
  0xdd   : > { %v2270_v46 = vld [vmem:[#allocation2 + $0x58] sm:$0xf]  ;;  %v1600_v36 = vpop.permute.xlu1 %1599  ;;  %v1864_v41 = vrot.slane %v14802_v0, 5  ;;  %v2444_v4 = vshrl.u32 %v2269_v54, 16  ;;  %v2447_v28 = vshll.u32 %v2269_v54, 16  ;;  %v509_v35 = vshrl.u32 %v14805_v9, 16  ;;  %3797 = vrot.lane.b32.xlu1 %v3534_v20, %s13997_s13 }
  0xde   : > { %1691 = vst.msk [vmem:[#allocation3 + $0x14] sm:$0xf] %vm1685_vm1, %v1600_v36  ;;  %v13661_v40 = vld [vmem:[#allocation3] sm:$0xff]   ;;  %1690 = vst.msk [vmem:[#allocation3 + $0x10] sm:$0xf] %vm1685_vm1, %v1598_v49  ;;  %v12396_v31 = vrot.slane %v14816_v13, 9  ;;  %3795 = vrot.lane.b32.xlu0 %v3524_v19, %s13997_s13  ;;  %v4038_v5 = vsel %vm14128_vm10, %v12426_v58, %v4037_v26  ;;  %v1372_v34 = vsel %vm14230_vm14, %v14812_v37, %v14800_v7 }
  0xdf   : > { %v811_v17 = vld [vmem:[#allocation2 + $0x78] sm:$0x2]  ;;  %v1868_v8 = vrot.slane %v14829_v15, 5  ;;  %v2453_v16 = vshll.u32 %v2270_v46, 16  ;;  %v2457_v45 = vshrl.u32 %v2270_v46, 16  ;;  %13517 = vmatprep.mubr.msk.bf16.mxu0 %vm4380_vm3, %v13661_v40  ;;  %v14853_v27 = vrot.slane %v1390_v25, 4 }
  0xe0   : > { %v14846_v12 = vld [vmem:[#allocation2 + $0x5c] sm:$0x1]  ;;  %v921_v63 = vld [vmem:[#allocation2 + $0x78] sm:$0x1]  ;;  %v512_v51 = vshll.u32 %v14805_v9, 16  ;;  %v14875_v2 = vrot.slane %v2444_v4, 4  ;;  %v1602_v53 = vpop.permute.xlu0 %1601  ;;  %v1362_v11 = vsel %vm14230_vm14, %v14810_v14, %v14758_v1  ;;  %v4041_v60 = vsel %vm14128_vm10, %v14798_v62, %v4040_v44 }
  0xe1   : > { %v14863_v48 = vld [vmem:[#allocation2 + $0x5c] sm:$0x1]  ;;  %v300_v55 = vld [vmem:[%s14054_s29 + $0x50] sm:$0xf]  ;;  %v1604_v47 = vpop.permute.xlu1 %1603  ;;  %v2273_v50 = vld [vmem:[#allocation2 + $0x64] sm:$0xf]  ;;  %4130 = vrot.lane.b32.xlu1 %v4034_v59, %s13998_s14 }
  0xe2   : > { %v14877_v42 = vld [vmem:[#allocation2 + $0x54] sm:$0xe]  ;;  %v12363_v33 = vrot.slane %v811_v17, 9  ;;  %1693 = vst.msk [vmem:[#allocation3 + $0x1c] sm:$0xf] %vm1685_vm1, %v1604_v47  ;;  %v13662_v32 = vld [vmem:[#allocation3 + $0x8] sm:$0xff]   ;;  %4128 = vrot.lane.b32.xlu0 %v4031_v22, %s13998_s14  ;;  %v332_v36 = vmax.bf16 %v18963_v3, %v300_v55 }
  0xe3   : > { %v14884_v26 = vrot.slane %v2447_v28, 5  ;;  %v14886_v57 = vld [vmem:[#allocation2 + $0x58] sm:$0xf]  ;;  %v507_v18 = vrot.slane %v14673_v56, 4  ;;  %v511_v58 = vrot.slane %v509_v35, 7  ;;  %v14894_v61 = vrot.slane %v2453_v16, 5  ;;  %13518 = vmatmul.mubr.msk.bf16.vlgmr.msra.gmra.mxu0 %vm4380_vm3, %v13662_v32 }
  0xe4   : > { %1692 = vst.msk [vmem:[#allocation3 + $0x18] sm:$0xf] %vm1685_vm1, %v1602_v53  ;;  %v14896_v54 = vrot.slane %v2457_v45, 4  ;;  %v922_v9 = vsel %vm14084_vm7, %v12363_v33, %v921_v63  ;;  %v741_v19 = vld [vmem:[#allocation2 + $0x80] sm:$0x1]  ;;  %v2463_v56 = vshll.u32 %v14846_v12, 16  ;;  %v1938_v35 = vpop.permute.xlu0 %1937 }
  0xe5   : > { %v301_v20 = vld [vmem:[%s14054_s29 + $0x54] sm:$0xf]  ;;  %v14904_v25 = vld [vmem:[#allocation2 + $0x5c] sm:$0x1]  ;;  %v3362_v46 = vld [vmem:[#allocation2 + $0x64] sm:$0xf]  ;;  %v514_v62 = vor.u32 %v512_v51, %v511_v58  ;;  %v1940_v4 = vpop.permute.xlu1 %1939  ;;  %4134 = vrot.lane.b32.xlu1 %v4041_v60, %s13998_s14  ;;  %v2450_v55 = vor.u32 %v14884_v26, %v14875_v2 }
  0xe6   : > { %923 = vst [vmem:[#allocation2 + $0x78] sm:$0x1] %v922_v9  ;;  %v516_v44 = vrot.slane %v511_v58, 4  ;;  %v14909_v28 = vrot.slane %v1868_v8, 4  ;;  %v1871_v49 = vrot.slane %v14863_v48, 5  ;;  %v2477_v40 = vshll.u32 %v2273_v50, 16  ;;  %4132 = vrot.lane.b32.xlu0 %v4038_v5, %s13998_s14 }
  0xe7   : > { %v2481_v22 = vshrl.u32 %v2273_v50, 16  ;;  %v1102_v17 = vld [vmem:[#allocation2 + $0x48] sm:$0xf]  ;;  %2031 = vst.msk [vmem:[#allocation3 + $0x14] sm:$0xf] %vm19023_vm4, %v1940_v4  ;;  %v12411_v16 = vrot.slane %v14877_v42, 9  ;;  %v515_v12 = vsel %vm14070_vm5, %v507_v18, %v514_v62  ;;  %v14921_v63 = vmax.bf16 %v18963_v3, %v301_v20 }
  0xe8   : > { %v14914_v45 = vld [vmem:[#allocation2 + $0x64] sm:$0xf]  ;;  %v742_v59 = vsel %vm14084_vm7, %v516_v44, %v741_v19  ;;  %1134 = vst.msk [vmem:[#allocation3 + $0x30] sm:$0xf] %vm668_vm2, %v1102_v17  ;;  %v1103_v51 = vld [vmem:[#allocation2 + $0x4c] sm:$0xf]  ;;  %v2460_v32 = vor.u32 %v14896_v54, %v14894_v61  ;;  %v1942_v54 = vpop.permute.xlu0 %1941  ;;  %v1396_v62 = vsel %vm14230_vm14, %v14853_v27, %v14831_v6  ;;  %v1872_v13 = vsel %vm14128_vm10, %v14909_v28, %v1871_v49 }
  0xe9   : > { %2030 = vst.msk [vmem:[#allocation3 + $0x10] sm:$0xf] %vm19023_vm4, %v1938_v35  ;;  %v2952_v47 = vrot.slane %v14886_v57, 5  ;;  %v3545_v50 = vshll.u32 %v3362_v46, 16  ;;  %v3549_v33 = vshrl.u32 %v3362_v46, 16  ;;  %v14934_v18 = vrot.slane %v2463_v56, 5  ;;  %v1944_v26 = vpop.permute.xlu1 %1943  ;;  %1615 = vrot.lane.b32.xlu1 %v1372_v34, %s13995_s11 }
  0xea   : > { %740 = vst.msk [vmem:[#allocation2 + $0x7c] sm:$0xf] %vm668_vm2, %v515_v12  ;;  %743 = vst [vmem:[#allocation2 + $0x80] sm:$0x1] %v742_v59  ;;  %v1104_v53 = vld [vmem:[#allocation2 + $0x54] sm:$0xf]  ;;  %v1386_v56 = vsel %vm14230_vm14, %v14814_v10, %v14788_v52  ;;  %1613 = vrot.lane.b32.xlu0 %v1362_v11, %s13995_s11  ;;  %v1865_v59 = vsel %vm14128_vm10, %v14827_v29, %v1864_v41 }
  0xeb   : > { %1135 = vst.msk [vmem:[#allocation3 + $0x34] sm:$0xf] %vm668_vm2, %v1103_v51  ;;  %v518_v58 = vshrl.u32 %v332_v36, 16  ;;  %v521_v60 = vshll.u32 %v332_v36, 16  ;;  %1136 = vst.msk [vmem:[#allocation3 + $0x38] sm:$0xf] %vm668_vm2, %v1104_v53 }
  0xec   : > { %v1105_v2 = vld [vmem:[#allocation2 + $0x58] sm:$0xf]  ;;  %v14937_v9 = vrot.slane %v2477_v40, 5  ;;  %v2483_v19 = vrot.slane %v2481_v22, 4  ;;  %v2955_v20 = vrot.slane %v14904_v25, 5  ;;  %v2959_v5 = vrot.slane %v14914_v45, 5 }
  0xed   : > { %v14940_v46 = vld [vmem:[#allocation2 + $0x60] sm:$0xe]  ;;  %1137 = vst.msk [vmem:[#allocation3 + $0x3c] sm:$0xf] %vm668_vm2, %v1105_v2  ;;  %v14955_v36 = vld [vmem:[#allocation2 + $0x64] sm:$0xf]  ;;  %v2133_v12 = vpop.permute.xlu1 %2132  ;;  %1619 = vrot.lane.b32.xlu1 %v1396_v62, %s13995_s11  ;;  %v1869_v62 = vsel %vm14128_vm10, %v12396_v31, %v1868_v8 }
  0xee   : > { %2033 = vst.msk [vmem:[#allocation3 + $0x1c] sm:$0xf] %vm19023_vm4, %v1944_v26  ;;  %v14953_v44 = vld [vmem:[#allocation2 + $0x60] sm:$0xe]  ;;  %v520_v4 = vrot.slane %v518_v58, 7  ;;  %v526_v40 = vshrl.u32 %v14921_v63, 16  ;;  %v2484_v1 = vor.u32 %v2483_v19, %v14937_v9  ;;  %1617 = vrot.lane.b32.xlu0 %v1386_v56, %s13995_s11 }
  0xef   : > { %2032 = vst.msk [vmem:[#allocation3 + $0x18] sm:$0xf] %vm19023_vm4, %v1942_v54  ;;  %v14965_v52 = vrot.slane %v2450_v55, 4  ;;  %v14967_v10 = vrot.slane %v3545_v50, 5  ;;  %v3551_v6 = vrot.slane %v3549_v33, 4  ;;  %v529_v22 = vshll.u32 %v14921_v63, 16  ;;  %v2131_v55 = vpop.permute.xlu0 %2130 }
  0xf0   : > { %v744_v27 = vld [vmem:[#allocation2 + $0x84] sm:$0xf]  ;;  %v14976_v17 = vrot.slane %v2460_v32, 4  ;;  %v2272_v35 = vld [vmem:[#allocation2 + $0x60] sm:$0xf]  ;;  %v14980_v7 = vrot.slane %v2952_v47, 4  ;;  %v523_v34 = vor.u32 %v521_v60, %v520_v4 }
  0xf1   : > { %v12412_v37 = vrot.slane %v14940_v46, 9  ;;  %v3361_v14 = vld [vmem:[#allocation2 + $0x60] sm:$0xf]  ;;  %v14989_v11 = vld [vmem:[#allocation2 + $0x64] sm:$0xf]  ;;  %v524_v63 = vrot.slane %v520_v4, 4  ;;  %v3552_v32 = vor.u32 %v3551_v6, %v14967_v10  ;;  %1955 = vrot.lane.b32.xlu1 %v1865_v59, %s13992_s8 }
  0xf2   : > { %v528_v51 = vrot.slane %v526_v40, 7  ;;  %2224 = vst.msk [vmem:[#allocation3 + $0x14] sm:$0xf] %vm2218_vm8, %v2133_v12  ;;  %v14994_v50 = vrot.slane %v2959_v5, 4  ;;  %v18961_v33 = vrot.slane %v14955_v36, 5  ;;  %v745_v29 = vsel %vm14076_vm6, %v523_v34, %v744_v27  ;;  %v2137_v27 = vpop.permute.xlu1 %2136  ;;  %1953 = vrot.lane.b32.xlu0 %v14861_v43, %s13992_s8 }
  0xf3   : > { %2223 = vst.msk [vmem:[#allocation3 + $0x10] sm:$0xf] %vm2218_vm8, %v2131_v55  ;;  %v2468_v41 = vshrl.u32 %v2272_v35, 16  ;;  %v2471_v53 = vshll.u32 %v2272_v35, 16  ;;  %v955_v58 = vld [vmem:[#allocation2 + $0x7c] sm:$0x8]  ;;  %v2135_v12 = vpop.permute.xlu0 %2134  ;;  %v2456_v43 = vsel %vm14230_vm14, %v14965_v52, %v14894_v61 }
  0xf4   : > { %v1066_v60 = vld [vmem:[#allocation2 + $0x80] sm:$0x1]  ;;  %746 = vst [vmem:[#allocation2 + $0x84] sm:$0xf] %v745_v29  ;;  %v531_v2 = vor.u32 %v529_v22, %v528_v51  ;;  %v3536_v26 = vshrl.u32 %v3361_v14, 16  ;;  %v3539_v19 = vshll.u32 %v3361_v14, 16 }
  0xf5   : > { %v15004_v54 = vld [vmem:[#allocation2 + $0x70] sm:$0xf]  ;;  %v1407_v4 = vshll.u32 %v14989_v11, 16  ;;  %v12381_v40 = vrot.slane %v955_v58, 11  ;;  %v2274_v6 = vld [vmem:[#allocation2 + $0x68] sm:$0x1]  ;;  %1959 = vrot.lane.b32.xlu1 %v1872_v13, %s13992_s8 }
  0xf6   : > { %v15013_v35 = vrot.slane %v2484_v1, 4  ;;  %v3363_v22 = vld [vmem:[#allocation2 + $0x68] sm:$0x1]  ;;  %v532_v56 = vsel %vm14070_vm5, %v524_v63, %v531_v2  ;;  %v533_v34 = vrot.slane %v528_v51, 4  ;;  %2226 = vst.msk [vmem:[#allocation3 + $0x1c] sm:$0xf] %vm2218_vm8, %v2137_v27  ;;  %v2694_v2 = vpop.permute.xlu1 %2693  ;;  %1957 = vrot.lane.b32.xlu0 %v1869_v62, %s13992_s8 }
  0xf7   : > { %v3364_v15 = vld [vmem:[#allocation2 + $0x6c] sm:$0xf]  ;;  %v15025_v31 = vrot.slane %v18961_v33, 4  ;;  %v1411_v8 = vshrl.u32 %v14989_v11, 16  ;;  %v1067_v1 = vsel %vm14148_vm11, %v12381_v40, %v1066_v60  ;;  %747 = vst.msk [vmem:[#allocation2 + $0x88] sm:$0xf] %vm668_vm2, %v532_v56  ;;  %v2692_v27 = vpop.permute.xlu0 %2691 }
  0xf8   : > { %v748_v14 = vld [vmem:[#allocation2 + $0x8c] sm:$0x1]  ;;  %2225 = vst.msk [vmem:[#allocation3 + $0x18] sm:$0xf] %vm2218_vm8, %v2135_v12  ;;  %v2470_v48 = vrot.slane %v2468_v41, 4  ;;  %v2473_v63 = vrot.slane %v2471_v53, 5 }
  0xf9   : > { %v15033_v28 = vrot.slane %v3552_v32, 4  ;;  %v3569_v49 = vshll.u32 %v15004_v54, 16  ;;  %1068 = vst [vmem:[#allocation2 + $0x80] sm:$0x1] %v1067_v1  ;;  %v2487_v51 = vshll.u32 %v2274_v6, 16  ;;  %v15038_v55 = vrot.slane %v3536_v26, 4 }
  0xfa   : > { %v15040_v29 = vrot.slane %v3539_v19, 5  ;;  %v3555_v58 = vshll.u32 %v3363_v22, 16  ;;  %v1178_v60 = vld [vmem:[#allocation2 + $0x60] sm:$0xf]  ;;  %v15042_v40 = vld [vmem:[#allocation2 + $0x68] sm:$0x1]  ;;  %v749_v32 = vsel %vm14084_vm7, %v533_v34, %v748_v14  ;;  %v2466_v26 = vsel %vm14230_vm14, %v14976_v17, %v14934_v18  ;;  %v2698_v14 = vpop.permute.xlu1 %2697 }
  0xfb   : > { %v3560_v59 = vshrl.u32 %v3364_v15, 16  ;;  %v3563_v41 = vshll.u32 %v3364_v15, 16  ;;  %v3573_v53 = vshrl.u32 %v15004_v54, 16  ;;  %2785 = vst.msk [vmem:[#allocation3 + $0x14] sm:$0xf] %vm19026_vm9, %v2694_v2  ;;  %v15062_v19 = vsel %vm14128_vm10, %v12411_v16, %v2952_v47 }
  0xfc   : > { %v15069_v54 = vsel %vm14128_vm10, %v14980_v7, %v2955_v20  ;;  %v1181_v6 = vld [vmem:[#allocation2 + $0x6c] sm:$0xf]  ;;  %v812_v22 = vld [vmem:[#allocation2 + $0x84] sm:$0x2]  ;;  %v924_v56 = vld [vmem:[#allocation2 + $0x84] sm:$0x1]  ;;  %v2474_v57 = vor.u32 %v2473_v63, %v2470_v48  ;;  %v3542_v13 = vor.u32 %v15040_v29, %v15038_v55 }
  0xfd   : > { %750 = vst [vmem:[#allocation2 + $0x8c] sm:$0x1] %v749_v32  ;;  %2784 = vst.msk [vmem:[#allocation3 + $0x10] sm:$0xf] %vm19026_vm9, %v2692_v27  ;;  %v2070_v42 = vld [vmem:[#allocation2 + $0x54] sm:$0xf]  ;;  %v2696_v32 = vpop.permute.xlu0 %2695 }
  0xfe   : > { %v15073_v34 = vld [vmem:[#allocation2 + $0x68] sm:$0x1]  ;;  %v1398_v16 = vshrl.u32 %v1178_v60, 16  ;;  %v1401_v47 = vshll.u32 %v1178_v60, 16  ;;  %v12364_v25 = vrot.slane %v812_v22, 9  ;;  %v15076_v20 = vrot.slane %v2487_v51, 5  ;;  %2146 = vrot.lane.b32.xlu0 %v2070_v42, %s13991_s30 }
  0xff   : > { %v2071_v12 = vld [vmem:[#allocation2 + $0x58] sm:$0xf]  ;;  %v2962_v7 = vrot.slane %v15042_v40, 5  ;;  %v15079_v15 = vrot.slane %v3555_v58, 5  ;;  %v15081_v1 = vrot.slane %v3569_v49, 5  ;;  %v1422_v63 = vshrl.u32 %v1181_v6, 16 }
 0x100   : > { %v1182_v48 = vld [vmem:[#allocation2 + $0x70] sm:$0xf]  ;;  %v1425_v2 = vshll.u32 %v1181_v6, 16  ;;  %v925_v60 = vsel %vm14084_vm7, %v12364_v25, %v924_v56  ;;  %v956_v62 = vld [vmem:[#allocation2 + $0x88] sm:$0x8]  ;;  %v3562_v27 = vrot.slane %v3560_v59, 4  ;;  %2148 = vrot.lane.b32.xlu1 %v2071_v12, %s13991_s30 }
 0x101   : > { %2787 = vst.msk [vmem:[#allocation3 + $0x1c] sm:$0xf] %vm19026_vm9, %v2698_v14  ;;  %v2073_v51 = vld [vmem:[#allocation2 + $0x64] sm:$0xf]  ;;  %v3565_v58 = vrot.slane %v3563_v41, 5  ;;  %v3575_v22 = vrot.slane %v3573_v53, 4 }
 0x102   : > { %v15089_v0 = vld [vmem:[#allocation2 + $0x6c] sm:$0xe]  ;;  %926 = vst [vmem:[#allocation2 + $0x84] sm:$0x1] %v925_v60  ;;  %2786 = vst.msk [vmem:[#allocation3 + $0x18] sm:$0xf] %vm19026_vm9, %v2696_v32  ;;  %v3031_v32 = vpop.permute.xlu1 %3030 }
 0x103   : > { %v2072_v55 = vld [vmem:[#allocation2 + $0x60] sm:$0xf]  ;;  %v15093_v29 = vrot.slane %v2474_v57, 4  ;;  %v15095_v6 = vld [vmem:[#allocation2 + $0x70] sm:$0xf]  ;;  %v1400_v56 = vrot.slane %v1398_v16, 4  ;;  %v2490_v57 = vsel %vm14230_vm14, %v15013_v35, %v15076_v20  ;;  %v3576_v33 = vor.u32 %v3575_v22, %v15081_v1 }
 0x104   : > { %v1403_v25 = vrot.slane %v1401_v47, 5  ;;  %v15099_v59 = vrot.slane %v1407_v4, 5  ;;  %v1180_v41 = vld [vmem:[#allocation2 + $0x68] sm:$0x1]  ;;  %v1413_v53 = vrot.slane %v1411_v8, 4  ;;  %v1431_v14 = vshll.u32 %v1182_v48, 16  ;;  %v3029_v47 = vpop.permute.xlu0 %3028  ;;  %2152 = vrot.lane.b32.xlu1 %v2073_v51, %s13991_s30  ;;  %2150 = vrot.lane.b32.xlu0 %v2072_v55, %s13991_s30 }
 0x105   : > { %v1435_v60 = vshrl.u32 %v1182_v48, 16  ;;  %v12382_v12 = vrot.slane %v956_v62, 11  ;;  %v15114_v4 = vsel %vm14128_vm10, %v12412_v37, %v2959_v5  ;;  %v1424_v42 = vrot.slane %v1422_v63, 4  ;;  %v2275_v8 = vld [vmem:[#allocation2 + $0x6c] sm:$0xf] }
 0x106   : > { %v1427_v11 = vrot.slane %v1425_v2, 5  ;;  %v1069_v16 = vld [vmem:[#allocation2 + $0x8c] sm:$0x1]  ;;  %3122 = vst.msk [vmem:[#allocation3 + $0x14] sm:$0xf] %vm3116_vm12, %v3031_v32  ;;  %v3566_v48 = vor.u32 %v3565_v58, %v3562_v27  ;;  %v18962_v49 = vrot.slane %v15095_v6, 5  ;;  %v1404_v37 = vor.u32 %v1403_v25, %v1400_v56 }
 0x107   : > { %v3366_v62 = vld [vmem:[#allocation2 + $0x74] sm:$0x1]  ;;  %v1070_v45 = vsel %vm14148_vm11, %v12382_v12, %v1069_v16  ;;  %3121 = vst.msk [vmem:[#allocation3 + $0x10] sm:$0xf] %vm3116_vm12, %v3029_v47  ;;  %v15123_v46 = vrot.slane %v3542_v13, 4  ;;  %v1417_v63 = vshll.u32 %v1180_v41, 16  ;;  %v2480_v27 = vsel %vm14230_vm14, %v15093_v29, %v14937_v9  ;;  %v3035_v13 = vpop.permute.xlu1 %3034 }
 0x108   : > { %v1183_v2 = vld [vmem:[#allocation2 + $0x74] sm:$0x1]  ;;  %1071 = vst [vmem:[#allocation2 + $0x8c] sm:$0x1] %v1070_v45  ;;  %v1414_v58 = vor.u32 %v1413_v53, %v15099_v59  ;;  %v2276_v22 = vld [vmem:[#allocation2 + $0x70] sm:$0xf]  ;;  %v1428_v56 = vor.u32 %v1427_v11, %v1424_v42  ;;  %v3033_v45 = vpop.permute.xlu0 %3032  ;;  %2709 = vrot.lane.b32.xlu1 %v2466_v26, %s13996_s12  ;;  %2707 = vrot.lane.b32.xlu0 %v2456_v43, %s13996_s12 }
 0x109   : > { %v2492_v12 = vshrl.u32 %v2275_v8, 16  ;;  %v2495_v51 = vshll.u32 %v2275_v8, 16  ;;  %v3579_v32 = vshll.u32 %v3366_v62, 16  ;;  %v15132_v16 = vld [vmem:[#allocation2 + $0x74] sm:$0x1]  ;;  %v15134_v25 = vrot.slane %v1431_v14, 5 }
 0x10a   : > { %v1437_v41 = vrot.slane %v1435_v60, 4  ;;  %v15136_v55 = vld [vmem:[#allocation2 + $0x60] sm:$0xe]  ;;  %v15138_v47 = vld [vmem:[#allocation2 + $0x64] sm:$0xf]  ;;  %v15141_v9 = vrot.slane %v3566_v48, 4 }
 0x10b   : > { %3124 = vst.msk [vmem:[#allocation3 + $0x1c] sm:$0xf] %vm3116_vm12, %v3035_v13  ;;  %v15143_v29 = vrot.slane %v3576_v33, 4  ;;  %v15147_v53 = vrot.slane %v18962_v49, 4  ;;  %v1441_v8 = vshll.u32 %v1183_v2, 16  ;;  %v15159_v60 = vrot.slane %v1404_v37, 4 }
 0x10c   : > { %v15149_v42 = vld [vmem:[#allocation2 + $0x68] sm:$0x1]  ;;  %v302_v14 = vld [vmem:[%s14054_s29 + $0x58] sm:$0xf]  ;;  %3123 = vst.msk [vmem:[#allocation3 + $0x18] sm:$0xf] %vm3116_vm12, %v3033_v45  ;;  %v1438_v5 = vor.u32 %v1437_v41, %v15134_v25  ;;  %v3223_v43 = vpop.permute.xlu0 %3222  ;;  %2713 = vrot.lane.b32.xlu1 %v2490_v57, %s13996_s12  ;;  %2711 = vrot.lane.b32.xlu0 %v2480_v27, %s13996_s12 }
 0x10d   : > { %v15161_v33 = vrot.slane %v1417_v63, 5  ;;  %v15163_v11 = vld [vmem:[#allocation2 + $0x70] sm:$0xf]  ;;  %v2501_v48 = vshll.u32 %v2276_v22, 16  ;;  %v2505_v62 = vshrl.u32 %v2276_v22, 16  ;;  %v15172_v13 = vrot.slane %v1414_v58, 4  ;;  %v3225_v63 = vpop.permute.xlu1 %3224 }
 0x10e   : > { %v15174_v18 = vld [vmem:[#allocation2 + $0x6c] sm:$0xe]  ;;  %v2494_v17 = vrot.slane %v2492_v12, 4  ;;  %v2497_v26 = vrot.slane %v2495_v51, 5  ;;  %v2277_v37 = vld [vmem:[#allocation2 + $0x74] sm:$0x1]  ;;  %v15184_v52 = vmax.bf16 %v18963_v3, %v302_v14 }
 0x10f   : > { %19052 = vst [vmem:[#allocation7_spill] sm:$0xff] %v15174_v18  ;;  %v15176_v45 = vrot.slane %v3579_v32, 5  ;;  %v15178_v22 = vrot.slane %v1428_v56, 4  ;;  %v15181_v49 = vld [vmem:[#allocation2 + $0x74] sm:$0x1]  ;;  %v15187_v58 = vrot.slane %v1441_v8, 5 }
 0x110   : > { %19053 = vst [vmem:[#allocation8_spill] sm:$0xff] %v15181_v49  ;;  %v2278_v61 = vld [vmem:[#allocation2 + $0x78] sm:$0xf]  ;;  %3316 = vst.msk [vmem:[#allocation3 + $0x14] sm:$0xf] %vm3310_vm13, %v3225_v63  ;;  %v18965_v51 = vrot.slane %v15138_v47, 5  ;;  %v2498_v2 = vor.u32 %v2497_v26, %v2494_v17  ;;  %v3227_v41 = vpop.permute.xlu0 %3226  ;;  %3046 = vrot.lane.b32.xlu1 %v15069_v54, %s13994_s10  ;;  %3044 = vrot.lane.b32.xlu0 %v15062_v19, %s13994_s10 }
 0x111   : > { %v15192_v56 = vld [vmem:[#allocation2 + $0x70] sm:$0xf]  ;;  %3315 = vst.msk [vmem:[#allocation3 + $0x10] sm:$0xf] %vm3310_vm13, %v3223_v43  ;;  %v15202_v8 = vrot.slane %v2501_v48, 5  ;;  %v2507_v14 = vrot.slane %v2505_v62, 4  ;;  %v2963_v43 = vsel %vm14128_vm10, %v14994_v50, %v2962_v7  ;;  %v3229_v57 = vpop.permute.xlu1 %3228 }
 0x112   : > { %19054 = vst [vmem:[#allocation9_spill] sm:$0xff] %v15192_v56  ;;  %v2511_v63 = vshll.u32 %v2277_v37, 16  ;;  %v303_v12 = vld [vmem:[%s14054_s29 + $0x5c] sm:$0xf]  ;;  %v2516_v3 = vshrl.u32 %v2278_v61, 16  ;;  %v2519_v32 = vshll.u32 %v2278_v61, 16 }
 0x113   : > { %19055 = vst [vmem:[#allocation10_spill] sm:$0xff] %v15202_v8  ;;  %v15211_v35 = vld [vmem:[#allocation2 + $0x6c] sm:$0xe]  ;;  %v15213_v20 = vld [vmem:[#allocation2 + $0x74] sm:$0x1]  ;;  %v15215_v48 = vrot.slane %v1438_v5, 4 }
 0x114   : > { %19056 = vst [vmem:[#allocation11_spill] sm:$0xff] %v15211_v35  ;;  %19057 = vst [vmem:[#allocation12_spill] sm:$0xff] %v15213_v20  ;;  %v15219_v37 = vld [vmem:[#allocation2 + $0x78] sm:$0xe]  ;;  %v535_v40 = vshrl.u32 %v15184_v52, 16  ;;  %v15225_v50 = vrot.slane %v18965_v51, 4  ;;  %v3784_v20 = vpop.permute.xlu0 %3783  ;;  %3050 = vrot.lane.b32.xlu1 %v2963_v43, %s13994_s10  ;;  %3048 = vrot.lane.b32.xlu0 %v15114_v4, %s13994_s10 }
 0x115   : > { %19058 = vst [vmem:[#allocation13_spill] sm:$0xff] %v15219_v37  ;;  %3318 = vst.msk [vmem:[#allocation3 + $0x1c] sm:$0xf] %vm3310_vm13, %v3229_v57  ;;  %v19059_v7 = vrot.slane %v15163_v11, 5  ;;  %v2279_v26 = vld [vmem:[#allocation2 + $0x7c] sm:$0xf]  ;;  %v2508_v57 = vor.u32 %v2507_v14, %v15202_v8  ;;  %v3786_v54 = vpop.permute.xlu1 %3785 }
 0x116   : > { %v19061_v61 = vmov 0   ;;  %3317 = vst.msk [vmem:[#allocation3 + $0x18] sm:$0xf] %vm3310_vm13, %v3227_v41  ;;  %v15237_v27 = vrot.slane %v2511_v63, 5  ;;  %v2518_v5 = vrot.slane %v2516_v3, 4  ;;  %v2525_v49 = vshll.u32 %v2279_v26, 16 }
 0x117   : > { %v15229_v17 = vrot.slane %v19059_v7, 4  ;;  %v335_v62 = vmax.bf16 %v19061_v61, %v303_v12  ;;  %v15243_v7 = vrot.slane %v2498_v2, 4  ;;  %v2521_v12 = vrot.slane %v2519_v32, 5  ;;  %3877 = vst.msk [vmem:[#allocation3 + $0x14] sm:$0xf] %vm3871_vm15, %v3786_v54 }
 0x118   : > { %v19063_v14 = vrot.slane %v15192_v56, 5  ;;  %v537_v51 = vrot.slane %v535_v40, 7  ;;  %v538_v18 = vshll.u32 %v15184_v52, 16  ;;  %v3163_v19 = vld [vmem:[#allocation2 + $0x64] sm:$0xf]  ;;  %v15258_v35 = vrot.slane %v2508_v57, 4  ;;  %v3788_v40 = vpop.permute.xlu0 %3787 }
 0x119   : > { %19060 = vst [vmem:[#allocation14_spill] sm:$0xff] %v15229_v17  ;;  %19062 = vst [vmem:[#allocation15_spill] sm:$0xff] %v15243_v7  ;;  %v15246_v17 = vld [vmem:[#allocation2 + $0x78] sm:$0xe]  ;;  %v15254_v2 = vld [vmem:[#allocation2 + $0x7c] sm:$0xf]  ;;  %v2522_v54 = vor.u32 %v2521_v12, %v2518_v5  ;;  %3240 = vrot.lane.b32.xlu1 %v3163_v19, %s13993_s9 }
 0x11a   : > { %v15250_v63 = vrot.slane %v19063_v14, 4  ;;  %v751_v3 = vld [vmem:[#allocation2 + $0x90] sm:$0xf]  ;;  %v543_v32 = vshrl.u32 %v335_v62, 16  ;;  %v546_v41 = vshll.u32 %v335_v62, 16  ;;  %v540_v52 = vor.u32 %v538_v18, %v537_v51  ;;  %v3790_v62 = vpop.permute.xlu1 %3789 }
 0x11b   : > { %3876 = vst.msk [vmem:[#allocation3 + $0x10] sm:$0xf] %vm3871_vm15, %v3784_v20  ;;  %v3162_v37 = vld [vmem:[#allocation2 + $0x60] sm:$0xf]  ;;  %v3367_v14 = vld [vmem:[#allocation2 + $0x78] sm:$0xf] }
 0x11c   : > { %19064 = vst [vmem:[#allocation16_spill] sm:$0xff] %v15250_v63  ;;  %v2529_v63 = vshrl.u32 %v2279_v26, 16  ;;  %v541_v56 = vrot.slane %v537_v51, 4  ;;  %v545_v7 = vrot.slane %v543_v32, 7  ;;  %v15263_v8 = vrot.slane %v2525_v49, 5  ;;  %3238 = vrot.lane.b32.xlu0 %v3162_v37, %s13993_s9 }
 0x11d   : > { %v18973_v43 = vrot.slane %v15254_v2, 5  ;;  %v752_v20 = vsel %vm14076_vm6, %v540_v52, %v751_v3  ;;  %v755_v57 = vld [vmem:[#allocation2 + $0x98] sm:$0x1]  ;;  %3879 = vst.msk [vmem:[#allocation3 + $0x1c] sm:$0xf] %vm3871_vm15, %v3790_v62  ;;  %v3584_v4 = vshrl.u32 %v3367_v14, 16 }
 0x11e   : > { %v3165_v18 = vld [vmem:[#allocation2 + $0x70] sm:$0xf]  ;;  %753 = vst [vmem:[#allocation2 + $0x90] sm:$0xf] %v752_v20  ;;  %v548_v5 = vor.u32 %v546_v41, %v545_v7  ;;  %v550_v26 = vrot.slane %v545_v7, 4  ;;  %v15276_v3 = vrot.slane %v2522_v54, 4  ;;  %v4123_v41 = vpop.permute.xlu1 %4122  ;;  %v4121_v54 = vpop.permute.xlu0 %4120 }
 0x11f   : > { %v304_v51 = vld [vmem:[%s14054_s29 + $0x60] sm:$0xf]  ;;  %3878 = vst.msk [vmem:[#allocation3 + $0x18] sm:$0xf] %vm3871_vm15, %v3788_v40  ;;  %v3164_v49 = vld [vmem:[#allocation2 + $0x6c] sm:$0xf]  ;;  %3244 = vrot.lane.b32.xlu1 %v3165_v18, %s13993_s9 }
 0x120   : > { %v15272_v12 = vld [vmem:[#allocation2 + $0x7c] sm:$0xf]  ;;  %v305_v32 = vld [vmem:[%s14054_s29 + $0x64] sm:$0xf]  ;;  %v15278_v52 = vrot.slane %v2529_v63, 4  ;;  %v549_v62 = vsel %vm14070_vm5, %v541_v56, %v548_v5  ;;  %v756_v7 = vsel %vm14084_vm7, %v550_v26, %v755_v57  ;;  %v15286_v19 = vrot.slane %v18973_v43, 4  ;;  %3242 = vrot.lane.b32.xlu0 %v3164_v49, %s13993_s9 }
 0x121   : > { %v3587_v40 = vshll.u32 %v3367_v14, 16  ;;  %754 = vst.msk [vmem:[#allocation2 + $0x94] sm:$0xf] %vm668_vm2, %v549_v62  ;;  %757 = vst [vmem:[#allocation2 + $0x98] sm:$0x1] %v756_v7  ;;  %v336_v37 = vmax.bf16 %v19061_v61, %v304_v51  ;;  %v15291_v63 = vrot.slane %v3584_v4, 4  ;;  %v337_v20 = vmax.bf16 %v19061_v61, %v305_v32 }
 0x122   : > { %4214 = vst.msk [vmem:[#allocation3 + $0x14] sm:$0xf] %vm4208_vm0, %v4123_v41  ;;  %v3593_v56 = vshll.u32 %v15272_v12, 16  ;;  %4213 = vst.msk [vmem:[#allocation3 + $0x10] sm:$0xf] %vm4208_vm0, %v4121_v54  ;;  %v3558_v5 = vsel %vm14230_vm14, %v15033_v28, %v15079_v15  ;;  %v4127_v51 = vpop.permute.xlu1 %4126  ;;  %v3548_v32 = vsel %vm14230_vm14, %v15123_v46, %v14967_v10  ;;  %v4125_v41 = vpop.permute.xlu0 %4124  ;;  %v3582_v10 = vsel %vm14230_vm14, %v15143_v29, %v15176_v45 }
 0x123   : > { %v552_v57 = vshrl.u32 %v336_v37, 16  ;;  %v555_v14 = vshll.u32 %v336_v37, 16  ;;  %v560_v26 = vshrl.u32 %v337_v20, 16  ;;  %v563_v4 = vshll.u32 %v337_v20, 16  ;;  %v758_v18 = vld [vmem:[#allocation2 + $0x9c] sm:$0xf]  ;;  %3801 = vrot.lane.b32.xlu1 %v3558_v5, %s13997_s13 }
 0x124   : > { %4216 = vst.msk [vmem:[#allocation3 + $0x1c] sm:$0xf] %vm4208_vm0, %v4127_v51  ;;  %v15307_v49 = vrot.slane %v3587_v40, 5  ;;  %v15309_v37 = vld [vmem:[#allocation2 + $0x78] sm:$0xf]  ;;  %3799 = vrot.lane.b32.xlu0 %v3548_v32, %s13997_s13  ;;  %v3597_v46 = vshrl.u32 %v15272_v12, 16  ;;  %v3572_v5 = vsel %vm14230_vm14, %v15141_v9, %v15081_v1 }
 0x125   : > { %v813_v62 = vld [vmem:[#allocation2 + $0x90] sm:$0x2]  ;;  %v927_v7 = vld [vmem:[#allocation2 + $0x90] sm:$0x1]  ;;  %v554_v28 = vrot.slane %v552_v57, 7  ;;  %v562_v15 = vrot.slane %v560_v26, 7 }
 0x126   : > { %v12365_v54 = vrot.slane %v813_v62, 9  ;;  %4215 = vst.msk [vmem:[#allocation3 + $0x18] sm:$0xf] %vm4208_vm0, %v4125_v41  ;;  %v15319_v40 = vld [vmem:[#allocation2 + $0x7c] sm:$0xf]  ;;  %v1608_v62 = vpop.permute.xlu1 %1607  ;;  %v1606_v41 = vpop.permute.xlu0 %1605  ;;  %v1446_v9 = vshrl.u32 %v15309_v37, 16 }
 0x127   : > { %v557_v26 = vor.u32 %v555_v14, %v554_v28  ;;  %v565_v51 = vor.u32 %v563_v4, %v562_v15  ;;  %v558_v45 = vrot.slane %v554_v28, 4  ;;  %v762_v32 = vld [vmem:[#allocation2 + $0xa4] sm:$0x1]  ;;  %1695 = vst.msk [vmem:[#allocation3 + $0x24] sm:$0xf] %vm1685_vm1, %v1608_v62  ;;  %v567_v4 = vrot.slane %v562_v15, 4  ;;  %3805 = vrot.lane.b32.xlu1 %v3582_v10, %s13997_s13 }
 0x128   : > { %v928_v20 = vsel %vm14084_vm7, %v12365_v54, %v927_v7  ;;  %v957_v57 = vld [vmem:[#allocation2 + $0x94] sm:$0x8]  ;;  %v2532_v7 = vor.u32 %v15278_v52, %v15263_v8  ;;  %v1072_v54 = vld [vmem:[#allocation2 + $0x98] sm:$0x1]  ;;  %1694 = vst.msk [vmem:[#allocation3 + $0x20] sm:$0xf] %vm1685_vm1, %v1606_v41  ;;  %3803 = vrot.lane.b32.xlu0 %v3572_v5, %s13997_s13  ;;  %v3590_v10 = vor.u32 %v15307_v49, %v15291_v63 }
 0x129   : > { %929 = vst [vmem:[#allocation2 + $0x90] sm:$0x1] %v928_v20  ;;  %v12383_v29 = vrot.slane %v957_v57, 11  ;;  %v13663_v43 = vld [vmem:[#allocation3 + $0x10] sm:$0xff]   ;;  %v759_v14 = vsel %vm14076_vm6, %v557_v26, %v758_v18  ;;  %v18974_v1 = vrot.slane %v15319_v40, 5  ;;  %v566_v52 = vsel %vm14070_vm5, %v558_v45, %v565_v51 }
 0x12a   : > { %760 = vst [vmem:[#allocation2 + $0x9c] sm:$0xf] %v759_v14  ;;  %13521 = vmatprep.mubr.msk.bf16.mxu0 %vm4380_vm3, %v13663_v43  ;;  %v19065_v18 = vrot.slane %v15073_v34, 5  ;;  %v3371_v20 = vld [vmem:[#allocation2 + $0x88] sm:$0xf]  ;;  %v763_v51 = vsel %vm14084_vm7, %v567_v4, %v762_v32  ;;  %v1612_v43 = vpop.permute.xlu1 %1611  ;;  %v19067_v34 = vrot.slane %v14955_v36, 5  ;;  %v1610_v49 = vpop.permute.xlu0 %1609 }
 0x12b   : > { %v1073_v28 = vsel %vm14148_vm11, %v12383_v29, %v1072_v54  ;;  %v15349_v57 = vld [vmem:[#allocation2 + $0x84] sm:$0xe]  ;;  %761 = vst.msk [vmem:[#allocation2 + $0xa0] sm:$0xf] %vm668_vm2, %v566_v52  ;;  %v1106_v26 = vld [vmem:[#allocation2 + $0x60] sm:$0xf]  ;;  %v1410_v54 = vsel %vm14230_vm14, %v15159_v60, %v15099_v59 }
 0x12c   : > { %v4048_v15 = vsel %vm14128_vm10, %v15025_v31, %v19065_v18  ;;  %19066 = vst [vmem:[#allocation17_spill] sm:$0xff] %v15349_v57  ;;  %1074 = vst [vmem:[#allocation2 + $0x98] sm:$0x1] %v1073_v28  ;;  %v19068_v62 = vrot.slane %v14953_v44, 9  ;;  %v15360_v5 = vld [vmem:[#allocation2 + $0x80] sm:$0x1] }
 0x12d   : > { %1138 = vst.msk [vmem:[#allocation3 + $0x40] sm:$0xf] %vm668_vm2, %v1106_v26  ;;  %v1107_v63 = vld [vmem:[#allocation2 + $0x64] sm:$0xf]  ;;  %764 = vst [vmem:[#allocation2 + $0xa4] sm:$0x1] %v763_v51  ;;  %4138 = vrot.lane.b32.xlu1 %v4048_v15, %s13998_s14 }
 0x12e   : > { %v4045_v31 = vsel %vm14128_vm10, %v19068_v62, %v19067_v34  ;;  %1697 = vst.msk [vmem:[#allocation3 + $0x2c] sm:$0xf] %vm1685_vm1, %v1612_v43  ;;  %v13664_v29 = vld [vmem:[#allocation3 + $0x18] sm:$0xff]   ;;  %v19069_v45 = vrot.slane %v15095_v6, 5  ;;  %v19070_v32 = vrot.slane %v15089_v0, 9  ;;  %v19071_v36 = vrot.slane %v15132_v16, 5  ;;  %v1948_v15 = vpop.permute.xlu1 %1947 }
 0x12f   : > { %v15379_v14 = vrot.slane %v2532_v7, 4  ;;  %v15381_v4 = vld [vmem:[#allocation2 + $0x7c] sm:$0xf]  ;;  %1139 = vst.msk [vmem:[#allocation3 + $0x44] sm:$0xf] %vm668_vm2, %v1107_v63  ;;  %v15388_v6 = vrot.slane %v3593_v56, 5  ;;  %4136 = vrot.lane.b32.xlu0 %v4045_v31, %s13998_s14  ;;  %13522 = vmatmul.mubr.msk.bf16.gmra.mxu0 %vm4380_vm3, %v13664_v29 }
 0x130   : > { %v4052_v44 = vsel %vm14128_vm10, %v19070_v32, %v19069_v45  ;;  %v4055_v41 = vsel %vm14128_vm10, %v15147_v53, %v19071_v36  ;;  %v1108_v0 = vld [vmem:[#allocation2 + $0x6c] sm:$0xf]  ;;  %1696 = vst.msk [vmem:[#allocation3 + $0x28] sm:$0xf] %vm1685_vm1, %v1610_v49  ;;  %v15390_v16 = vrot.slane %v3597_v46, 4  ;;  %v3617_v53 = vshll.u32 %v3371_v20, 16 }
 0x131   : > { %v3621_v28 = vshrl.u32 %v3371_v20, 16  ;;  %1140 = vst.msk [vmem:[#allocation3 + $0x48] sm:$0xf] %vm668_vm2, %v1108_v0  ;;  %v1109_v7 = vld [vmem:[#allocation2 + $0x70] sm:$0xf]  ;;  %v15397_v18 = vrot.slane %v3590_v10, 4  ;;  %v1420_v20 = vsel %vm14230_vm14, %v15172_v13, %v15161_v33  ;;  %v1444_v33 = vsel %vm14230_vm14, %v15215_v48, %v15187_v58  ;;  %4142 = vrot.lane.b32.xlu1 %v4055_v41, %s13998_s14 }
 0x132   : > { %v15395_v52 = vld [vmem:[#allocation2 + $0x80] sm:$0x1]  ;;  %v15401_v12 = vrot.slane %v18974_v1, 4  ;;  %v1449_v46 = vshll.u32 %v15309_v37, 16  ;;  %1141 = vst.msk [vmem:[#allocation3 + $0x4c] sm:$0xf] %vm668_vm2, %v1109_v7  ;;  %v1946_v37 = vpop.permute.xlu0 %1945 }
 0x133   : > { %v2535_v26 = vshll.u32 %v15360_v5, 16  ;;  %v15415_v51 = vld [vmem:[#allocation2 + $0x80] sm:$0x1]  ;;  %v3370_v43 = vld [vmem:[#allocation2 + $0x84] sm:$0xf]  ;;  %v15417_v34 = vrot.slane %v1446_v9, 4  ;;  %4140 = vrot.lane.b32.xlu0 %v4052_v44, %s13998_s14 }
 0x134   : > { %2035 = vst.msk [vmem:[#allocation3 + $0x24] sm:$0xf] %vm19023_vm4, %v1948_v15  ;;  %v19072_v13 = vrot.slane %v15138_v47, 5  ;;  %v19073_v62 = vrot.slane %v15136_v55, 9  ;;  %v19074_v63 = vrot.slane %v15149_v42, 5  ;;  %v19075_v49 = vrot.slane %v15163_v11, 5 }
 0x135   : > { %v19076_v29 = vld [vmem:[#allocation7_spill] sm:$0xff]  ;;  %v1187_v55 = vld [vmem:[#allocation2 + $0x84] sm:$0xf]  ;;  %v1188_v58 = vld [vmem:[#allocation2 + $0x88] sm:$0xf]  ;;  %v15449_v42 = vrot.slane %v3617_v53, 5  ;;  %1623 = vrot.lane.b32.xlu1 %v1420_v20, %s13995_s11 }
 0x136   : > { %v15430_v31 = vsel %vm14128_vm10, %v19073_v62, %v19072_v13  ;;  %v15437_v9 = vsel %vm14128_vm10, %v15225_v50, %v19074_v63  ;;  %v19077_v45 = vrot.slane %v19076_v29, 9  ;;  %v814_v48 = vld [vmem:[#allocation2 + $0x9c] sm:$0x2]  ;;  %2034 = vst.msk [vmem:[#allocation3 + $0x20] sm:$0xf] %vm19023_vm4, %v1946_v37  ;;  %v3623_v32 = vrot.slane %v3621_v28, 4  ;;  %v1952_v37 = vpop.permute.xlu1 %1951  ;;  %v1950_v29 = vpop.permute.xlu0 %1949 }
 0x137   : > { %v1455_v50 = vshll.u32 %v15381_v4, 16  ;;  %v1459_v11 = vshrl.u32 %v15381_v4, 16  ;;  %v930_v36 = vld [vmem:[#allocation2 + $0x9c] sm:$0x1]  ;;  %v3608_v7 = vshrl.u32 %v3370_v43, 16  ;;  %v3611_v15 = vshll.u32 %v3370_v43, 16  ;;  %1621 = vrot.lane.b32.xlu0 %v1410_v54, %s13995_s11 }
 0x138   : > { %v15445_v47 = vsel %vm14128_vm10, %v19077_v45, %v19075_v49  ;;  %v15455_v13 = vld [vmem:[#allocation2 + $0x88] sm:$0xf]  ;;  %v12366_v62 = vrot.slane %v814_v48, 9  ;;  %v1186_v63 = vld [vmem:[#allocation2 + $0x80] sm:$0x1]  ;;  %v1470_v41 = vshrl.u32 %v1187_v55, 16  ;;  %v3600_v4 = vor.u32 %v15390_v16, %v15388_v6 }
 0x139   : > { %19078 = vst [vmem:[#allocation7_spill] sm:$0xff] %v15455_v13  ;;  %v1473_v53 = vshll.u32 %v1187_v55, 16  ;;  %v1479_v49 = vshll.u32 %v1188_v58, 16  ;;  %v1483_v28 = vshrl.u32 %v1188_v58, 16  ;;  %2037 = vst.msk [vmem:[#allocation3 + $0x2c] sm:$0xf] %vm19023_vm4, %v1952_v37  ;;  %v3624_v55 = vor.u32 %v3623_v32, %v15449_v42  ;;  %1627 = vrot.lane.b32.xlu1 %v1444_v33, %s13995_s11 }
 0x13a   : > { %v3603_v44 = vshll.u32 %v15415_v51, 16  ;;  %v15461_v45 = vld [vmem:[#allocation2 + $0x80] sm:$0x1]  ;;  %v1451_v43 = vrot.slane %v1449_v46, 5  ;;  %v931_v48 = vsel %vm14084_vm7, %v12366_v62, %v930_v36  ;;  %v958_v56 = vld [vmem:[#allocation2 + $0xa0] sm:$0x8]  ;;  %v19083_v33 = vsel %vm14230_vm14, %v15178_v22, %v15134_v25 }
 0x13b   : > { %2036 = vst.msk [vmem:[#allocation3 + $0x28] sm:$0xf] %vm19023_vm4, %v1950_v29  ;;  %v15469_v37 = vrot.slane %v1455_v50, 5  ;;  %v1461_v16 = vrot.slane %v1459_v11, 4  ;;  %932 = vst [vmem:[#allocation2 + $0x9c] sm:$0x1] %v931_v48  ;;  %v2141_v29 = vpop.permute.xlu1 %2140  ;;  %v2139_v48 = vpop.permute.xlu0 %2138  ;;  %1625 = vrot.lane.b32.xlu0 %v19083_v33, %s13995_s11 }
 0x13c   : > { %v1075_v51 = vld [vmem:[#allocation2 + $0xa4] sm:$0x1]  ;;  %v3610_v46 = vrot.slane %v3608_v7, 4  ;;  %v3613_v36 = vrot.slane %v3611_v15, 5  ;;  %v1465_v62 = vshll.u32 %v1186_v63, 16  ;;  %v12384_v20 = vrot.slane %v958_v56, 11 }
 0x13d   : > { %19079 = vst [vmem:[#allocation18_spill] sm:$0xff] %v15469_v37  ;;  %v1472_v32 = vrot.slane %v1470_v41, 4  ;;  %v1475_v1 = vrot.slane %v1473_v53, 5  ;;  %v15477_v0 = vrot.slane %v1479_v49, 5  ;;  %v1485_v50 = vrot.slane %v1483_v28, 4  ;;  %v19084_v5 = vld [vmem:[#allocation8_spill] sm:$0xff]  ;;  %1963 = vrot.lane.b32.xlu1 %v15437_v9, %s13992_s8 }
 0x13e   : > { %v15479_v11 = vld [vmem:[#allocation2 + $0x78] sm:$0xe]  ;;  %2228 = vst.msk [vmem:[#allocation3 + $0x24] sm:$0xf] %vm2218_vm8, %v2141_v29  ;;  %v15482_v10 = vrot.slane %v3600_v4, 4  ;;  %v1452_v60 = vor.u32 %v1451_v43, %v15417_v34  ;;  %v1076_v56 = vsel %vm14148_vm11, %v12384_v20, %v1075_v51  ;;  %v15492_v7 = vrot.slane %v2535_v26, 5 }
 0x13f   : > { %19080 = vst [vmem:[#allocation19_spill] sm:$0xff] %v15477_v0  ;;  %19081 = vst [vmem:[#allocation20_spill] sm:$0xff] %v15479_v11  ;;  %v3372_v58 = vld [vmem:[#allocation2 + $0x8c] sm:$0x1]  ;;  %v15494_v15 = vrot.slane %v3603_v44, 5  ;;  %v19082_v63 = vrot.slane %v15455_v13, 5  ;;  %v1462_v34 = vor.u32 %v1461_v16, %v15469_v37  ;;  %v3614_v4 = vor.u32 %v3613_v36, %v3610_v46  ;;  %v2145_v20 = vpop.permute.xlu1 %2144  ;;  %v2143_v33 = vpop.permute.xlu0 %2142  ;;  %1961 = vrot.lane.b32.xlu0 %v15430_v31, %s13992_s8 }
 0x140   : > { %v1189_v54 = vld [vmem:[#allocation2 + $0x8c] sm:$0x1]  ;;  %2227 = vst.msk [vmem:[#allocation3 + $0x20] sm:$0xf] %vm2218_vm8, %v2139_v48  ;;  %v2281_v53 = vld [vmem:[#allocation2 + $0x84] sm:$0xf]  ;;  %v1476_v48 = vor.u32 %v1475_v1, %v1472_v32  ;;  %v1486_v25 = vor.u32 %v1485_v50, %v15477_v0 }
 0x141   : > { %v15498_v41 = vrot.slane %v19082_v63, 4  ;;  %1077 = vst [vmem:[#allocation2 + $0xa4] sm:$0x1] %v1076_v56  ;;  %v19085_v26 = vrot.slane %v19084_v5, 5  ;;  %v19086_v49 = vld [vmem:[#allocation14_spill] sm:$0xff]  ;;  %v15512_v44 = vrot.slane %v3624_v55, 4 }
 0x142   : > { %v15514_v43 = vld [vmem:[#allocation2 + $0x8c] sm:$0x1]  ;;  %v15516_v16 = vrot.slane %v1465_v62, 5  ;;  %v2282_v51 = vld [vmem:[#allocation2 + $0x88] sm:$0xf]  ;;  %v3627_v29 = vshll.u32 %v3372_v58, 16 }
 0x143   : > { %v1886_v28 = vsel %vm14128_vm10, %v19086_v49, %v19085_v26  ;;  %v1489_v22 = vshll.u32 %v1189_v54, 16  ;;  %v15519_v56 = vld [vmem:[#allocation2 + $0x7c] sm:$0xf]  ;;  %v2285_v63 = vld [vmem:[#allocation2 + $0x94] sm:$0xf]  ;;  %v15522_v46 = vrot.slane %v1452_v60, 4  ;;  %v2702_v9 = vpop.permute.xlu1 %2701  ;;  %v2700_v31 = vpop.permute.xlu0 %2699  ;;  %1965 = vrot.lane.b32.xlu0 %v15445_v47, %s13992_s8 }
 0x144   : > { %19087 = vst [vmem:[#allocation8_spill] sm:$0xff] %v15516_v16  ;;  %19088 = vst [vmem:[#allocation14_spill] sm:$0xff] %v15519_v56  ;;  %v2540_v36 = vshrl.u32 %v2281_v53, 16  ;;  %v2543_v62 = vshll.u32 %v2281_v53, 16  ;;  %v15529_v58 = vrot.slane %v1462_v34, 4  ;;  %v2549_v50 = vshll.u32 %v2282_v51, 16  ;;  %1967 = vrot.lane.b32.xlu1 %v1886_v28, %s13992_s8 }
 0x145   : > { %2230 = vst.msk [vmem:[#allocation3 + $0x2c] sm:$0xf] %vm2218_vm8, %v2145_v20  ;;  %19089 = vst [vmem:[#allocation21_spill] sm:$0xff] %v15522_v46  ;;  %v15531_v32 = vld [vmem:[#allocation2 + $0x80] sm:$0x1]  ;;  %v2553_v54 = vshrl.u32 %v2282_v51, 16 }
 0x146   : > { %2229 = vst.msk [vmem:[#allocation3 + $0x28] sm:$0xf] %vm2218_vm8, %v2143_v33  ;;  %19090 = vst [vmem:[#allocation22_spill] sm:$0xff] %v15529_v58  ;;  %v3374_v5 = vld [vmem:[#allocation2 + $0x94] sm:$0xf]  ;;  %v15535_v60 = vrot.slane %v3614_v4, 4 }
 0x147   : > { %19091 = vst [vmem:[#allocation23_spill] sm:$0xff] %v15531_v32  ;;  %v2284_v26 = vld [vmem:[#allocation2 + $0x90] sm:$0xf]  ;;  %v2573_v49 = vshll.u32 %v2285_v63, 16  ;;  %v2577_v20 = vshrl.u32 %v2285_v63, 16  ;;  %v15538_v33 = vrot.slane %v3627_v29, 5  ;;  %v2704_v32 = vpop.permute.xlu0 %2703 }
 0x148   : > { %v15540_v34 = vrot.slane %v1476_v48, 4  ;;  %v15542_v55 = vrot.slane %v1486_v25, 4  ;;  %v15544_v1 = vrot.slane %v1489_v22, 5  ;;  %v15546_v51 = vld [vmem:[#allocation2 + $0x84] sm:$0xe]  ;;  %v2542_v53 = vrot.slane %v2540_v36, 4 }
 0x149   : > { %v15548_v59 = vld [vmem:[#allocation2 + $0x88] sm:$0xf]  ;;  %2789 = vst.msk [vmem:[#allocation3 + $0x24] sm:$0xf] %vm19026_vm9, %v2702_v9  ;;  %v2075_v4 = vld [vmem:[#allocation2 + $0x70] sm:$0xf] }
 0x14a   : > { %19092 = vst [vmem:[#allocation24_spill] sm:$0xff] %v15540_v34  ;;  %19093 = vst [vmem:[#allocation25_spill] sm:$0xff] %v15542_v55  ;;  %v2545_v11 = vrot.slane %v2543_v62, 5  ;;  %v2283_v63 = vld [vmem:[#allocation2 + $0x8c] sm:$0x1]  ;;  %v3641_v0 = vshll.u32 %v3374_v5, 16  ;;  %2156 = vrot.lane.b32.xlu1 %v2075_v4, %s13991_s30 }
 0x14b   : > { %19094 = vst [vmem:[#allocation26_spill] sm:$0xff] %v15544_v1  ;;  %v3645_v29 = vshrl.u32 %v3374_v5, 16  ;;  %2788 = vst.msk [vmem:[#allocation3 + $0x20] sm:$0xf] %vm19026_vm9, %v2700_v31  ;;  %v2074_v48 = vld [vmem:[#allocation2 + $0x6c] sm:$0xf] }
 0x14c   : > { %v15553_v25 = vrot.slane %v2549_v50, 5  ;;  %v2555_v22 = vrot.slane %v2553_v54, 4  ;;  %v2564_v34 = vshrl.u32 %v2284_v26, 16  ;;  %v2567_v55 = vshll.u32 %v2284_v26, 16  ;;  %v15555_v1 = vld [vmem:[#allocation2 + $0x88] sm:$0xf]  ;;  %v2706_v26 = vpop.permute.xlu1 %2705  ;;  %2154 = vrot.lane.b32.xlu0 %v2074_v48, %s13991_s30 }
 0x14d   : > { %v19096_v36 = vrot.slane %v15519_v56, 5  ;;  %v15564_v9 = vld [vmem:[#allocation2 + $0x8c] sm:$0x1]  ;;  %v15566_v28 = vrot.slane %v2573_v49, 5  ;;  %v2579_v50 = vrot.slane %v2577_v20, 4  ;;  %v13669_v54 = vld [vmem:[%s18953_s3 + $0xf8] sm:$0xff]   ;;  %v2546_v46 = vor.u32 %v2545_v11, %v2542_v53 }
 0x14e   : > { %19095 = vst [vmem:[#allocation27_spill] sm:$0xff] %v15553_v25  ;;  %v15568_v31 = vld [vmem:[#allocation2 + $0x84] sm:$0xe]  ;;  %v2559_v5 = vshll.u32 %v2283_v63, 16  ;;  %v3373_v49 = vld [vmem:[#allocation2 + $0x90] sm:$0xf]  ;;  %13134 = vmatprep.subr.bf16.mxu0 %v13669_v54  ;;  %v2556_v47 = vor.u32 %v2555_v22, %v15553_v25 }
 0x14f   : > { %v15561_v62 = vrot.slane %v19096_v36, 4  ;;  %19098 = vst [vmem:[#allocation29_spill] sm:$0xff] %v15566_v28  ;;  %19099 = vst [vmem:[#allocation30_spill] sm:$0xff] %v15568_v31  ;;  %v2077_v20 = vld [vmem:[#allocation2 + $0x7c] sm:$0xf]  ;;  %v15584_v58 = vrot.slane %v3641_v0, 5  ;;  %v2580_v11 = vor.u32 %v2579_v50, %v15566_v28 }
 0x150   : > { %2791 = vst.msk [vmem:[#allocation3 + $0x2c] sm:$0xf] %vm19026_vm9, %v2706_v26  ;;  %v15582_v37 = vld [vmem:[#allocation2 + $0x8c] sm:$0x1]  ;;  %v3647_v16 = vrot.slane %v3645_v29, 4  ;;  %v2566_v36 = vrot.slane %v2564_v34, 4  ;;  %v3039_v54 = vpop.permute.xlu1 %3038  ;;  %2160 = vrot.lane.b32.xlu1 %v2077_v20, %s13991_s30 }
 0x151   : > { %19097 = vst [vmem:[#allocation28_spill] sm:$0xff] %v15561_v62  ;;  %v15578_v62 = vld [vmem:[#allocation2 + $0x94] sm:$0xf]  ;;  %19101 = vst [vmem:[#allocation32_spill] sm:$0xff] %v15584_v58  ;;  %v2076_v63 = vld [vmem:[#allocation2 + $0x78] sm:$0xf] }
 0x152   : > { %19100 = vst [vmem:[#allocation31_spill] sm:$0xff] %v15578_v62  ;;  %2790 = vst.msk [vmem:[#allocation3 + $0x28] sm:$0xf] %vm19026_vm9, %v2704_v32  ;;  %v2569_v57 = vrot.slane %v2567_v55, 5  ;;  %v2286_v26 = vld [vmem:[#allocation2 + $0x98] sm:$0x1]  ;;  %v3648_v13 = vor.u32 %v3647_v16, %v15584_v58  ;;  %2158 = vrot.lane.b32.xlu0 %v2076_v63, %s13991_s30  ;;  %v2528_v63 = vsel %vm14230_vm14, %v15276_v3, %v15263_v8 }
 0x153   : > { %v15592_v0 = vld [vmem:[#allocation2 + $0x90] sm:$0xe]  ;;  %v3632_v29 = vshrl.u32 %v3373_v49, 16  ;;  %v3635_v32 = vshll.u32 %v3373_v49, 16  ;;  %v19103_v4 = vrot.slane %v15548_v59, 5  ;;  %v15600_v34 = vrot.slane %v2559_v5, 5  ;;  %v3037_v49 = vpop.permute.xlu0 %3036 }
 0x154   : > { %19102 = vst [vmem:[#allocation33_spill] sm:$0xff] %v15592_v0  ;;  %v13670_v48 = vld [vmem:[%s18953_s3 + $0xb8] sm:$0xff]   ;;  %v13671_v50 = vld [vmem:[%s18953_s3 + $0xf0] sm:$0xff]   ;;  %3126 = vst.msk [vmem:[#allocation3 + $0x24] sm:$0xf] %vm3116_vm12, %v3039_v54  ;;  %v15610_v53 = vrot.slane %v2546_v46, 4  ;;  %v2570_v31 = vor.u32 %v2569_v57, %v2566_v36  ;;  %v19112_v3 = vsel %vm14230_vm14, %v15258_v35, %v15237_v27 }
 0x155   : > { %v15597_v56 = vrot.slane %v19103_v4, 4  ;;  %v2583_v4 = vshll.u32 %v2286_v26, 16  ;;  %v3375_v5 = vld [vmem:[#allocation2 + $0x98] sm:$0x1]  ;;  %3125 = vst.msk [vmem:[#allocation3 + $0x20] sm:$0xf] %vm3116_vm12, %v3037_v49  ;;  %13135 = vmatpush3.bf16.msra.mxu0 %v13670_v48  ;;  %v3043_v49 = vpop.permute.xlu1 %3042  ;;  %2717 = vrot.lane.b32.xlu1 %v19112_v3, %s13996_s12 }
 0x156   : > { %v15616_v22 = vrot.slane %v2556_v47, 4  ;;  %v19104_v28 = vrot.slane %v15555_v1, 5  ;;  %v15623_v26 = vld [vmem:[#allocation2 + $0x98] sm:$0x1]  ;;  %v13672_v16 = vld [vmem:[%s18953_s3 + $0xb0] sm:$0xff]   ;;  %v15629_v20 = vrot.slane %v2580_v11, 4  ;;  %13136 = vmatprep.subr.bf16.mxu0 %v13671_v50 }
 0x157   : > { %19105 = vst [vmem:[#allocation34_spill] sm:$0xff] %v15623_v26  ;;  %v19106_v57 = vrot.slane %v15578_v62, 5  ;;  %v3637_v36 = vrot.slane %v3635_v32, 5  ;;  %v306_v54 = vld [vmem:[%s14054_s29 + $0x68] sm:$0xf]  ;;  %v19108_v46 = vld [vmem:[#allocation10_spill] sm:$0xff]  ;;  %v3041_v32 = vpop.permute.xlu0 %3040 }
 0x158   : > { %v15620_v25 = vrot.slane %v19104_v28, 4  ;;  %v3634_v28 = vrot.slane %v3632_v29, 4  ;;  %v19109_v55 = vld [vmem:[#allocation15_spill] sm:$0xff]  ;;  %v3651_v11 = vshll.u32 %v3375_v5, 16  ;;  %v3377_v58 = vld [vmem:[#allocation2 + $0xa0] sm:$0xf] }
 0x159   : > { %v15633_v47 = vrot.slane %v19106_v57, 4  ;;  %v2504_v48 = vsel %vm14230_vm14, %v19109_v55, %v19108_v46  ;;  %v338_v57 = vmax.bf16 %v19061_v61, %v306_v54  ;;  %v307_v0 = vld [vmem:[%s14054_s29 + $0x6c] sm:$0xf]  ;;  %3128 = vst.msk [vmem:[#allocation3 + $0x2c] sm:$0xf] %vm3116_vm12, %v3043_v49  ;;  %v15650_v50 = vrot.slane %v2583_v4, 5  ;;  %13137 = vmatpush3.bf16.msra.mxu0 %v13672_v16 }
 0x15a   : > { %v13673_v29 = vld [vmem:[%s18953_s3 + $0xe8] sm:$0xff]   ;;  %v15653_v46 = vrot.slane %v3648_v13, 4  ;;  %v15655_v62 = vld [vmem:[#allocation2 + $0x90] sm:$0xe]  ;;  %v339_v8 = vmax.bf16 %v19061_v61, %v307_v0  ;;  %3127 = vst.msk [vmem:[#allocation3 + $0x28] sm:$0xf] %vm3116_vm12, %v3041_v32  ;;  %v2538_v4 = vsel %vm14230_vm14, %v15379_v14, %v15492_v7  ;;  %2715 = vrot.lane.b32.xlu0 %v2504_v48, %s13996_s12  ;;  %v3638_v35 = vor.u32 %v3637_v36, %v3634_v28  ;;  %v3233_v7 = vpop.permute.xlu1 %3232 }
 0x15b   : > { %19107 = vst [vmem:[#allocation35_spill] sm:$0xff] %v15633_v47  ;;  %19111 = vst [vmem:[#allocation15_spill] sm:$0xff] %v15655_v62  ;;  %v15669_v13 = vrot.slane %v2570_v31, 4  ;;  %v15671_v5 = vld [vmem:[#allocation2 + $0x94] sm:$0xf]  ;;  %v569_v0 = vshrl.u32 %v338_v57, 16  ;;  %13138 = vmatprep.subr.bf16.mxu0 %v13673_v29  ;;  %v3231_v28 = vpop.permute.xlu0 %3230  ;;  %2721 = vrot.lane.b32.xlu1 %v2538_v4, %s13996_s12 }
 0x15c   : > { %19110 = vst [vmem:[#allocation10_spill] sm:$0xff] %v15653_v46  ;;  %19113 = vst [vmem:[#allocation36_spill] sm:$0xff] %v15671_v5  ;;  %v572_v54 = vshll.u32 %v338_v57, 16  ;;  %v13674_v49 = vld [vmem:[%s18953_s3 + $0xa8] sm:$0xff]   ;;  %v3665_v27 = vshll.u32 %v3377_v58, 16  ;;  %v577_v32 = vshrl.u32 %v339_v8, 16 }
 0x15d   : > { %v580_v3 = vshll.u32 %v339_v8, 16  ;;  %v13675_v14 = vld [vmem:[%s18953_s3 + $0xe0] sm:$0xff]   ;;  %v15680_v31 = vrot.slane %v3651_v11, 5  ;;  %v3669_v16 = vshrl.u32 %v3377_v58, 16  ;;  %v15683_v55 = vld [vmem:[#allocation2 + $0x98] sm:$0x1]  ;;  %13139 = vmatpush3.bf16.msra.mxu0 %v13674_v49 }
 0x15e   : > { %19115 = vst [vmem:[#allocation38_spill] sm:$0xff] %v15683_v55  ;;  %v571_v46 = vrot.slane %v569_v0, 7  ;;  %3320 = vst.msk [vmem:[#allocation3 + $0x24] sm:$0xf] %vm3310_vm13, %v3233_v7  ;;  %v765_v48 = vld [vmem:[#allocation2 + $0xa8] sm:$0xf]  ;;  %2719 = vrot.lane.b32.xlu0 %v2528_v63, %s13996_s12  ;;  %13140 = vmatprep.subr.bf16.mxu0 %v13675_v14 }
 0x15f   : > { %19114 = vst [vmem:[#allocation37_spill] sm:$0xff] %v15680_v31  ;;  %v579_v29 = vrot.slane %v577_v32, 7  ;;  %v308_v8 = vld [vmem:[%s14054_s29 + $0x70] sm:$0xf]  ;;  %3319 = vst.msk [vmem:[#allocation3 + $0x20] sm:$0xf] %vm3310_vm13, %v3231_v28 }
 0x160   : > { %v19116_v11 = vld [vmem:[#allocation9_spill] sm:$0xff]  ;;  %v19118_v31 = vld [vmem:[#allocation11_spill] sm:$0xff]  ;;  %v19120_v62 = vld [vmem:[#allocation12_spill] sm:$0xff]  ;;  %v574_v36 = vor.u32 %v572_v54, %v571_v46  ;;  %v575_v32 = vrot.slane %v571_v46, 4  ;;  %v15712_v46 = vrot.slane %v3665_v27, 5  ;;  %v15714_v54 = vrot.slane %v3669_v16, 4 }
 0x161   : > { %v19117_v58 = vrot.slane %v19116_v11, 5  ;;  %v19119_v57 = vrot.slane %v19118_v31, 9  ;;  %v19121_v47 = vrot.slane %v19120_v62, 5  ;;  %v19122_v26 = vld [vmem:[#allocation16_spill] sm:$0xff]  ;;  %v769_v28 = vld [vmem:[#allocation2 + $0xb0] sm:$0x1] }
 0x162   : > { %v13676_v4 = vld [vmem:[%s18953_s3 + $0xa0] sm:$0xff]   ;;  %v309_v11 = vld [vmem:[%s14054_s29 + $0x74] sm:$0xf]  ;;  %v15706_v31 = vrot.slane %v3638_v35, 4  ;;  %v13677_v62 = vld [vmem:[%s18953_s3 + $0xd8] sm:$0xff]   ;;  %v766_v49 = vsel %vm14076_vm6, %v574_v36, %v765_v48  ;;  %v3235_v35 = vpop.permute.xlu0 %3234  ;;  %v19124_v36 = vrot.slane %v15671_v5, 5 }
 0x163   : > { %v2967_v0 = vsel %vm14128_vm10, %v19119_v57, %v19117_v58  ;;  %v2970_v7 = vsel %vm14128_vm10, %v19122_v26, %v19121_v47  ;;  %v582_v57 = vor.u32 %v580_v3, %v579_v29  ;;  %v584_v58 = vrot.slane %v579_v29, 4  ;;  %v3237_v47 = vpop.permute.xlu1 %3236  ;;  %v15721_v14 = vld [vmem:[#allocation2 + $0x90] sm:$0xf]  ;;  %767 = vst [vmem:[#allocation2 + $0xa8] sm:$0xf] %v766_v49  ;;  %13141 = vmatpush3.bf16.msra.mxu0 %v13676_v4 }
 0x164   : > { %19123 = vst [vmem:[#allocation9_spill] sm:$0xff] %v15706_v31  ;;  %v340_v26 = vmax.bf16 %v19061_v61, %v308_v8  ;;  %v341_v63 = vmax.bf16 %v19061_v61, %v309_v11  ;;  %3322 = vst.msk [vmem:[#allocation3 + $0x2c] sm:$0xf] %vm3310_vm13, %v3237_v47  ;;  %3054 = vrot.lane.b32.xlu1 %v2970_v7, %s13994_s10  ;;  %v15731_v48 = vrot.slane %v19124_v36, 4  ;;  %v15733_v8 = vld [vmem:[#allocation2 + $0xa0] sm:$0xf]  ;;  %3052 = vrot.lane.b32.xlu0 %v2967_v0, %s13994_s10 }
 0x165   : > { %v583_v29 = vsel %vm14070_vm5, %v575_v32, %v582_v57  ;;  %v770_v27 = vsel %vm14084_vm7, %v584_v58, %v769_v28  ;;  %3321 = vst.msk [vmem:[#allocation3 + $0x28] sm:$0xf] %vm3310_vm13, %v3235_v35  ;;  %v13678_v32 = vld [vmem:[%s18953_s3 + $0x98] sm:$0xff]   ;;  %v19126_v7 = vrot.slane %v15395_v52, 5  ;;  %v15745_v47 = vld [vmem:[#allocation2 + $0x94] sm:$0xf]  ;;  %13142 = vmatprep.subr.bf16.mxu0 %v13677_v62 }
 0x166   : > { %v586_v16 = vshrl.u32 %v340_v26, 16  ;;  %19125 = vst [vmem:[#allocation11_spill] sm:$0xff] %v15731_v48  ;;  %768 = vst.msk [vmem:[#allocation2 + $0xac] sm:$0xf] %vm668_vm2, %v583_v29  ;;  %v589_v28 = vshll.u32 %v340_v26, 16  ;;  %v594_v11 = vshrl.u32 %v341_v63, 16 }
 0x167   : > { %771 = vst [vmem:[#allocation2 + $0xb0] sm:$0x1] %v770_v27  ;;  %v2977_v57 = vsel %vm14128_vm10, %v15286_v19, %v19126_v7  ;;  %v3376_v58 = vld [vmem:[#allocation2 + $0x9c] sm:$0xf]  ;;  %v13679_v4 = vld [vmem:[%s18953_s3 + $0xd0] sm:$0xff]   ;;  %v3794_v35 = vpop.permute.xlu1 %3793  ;;  %v19127_v26 = vrot.slane %v15254_v2, 5  ;;  %v3792_v7 = vpop.permute.xlu0 %3791  ;;  %13143 = vmatpush3.bf16.msra.mxu0 %v13678_v32 }
 0x168   : > { %v588_v49 = vrot.slane %v586_v16, 7  ;;  %v19128_v29 = vld [vmem:[#allocation13_spill] sm:$0xff]  ;;  %v1494_v27 = vshrl.u32 %v15721_v14, 16  ;;  %v772_v19 = vld [vmem:[#allocation2 + $0xb4] sm:$0xf]  ;;  %v15757_v36 = vrot.slane %v594_v11, 7  ;;  %3058 = vrot.lane.b32.xlu1 %v2977_v57, %s13994_s10  ;;  %13144 = vmatprep.subr.bf16.mxu0 %v13679_v4 }
 0x169   : > { %v19129_v0 = vrot.slane %v19128_v29, 9  ;;  %3881 = vst.msk [vmem:[#allocation3 + $0x24] sm:$0xf] %vm3871_vm15, %v3794_v35  ;;  %v3167_v62 = vld [vmem:[#allocation2 + $0x7c] sm:$0xf]  ;;  %v597_v5 = vshll.u32 %v341_v63, 16 }
 0x16a   : > { %v15760_v3 = vor.u32 %v589_v28, %v588_v49  ;;  %v592_v16 = vrot.slane %v588_v49, 4  ;;  %3880 = vst.msk [vmem:[#allocation3 + $0x20] sm:$0xf] %vm3871_vm15, %v3792_v7  ;;  %v3166_v2 = vld [vmem:[#allocation2 + $0x78] sm:$0xf]  ;;  %v13680_v11 = vld [vmem:[%s18953_s3 + $0x90] sm:$0xff]  }
 0x16b   : > { %v2974_v52 = vsel %vm14128_vm10, %v19129_v0, %v19127_v26  ;;  %v1497_v35 = vshll.u32 %v15721_v14, 16  ;;  %v1503_v28 = vshll.u32 %v15745_v47, 16  ;;  %v13681_v63 = vld [vmem:[%s18953_s3 + $0xc8] sm:$0xff]   ;;  %v599_v32 = vor.u32 %v597_v5, %v15757_v36  ;;  %v3798_v49 = vpop.permute.xlu1 %3797  ;;  %v3796_v14 = vpop.permute.xlu0 %3795  ;;  %v3168_v5 = vld [vmem:[#allocation2 + $0x84] sm:$0xf]  ;;  %13145 = vmatpush3.bf16.msra.mxu0 %v13680_v11 }
 0x16c   : > { %19130 = vst [vmem:[#allocation12_spill] sm:$0xff] %v15760_v3  ;;  %3056 = vrot.lane.b32.xlu0 %v2974_v52, %s13994_s10  ;;  %v773_v57 = vsel %vm14076_vm6, %v15760_v3, %v772_v19  ;;  %v3656_v29 = vshrl.u32 %v3376_v58, 16  ;;  %v3659_v0 = vshll.u32 %v3376_v58, 16  ;;  %v815_v7 = vld [vmem:[#allocation2 + $0xa8] sm:$0x2]  ;;  %v15779_v26 = vrot.slane %v1494_v27, 4  ;;  %3248 = vrot.lane.b32.xlu1 %v3167_v62, %s13993_s9 }
 0x16d   : > { %v933_v52 = vld [vmem:[#allocation2 + $0xa8] sm:$0x1]  ;;  %774 = vst [vmem:[#allocation2 + $0xb4] sm:$0xf] %v773_v57  ;;  %3883 = vst.msk [vmem:[#allocation3 + $0x2c] sm:$0xf] %vm3871_vm15, %v3798_v49  ;;  %v600_v55 = vsel %vm14070_vm5, %v592_v16, %v599_v32  ;;  %13146 = vmatprep.subr.bf16.mxu0 %v13681_v63 }
 0x16e   : > { %v3169_v4 = vld [vmem:[#allocation2 + $0x88] sm:$0xf]  ;;  %v12367_v48 = vrot.slane %v815_v7, 9  ;;  %3882 = vst.msk [vmem:[#allocation3 + $0x28] sm:$0xf] %vm3871_vm15, %v3796_v14  ;;  %v1507_v58 = vshrl.u32 %v15745_v47, 16 }
 0x16f   : > { %v959_v57 = vld [vmem:[#allocation2 + $0xac] sm:$0x8]  ;;  %v1078_v31 = vld [vmem:[#allocation2 + $0xb0] sm:$0x1]  ;;  %775 = vst.msk [vmem:[#allocation2 + $0xb8] sm:$0xf] %vm668_vm2, %v600_v55  ;;  %v4131_v7 = vpop.permute.xlu1 %4130 }
 0x170   : > { %v13682_v27 = vld [vmem:[%s18953_s3 + $0x88] sm:$0xff]   ;;  %797 = vst.msk [vmem:[#allocation2 + $0xd0] sm:$0xf] %vm668_vm2, %v600_v55  ;;  %3246 = vrot.lane.b32.xlu0 %v3166_v2, %s13993_s9  ;;  %v1499_v16 = vrot.slane %v1497_v35, 5  ;;  %v15793_v32 = vrot.slane %v1503_v28, 5  ;;  %v934_v47 = vsel %vm14084_vm7, %v12367_v48, %v933_v52  ;;  %v12385_v49 = vrot.slane %v959_v57, 11  ;;  %v4129_v2 = vpop.permute.xlu0 %4128  ;;  %3252 = vrot.lane.b32.xlu1 %v3169_v4, %s13993_s9 }
 0x171   : > { %v1192_v62 = vld [vmem:[#allocation2 + $0x98] sm:$0x1]  ;;  %v13683_v11 = vld [vmem:[%s18953_s3 + $0xc0] sm:$0xff]   ;;  %v3658_v14 = vrot.slane %v3656_v29, 4  ;;  %v3661_v19 = vrot.slane %v3659_v0, 5  ;;  %v19131_v63 = vrot.slane %v15757_v36, 4  ;;  %13147 = vmatpush3.bf16.msra.mxu0 %v13682_v27  ;;  %v3672_v4 = vor.u32 %v15714_v54, %v15712_v46 }
 0x172   : > { %v1193_v3 = vld [vmem:[#allocation2 + $0x9c] sm:$0xf]  ;;  %935 = vst [vmem:[#allocation2 + $0xa8] sm:$0x1] %v934_v47  ;;  %4218 = vst.msk [vmem:[#allocation3 + $0x24] sm:$0xf] %vm4208_vm0, %v4131_v7  ;;  %v1079_v48 = vsel %vm14148_vm11, %v12385_v49, %v1078_v31  ;;  %v3606_v31 = vsel %vm14230_vm14, %v15482_v10, %v15494_v15  ;;  %v1500_v47 = vor.u32 %v1499_v16, %v15779_v26  ;;  %13148 = vmatprep.subr.bf16.mxu0 %v13683_v11 }
 0x173   : > { %v776_v55 = vld [vmem:[#allocation2 + $0xbc] sm:$0x1]  ;;  %v3378_v35 = vld [vmem:[#allocation2 + $0xa4] sm:$0x1]  ;;  %v15801_v28 = vld [vmem:[#allocation2 + $0x9c] sm:$0xe]  ;;  %v4135_v7 = vpop.permute.xlu1 %4134  ;;  %v3630_v10 = vsel %vm14230_vm14, %v15512_v44, %v15538_v33  ;;  %v3662_v15 = vor.u32 %v3661_v19, %v3658_v14 }
 0x174   : > { %v777_v52 = vsel %vm14084_vm7, %v19131_v63, %v776_v55  ;;  %4217 = vst.msk [vmem:[#allocation3 + $0x20] sm:$0xf] %vm4208_vm0, %v4129_v2  ;;  %v15811_v29 = vld [vmem:[#allocation2 + $0xa4] sm:$0x1]  ;;  %v1509_v0 = vrot.slane %v1507_v58, 4  ;;  %3250 = vrot.lane.b32.xlu0 %v3168_v5, %s13993_s9  ;;  %v3596_v5 = vsel %vm14230_vm14, %v15397_v18, %v15388_v6  ;;  %v1513_v55 = vshll.u32 %v1192_v62, 16  ;;  %3809 = vrot.lane.b32.xlu1 %v3606_v31, %s13997_s13 }
 0x175   : > { %1080 = vst [vmem:[#allocation2 + $0xb0] sm:$0x1] %v1079_v48  ;;  %v13684_v57 = vld [vmem:[%s18953_s3 + $0x80] sm:$0xff]   ;;  %778 = vst [vmem:[#allocation2 + $0xbc] sm:$0x1] %v777_v52  ;;  %v4133_v48 = vpop.permute.xlu0 %4132  ;;  %v1518_v54 = vshrl.u32 %v1193_v3, 16  ;;  %v3620_v63 = vsel %vm14230_vm14, %v15535_v60, %v15449_v42 }
 0x176   : > { %v15824_v58 = vld [vmem:[#allocation2 + $0xa0] sm:$0xf]  ;;  %v816_v27 = vld [vmem:[#allocation2 + $0xb4] sm:$0x2]  ;;  %v936_v49 = vld [vmem:[#allocation2 + $0xb4] sm:$0x1]  ;;  %v1510_v18 = vor.u32 %v1509_v0, %v15793_v32  ;;  %13149 = vmatpush3.bf16.msra.mxu0 %v13684_v57 }
 0x177   : > { %v12368_v2 = vrot.slane %v816_v27, 9  ;;  %4220 = vst.msk [vmem:[#allocation3 + $0x2c] sm:$0xf] %vm4208_vm0, %v4135_v7  ;;  %v1521_v26 = vshll.u32 %v1193_v3, 16  ;;  %4219 = vst.msk [vmem:[#allocation3 + $0x28] sm:$0xf] %vm4208_vm0, %v4133_v48 }
 0x178   : > { %v3675_v16 = vshll.u32 %v3378_v35, 16  ;;  %3807 = vrot.lane.b32.xlu0 %v3596_v5, %s13997_s13  ;;  %v15842_v11 = vrot.slane %v3672_v4, 4  ;;  %v19132_v44 = vrot.slane %v15733_v8, 5  ;;  %v15849_v19 = vrot.slane %v1500_v47, 4  ;;  %v1195_v14 = vld [vmem:[#allocation2 + $0xa4] sm:$0x1]  ;;  %v1616_v35 = vpop.permute.xlu1 %1615  ;;  %3813 = vrot.lane.b32.xlu1 %v3630_v10, %s13997_s13 }
 0x179   : > { %v937_v62 = vsel %vm14084_vm7, %v12368_v2, %v936_v49  ;;  %v15855_v52 = vrot.slane %v1513_v55, 5  ;;  %v1527_v0 = vshll.u32 %v15824_v58, 16  ;;  %v15858_v57 = vld [vmem:[#allocation2 + $0x90] sm:$0xe]  ;;  %v1614_v31 = vpop.permute.xlu0 %1613  ;;  %1699 = vst.msk [vmem:[#allocation3 + $0x34] sm:$0xf] %vm1685_vm1, %v1616_v35 }
 0x17a   : > { %v15846_v33 = vrot.slane %v19132_v44, 4  ;;  %938 = vst [vmem:[#allocation2 + $0xb4] sm:$0x1] %v937_v62  ;;  %19133 = vst [vmem:[#allocation16_spill] sm:$0xff] %v15858_v57  ;;  %v15861_v47 = vrot.slane %v3662_v15, 4  ;;  %v1520_v27 = vrot.slane %v1518_v54, 4 }
 0x17b   : > { %v13665_v4 = vld [vmem:[#allocation3 + $0x20] sm:$0xff]   ;;  %v1523_v49 = vrot.slane %v1521_v26, 5  ;;  %1698 = vst.msk [vmem:[#allocation3 + $0x30] sm:$0xf] %vm1685_vm1, %v1614_v31  ;;  %v15865_v7 = vrot.slane %v3675_v16, 5  ;;  %v15867_v42 = vrot.slane %v1510_v18, 4 }
 0x17c   : > { %v15869_v60 = vld [vmem:[#allocation2 + $0x94] sm:$0xf]  ;;  %v960_v5 = vld [vmem:[#allocation2 + $0xb8] sm:$0x8]  ;;  %3811 = vrot.lane.b32.xlu0 %v3620_v63, %s13997_s13  ;;  %13525 = vmatprep.mubr.msk.bf16.mxu0 %vm4380_vm3, %v13665_v4  ;;  %v19136_v55 = vrot.slane %v15461_v45, 5  ;;  %v1531_v48 = vshrl.u32 %v15824_v58, 16  ;;  %v1620_v26 = vpop.permute.xlu1 %1619 }
 0x17d   : > { %19134 = vst [vmem:[#allocation13_spill] sm:$0xff] %v15867_v42  ;;  %19135 = vst [vmem:[#allocation39_spill] sm:$0xff] %v15869_v60  ;;  %v1537_v10 = vshll.u32 %v1195_v14, 16  ;;  %v15879_v15 = vld [vmem:[#allocation2 + $0x98] sm:$0x1]  ;;  %v19138_v16 = vrot.slane %v15319_v40, 5  ;;  %v1618_v58 = vpop.permute.xlu0 %1617  ;;  %v1524_v63 = vor.u32 %v1523_v49, %v1520_v27 }
 0x17e   : > { %v4062_v2 = vsel %vm14128_vm10, %v15401_v12, %v19136_v55  ;;  %19137 = vst [vmem:[#allocation40_spill] sm:$0xff] %v15879_v15  ;;  %v2287_v54 = vld [vmem:[#allocation2 + $0x9c] sm:$0xf]  ;;  %v19139_v18 = vrot.slane %v15246_v17, 9  ;;  %v15887_v44 = vrot.slane %v1527_v0, 5  ;;  %v13666_v14 = vld [vmem:[#allocation3 + $0x28] sm:$0xff]  }
 0x17f   : > { %v15890_v35 = vld [vmem:[#allocation2 + $0x9c] sm:$0xe]  ;;  %v2288_v12 = vld [vmem:[#allocation2 + $0xa0] sm:$0xf]  ;;  %1701 = vst.msk [vmem:[#allocation3 + $0x3c] sm:$0xf] %vm1685_vm1, %v1620_v26  ;;  %4146 = vrot.lane.b32.xlu1 %v4062_v2, %s13998_s14  ;;  %13526 = vmatmul.mubr.msk.bf16.gmra.mxu0 %vm4380_vm3, %v13666_v14 }
 0x180   : > { %v4059_v62 = vsel %vm14128_vm10, %v19139_v18, %v19138_v16  ;;  %19140 = vst [vmem:[#allocation41_spill] sm:$0xff] %v15890_v35  ;;  %v15893_v31 = vld [vmem:[#allocation2 + $0xa0] sm:$0xf]  ;;  %v12386_v40 = vrot.slane %v960_v5, 11  ;;  %1700 = vst.msk [vmem:[#allocation3 + $0x38] sm:$0xf] %vm1685_vm1, %v1618_v58  ;;  %v1956_v18 = vpop.permute.xlu1 %1955 }
 0x181   : > { %19141 = vst [vmem:[#allocation42_spill] sm:$0xff] %v15893_v31  ;;  %v19142_v17 = vrot.slane %v15514_v43, 5  ;;  %v18993_v4 = vrot.slane %v15869_v60, 5  ;;  %v15903_v55 = vld [vmem:[#allocation2 + $0xa4] sm:$0x1]  ;;  %v2588_v26 = vshrl.u32 %v2287_v54, 16  ;;  %4144 = vrot.lane.b32.xlu0 %v4059_v62, %s13998_s14 }
 0x182   : > { %19143 = vst [vmem:[#allocation43_spill] sm:$0xff] %v15903_v55  ;;  %v1110_v16 = vld [vmem:[#allocation2 + $0x78] sm:$0xf]  ;;  %v15907_v27 = vrot.slane %v1531_v48, 4  ;;  %v2591_v49 = vshll.u32 %v2287_v54, 16  ;;  %v2597_v5 = vshll.u32 %v2288_v12, 16 }
 0x183   : > { %v4069_v0 = vsel %vm14128_vm10, %v15498_v41, %v19142_v17  ;;  %v2601_v2 = vshrl.u32 %v2288_v12, 16  ;;  %1142 = vst.msk [vmem:[#allocation3 + $0x50] sm:$0xf] %vm668_vm2, %v1110_v16  ;;  %v1111_v43 = vld [vmem:[#allocation2 + $0x7c] sm:$0xf]  ;;  %v19146_v17 = vld [vmem:[#allocation17_spill] sm:$0xff]  ;;  %v1954_v12 = vpop.permute.xlu0 %1953 }
 0x184   : > { %v19144_v41 = vld [vmem:[#allocation7_spill] sm:$0xff]  ;;  %v19147_v45 = vrot.slane %v19146_v17, 9  ;;  %v15916_v6 = vrot.slane %v1537_v10, 5  ;;  %v15919_v48 = vld [vmem:[#allocation2 + $0xa4] sm:$0x1]  ;;  %v19150_v16 = vld [vmem:[#allocation22_spill] sm:$0xff]  ;;  %4150 = vrot.lane.b32.xlu1 %v4069_v0, %s13998_s14  ;;  %v1960_v10 = vpop.permute.xlu1 %1959 }
 0x185   : > { %v19145_v58 = vrot.slane %v19144_v41, 5  ;;  %1143 = vst.msk [vmem:[#allocation3 + $0x54] sm:$0xf] %vm668_vm2, %v1111_v43  ;;  %v1081_v54 = vld [vmem:[#allocation2 + $0xbc] sm:$0x1]  ;;  %v19149_v14 = vld [vmem:[#allocation8_spill] sm:$0xff] }
 0x186   : > { %19148 = vst [vmem:[#allocation7_spill] sm:$0xff] %v15916_v6  ;;  %2039 = vst.msk [vmem:[#allocation3 + $0x34] sm:$0xf] %vm19023_vm4, %v1956_v18  ;;  %v1468_v41 = vsel %vm14230_vm14, %v19150_v16, %v19149_v14  ;;  %v15927_v17 = vrot.slane %v1524_v63, 4  ;;  %v1112_v62 = vld [vmem:[#allocation2 + $0x84] sm:$0xf] }
 0x187   : > { %v4066_v3 = vsel %vm14128_vm10, %v19147_v45, %v19145_v58  ;;  %v2291_v45 = vld [vmem:[#allocation2 + $0xac] sm:$0xf]  ;;  %v1082_v58 = vsel %vm14148_vm11, %v12386_v40, %v1081_v54  ;;  %2038 = vst.msk [vmem:[#allocation3 + $0x30] sm:$0xf] %vm19023_vm4, %v1954_v12  ;;  %v15936_v43 = vrot.slane %v18993_v4, 4  ;;  %v15940_v14 = vrot.slane %v2588_v26, 4  ;;  %v1958_v35 = vpop.permute.xlu0 %1957 }
 0x188   : > { %19151 = vst [vmem:[#allocation17_spill] sm:$0xff] %v15927_v17  ;;  %1083 = vst [vmem:[#allocation2 + $0xbc] sm:$0x1] %v1082_v58  ;;  %v1113_v16 = vld [vmem:[#allocation2 + $0x88] sm:$0xf]  ;;  %4148 = vrot.lane.b32.xlu0 %v4066_v3, %s13998_s14  ;;  %v2593_v40 = vrot.slane %v2591_v49, 5  ;;  %1631 = vrot.lane.b32.xlu1 %v1468_v41, %s13995_s11  ;;  %v1534_v17 = vor.u32 %v15907_v27, %v15887_v44 }
 0x189   : > { %19152 = vst [vmem:[#allocation8_spill] sm:$0xff] %v15936_v43  ;;  %1144 = vst.msk [vmem:[#allocation3 + $0x58] sm:$0xf] %vm668_vm2, %v1112_v62  ;;  %v15944_v54 = vrot.slane %v2597_v5, 5  ;;  %v2603_v0 = vrot.slane %v2601_v2, 4  ;;  %v2607_v12 = vshll.u32 %v15919_v48, 16 }
 0x18a   : > { %1145 = vst.msk [vmem:[#allocation3 + $0x5c] sm:$0xf] %vm668_vm2, %v1113_v16  ;;  %v19154_v4 = vld [vmem:[#allocation18_spill] sm:$0xff]  ;;  %v19155_v18 = vld [vmem:[#allocation21_spill] sm:$0xff]  ;;  %v2621_v63 = vshll.u32 %v2291_v45, 16  ;;  %v2625_v62 = vshrl.u32 %v2291_v45, 16  ;;  %v2149_v16 = vpop.permute.xlu1 %2148 }
 0x18b   : > { %19153 = vst [vmem:[#allocation22_spill] sm:$0xff] %v15944_v54  ;;  %v1458_v26 = vsel %vm14230_vm14, %v19155_v18, %v19154_v4  ;;  %v2290_v58 = vld [vmem:[#allocation2 + $0xa8] sm:$0xf]  ;;  %2041 = vst.msk [vmem:[#allocation3 + $0x3c] sm:$0xf] %vm19023_vm4, %v1960_v10  ;;  %v19157_v2 = vld [vmem:[#allocation26_spill] sm:$0xff]  ;;  %v2147_v57 = vpop.permute.xlu0 %2146 }
 0x18c   : > { %v3380_v3 = vld [vmem:[#allocation2 + $0xac] sm:$0xf]  ;;  %2040 = vst.msk [vmem:[#allocation3 + $0x38] sm:$0xf] %vm19023_vm4, %v1958_v35  ;;  %v15955_v49 = vld [vmem:[#allocation2 + $0xa0] sm:$0xf]  ;;  %1629 = vrot.lane.b32.xlu0 %v1458_v26, %s13995_s11 }
 0x18d   : > { %19156 = vst [vmem:[#allocation18_spill] sm:$0xff] %v15955_v49  ;;  %v3379_v5 = vld [vmem:[#allocation2 + $0xa8] sm:$0xf]  ;;  %v2612_v18 = vshrl.u32 %v2290_v58, 16  ;;  %v2615_v45 = vshll.u32 %v2290_v58, 16  ;;  %v19159_v55 = vld [vmem:[#allocation19_spill] sm:$0xff] }
 0x18e   : > { %v19158_v48 = vld [vmem:[#allocation25_spill] sm:$0xff]  ;;  %v19160_v10 = vld [vmem:[#allocation24_spill] sm:$0xff]  ;;  %v19161_v6 = vld [vmem:[#allocation14_spill] sm:$0xff]  ;;  %2232 = vst.msk [vmem:[#allocation3 + $0x34] sm:$0xf] %vm2218_vm8, %v2149_v16  ;;  %v3689_v60 = vshll.u32 %v3380_v3, 16 }
 0x18f   : > { %v1492_v4 = vsel %vm14230_vm14, %v19158_v48, %v19157_v2  ;;  %v1482_v35 = vsel %vm14230_vm14, %v19160_v10, %v19159_v55  ;;  %v19162_v41 = vrot.slane %v19161_v6, 5  ;;  %v19163_v43 = vld [vmem:[#allocation20_spill] sm:$0xff]  ;;  %v15975_v58 = vld [vmem:[#allocation2 + $0xac] sm:$0xf]  ;;  %v3680_v2 = vshrl.u32 %v3379_v5, 16  ;;  %v19166_v16 = vld [vmem:[#allocation23_spill] sm:$0xff] }
 0x190   : > { %v19164_v15 = vrot.slane %v19163_v43, 9  ;;  %v3683_v48 = vshll.u32 %v3379_v5, 16  ;;  %v3693_v42 = vshrl.u32 %v3380_v3, 16  ;;  %2231 = vst.msk [vmem:[#allocation3 + $0x30] sm:$0xf] %vm2218_vm8, %v2147_v57  ;;  %1635 = vrot.lane.b32.xlu1 %v1492_v4, %s13995_s11  ;;  %v2594_v6 = vor.u32 %v2593_v40, %v15940_v14  ;;  %1633 = vrot.lane.b32.xlu0 %v1482_v35, %s13995_s11  ;;  %v19168_v5 = vld [vmem:[#allocation28_spill] sm:$0xff]  ;;  %v2153_v35 = vpop.permute.xlu1 %2152 }
 0x191   : > { %v15981_v55 = vrot.slane %v2621_v63, 5  ;;  %v2627_v27 = vrot.slane %v2625_v62, 4  ;;  %v15983_v43 = vld [vmem:[#allocation2 + $0x9c] sm:$0xe]  ;;  %v19167_v10 = vrot.slane %v19166_v16, 5  ;;  %v19169_v57 = vrot.slane %v15564_v9, 5 }
 0x192   : > { %v1890_v26 = vsel %vm14128_vm10, %v19164_v15, %v19162_v41  ;;  %v2604_v15 = vor.u32 %v2603_v0, %v15944_v54  ;;  %19165 = vst [vmem:[#allocation21_spill] sm:$0xff] %v15983_v43  ;;  %v19170_v63 = vrot.slane %v15893_v31, 5  ;;  %v16001_v62 = vld [vmem:[#allocation2 + $0xa4] sm:$0x1]  ;;  %v16003_v4 = vld [vmem:[#allocation2 + $0xa8] sm:$0xe] }
 0x193   : > { %v1893_v3 = vsel %vm14128_vm10, %v19168_v5, %v19167_v10  ;;  %v1900_v14 = vsel %vm14128_vm10, %v15597_v56, %v19169_v57  ;;  %19172 = vst [vmem:[#allocation25_spill] sm:$0xff] %v16001_v62  ;;  %19173 = vst [vmem:[#allocation19_spill] sm:$0xff] %v16003_v4  ;;  %v16005_v41 = vrot.slane %v1534_v17, 4  ;;  %v2614_v16 = vrot.slane %v2612_v18, 4  ;;  %v2292_v9 = vld [vmem:[#allocation2 + $0xb0] sm:$0x1]  ;;  %v2151_v56 = vpop.permute.xlu0 %2150 }
 0x194   : > { %v15998_v40 = vrot.slane %v19170_v63, 4  ;;  %v2617_v10 = vrot.slane %v2615_v45, 5  ;;  %2234 = vst.msk [vmem:[#allocation3 + $0x3c] sm:$0xf] %vm2218_vm8, %v2153_v35  ;;  %v3682_v57 = vrot.slane %v3680_v2, 4  ;;  %v3685_v63 = vrot.slane %v3683_v48, 5  ;;  %1971 = vrot.lane.b32.xlu1 %v1893_v3, %s13992_s8  ;;  %1969 = vrot.lane.b32.xlu0 %v1890_v26, %s13992_s8 }
 0x195   : > { %v16009_v54 = vrot.slane %v3689_v60, 5  ;;  %v3381_v0 = vld [vmem:[#allocation2 + $0xb0] sm:$0x1]  ;;  %v3695_v31 = vrot.slane %v3693_v42, 4  ;;  %2233 = vst.msk [vmem:[#allocation3 + $0x38] sm:$0xf] %vm2218_vm8, %v2151_v56  ;;  %v2628_v5 = vor.u32 %v2627_v27, %v15981_v55 }
 0x196   : > { %19171 = vst [vmem:[#allocation26_spill] sm:$0xff] %v15998_v40  ;;  %v16013_v17 = vrot.slane %v2594_v6, 4  ;;  %v16015_v18 = vrot.slane %v2604_v15, 4  ;;  %v16017_v45 = vrot.slane %v2607_v12, 5  ;;  %v310_v40 = vld [vmem:[%s14054_s29 + $0x78] sm:$0xf]  ;;  %v2710_v15 = vpop.permute.xlu1 %2709  ;;  %v2618_v35 = vor.u32 %v2617_v10, %v2614_v16 }
 0x197   : > { %19174 = vst [vmem:[#allocation24_spill] sm:$0xff] %v16009_v54  ;;  %v2631_v2 = vshll.u32 %v2292_v9, 16  ;;  %v19175_v42 = vrot.slane %v15955_v49, 5  ;;  %v16028_v3 = vld [vmem:[#allocation2 + $0xb0] sm:$0x1]  ;;  %v19178_v12 = vrot.slane %v15548_v59, 5  ;;  %v3696_v59 = vor.u32 %v3695_v31, %v16009_v54 }
 0x198   : > { %19177 = vst [vmem:[#allocation20_spill] sm:$0xff] %v16028_v3  ;;  %v19179_v27 = vrot.slane %v15546_v51, 9  ;;  %v3699_v56 = vshll.u32 %v3381_v0, 16  ;;  %v3382_v60 = vld [vmem:[#allocation2 + $0xb4] sm:$0xf]  ;;  %v19180_v6 = vrot.slane %v15975_v58, 5  ;;  %v342_v51 = vmax.bf16 %v19061_v61, %v310_v40  ;;  %1975 = vrot.lane.b32.xlu1 %v1900_v14, %s13992_s8 }
 0x199   : > { %v16025_v48 = vrot.slane %v19175_v42, 4  ;;  %v2708_v42 = vpop.permute.xlu0 %2707  ;;  %2793 = vst.msk [vmem:[#allocation3 + $0x34] sm:$0xf] %vm19026_vm9, %v2710_v15  ;;  %v2079_v43 = vld [vmem:[#allocation2 + $0x88] sm:$0xf]  ;;  %v16047_v16 = vrot.slane %v2628_v5, 4 }
 0x19a   : > { %v1897_v26 = vsel %vm14128_vm10, %v19179_v27, %v19178_v12  ;;  %v16040_v49 = vrot.slane %v19180_v6, 4  ;;  %v311_v62 = vld [vmem:[%s14054_s29 + $0x7c] sm:$0xf]  ;;  %2792 = vst.msk [vmem:[#allocation3 + $0x30] sm:$0xf] %vm19026_vm9, %v2708_v42  ;;  %v16053_v6 = vrot.slane %v2631_v2, 5  ;;  %v2714_v40 = vpop.permute.xlu1 %2713 }
 0x19b   : > { %19176 = vst [vmem:[#allocation14_spill] sm:$0xff] %v16025_v48  ;;  %v3686_v48 = vor.u32 %v3685_v63, %v3682_v57  ;;  %v2078_v0 = vld [vmem:[#allocation2 + $0x84] sm:$0xf]  ;;  %v16050_v15 = vld [vmem:[#allocation2 + $0xb8] sm:$0xf]  ;;  %1973 = vrot.lane.b32.xlu0 %v1897_v26, %s13992_s8  ;;  %v3704_v57 = vshrl.u32 %v3382_v60, 16  ;;  %v343_v14 = vmax.bf16 %v19061_v61, %v311_v62 }
 0x19c   : > { %19181 = vst [vmem:[#allocation23_spill] sm:$0xff] %v16040_v49  ;;  %v603_v31 = vshrl.u32 %v342_v51, 16  ;;  %v606_v63 = vshll.u32 %v342_v51, 16  ;;  %v16055_v12 = vrot.slane %v2618_v35, 4  ;;  %v16057_v27 = vrot.slane %v3699_v56, 5  ;;  %2164 = vrot.lane.b32.xlu1 %v2079_v43, %s13991_s30 }
 0x19d   : > { %v2712_v5 = vpop.permute.xlu0 %2711  ;;  %2795 = vst.msk [vmem:[#allocation3 + $0x3c] sm:$0xf] %vm19026_vm9, %v2714_v40  ;;  %v2081_v42 = vld [vmem:[#allocation2 + $0x94] sm:$0xf]  ;;  %v16061_v10 = vrot.slane %v3686_v48, 4  ;;  %v16063_v9 = vrot.slane %v3696_v59, 4 }
 0x19e   : > { %19182 = vst [vmem:[#allocation28_spill] sm:$0xff] %v16057_v27  ;;  %v3707_v2 = vshll.u32 %v3382_v60, 16  ;;  %v605_v26 = vrot.slane %v603_v31, 7  ;;  %2794 = vst.msk [vmem:[#allocation3 + $0x38] sm:$0xf] %vm19026_vm9, %v2712_v5  ;;  %v3713_v35 = vshll.u32 %v16050_v15, 16 }
 0x19f   : > { %19183 = vst [vmem:[#allocation44_spill] sm:$0xff] %v16061_v10  ;;  %19184 = vst [vmem:[#allocation45_spill] sm:$0xff] %v16063_v9  ;;  %v779_v56 = vld [vmem:[#allocation2 + $0xc0] sm:$0xf]  ;;  %v611_v51 = vshrl.u32 %v343_v14, 16  ;;  %2162 = vrot.lane.b32.xlu0 %v2078_v0, %s13991_s30  ;;  %v16069_v62 = vrot.slane %v3704_v57, 4  ;;  %v3047_v9 = vpop.permute.xlu1 %3046 }
 0x1a0   : > { %v2080_v61 = vld [vmem:[#allocation2 + $0x90] sm:$0xf]  ;;  %v3717_v48 = vshrl.u32 %v16050_v15, 16  ;;  %v608_v40 = vor.u32 %v606_v63, %v605_v26  ;;  %v614_v59 = vshll.u32 %v343_v14, 16  ;;  %v1196_v60 = vld [vmem:[#allocation2 + $0xa8] sm:$0xf]  ;;  %2168 = vrot.lane.b32.xlu1 %v2081_v42, %s13991_s30  ;;  %v2562_v15 = vsel %vm14230_vm14, %v15616_v22, %v15600_v34 }
 0x1a1   : > { %v1197_v31 = vld [vmem:[#allocation2 + $0xac] sm:$0xf]  ;;  %v3045_v27 = vpop.permute.xlu0 %3044  ;;  %3130 = vst.msk [vmem:[#allocation3 + $0x34] sm:$0xf] %vm3116_vm12, %v3047_v9  ;;  %v16073_v43 = vrot.slane %v3707_v2, 5  ;;  %v609_v10 = vrot.slane %v605_v26, 4 }
 0x1a2   : > { %v780_v5 = vsel %vm14076_vm6, %v608_v40, %v779_v56  ;;  %v613_v0 = vrot.slane %v611_v51, 7  ;;  %3129 = vst.msk [vmem:[#allocation3 + $0x30] sm:$0xf] %vm3116_vm12, %v3045_v27  ;;  %v1199_v57 = vld [vmem:[#allocation2 + $0xb4] sm:$0xf]  ;;  %v1542_v9 = vshrl.u32 %v1196_v60, 16 }
 0x1a3   : > { %781 = vst [vmem:[#allocation2 + $0xc0] sm:$0xf] %v780_v5  ;;  %2166 = vrot.lane.b32.xlu0 %v2080_v61, %s13991_s30  ;;  %v1545_v63 = vshll.u32 %v1196_v60, 16  ;;  %v1551_v14 = vshll.u32 %v1197_v31, 16  ;;  %v783_v56 = vld [vmem:[#allocation2 + $0xc8] sm:$0x1]  ;;  %v3051_v26 = vpop.permute.xlu1 %3050 }
 0x1a4   : > { %v616_v2 = vor.u32 %v614_v59, %v613_v0  ;;  %v19185_v51 = vld [vmem:[#allocation27_spill] sm:$0xff]  ;;  %v1555_v42 = vshrl.u32 %v1197_v31, 16  ;;  %v618_v54 = vrot.slane %v613_v0, 4  ;;  %3132 = vst.msk [vmem:[#allocation3 + $0x3c] sm:$0xf] %vm3116_vm12, %v3051_v26  ;;  %v1566_v22 = vshrl.u32 %v1199_v57, 16  ;;  %2725 = vrot.lane.b32.xlu1 %v2562_v15, %s13996_s12 }
 0x1a5   : > { %v2552_v27 = vsel %vm14230_vm14, %v15610_v53, %v19185_v51  ;;  %v1200_v40 = vld [vmem:[#allocation2 + $0xb8] sm:$0xf]  ;;  %v3049_v49 = vpop.permute.xlu0 %3048  ;;  %v16089_v34 = vld [vmem:[#allocation2 + $0xa8] sm:$0xe]  ;;  %v1569_v61 = vshll.u32 %v1199_v57, 16  ;;  %v2586_v31 = vsel %vm14230_vm14, %v15629_v20, %v15650_v50  ;;  %v3719_v50 = vrot.slane %v3717_v48, 4 }
 0x1a6   : > { %19186 = vst [vmem:[#allocation27_spill] sm:$0xff] %v16089_v34  ;;  %v617_v59 = vsel %vm14070_vm5, %v609_v10, %v616_v2  ;;  %3131 = vst.msk [vmem:[#allocation3 + $0x38] sm:$0xf] %vm3116_vm12, %v3049_v49  ;;  %v16095_v60 = vld [vmem:[#allocation2 + $0xac] sm:$0xf]  ;;  %v784_v53 = vsel %vm14084_vm7, %v618_v54, %v783_v56  ;;  %v1575_v15 = vshll.u32 %v1200_v40, 16 }
 0x1a7   : > { %782 = vst.msk [vmem:[#allocation2 + $0xc4] sm:$0xf] %vm668_vm2, %v617_v59  ;;  %2723 = vrot.lane.b32.xlu0 %v2552_v27, %s13996_s12  ;;  %785 = vst [vmem:[#allocation2 + $0xc8] sm:$0x1] %v784_v53  ;;  %v3241_v10 = vpop.permute.xlu1 %3240  ;;  %v19187_v5 = vld [vmem:[#allocation29_spill] sm:$0xff]  ;;  %v1579_v57 = vshrl.u32 %v1200_v40, 16 }
 0x1a8   : > { %v2576_v49 = vsel %vm14230_vm14, %v15669_v13, %v19187_v5  ;;  %3324 = vst.msk [vmem:[#allocation3 + $0x34] sm:$0xf] %vm3310_vm13, %v3241_v10  ;;  %2729 = vrot.lane.b32.xlu1 %v2586_v31, %s13996_s12  ;;  %v16112_v56 = vrot.slane %v3713_v35, 5  ;;  %v3384_v20 = vld [vmem:[#allocation2 + $0xbc] sm:$0x1]  ;;  %v19189_v13 = vrot.slane %v15555_v1, 5 }
 0x1a9   : > { %v3239_v0 = vpop.permute.xlu0 %3238  ;;  %v19190_v27 = vld [vmem:[#allocation30_spill] sm:$0xff]  ;;  %v19192_v53 = vrot.slane %v15582_v37, 5  ;;  %v16128_v31 = vld [vmem:[#allocation2 + $0xb8] sm:$0xf]  ;;  %v1544_v10 = vrot.slane %v1542_v9, 4  ;;  %v1557_v1 = vrot.slane %v1555_v42, 4  ;;  %v3710_v9 = vor.u32 %v16073_v43, %v16069_v62 }
 0x1aa   : > { %v817_v54 = vld [vmem:[#allocation2 + $0xc0] sm:$0x2]  ;;  %v939_v2 = vld [vmem:[#allocation2 + $0xc0] sm:$0x1]  ;;  %3323 = vst.msk [vmem:[#allocation3 + $0x30] sm:$0xf] %vm3310_vm13, %v3239_v0 }
 0x1ab   : > { %19188 = vst [vmem:[#allocation29_spill] sm:$0xff] %v16112_v56  ;;  %v12369_v51 = vrot.slane %v817_v54, 9  ;;  %2727 = vrot.lane.b32.xlu0 %v2576_v49, %s13996_s12  ;;  %v19191_v59 = vrot.slane %v19190_v27, 9  ;;  %v2984_v35 = vsel %vm14128_vm10, %v15620_v25, %v19192_v53  ;;  %v3245_v5 = vpop.permute.xlu1 %3244  ;;  %v1547_v49 = vrot.slane %v1545_v63, 5  ;;  %v16135_v37 = vld [vmem:[#allocation2 + $0xb0] sm:$0x1] }
 0x1ac   : > { %v16130_v0 = vrot.slane %v1551_v14, 5  ;;  %3326 = vst.msk [vmem:[#allocation3 + $0x3c] sm:$0xf] %vm3310_vm13, %v3245_v5  ;;  %v1198_v27 = vld [vmem:[#allocation2 + $0xb0] sm:$0x1]  ;;  %v1568_v25 = vrot.slane %v1566_v22, 4  ;;  %3062 = vrot.lane.b32.xlu1 %v2984_v35, %s13994_s10 }
 0x1ad   : > { %v2981_v40 = vsel %vm14128_vm10, %v19191_v59, %v19189_v13  ;;  %v940_v54 = vsel %vm14084_vm7, %v12369_v51, %v939_v2  ;;  %v3243_v13 = vpop.permute.xlu0 %3242  ;;  %v1571_v59 = vrot.slane %v1569_v61, 5  ;;  %v16137_v53 = vrot.slane %v1575_v15, 5  ;;  %v16143_v14 = vld [vmem:[#allocation2 + $0xb4] sm:$0xe]  ;;  %v1201_v2 = vld [vmem:[#allocation2 + $0xbc] sm:$0x1] }
 0x1ae   : > { %v1581_v26 = vrot.slane %v1579_v57, 4  ;;  %941 = vst [vmem:[#allocation2 + $0xc0] sm:$0x1] %v940_v54  ;;  %3325 = vst.msk [vmem:[#allocation3 + $0x38] sm:$0xf] %vm3310_vm13, %v3243_v13  ;;  %v3723_v63 = vshll.u32 %v3384_v20, 16  ;;  %v3720_v51 = vor.u32 %v3719_v50, %v16112_v56  ;;  %v1558_v50 = vor.u32 %v1557_v1, %v16130_v0 }
 0x1af   : > { %3060 = vrot.lane.b32.xlu0 %v2981_v40, %s13994_s10  ;;  %v19193_v22 = vld [vmem:[#allocation34_spill] sm:$0xff]  ;;  %v19195_v15 = vld [vmem:[#allocation35_spill] sm:$0xff]  ;;  %v16153_v35 = vld [vmem:[#allocation2 + $0xac] sm:$0xf]  ;;  %v3802_v43 = vpop.permute.xlu1 %3801  ;;  %v1561_v34 = vshll.u32 %v1198_v27, 16  ;;  %v1585_v4 = vshll.u32 %v1201_v2, 16 }
 0x1b0   : > { %v19194_v61 = vrot.slane %v19193_v22, 5  ;;  %19196 = vst [vmem:[#allocation30_spill] sm:$0xff] %v16153_v35  ;;  %v961_v5 = vld [vmem:[#allocation2 + $0xc4] sm:$0x8]  ;;  %v1084_v62 = vld [vmem:[#allocation2 + $0xc8] sm:$0x1]  ;;  %v1548_v22 = vor.u32 %v1547_v49, %v1544_v10  ;;  %v1582_v56 = vor.u32 %v1581_v26, %v16137_v53 }
 0x1b1   : > { %v19197_v20 = vld [vmem:[#allocation31_spill] sm:$0xff]  ;;  %v19199_v13 = vld [vmem:[#allocation33_spill] sm:$0xff]  ;;  %v12387_v3 = vrot.slane %v961_v5, 11  ;;  %3885 = vst.msk [vmem:[#allocation3 + $0x34] sm:$0xf] %vm3871_vm15, %v3802_v43  ;;  %v19013_v49 = vrot.slane %v16153_v35, 5 }
 0x1b2   : > { %v2991_v57 = vsel %vm14128_vm10, %v19195_v15, %v19194_v61  ;;  %v19198_v54 = vrot.slane %v19197_v20, 5  ;;  %v19200_v42 = vrot.slane %v19199_v13, 9  ;;  %v16161_v48 = vld [vmem:[#allocation2 + $0xbc] sm:$0x1]  ;;  %v3800_v61 = vpop.permute.xlu0 %3799  ;;  %v1572_v15 = vor.u32 %v1571_v59, %v1568_v25  ;;  %v3171_v20 = vld [vmem:[#allocation2 + $0x94] sm:$0xf] }
 0x1b3   : > { %3884 = vst.msk [vmem:[#allocation3 + $0x30] sm:$0xf] %vm3871_vm15, %v3800_v61  ;;  %3066 = vrot.lane.b32.xlu1 %v2991_v57, %s13994_s10  ;;  %v1085_v27 = vsel %vm14148_vm11, %v12387_v3, %v1084_v62  ;;  %v16175_v1 = vrot.slane %v3720_v51, 4  ;;  %v16177_v26 = vrot.slane %v3723_v63, 5  ;;  %v19201_v25 = vrot.slane %v16095_v60, 5  ;;  %v3806_v57 = vpop.permute.xlu1 %3805 }
 0x1b4   : > { %v2988_v40 = vsel %vm14128_vm10, %v19200_v42, %v19198_v54  ;;  %v16168_v42 = vrot.slane %v3710_v9, 4  ;;  %v16184_v2 = vld [vmem:[#allocation2 + $0xa8] sm:$0xe]  ;;  %1086 = vst [vmem:[#allocation2 + $0xc8] sm:$0x1] %v1085_v27  ;;  %v19203_v43 = vrot.slane %v16128_v31, 5 }
 0x1b5   : > { %3064 = vrot.lane.b32.xlu0 %v2988_v40, %s13994_s10  ;;  %v16181_v59 = vrot.slane %v19201_v25, 4  ;;  %19202 = vst [vmem:[#allocation34_spill] sm:$0xff] %v16184_v2  ;;  %v3170_v5 = vld [vmem:[#allocation2 + $0x90] sm:$0xf]  ;;  %v16191_v62 = vrot.slane %v1548_v22, 4  ;;  %v16193_v63 = vrot.slane %v1561_v34, 5 }
 0x1b6   : > { %v16188_v3 = vrot.slane %v19203_v43, 4  ;;  %v3804_v54 = vpop.permute.xlu0 %3803  ;;  %3887 = vst.msk [vmem:[#allocation3 + $0x3c] sm:$0xf] %vm3871_vm15, %v3806_v57  ;;  %v3173_v13 = vld [vmem:[#allocation2 + $0xa0] sm:$0xf]  ;;  %v16196_v40 = vrot.slane %v1558_v50, 4 }
 0x1b7   : > { %v16198_v61 = vrot.slane %v1572_v15, 4  ;;  %v16200_v27 = vrot.slane %v1582_v56, 4  ;;  %v16202_v25 = vrot.slane %v1585_v4, 5  ;;  %3886 = vst.msk [vmem:[#allocation3 + $0x38] sm:$0xf] %vm3871_vm15, %v3804_v54  ;;  %3256 = vrot.lane.b32.xlu1 %v3171_v20, %s13993_s9  ;;  %v16211_v57 = vrot.slane %v19013_v49, 4  ;;  %v4139_v20 = vpop.permute.xlu1 %4138 }
 0x1b8   : > { %v3172_v22 = vld [vmem:[#allocation2 + $0x9c] sm:$0xf]  ;;  %v16207_v43 = vld [vmem:[#allocation2 + $0xb0] sm:$0x1]  ;;  %v794_v50 = vld [vmem:[#allocation2 + $0xcc] sm:$0xf] }
 0x1b9   : > { %19204 = vst [vmem:[#allocation35_spill] sm:$0xff] %v16200_v27  ;;  %19205 = vst [vmem:[#allocation31_spill] sm:$0xff] %v16202_v25  ;;  %3254 = vrot.lane.b32.xlu0 %v3170_v5, %s13993_s9  ;;  %v16214_v56 = vld [vmem:[#allocation2 + $0xb8] sm:$0xf]  ;;  %v2293_v4 = vld [vmem:[#allocation2 + $0xb4] sm:$0xf] }
 0x1ba   : > { %19206 = vst [vmem:[#allocation33_spill] sm:$0xff] %v16207_v43  ;;  %19207 = vst [vmem:[#allocation46_spill] sm:$0xff] %v16211_v57  ;;  %v19208_v15 = vld [vmem:[#allocation12_spill] sm:$0xff]  ;;  %v2294_v51 = vld [vmem:[#allocation2 + $0xb8] sm:$0xf]  ;;  %v4137_v9 = vpop.permute.xlu0 %4136  ;;  %v19209_v49 = vrot.slane %v15757_v36, 4 }
 0x1bb   : > { %v795_v54 = vsel %vm14076_vm6, %v19208_v15, %v794_v50  ;;  %v798_v34 = vld [vmem:[#allocation2 + $0xd4] sm:$0x1]  ;;  %4222 = vst.msk [vmem:[#allocation3 + $0x34] sm:$0xf] %vm4208_vm0, %v4139_v20  ;;  %4221 = vst.msk [vmem:[#allocation3 + $0x30] sm:$0xf] %vm4208_vm0, %v4137_v9  ;;  %3260 = vrot.lane.b32.xlu1 %v3173_v13, %s13993_s9  ;;  %v4143_v13 = vpop.permute.xlu1 %4142 }
 0x1bc   : > { %796 = vst [vmem:[#allocation2 + $0xcc] sm:$0xf] %v795_v54  ;;  %v799_v10 = vsel %vm14084_vm7, %v19209_v49, %v798_v34  ;;  %v2636_v50 = vshrl.u32 %v2293_v4, 16  ;;  %v2639_v15 = vshll.u32 %v2293_v4, 16  ;;  %v19210_v54 = vld [vmem:[#allocation37_spill] sm:$0xff]  ;;  %v19211_v20 = vld [vmem:[#allocation10_spill] sm:$0xff] }
 0x1bd   : > { %800 = vst [vmem:[#allocation2 + $0xd4] sm:$0x1] %v799_v10  ;;  %3258 = vrot.lane.b32.xlu0 %v3172_v22, %s13993_s9  ;;  %v3654_v36 = vsel %vm14230_vm14, %v19211_v20, %v19210_v54  ;;  %v16233_v57 = vld [vmem:[#allocation2 + $0xb4] sm:$0xe]  ;;  %v2645_v49 = vshll.u32 %v2294_v51, 16  ;;  %v2649_v9 = vshrl.u32 %v2294_v51, 16  ;;  %v3668_v51 = vsel %vm14230_vm14, %v15861_v47, %v15712_v46 }
 0x1be   : > { %v2297_v34 = vld [vmem:[#allocation2 + $0xc4] sm:$0xf]  ;;  %v19213_v5 = vld [vmem:[#allocation9_spill] sm:$0xff]  ;;  %v4141_v4 = vpop.permute.xlu0 %4140  ;;  %4224 = vst.msk [vmem:[#allocation3 + $0x3c] sm:$0xf] %vm4208_vm0, %v4143_v13  ;;  %v2638_v22 = vrot.slane %v2636_v50, 4 }
 0x1bf   : > { %v19212_v2 = vld [vmem:[#allocation32_spill] sm:$0xff]  ;;  %v16240_v10 = vld [vmem:[#allocation2 + $0xbc] sm:$0x1]  ;;  %4223 = vst.msk [vmem:[#allocation3 + $0x38] sm:$0xf] %vm4208_vm0, %v4141_v4  ;;  %3817 = vrot.lane.b32.xlu1 %v3654_v36, %s13997_s13  ;;  %v2641_v54 = vrot.slane %v2639_v15, 5  ;;  %v1624_v36 = vpop.permute.xlu1 %1623 }
 0x1c0   : > { %v3644_v30 = vsel %vm14230_vm14, %v19213_v5, %v19212_v2  ;;  %19214 = vst [vmem:[#allocation12_spill] sm:$0xff] %v16240_v10  ;;  %v2295_v20 = vld [vmem:[#allocation2 + $0xbc] sm:$0x1]  ;;  %v3678_v2 = vsel %vm14230_vm14, %v15842_v11, %v15865_v7  ;;  %v2669_v5 = vshll.u32 %v2297_v34, 16  ;;  %v2673_v13 = vshrl.u32 %v2297_v34, 16 }
 0x1c1   : > { %3815 = vrot.lane.b32.xlu0 %v3644_v30, %s13997_s13  ;;  %v16254_v15 = vrot.slane %v2645_v49, 5  ;;  %v2651_v30 = vrot.slane %v2649_v9, 4  ;;  %1703 = vst.msk [vmem:[#allocation3 + $0x44] sm:$0xf] %vm1685_vm1, %v1624_v36  ;;  %v19216_v47 = vrot.slane %v16214_v56, 5  ;;  %v2642_v34 = vor.u32 %v2641_v54, %v2638_v22  ;;  %v19218_v36 = vld [vmem:[#allocation38_spill] sm:$0xff] }
 0x1c2   : > { %v1622_v27 = vpop.permute.xlu0 %1621  ;;  %v13667_v46 = vld [vmem:[#allocation3 + $0x30] sm:$0xff]   ;;  %v2296_v11 = vld [vmem:[#allocation2 + $0xc0] sm:$0xf]  ;;  %v2655_v49 = vshll.u32 %v2295_v20, 16  ;;  %v19220_v50 = vld [vmem:[#allocation11_spill] sm:$0xff]  ;;  %v16278_v22 = vrot.slane %v2669_v5, 5 }
 0x1c3   : > { %v818_v4 = vld [vmem:[#allocation2 + $0xcc] sm:$0x2]  ;;  %v942_v43 = vld [vmem:[#allocation2 + $0xcc] sm:$0x1]  ;;  %19215 = vst [vmem:[#allocation37_spill] sm:$0xff] %v16254_v15  ;;  %v16259_v25 = vrot.slane %v19216_v47, 4  ;;  %3821 = vrot.lane.b32.xlu1 %v3678_v2, %s13997_s13  ;;  %13529 = vmatprep.mubr.msk.bf16.mxu0 %vm4380_vm3, %v13667_v46  ;;  %v1628_v54 = vpop.permute.xlu1 %1627 }
 0x1c4   : > { %v12370_v35 = vrot.slane %v818_v4, 9  ;;  %1702 = vst.msk [vmem:[#allocation3 + $0x40] sm:$0xf] %vm1685_vm1, %v1622_v27  ;;  %v1114_v4 = vld [vmem:[#allocation2 + $0x90] sm:$0xf]  ;;  %v19219_v47 = vrot.slane %v19218_v36, 5 }
 0x1c5   : > { %19217 = vst [vmem:[#allocation10_spill] sm:$0xff] %v16259_v25  ;;  %3819 = vrot.lane.b32.xlu0 %v3668_v51, %s13997_s13  ;;  %v16276_v2 = vld [vmem:[%s18952_s2] ss:$0 sm:$0xff]  ;;  %19221 = vst [vmem:[#allocation32_spill] sm:$0xff] %v16278_v22  ;;  %v2675_v39 = vrot.slane %v2673_v13, 4  ;;  %v19225_v46 = vld [vmem:[#allocation15_spill] sm:$0xff] }
 0x1c6   : > { %v943_v9 = vsel %vm14084_vm7, %v12370_v35, %v942_v43  ;;  %v4076_v27 = vsel %vm14128_vm10, %v19220_v50, %v19219_v47  ;;  %v16280_v35 = vld [vmem:[#allocation2 + $0xb8] sm:$0xf]  ;;  %1146 = vst.msk [vmem:[#allocation3 + $0x60] sm:$0xf] %vm668_vm2, %v1114_v4  ;;  %v1115_v43 = vld [vmem:[#allocation2 + $0x94] sm:$0xf]  ;;  %v2652_v47 = vor.u32 %v2651_v30, %v16254_v15  ;;  %v1626_v25 = vpop.permute.xlu0 %1625 }
 0x1c7   : > { %19222 = vst [vmem:[#allocation9_spill] sm:$0xff] %v16280_v35  ;;  %944 = vst [vmem:[#allocation2 + $0xcc] sm:$0x1] %v943_v9  ;;  %v19223_v20 = vld [vmem:[#allocation36_spill] sm:$0xff]  ;;  %v19226_v36 = vrot.slane %v19225_v46, 9  ;;  %v2660_v7 = vshrl.u32 %v2296_v11, 16  ;;  %4154 = vrot.lane.b32.xlu1 %v4076_v27, %s13998_s14 }
 0x1c8   : > { %v19224_v51 = vrot.slane %v19223_v20, 5  ;;  %v2663_v5 = vshll.u32 %v2296_v11, 16  ;;  %1147 = vst.msk [vmem:[#allocation3 + $0x64] sm:$0xf] %vm668_vm2, %v1115_v43  ;;  %v962_v13 = vld [vmem:[#allocation2 + $0xd0] sm:$0x8] }
 0x1c9   : > { %1705 = vst.msk [vmem:[#allocation3 + $0x4c] sm:$0xf] %vm1685_vm1, %v1628_v54  ;;  %v13668_v9 = vld [vmem:[#allocation3 + $0x38] sm:$0xff]   ;;  %v16292_v4 = vld [vmem:[#allocation2 + $0xc4] sm:$0xf]  ;;  %v12388_v10 = vrot.slane %v962_v13, 11 }
 0x1ca   : > { %v4073_v50 = vsel %vm14128_vm10, %v19226_v36, %v19224_v51  ;;  %19227 = vst [vmem:[#allocation38_spill] sm:$0xff] %v16292_v4  ;;  %1704 = vst.msk [vmem:[#allocation3 + $0x48] sm:$0xf] %vm1685_vm1, %v1626_v25  ;;  %vm5043_vm6 = vcmask 1043456   ;;  %v19228_v20 = vrot.slane %v15733_v8, 5  ;;  %v19229_v30 = vrot.slane %v15801_v28, 9  ;;  %v13519_v25 = vpop.f32.mrf.mxu0  ;;  %13530 = vmatmul.mubr.msk.bf16.gmra.mxu0 %vm4380_vm3, %v13668_v9  ;;  %v1962_v38 = vpop.permute.xlu0 %1961 }
 0x1cb   : > { %v16302_v43 = vrot.slane %v2642_v34, 4  ;;  %v16304_v51 = vrot.slane %v2655_v49, 5  ;;  %v16306_v54 = vld [vmem:[#allocation2 + $0xb4] sm:$0xe]  ;;  %v1087_v46 = vld [vmem:[#allocation2 + $0xd4] sm:$0x1]  ;;  %4152 = vrot.lane.b32.xlu0 %v4073_v50, %s13998_s14  ;;  %v2676_v28 = vor.u32 %v2675_v39, %v16278_v22  ;;  %v4476_v50 = vadd.f32 %v13519_v25, %v16276_v2 }
 0x1cc   : > { %v4080_v11 = vsel %vm14128_vm10, %v19229_v30, %v19228_v20  ;;  %19232 = vst [vmem:[#allocation15_spill] sm:$0xff] %v16306_v54  ;;  %v19233_v27 = vrot.slane %v15811_v29, 5  ;;  %v16316_v34 = vld [vmem:[#allocation2 + $0xbc] sm:$0x1]  ;;  %v1088_v49 = vsel %vm14148_vm11, %v12388_v10, %v1087_v46  ;;  %v1117_v13 = vld [vmem:[#allocation2 + $0xa0] sm:$0xf]  ;;  %v1964_v20 = vpop.permute.xlu1 %1963  ;;  %v4467_v10 = vpop.f32.mrf.mxu0  ;;  %v1506_v39 = vsel %vm14230_vm14, %v15849_v19, %v15793_v32 }
 0x1cd   : > { %19230 = vst [vmem:[#allocation11_spill] sm:$0xff] %v16302_v43  ;;  %19231 = vst [vmem:[#allocation36_spill] sm:$0xff] %v16304_v51  ;;  %v1116_v36 = vld [vmem:[#allocation2 + $0x9c] sm:$0xf]  ;;  %v16321_v30 = vrot.slane %v2652_v47, 4  ;;  %v2662_v47 = vrot.slane %v2660_v7, 4 }
 0x1ce   : > { %v4083_v8 = vsel %vm14128_vm10, %v15846_v33, %v19233_v27  ;;  %19234 = vst [vmem:[#allocation47_spill] sm:$0xff] %v16316_v34  ;;  %v16324_v9 = vld [vmem:[#allocation2 + $0xc0] sm:$0xe]  ;;  %1089 = vst [vmem:[#allocation2 + $0xd4] sm:$0x1] %v1088_v49  ;;  %v2665_v46 = vrot.slane %v2663_v5, 5  ;;  %v4468_v27 = vadd.f32 %v16276_v2, %v4467_v10 }
 0x1cf   : > { %19235 = vst [vmem:[#allocation48_spill] sm:$0xff] %v16321_v30  ;;  %19236 = vst [vmem:[#allocation49_spill] sm:$0xff] %v16324_v9  ;;  %v4596_v25 = vmax.f32 %v4476_v50, 0.0  ;;  %4158 = vrot.lane.b32.xlu1 %v4083_v8, %s13998_s14  ;;  %v2298_v49 = vld [vmem:[#allocation2 + $0xc8] sm:$0x1]  ;;  %vm5049_vm7 = vcmask 1040384   ;;  %4156 = vrot.lane.b32.xlu0 %v4080_v11, %s13998_s14 }
 0x1d0   : > { %1148 = vst.msk [vmem:[#allocation3 + $0x68] sm:$0xf] %vm668_vm2, %v1116_v36  ;;  %1149 = vst.msk [vmem:[#allocation3 + $0x6c] sm:$0xf] %vm668_vm2, %v1117_v13  ;;  %v19237_v32 = vld [vmem:[#allocation13_spill] sm:$0xff]  ;;  %v19238_v7 = vld [vmem:[#allocation39_spill] sm:$0xff]  ;;  %v1968_v34 = vpop.permute.xlu1 %1967 }
 0x1d1   : > { %2043 = vst.msk [vmem:[#allocation3 + $0x44] sm:$0xf] %vm19023_vm4, %v1964_v20  ;;  %2042 = vst.msk [vmem:[#allocation3 + $0x40] sm:$0xf] %vm19023_vm4, %v1962_v38  ;;  %v13520_v20 = vpop.f32.mrf.mxu0  ;;  %v1516_v19 = vsel %vm14230_vm14, %v19237_v32, %v15855_v52  ;;  %v19239_v5 = vrot.slane %v19238_v7, 5  ;;  %v19240_v50 = vld [vmem:[#allocation16_spill] sm:$0xff]  ;;  %v12973_v11 = vpack.c.bf16 %v4596_v25, %v4596_v25  ;;  %v2666_v25 = vor.u32 %v2665_v46, %v2662_v47 }
 0x1d2   : > { %v19241_v38 = vrot.slane %v19240_v50, 9  ;;  %v16352_v10 = vrot.slane %v2676_v28, 4  ;;  %v3385_v36 = vld [vmem:[#allocation2 + $0xc0] sm:$0xf]  ;;  %v4594_v33 = vmax.f32 %v4468_v27, 0.0  ;;  %v4479_v29 = vadd.f32 %v13520_v20, %v16276_v2  ;;  %v1966_v50 = vpop.permute.xlu0 %1965  ;;  %v19246_v28 = vld [vmem:[#allocation17_spill] sm:$0xff] }
 0x1d3   : > { %v19243_v52 = vrot.slane %v16280_v35, 5  ;;  %v16360_v7 = vld [vmem:[#allocation2 + $0xc8] sm:$0x1]  ;;  %2045 = vst.msk [vmem:[#allocation3 + $0x4c] sm:$0xf] %vm19023_vm4, %v1968_v34  ;;  %v2679_v27 = vshll.u32 %v2298_v49, 16  ;;  %1639 = vrot.lane.b32.xlu1 %v1516_v19, %s13995_s11  ;;  %1637 = vrot.lane.b32.xlu0 %v1506_v39, %s13995_s11 }
 0x1d4   : > { %v16350_v8 = vsel %vm14128_vm10, %v19241_v38, %v19239_v5  ;;  %19242 = vst [vmem:[#allocation13_spill] sm:$0xff] %v16352_v10  ;;  %19245 = vst [vmem:[#allocation16_spill] sm:$0xff] %v16360_v7  ;;  %v4470_v5 = vpop.f32.mrf.mxu0  ;;  %v1530_v38 = vsel %vm14230_vm14, %v19246_v28, %v15887_v44  ;;  %v19247_v20 = vrot.slane %v16292_v4, 5  ;;  %v4740_v9 = vshrl.u32 %v12973_v11, 16  ;;  %v19249_v34 = vld [vmem:[#allocation40_spill] sm:$0xff]  ;;  %v19283_v30 = vld [vmem:[#allocation21_spill] sm:$0xff] }
 0x1d5   : > { %v16358_v32 = vrot.slane %v19243_v52, 4  ;;  %v12971_v52 = vpack.c.bf16 %v4594_v33, %v4594_v33  ;;  %2044 = vst.msk [vmem:[#allocation3 + $0x48] sm:$0xf] %vm19023_vm4, %v1966_v50  ;;  %v19250_v54 = vrot.slane %v19249_v34, 5  ;;  %v19251_v35 = vld [vmem:[#allocation8_spill] sm:$0xff]  ;;  %v4471_v49 = vadd.f32 %v16276_v2, %v4470_v5  ;;  %v19252_v33 = vld [vmem:[#allocation7_spill] sm:$0xff] }
 0x1d6   : > { %v16369_v13 = vrot.slane %v19247_v20, 4  ;;  %v16378_v44 = vld [vmem:[#allocation2 + $0xc4] sm:$0xf]  ;;  %v5054_v47 = vld [vmem:[#allocation4 + $0x18] sm:$0xf]  ;;  %v3728_v19 = vshrl.u32 %v3385_v36, 16  ;;  %v2155_v39 = vpop.permute.xlu0 %2154 }
 0x1d7   : > { %19244 = vst [vmem:[#allocation39_spill] sm:$0xff] %v16358_v32  ;;  %v4597_v32 = vmax.f32 %v4479_v29, 0.0  ;;  %v1907_v22 = vsel %vm14128_vm10, %v19251_v35, %v19250_v54  ;;  %v5159_v46 = vld [vmem:[#allocation4] sm:$0xf]  ;;  %v1540_v29 = vsel %vm14230_vm14, %v16005_v41, %v19252_v33  ;;  %v3731_v50 = vshll.u32 %v3385_v36, 16  ;;  %v2157_v35 = vpop.permute.xlu1 %2156  ;;  %1641 = vrot.lane.b32.xlu0 %v1530_v38, %s13995_s11 }
 0x1d8   : > { %19248 = vst [vmem:[#allocation17_spill] sm:$0xff] %v16369_v13  ;;  %v4742_v28 = vrot.slane %v4740_v9, 7  ;;  %v4743_v20 = vshll.u32 %v12973_v11, 16  ;;  %v4723_v34 = vshrl.u32 %v12971_v52, 16  ;;  %vm19253_vm11 = vsmask.f32 7938  ;;  %1643 = vrot.lane.b32.xlu1 %v1540_v29, %s13995_s11 }
 0x1d9   : > { %v12974_v13 = vpack.c.bf16 %v4597_v32, %v4597_v32  ;;  %vm16388_vm4 = vmand %vm5043_vm6, %vm19253_vm11  ;;  %v4595_v2 = vmax.f32 %v4471_v49, 0.0  ;;  %2236 = vst.msk [vmem:[#allocation3 + $0x44] sm:$0xf] %vm2218_vm8, %v2157_v35  ;;  %v16393_v5 = vrot.slane %v2666_v25, 4  ;;  %v3737_v9 = vshll.u32 %v16378_v44, 16 }
 0x1da   : > { %v4745_v36 = vor.u32 %v4743_v20, %v4742_v28  ;;  %v4725_v11 = vrot.slane %v4723_v34, 7  ;;  %v4726_v32 = vshll.u32 %v12971_v52, 16  ;;  %v5045_v33 = vld [vmem:[#allocation4 + $0xc] sm:$0xf]  ;;  %2235 = vst.msk [vmem:[#allocation3 + $0x40] sm:$0xf] %vm2218_vm8, %v2155_v39 }
 0x1db   : > { %19256 = vst [vmem:[#allocation40_spill] sm:$0xff] %v16393_v5  ;;  %v4748_v4 = vshrl.u32 %v12974_v13, 16  ;;  %v12972_v10 = vpack.c.bf16 %v4595_v2, %v4595_v2  ;;  %v16400_v49 = vrot.slane %v2679_v27, 5  ;;  %v16402_v25 = vrot.slane %v3728_v19, 4  ;;  %v5058_v41 = vld [vmem:[#allocation4 + $0x20] sm:$0x1]  ;;  %v2161_v7 = vpop.permute.xlu1 %2160  ;;  %v2159_v2 = vpop.permute.xlu0 %2158  ;;  %1977 = vrot.lane.b32.xlu0 %v16350_v8, %s13992_s8 }
 0x1dc   : > { %v3741_v35 = vshrl.u32 %v16378_v44, 16  ;;  %v5055_v20 = vsel %vm16388_vm4, %v4745_v36, %v5054_v47  ;;  %v5160_v52 = vsel %vm16388_vm4, %v4745_v36, %v5159_v46  ;;  %v4728_v34 = vor.u32 %v4726_v32, %v4725_v11  ;;  %v5163_v39 = vld [vmem:[#allocation4 + $0x8] sm:$0x1]  ;;  %2238 = vst.msk [vmem:[#allocation3 + $0x4c] sm:$0xf] %vm2218_vm8, %v2161_v7  ;;  %1979 = vrot.lane.b32.xlu1 %v1907_v22, %s13992_s8  ;;  %v19264_v32 = vld [vmem:[#allocation43_spill] sm:$0xff] }
 0x1dd   : > { %19257 = vst [vmem:[#allocation8_spill] sm:$0xff] %v16400_v49  ;;  %v16409_v29 = vrot.slane %v3731_v50, 5  ;;  %5056 = vst [vmem:[#allocation4 + $0x18] sm:$0xf] %v5055_v20  ;;  %v4750_v38 = vrot.slane %v4748_v4, 7  ;;  %v4751_v27 = vshll.u32 %v12974_v13, 16 }
 0x1de   : > { %5161 = vst [vmem:[#allocation4] sm:$0xf] %v5160_v52  ;;  %v4731_v19 = vshrl.u32 %v12972_v10, 16  ;;  %v16412_v44 = vrot.slane %v3737_v9, 5  ;;  %v4746_v47 = vrot.slane %v4742_v28, 4  ;;  %v19260_v46 = vmov 0 }
 0x1df   : > { %vm19259_vm6 = vsmask.f32 256  ;;  %v5046_v50 = vsel %vm16388_vm4, %v4728_v34, %v5045_v33  ;;  %v4734_v36 = vshll.u32 %v12972_v10, 16  ;;  %2237 = vst.msk [vmem:[#allocation3 + $0x48] sm:$0xf] %vm2218_vm8, %v2159_v2  ;;  %v4753_v13 = vor.u32 %v4751_v27, %v4750_v38  ;;  %v19266_v52 = vld [vmem:[#allocation26_spill] sm:$0xff]  ;;  %v2718_v34 = vpop.permute.xlu1 %2717 }
 0x1e0   : > { %19258 = vst [vmem:[#allocation7_spill] sm:$0xff] %v16412_v44  ;;  %vm16416_vm11 = vmand %vm5049_vm7, %vm19259_vm6  ;;  %v16424_v4 = vld [vmem:[#allocation2 + $0xc8] sm:$0x1]  ;;  %v4755_v7 = vrot.slane %v4750_v38, 4  ;;  %v4733_v28 = vrot.slane %v4731_v19, 7  ;;  %v19265_v20 = vrot.slane %v19264_v32, 5  ;;  %v2716_v32 = vpop.permute.xlu0 %2715 }
 0x1e1   : > { %v19261_v46 = vsel %vm16416_vm11, 4294967295, %v19260_v46  ;;  %19263 = vst [vmem:[#allocation51_spill] sm:$0xff] %v16424_v4  ;;  %5047 = vst [vmem:[#allocation4 + $0xc] sm:$0xf] %v5046_v50  ;;  %v5051_v9 = vld [vmem:[#allocation4 + $0x14] sm:$0x1]  ;;  %v4754_v8 = vsel %vm14070_vm5, %v4746_v47, %v4753_v13 }
 0x1e2   : > { %19262 = vst [vmem:[#allocation50_spill] sm:$0xff] %v19261_v46  ;;  %v1914_v10 = vsel %vm14128_vm10, %v19266_v52, %v19265_v20  ;;  %v4729_v33 = vrot.slane %v4725_v11, 4  ;;  %v19267_v2 = vld [vmem:[#allocation42_spill] sm:$0xff]  ;;  %v19269_v5 = vld [vmem:[#allocation41_spill] sm:$0xff]  ;;  %v16439_v27 = vrot.slane %v3741_v35, 4  ;;  %v5059_v19 = vsel %vm16416_vm11, %v4755_v7, %v5058_v41 }
 0x1e3   : > { %v19268_v22 = vrot.slane %v19267_v2, 5  ;;  %v19270_v49 = vrot.slane %v19269_v5, 9  ;;  %v5164_v50 = vsel %vm16416_vm11, %v4755_v7, %v5163_v39  ;;  %v4736_v11 = vor.u32 %v4734_v36, %v4733_v28  ;;  %2797 = vst.msk [vmem:[#allocation3 + $0x44] sm:$0xf] %vm19026_vm9, %v2718_v34  ;;  %v2083_v20 = vld [vmem:[#allocation2 + $0xa0] sm:$0xf]  ;;  %1983 = vrot.lane.b32.xlu1 %v1914_v10, %s13992_s8  ;;  %v2722_v13 = vpop.permute.xlu1 %2721 }
 0x1e4   : > { %19271 = vst [vmem:[#allocation43_spill] sm:$0xff] %v16439_v27  ;;  %5057 = vst [vmem:[#allocation4 + $0x1c] sm:$0xf] %v4754_v8  ;;  %v4738_v5 = vrot.slane %v4733_v28, 4  ;;  %v5176_v47 = vld [vmem:[#allocation4 + $0x18] sm:$0x2]  ;;  %v2720_v34 = vpop.permute.xlu0 %2719 }
 0x1e5   : > { %v1911_v38 = vsel %vm14128_vm10, %v19270_v49, %v19268_v22  ;;  %5060 = vst [vmem:[#allocation4 + $0x20] sm:$0x1] %v5059_v19  ;;  %5162 = vst [vmem:[#allocation4 + $0x4] sm:$0xf] %v4754_v8  ;;  %v2082_v49 = vld [vmem:[#allocation2 + $0x9c] sm:$0xf]  ;;  %v4737_v35 = vsel %vm14070_vm5, %v4729_v33, %v4736_v11 }
 0x1e6   : > { %5165 = vst [vmem:[#allocation4 + $0x8] sm:$0x1] %v5164_v50  ;;  %2796 = vst.msk [vmem:[#allocation3 + $0x40] sm:$0xf] %vm19026_vm9, %v2716_v32  ;;  %1981 = vrot.lane.b32.xlu0 %v1911_v38, %s13992_s8  ;;  %v5174_v39 = vld [vmem:[#allocation4] sm:$0x2]  ;;  %v5052_v36 = vsel %vm16416_vm11, %v4738_v5, %v5051_v9 }
 0x1e7   : > { %5048 = vst [vmem:[#allocation4 + $0x10] sm:$0xf] %v4737_v35  ;;  %v16456_v7 = vld [vmem:[#allocation2 + $0xd0] sm:$0xf]  ;;  %v12505_v28 = vrot.slane %v5174_v39, 9  ;;  %v12507_v52 = vrot.slane %v5176_v47, 9  ;;  %2172 = vrot.lane.b32.xlu1 %v2083_v20, %s13991_s30  ;;  %v3055_v20 = vpop.permute.xlu1 %3054 }
 0x1e8   : > { %v5264_v10 = vld [vmem:[#allocation4] sm:$0x1]  ;;  %5053 = vst [vmem:[#allocation4 + $0x14] sm:$0x1] %v5052_v36  ;;  %2799 = vst.msk [vmem:[#allocation3 + $0x4c] sm:$0xf] %vm19026_vm9, %v2722_v13 }
 0x1e9   : > { %v2085_v2 = vld [vmem:[#allocation2 + $0xac] sm:$0xf]  ;;  %v5270_v22 = vld [vmem:[#allocation4 + $0x18] sm:$0x1]  ;;  %v5175_v38 = vld [vmem:[#allocation4 + $0xc] sm:$0x2]  ;;  %v5265_v8 = vsel %vm16416_vm11, %v12505_v28, %v5264_v10  ;;  %v3053_v10 = vpop.permute.xlu0 %3052 }
 0x1ea   : > { %v16459_v33 = vld [vmem:[#allocation2 + $0xcc] sm:$0xf]  ;;  %2798 = vst.msk [vmem:[#allocation3 + $0x48] sm:$0xf] %vm19026_vm9, %v2720_v34  ;;  %v16463_v9 = vld [vmem:[#allocation4] sm:$0xe]  ;;  %v5271_v19 = vsel %vm16416_vm11, %v12507_v52, %v5270_v22  ;;  %2170 = vrot.lane.b32.xlu0 %v2082_v49, %s13991_s30 }
 0x1eb   : > { %v12506_v50 = vrot.slane %v5175_v38, 9  ;;  %v2084_v11 = vld [vmem:[#allocation2 + $0xa8] sm:$0xf]  ;;  %v16470_v32 = vld [vmem:[#allocation4 + $0xc] sm:$0xe]  ;;  %v19273_v52 = vmov 0  ;;  %2176 = vrot.lane.b32.xlu1 %v2085_v2, %s13991_s30 }
 0x1ec   : > { %5266 = vst [vmem:[#allocation4] sm:$0x1] %v5265_v8  ;;  %5272 = vst [vmem:[#allocation4 + $0x18] sm:$0x1] %v5271_v19  ;;  %v5267_v35 = vld [vmem:[#allocation4 + $0xc] sm:$0x1] }
 0x1ed   : > { %v16473_v39 = vld [vmem:[#allocation4 + $0x18] sm:$0xe]  ;;  %v5268_v13 = vsel %vm16416_vm11, %v12506_v50, %v5267_v35  ;;  %v5318_v28 = vld [vmem:[#allocation4 + $0x4] sm:$0x8]  ;;  %v5320_v49 = vld [vmem:[#allocation4 + $0x1c] sm:$0x8] }
 0x1ee   : > { %vm19272_vm6 = vsmask.f32 7938  ;;  %3134 = vst.msk [vmem:[#allocation3 + $0x44] sm:$0xf] %vm3116_vm12, %v3055_v20  ;;  %5269 = vst [vmem:[#allocation4 + $0xc] sm:$0x1] %v5268_v13  ;;  %2174 = vrot.lane.b32.xlu0 %v2084_v11, %s13991_s30  ;;  %v3059_v11 = vpop.permute.xlu1 %3058 }
 0x1ef   : > { %vm16481_vm9 = vmand %vm5049_vm7, %vm19272_vm6  ;;  %v12523_v38 = vrot.slane %v5318_v28, 11  ;;  %v12525_v8 = vrot.slane %v5320_v49, 11  ;;  %v5409_v19 = vld [vmem:[#allocation4 + $0x8] sm:$0x1]  ;;  %v16488_v50 = vld [vmem:[#allocation4 + $0x4] sm:$0xf]  ;;  %v2610_v28 = vsel %vm14230_vm14, %v16015_v18, %v16017_v45  ;;  %v2624_v45 = vsel %vm14230_vm14, %v16055_v12, %v15981_v55 }
 0x1f0   : > { %v19274_v52 = vsel %vm16481_vm9, 4294967295, %v19273_v52  ;;  %3133 = vst.msk [vmem:[#allocation3 + $0x40] sm:$0xf] %vm3116_vm12, %v3053_v10  ;;  %v5415_v35 = vld [vmem:[#allocation4 + $0x20] sm:$0x1]  ;;  %v19276_v20 = vld [vmem:[#allocation22_spill] sm:$0xff]  ;;  %2733 = vrot.lane.b32.xlu1 %v2610_v28, %s13996_s12 }
 0x1f1   : > { %19275 = vst [vmem:[#allocation26_spill] sm:$0xff] %v19274_v52  ;;  %v16492_v41 = vld [vmem:[#allocation4 + $0x1c] sm:$0xf]  ;;  %v2600_v13 = vsel %vm14230_vm14, %v16013_v17, %v19276_v20  ;;  %v5410_v2 = vsel %vm16481_vm9, %v12523_v38, %v5409_v19  ;;  %v5416_v49 = vsel %vm16481_vm9, %v12525_v8, %v5415_v35  ;;  %v5319_v47 = vld [vmem:[#allocation4 + $0x10] sm:$0x8]  ;;  %v5585_v22 = vshll.u32 %v16488_v50, 16  ;;  %v3057_v19 = vpop.permute.xlu0 %3056 }
 0x1f2   : > { %v16494_v36 = vld [vmem:[#allocation4 + $0x1c] sm:$0xf]  ;;  %5411 = vst [vmem:[#allocation4 + $0x8] sm:$0x1] %v5410_v2  ;;  %5417 = vst [vmem:[#allocation4 + $0x20] sm:$0x1] %v5416_v49  ;;  %2731 = vrot.lane.b32.xlu0 %v2600_v13, %s13996_s12 }
 0x1f3   : > { %v16509_v10 = vld [vmem:[#allocation4 + $0x1c] sm:$0xf]  ;;  %v12524_v38 = vrot.slane %v5319_v47, 11  ;;  %3136 = vst.msk [vmem:[#allocation3 + $0x4c] sm:$0xf] %vm3116_vm12, %v3059_v11  ;;  %v2634_v11 = vsel %vm14230_vm14, %v16047_v16, %v16053_v6 }
 0x1f4   : > { %v6024_v8 = vld [vmem:[#allocation4 + $0x4] sm:$0xf]  ;;  %v5412_v20 = vld [vmem:[#allocation4 + $0x14] sm:$0x1]  ;;  %3135 = vst.msk [vmem:[#allocation3 + $0x48] sm:$0xf] %vm3116_vm12, %v3057_v19  ;;  %2737 = vrot.lane.b32.xlu1 %v2634_v11, %s13996_s12 }
 0x1f5   : > { %v6121_v2 = vrot.slane %v6024_v8, 5  ;;  %v6296_v49 = vld [vmem:[#allocation4 + $0x10] sm:$0xf]  ;;  %v16520_v5 = vld [vmem:[#allocation4] sm:$0xf]  ;;  %v5413_v47 = vsel %vm16481_vm9, %v12524_v38, %v5412_v20  ;;  %v3249_v8 = vpop.permute.xlu1 %3248  ;;  %v16540_v20 = vrot.slane %v5585_v22, 5 }
 0x1f6   : > { %v16522_v17 = vld [vmem:[#allocation4 + $0x18] sm:$0xf]  ;;  %6328 = vst [vmem:[#allocation5 + $0x30] sm:$0xf] %v6296_v49  ;;  %v5576_v28 = vshrl.u32 %v16520_v5, 16  ;;  %v19277_v22 = vrot.slane %v16463_v9, 9  ;;  %2735 = vrot.lane.b32.xlu0 %v2624_v45, %s13996_s12 }
 0x1f7   : > { %v16524_v18 = vld [vmem:[#allocation4 + $0x18] sm:$0xf]  ;;  %5414 = vst [vmem:[#allocation4 + $0x14] sm:$0x1] %v5413_v47  ;;  %v6027_v38 = vld [vmem:[#allocation4 + $0x10] sm:$0xf]  ;;  %v3247_v47 = vpop.permute.xlu0 %3246 }
 0x1f8   : > { %v16534_v19 = vld [vmem:[#allocation4 + $0x18] sm:$0xf]  ;;  %v16546_v49 = vld [vmem:[#allocation4 + $0xc] sm:$0xf]  ;;  %3328 = vst.msk [vmem:[#allocation3 + $0x44] sm:$0xf] %vm3310_vm13, %v3249_v8  ;;  %v6122_v6 = vsel %vm14128_vm10, %v19277_v22, %v6121_v2 }
 0x1f9   : > { %v5600_v12 = vshrl.u32 %v16546_v49, 16  ;;  %3327 = vst.msk [vmem:[#allocation3 + $0x40] sm:$0xf] %vm3310_vm13, %v3247_v47  ;;  %v16559_v35 = vld [vmem:[#allocation4 + $0xc] sm:$0xf]  ;;  %v19278_v8 = vld [vmem:[#allocation25_spill] sm:$0xff]  ;;  %v3253_v43 = vpop.permute.xlu1 %3252 }
 0x1fa   : > { %v19279_v34 = vrot.slane %v19278_v8, 5  ;;  %v19280_v55 = vld [vmem:[#allocation14_spill] sm:$0xff]  ;;  %6263 = vst [vmem:[#allocation5 + $0x8] sm:$0xf] %v6122_v6  ;;  %v6295_v47 = vld [vmem:[#allocation4 + $0xc] sm:$0xf] }
 0x1fb   : > { %v6128_v11 = vrot.slane %v6027_v38, 5  ;;  %v19281_v9 = vld [vmem:[#allocation18_spill] sm:$0xff]  ;;  %v19284_v22 = vrot.slane %v19283_v30, 9  ;;  %v6025_v51 = vld [vmem:[#allocation4 + $0x8] sm:$0x1]  ;;  %v3251_v8 = vpop.permute.xlu0 %3250  ;;  %v19286_v6 = vld [vmem:[#allocation19_spill] sm:$0xff] }
 0x1fc   : > { %v2998_v13 = vsel %vm14128_vm10, %v19280_v55, %v19279_v34  ;;  %v19282_v15 = vrot.slane %v19281_v9, 5  ;;  %6327 = vst [vmem:[#allocation5 + $0xc] sm:$0xf] %v6295_v47  ;;  %v6297_v45 = vld [vmem:[#allocation4 + $0x18] sm:$0xf]  ;;  %v19285_v34 = vrot.slane %v15975_v58, 5 }
 0x1fd   : > { %v6298_v52 = vld [vmem:[#allocation4 + $0x1c] sm:$0xf]  ;;  %3330 = vst.msk [vmem:[#allocation3 + $0x4c] sm:$0xf] %vm3310_vm13, %v3253_v43  ;;  %v19287_v55 = vrot.slane %v19286_v6, 9  ;;  %v6123_v9 = vrot.slane %v6121_v2, 4  ;;  %3070 = vrot.lane.b32.xlu1 %v2998_v13, %s13994_s10  ;;  %v3810_v43 = vpop.permute.xlu1 %3809 }
 0x1fe   : > { %v2995_v16 = vsel %vm14128_vm10, %v19284_v22, %v19282_v15  ;;  %v6124_v4 = vrot.slane %v6025_v51, 5  ;;  %v19288_v30 = vrot.slane %v16470_v32, 9  ;;  %6329 = vst [vmem:[#allocation5 + $0x54] sm:$0xf] %v6297_v45  ;;  %6330 = vst [vmem:[#allocation5 + $0x78] sm:$0xf] %v6298_v52 }
 0x1ff   : > { %v3002_v38 = vsel %vm14128_vm10, %v19287_v55, %v19285_v34  ;;  %v6030_v47 = vld [vmem:[#allocation4 + $0x1c] sm:$0xf]  ;;  %v6031_v22 = vld [vmem:[#allocation4 + $0x20] sm:$0x1]  ;;  %3329 = vst.msk [vmem:[#allocation3 + $0x48] sm:$0xf] %vm3310_vm13, %v3251_v8  ;;  %3068 = vrot.lane.b32.xlu0 %v2995_v16, %s13994_s10 }
 0x200   : > { %v6129_v15 = vsel %vm14128_vm10, %v19288_v30, %v6128_v11  ;;  %v6135_v2 = vrot.slane %v6030_v47, 5  ;;  %v6138_v51 = vrot.slane %v6031_v22, 5  ;;  %v19289_v32 = vld [vmem:[#allocation20_spill] sm:$0xff]  ;;  %v19291_v6 = vld [vmem:[#allocation23_spill] sm:$0xff]  ;;  %v6125_v45 = vsel %vm14128_vm10, %v6123_v9, %v6124_v4  ;;  %v6028_v55 = vld [vmem:[#allocation4 + $0x14] sm:$0x1] }
 0x201   : > { %6265 = vst [vmem:[#allocation5 + $0x50] sm:$0xf] %v6129_v15  ;;  %v19290_v34 = vrot.slane %v19289_v32, 5  ;;  %v6130_v30 = vrot.slane %v6128_v11, 4  ;;  %v5463_v58 = vld [vmem:[#allocation4] sm:$0xf]  ;;  %v3808_v11 = vpop.permute.xlu0 %3807 }
 0x202   : > { %v5578_v8 = vrot.slane %v5576_v28, 4  ;;  %6264 = vst [vmem:[#allocation5 + $0x2c] sm:$0xf] %v6125_v45  ;;  %v6131_v13 = vrot.slane %v6028_v55, 5  ;;  %v19292_v15 = vld [vmem:[#allocation24_spill] sm:$0xff]  ;;  %v19294_v22 = vrot.slane %v16473_v39, 9 }
 0x203   : > { %v3005_v52 = vsel %vm14128_vm10, %v19291_v6, %v19290_v34  ;;  %v19293_v47 = vld [vmem:[#allocation44_spill] sm:$0xff]  ;;  %v6137_v34 = vrot.slane %v6135_v2, 4  ;;  %v5464_v6 = vld [vmem:[#allocation4 + $0x4] sm:$0xf]  ;;  %5495 = vst [vmem:[#allocation5] sm:$0xf] %v5463_v58  ;;  %3072 = vrot.lane.b32.xlu0 %v3002_v38, %s13994_s10 }
 0x204   : > { %v6136_v32 = vsel %vm14128_vm10, %v19294_v22, %v6135_v2  ;;  %v5529_v4 = vld [vmem:[#allocation4 + $0x8] sm:$0x1]  ;;  %3889 = vst.msk [vmem:[#allocation3 + $0x44] sm:$0xf] %vm3871_vm15, %v3810_v43  ;;  %v3175_v28 = vld [vmem:[#allocation2 + $0xac] sm:$0xf]  ;;  %3074 = vrot.lane.b32.xlu1 %v3005_v52, %s13994_s10  ;;  %v6132_v43 = vsel %vm14128_vm10, %v6130_v30, %v6131_v13 }
 0x205   : > { %6267 = vst [vmem:[#allocation5 + $0x98] sm:$0xf] %v6136_v32  ;;  %5496 = vst [vmem:[#allocation5 + $0x24] sm:$0xf] %v5464_v6  ;;  %v19295_v9 = vshll.u32 %v16520_v5, 16  ;;  %v19296_v55 = vshrl.u32 %v16488_v50, 16  ;;  %v3814_v50 = vpop.permute.xlu1 %3813 }
 0x206   : > { %v5595_v39 = vshll.u32 %v5529_v4, 16  ;;  %v5465_v46 = vld [vmem:[#allocation4 + $0xc] sm:$0xf]  ;;  %v5602_v21 = vrot.slane %v5600_v12, 4  ;;  %3888 = vst.msk [vmem:[#allocation3 + $0x40] sm:$0xf] %vm3871_vm15, %v3808_v11  ;;  %v6139_v12 = vsel %vm14128_vm10, %v6137_v34, %v6138_v51 }
 0x207   : > { %v5581_v45 = vrot.slane %v19295_v9, 5  ;;  %v5591_v16 = vrot.slane %v19296_v55, 4  ;;  %v3174_v58 = vld [vmem:[#allocation2 + $0xa8] sm:$0xf]  ;;  %v19297_v2 = vld [vmem:[#allocation28_spill] sm:$0xff]  ;;  %v19299_v11 = vshll.u32 %v16546_v49, 16 }
 0x208   : > { %v19298_v22 = vld [vmem:[#allocation45_spill] sm:$0xff]  ;;  %5497 = vst [vmem:[#allocation5 + $0x48] sm:$0xf] %v5465_v46  ;;  %6266 = vst [vmem:[#allocation5 + $0x74] sm:$0xf] %v6132_v43  ;;  %v5597_v4 = vrot.slane %v5595_v39, 5  ;;  %v3812_v43 = vpop.permute.xlu0 %3811  ;;  %3264 = vrot.lane.b32.xlu1 %v3175_v28, %s13993_s9  ;;  %3262 = vrot.lane.b32.xlu0 %v3174_v58, %s13993_s9 }
 0x209   : > { %v5466_v32 = vld [vmem:[#allocation4 + $0x10] sm:$0xf]  ;;  %v5532_v6 = vld [vmem:[#allocation4 + $0x14] sm:$0x1]  ;;  %6268 = vst [vmem:[#allocation5 + $0xbc] sm:$0xf] %v6139_v12  ;;  %v5582_v30 = vor.u32 %v5581_v45, %v5578_v8  ;;  %v5592_v13 = vor.u32 %v5591_v16, %v16540_v20 }
 0x20a   : > { %v5531_v52 = vld [vmem:[#allocation4 + $0x10] sm:$0xf]  ;;  %5498 = vst [vmem:[#allocation5 + $0x6c] sm:$0xf] %v5466_v32  ;;  %v5605_v9 = vrot.slane %v19299_v11, 5  ;;  %v5619_v34 = vshll.u32 %v5532_v6, 16 }
 0x20b   : > { %v5467_v55 = vld [vmem:[#allocation4 + $0x18] sm:$0xf]  ;;  %v5609_v5 = vshll.u32 %v5531_v52, 16  ;;  %v5613_v51 = vshrl.u32 %v5531_v52, 16  ;;  %v5468_v46 = vld [vmem:[#allocation4 + $0x1c] sm:$0xf] }
 0x20c   : > { %5499 = vst [vmem:[#allocation5 + $0x90] sm:$0xf] %v5467_v55  ;;  %v19300_v27 = vshrl.u32 %v16522_v17, 16  ;;  %3891 = vst.msk [vmem:[#allocation3 + $0x4c] sm:$0xf] %vm3871_vm15, %v3814_v50  ;;  %v5583_v16 = vrot.slane %v5582_v30, 4  ;;  %v5606_v39 = vor.u32 %v5605_v9, %v5602_v21  ;;  %v4145_v44 = vpop.permute.xlu0 %4144 }
 0x20d   : > { %v3177_v8 = vld [vmem:[#allocation2 + $0xb8] sm:$0xf]  ;;  %v5593_v45 = vrot.slane %v5592_v13, 4  ;;  %5500 = vst [vmem:[#allocation5 + $0xb4] sm:$0xf] %v5468_v46  ;;  %v19301_v12 = vshll.u32 %v16522_v17, 16 }
 0x20e   : > { %v5626_v38 = vrot.slane %v19300_v27, 4  ;;  %v5535_v49 = vld [vmem:[#allocation4 + $0x20] sm:$0x1]  ;;  %3890 = vst.msk [vmem:[#allocation3 + $0x48] sm:$0xf] %vm3871_vm15, %v3812_v43  ;;  %v5611_v6 = vrot.slane %v5609_v5, 5  ;;  %v5588_v17 = vsel %vm14230_vm14, %v5583_v16, %v16540_v20  ;;  %v4147_v5 = vpop.permute.xlu1 %4146  ;;  %3268 = vrot.lane.b32.xlu1 %v3177_v8, %s13993_s9 }
 0x20f   : > { %v5629_v32 = vrot.slane %v19301_v12, 5  ;;  %v3176_v52 = vld [vmem:[#allocation2 + $0xb4] sm:$0xf]  ;;  %v5615_v11 = vrot.slane %v5613_v51, 4  ;;  %v5621_v27 = vrot.slane %v5619_v34, 5  ;;  %v5633_v55 = vshll.u32 %v16492_v41, 16 }
 0x210   : > { %v7128_v50 = vld [vmem:[#allocation4 + $0x18] sm:$0xf]  ;;  %v13685_v30 = vld [vmem:[#allocation5 + $0x8] ss:$36 sps:$4 sm:$0xff]   ;;  %v5598_v13 = vsel %vm14230_vm14, %v5593_v45, %v5597_v4  ;;  %v5607_v9 = vrot.slane %v5606_v39, 4  ;;  %v19302_v46 = vshrl.u32 %v16492_v41, 16  ;;  %3266 = vrot.lane.b32.xlu0 %v3176_v52, %s13993_s9  ;;  %v4149_v52 = vpop.permute.xlu0 %4148 }
 0x211   : > { %v13687_v21 = vld [vmem:[#allocation5 + $0xc] ss:$36 sps:$4 sm:$0xff]   ;;  %v5630_v28 = vor.u32 %v5629_v32, %v5626_v38  ;;  %7160 = vst [vmem:[#allocation5 + $0x18] sm:$0xf] %v7128_v50  ;;  %5991 = vst [vmem:[#allocation5 + $0x4] sm:$0xf] %v5588_v17  ;;  %v5616_v51 = vor.u32 %v5615_v11, %v5611_v6 }
 0x212   : > { %5992 = vst [vmem:[#allocation5 + $0x28] sm:$0xf] %v5598_v13  ;;  %v5635_v34 = vrot.slane %v5633_v55, 5  ;;  %v5639_v58 = vrot.slane %v19302_v46, 4  ;;  %v5643_v43 = vshll.u32 %v5535_v49, 16  ;;  %9632 = vmatprep.mubr.bf16.mxu0 %v13687_v21  ;;  %v5612_v20 = vsel %vm14230_vm14, %v5607_v9, %v5611_v6  ;;  %v7976_v46 = vld [vmem:[#allocation5 + $0x74] sm:$0xff] }
 0x213   : > { %v7129_v12 = vld [vmem:[#allocation4 + $0x1c] sm:$0xf]  ;;  %4226 = vst.msk [vmem:[#allocation3 + $0x44] sm:$0xf] %vm4208_vm0, %v4147_v5  ;;  %v5631_v4 = vrot.slane %v5630_v28, 4  ;;  %v19303_v16 = vshrl.u32 %v16534_v19, 16  ;;  %9633 = vmatmul.mubr.bf16.vlgmr.msra.gmra.mxu0 %v13685_v30  ;;  %v4151_v30 = vpop.permute.xlu1 %4150 }
 0x214   : > { %7161 = vst [vmem:[#allocation5 + $0x3c] sm:$0xf] %v7129_v12  ;;  %v7194_v38 = vld [vmem:[#allocation4 + $0x20] sm:$0x1]  ;;  %v19304_v39 = vshll.u32 %v16534_v19, 16  ;;  %v5617_v49 = vrot.slane %v5616_v51, 4  ;;  %v5640_v11 = vor.u32 %v5639_v58, %v5635_v34 }
 0x215   : > { %v7243_v45 = vrot.slane %v19303_v16, 4  ;;  %4225 = vst.msk [vmem:[#allocation3 + $0x40] sm:$0xf] %vm4208_vm0, %v4145_v44  ;;  %v13688_v41 = vld [vmem:[#allocation5 + $0x54] ss:$36 sps:$4 sm:$0xff]   ;;  %v5645_v55 = vrot.slane %v5643_v43, 5  ;;  %v5636_v19 = vsel %vm14230_vm14, %v5631_v4, %v5635_v34 }
 0x216   : > { %v7246_v32 = vrot.slane %v19304_v39, 5  ;;  %5993 = vst [vmem:[#allocation5 + $0x4c] sm:$0xf] %v5612_v20  ;;  %v7250_v6 = vshll.u32 %v16509_v10, 16  ;;  %v6435_v50 = vshll.u32 %v16524_v18, 16  ;;  %v19305_v44 = vshrl.u32 %v16509_v10, 16  ;;  %9640 = vmatprep.mubr.bf16.mxu0 %v13688_v41 }
 0x217   : > { %v6360_v8 = vld [vmem:[#allocation4 + $0x10] sm:$0xf]  ;;  %v5622_v13 = vsel %vm14230_vm14, %v5617_v49, %v5621_v27  ;;  %v5641_v9 = vrot.slane %v5640_v11, 4  ;;  %5995 = vst [vmem:[#allocation5 + $0x94] sm:$0xf] %v5636_v19  ;;  %v7260_v5 = vshll.u32 %v7194_v38, 16  ;;  %v19308_v38 = vsel %vm14230_vm14, %v19298_v22, %v19297_v2 }
 0x218   : > { %v7247_v21 = vor.u32 %v7246_v32, %v7243_v45  ;;  %v7256_v17 = vrot.slane %v19305_v44, 4  ;;  %v7252_v28 = vrot.slane %v7250_v6, 5  ;;  %v6361_v51 = vld [vmem:[#allocation4 + $0x14] sm:$0x1]  ;;  %4228 = vst.msk [vmem:[#allocation3 + $0x4c] sm:$0xf] %vm4208_vm0, %v4151_v30  ;;  %3825 = vrot.lane.b32.xlu1 %v19308_v38, %s13997_s13  ;;  %v19309_v41 = vsel %vm14230_vm14, %v19293_v47, %v19292_v15  ;;  %v1632_v6 = vpop.permute.xlu1 %1631 }
 0x219   : > { %5994 = vst [vmem:[#allocation5 + $0x70] sm:$0xf] %v5622_v13  ;;  %v19306_v10 = vshrl.u32 %v16559_v35, 16  ;;  %v19307_v43 = vshll.u32 %v16559_v35, 16  ;;  %v6417_v20 = vshll.u32 %v6360_v8, 16  ;;  %v7971_v27 = vld [vmem:[#allocation5 + $0x50] sm:$0xff]  ;;  %v5646_v45 = vsel %vm14230_vm14, %v5641_v9, %v5645_v55  ;;  %3823 = vrot.lane.b32.xlu0 %v19309_v41, %s13997_s13 }
 0x21a   : > { %v7248_v34 = vrot.slane %v7247_v21, 4  ;;  %v6855_v4 = vld [vmem:[#allocation4 + $0xc] sm:$0xe]  ;;  %4227 = vst.msk [vmem:[#allocation3 + $0x48] sm:$0xf] %vm4208_vm0, %v4149_v52  ;;  %v7257_v39 = vor.u32 %v7256_v17, %v7252_v28  ;;  %v7262_v32 = vrot.slane %v7260_v5, 5  ;;  %v12601_v44 = vcombine.low %v7971_v27, %v7976_v46 }
 0x21b   : > { %v6410_v58 = vrot.slane %v19306_v10, 4  ;;  %v6413_v12 = vrot.slane %v19307_v43, 5  ;;  %v1118_v16 = vld [vmem:[#allocation2 + $0xa8] sm:$0xf]  ;;  %v6421_v35 = vshrl.u32 %v6360_v8, 16  ;;  %v6419_v49 = vrot.slane %v6417_v20, 5  ;;  %v1630_v8 = vpop.permute.xlu0 %1629 }
 0x21c   : > { %1150 = vst.msk [vmem:[#allocation3 + $0x70] sm:$0xf] %vm668_vm2, %v1118_v16  ;;  %5996 = vst [vmem:[#allocation5 + $0xb8] sm:$0xf] %v5646_v45  ;;  %v7253_v2 = vsel %vm14230_vm14, %v7248_v34, %v7252_v28  ;;  %v6427_v11 = vshll.u32 %v6361_v51, 16  ;;  %v19310_v19 = vld [vmem:[#allocation29_spill] sm:$0xff]  ;;  %9641 = vmatmul.mubr.bf16.gmra.mxu0 %v12601_v44 }
 0x21d   : > { %v6414_v22 = vor.u32 %v6413_v12, %v6410_v58  ;;  %v6856_v55 = vld [vmem:[#allocation4 + $0x10] sm:$0xf]  ;;  %v3716_v21 = vsel %vm14230_vm14, %v16168_v42, %v19310_v19  ;;  %v7258_v17 = vrot.slane %v7257_v39, 4  ;;  %7656 = vst [vmem:[#allocation5 + $0x1c] sm:$0xf] %v7253_v2  ;;  %v6423_v15 = vrot.slane %v6421_v35, 4  ;;  %v1636_v12 = vpop.permute.xlu1 %1635 }
 0x21e   : > { %v6857_v47 = vld [vmem:[#allocation4 + $0x14] sm:$0x1]  ;;  %1707 = vst.msk [vmem:[#allocation3 + $0x54] sm:$0xf] %vm1685_vm1, %v1632_v6  ;;  %v13690_v30 = vld [vmem:[#allocation3 + $0x40] sm:$0xff]   ;;  %v19311_v13 = vrot.slane %v16135_v37, 5  ;;  %v19312_v42 = vsel %vm14230_vm14, %v16175_v1, %v16177_v26  ;;  %3827 = vrot.lane.b32.xlu0 %v3716_v21, %s13997_s13  ;;  %v13523_v21 = vpop.f32.mrf.mxu0 }
 0x21f   : > { %v6415_v28 = vrot.slane %v6414_v22, 4  ;;  %v6429_v5 = vrot.slane %v6427_v11, 5  ;;  %1706 = vst.msk [vmem:[#allocation3 + $0x50] sm:$0xf] %vm1685_vm1, %v1630_v8  ;;  %3829 = vrot.lane.b32.xlu1 %v19312_v42, %s13997_s13  ;;  %v1119_v51 = vld [vmem:[#allocation2 + $0xac] sm:$0xf]  ;;  %v7263_v37 = vsel %vm14230_vm14, %v7258_v17, %v7262_v32  ;;  %v6424_v46 = vor.u32 %v6423_v15, %v6419_v49  ;;  %13533 = vmatprep.mubr.msk.bf16.mxu1 %vm4380_vm3, %v13690_v30  ;;  %v1634_v32 = vpop.permute.xlu0 %1633 }
 0x220   : > { %v4090_v9 = vsel %vm14128_vm10, %v16181_v59, %v19311_v13  ;;  %v12557_v52 = vrot.slane %v6855_v4, 9  ;;  %v6953_v34 = vrot.slane %v6856_v55, 5  ;;  %1151 = vst.msk [vmem:[#allocation3 + $0x74] sm:$0xf] %vm668_vm2, %v1119_v51  ;;  %v1120_v59 = vld [vmem:[#allocation2 + $0xb4] sm:$0xf]  ;;  %v4483_v51 = vpop.f32.mrf.mxu0 }
 0x221   : > { %7657 = vst [vmem:[#allocation5 + $0x40] sm:$0xf] %v7263_v37  ;;  %v6420_v1 = vsel %vm14230_vm14, %v6415_v28, %v6419_v49  ;;  %v6956_v26 = vrot.slane %v6857_v47, 5  ;;  %v19313_v10 = vshrl.u32 %v16524_v18, 16  ;;  %v6437_v43 = vrot.slane %v6435_v50, 5  ;;  %v19315_v4 = vld [vmem:[#allocation27_spill] sm:$0xff]  ;;  %v1972_v30 = vpop.permute.xlu1 %1971 }
 0x222   : > { %v19314_v20 = vrot.slane %v16095_v60, 5  ;;  %v19316_v27 = vrot.slane %v19315_v4, 9  ;;  %1152 = vst.msk [vmem:[#allocation3 + $0x78] sm:$0xf] %vm668_vm2, %v1120_v59  ;;  %v6425_v16 = vrot.slane %v6424_v46, 4  ;;  %v6954_v45 = vsel %vm14128_vm10, %v12557_v52, %v6953_v34  ;;  %v13691_v18 = vld [vmem:[#allocation3 + $0x48] sm:$0xff]  }
 0x223   : > { %v6434_v58 = vrot.slane %v19313_v10, 4  ;;  %6823 = vst [vmem:[#allocation5 + $0x10] sm:$0xf] %v6420_v1  ;;  %v6364_v39 = vld [vmem:[#allocation4 + $0x20] sm:$0x1]  ;;  %v19317_v50 = vrot.slane %v16128_v31, 5  ;;  %4162 = vrot.lane.b32.xlu1 %v4090_v9, %s13998_s14  ;;  %v1554_v31 = vsel %vm14230_vm14, %v16191_v62, %v16130_v0  ;;  %13534 = vmatmul.mubr.msk.bf16.vlgmr.msra.gmra.mxu1 %vm4380_vm3, %v13691_v18  ;;  %v1970_v42 = vpop.permute.xlu0 %1969  ;;  %v1578_v37 = vsel %vm14230_vm14, %v16198_v61, %v16137_v53 }
 0x224   : > { %v4087_v38 = vsel %vm14128_vm10, %v19316_v27, %v19314_v20  ;;  %1709 = vst.msk [vmem:[#allocation3 + $0x5c] sm:$0xf] %vm1685_vm1, %v1636_v12  ;;  %v19318_v60 = vrot.slane %v16143_v14, 9  ;;  %v6955_v41 = vrot.slane %v6953_v34, 4  ;;  %7095 = vst [vmem:[#allocation5 + $0x14] sm:$0xf] %v6954_v45  ;;  %v6430_v55 = vsel %vm14230_vm14, %v6425_v16, %v6429_v5 }
 0x225   : > { %v6438_v2 = vor.u32 %v6437_v43, %v6434_v58  ;;  %v6859_v22 = vld [vmem:[#allocation4 + $0x1c] sm:$0xf]  ;;  %1708 = vst.msk [vmem:[#allocation3 + $0x58] sm:$0xf] %vm1685_vm1, %v1634_v32  ;;  %v19319_v49 = vrot.slane %v16161_v48, 5  ;;  %v6441_v6 = vshll.u32 %v16494_v36, 16  ;;  %4160 = vrot.lane.b32.xlu0 %v4087_v38, %s13998_s14  ;;  %v1976_v16 = vpop.permute.xlu1 %1975 }
 0x226   : > { %v4094_v35 = vsel %vm14128_vm10, %v19318_v60, %v19317_v50  ;;  %v1121_v14 = vld [vmem:[#allocation2 + $0xb8] sm:$0xf]  ;;  %v6858_v19 = vld [vmem:[#allocation4 + $0x18] sm:$0xe]  ;;  %6824 = vst [vmem:[#allocation5 + $0x34] sm:$0xf] %v6430_v55  ;;  %v6957_v48 = vsel %vm14128_vm10, %v6955_v41, %v6956_v26 }
 0x227   : > { %v4097_v11 = vsel %vm14128_vm10, %v16188_v3, %v19319_v49  ;;  %1153 = vst.msk [vmem:[#allocation3 + $0x7c] sm:$0xf] %vm668_vm2, %v1121_v14  ;;  %v6439_v3 = vrot.slane %v6438_v2, 4  ;;  %v19320_v44 = vshrl.u32 %v16494_v36, 16  ;;  %v6451_v15 = vshll.u32 %v6364_v39, 16  ;;  %v19324_v10 = vld [vmem:[#allocation35_spill] sm:$0xff]  ;;  %v1974_v39 = vpop.permute.xlu0 %1973 }
 0x228   : > { %v13943_v47 = vld [vmem:[%s18952_s2] ss:$0 sm:$0xff]  ;;  %v3755_v13 = vshll.u32 %v16459_v33, 16  ;;  %7096 = vst [vmem:[#allocation5 + $0x38] sm:$0xf] %v6957_v48  ;;  %v6443_v9 = vrot.slane %v6441_v6, 5  ;;  %v1564_v36 = vsel %vm14230_vm14, %v16196_v40, %v16193_v63  ;;  %4166 = vrot.lane.b32.xlu1 %v4097_v11, %s13998_s14  ;;  %v13524_v63 = vpop.f32.mrf.mxu0 }
 0x229   : > { %v6447_v17 = vrot.slane %v19320_v44, 4  ;;  %v4492_v8 = vadd.f32 %v13943_v47, %v13523_v21  ;;  %v6860_v28 = vld [vmem:[#allocation4 + $0x20] sm:$0x1]  ;;  %v6960_v5 = vrot.slane %v6859_v22, 5  ;;  %vm19321_vm2 = vcmask 93248   ;;  %4164 = vrot.lane.b32.xlu0 %v4094_v35, %s13998_s14  ;;  %v19326_v18 = vld [vmem:[#allocation30_spill] sm:$0xff] }
 0x22a   : > { %2047 = vst.msk [vmem:[#allocation3 + $0x54] sm:$0xf] %vm19321_vm2, %v1972_v30  ;;  %v12558_v46 = vrot.slane %v6858_v19, 9  ;;  %v6963_v52 = vrot.slane %v6860_v28, 5  ;;  %vm19322_vm7 = vmmov %vm19321_vm2  ;;  %v4484_v59 = vadd.f32 %v13943_v47, %v4483_v51  ;;  %v6444_v1 = vsel %vm14230_vm14, %v6439_v3, %v6443_v9  ;;  %v19323_v40 = vld [vmem:[#allocation31_spill] sm:$0xff]  ;;  %v4486_v32 = vpop.f32.mrf.mxu0  ;;  %v19328_v60 = vld [vmem:[#allocation34_spill] sm:$0xff] }
 0x22b   : > { %v4600_v34 = vmax.f32 %v4492_v8, 0.0  ;;  %2046 = vst.msk [vmem:[#allocation3 + $0x50] sm:$0xf] %vm19322_vm7, %v1970_v42  ;;  %v6448_v26 = vor.u32 %v6447_v17, %v6443_v9  ;;  %v1588_v58 = vsel %vm14230_vm14, %v19324_v10, %v19323_v40  ;;  %v6453_v43 = vrot.slane %v6451_v15, 5  ;;  %6825 = vst [vmem:[#allocation5 + $0x58] sm:$0xf] %v6444_v1  ;;  %v2163_v62 = vpop.permute.xlu0 %2162 }
 0x22c   : > { %v6961_v12 = vsel %vm14128_vm10, %v12558_v46, %v6960_v5  ;;  %v6962_v20 = vrot.slane %v6960_v5, 4  ;;  %v4598_v27 = vmax.f32 %v4484_v59, 0.0  ;;  %v4495_v38 = vadd.f32 %v13943_v47, %v13524_v63  ;;  %vm19325_vm6 = vmmov %vm19321_vm2  ;;  %v19330_v2 = vld [vmem:[#allocation33_spill] sm:$0xff]  ;;  %v19332_v49 = vld [vmem:[#allocation46_spill] sm:$0xff]  ;;  %2048 = vst.msk [vmem:[#allocation3 + $0x58] sm:$0xf] %vm19321_vm2, %v1974_v39  ;;  %1647 = vrot.lane.b32.xlu1 %v1564_v36, %s13995_s11  ;;  %v2165_v36 = vpop.permute.xlu1 %2164 }
 0x22d   : > { %v12977_v4 = vpack.c.bf16 %v4600_v34, %v4600_v34  ;;  %v6449_v45 = vrot.slane %v6448_v26, 4  ;;  %7097 = vst [vmem:[#allocation5 + $0x5c] sm:$0xf] %v6961_v12  ;;  %2049 = vst.msk [vmem:[#allocation3 + $0x5c] sm:$0xf] %vm19325_vm6, %v1976_v16  ;;  %v19327_v50 = vrot.slane %v19326_v18, 5  ;;  %1645 = vrot.lane.b32.xlu0 %v1554_v31, %s13995_s11  ;;  %v3734_v59 = vor.u32 %v16409_v29, %v16402_v25 }
 0x22e   : > { %v19329_v35 = vrot.slane %v19328_v60, 9  ;;  %v19331_v22 = vrot.slane %v19330_v2, 5  ;;  %v19333_v14 = vrot.slane %v16214_v56, 5  ;;  %v19334_v55 = vrot.slane %v16233_v57, 9  ;;  %v5068_v57 = vld [vmem:[#allocation4 + $0x30] sm:$0xf] }
 0x22f   : > { %v6964_v19 = vsel %vm14128_vm10, %v6962_v20, %v6963_v52  ;;  %v4774_v21 = vshrl.u32 %v12977_v4, 16  ;;  %v12975_v48 = vpack.c.bf16 %v4598_v27, %v4598_v27  ;;  %v4601_v3 = vmax.f32 %v4495_v38, 0.0  ;;  %v7688_v46 = vld [vmem:[#allocation4 + $0x18] sm:$0xe]  ;;  %2240 = vst.msk [vmem:[#allocation3 + $0x54] sm:$0xf] %vm2218_vm8, %v2165_v36 }
 0x230   : > { %v16780_v41 = vsel %vm14128_vm10, %v19329_v35, %v19327_v50  ;;  %v1921_v11 = vsel %vm14128_vm10, %v19332_v49, %v19331_v22  ;;  %v16793_v6 = vsel %vm14128_vm10, %v19334_v55, %v19333_v14  ;;  %v19335_v44 = vshll.u32 %v16456_v7, 16  ;;  %7098 = vst [vmem:[#allocation5 + $0x80] sm:$0xf] %v6964_v19  ;;  %v19338_v31 = vld [vmem:[#allocation12_spill] sm:$0xff]  ;;  %v19340_v34 = vld [vmem:[#allocation10_spill] sm:$0xff]  ;;  %1651 = vrot.lane.b32.xlu1 %v1588_v58, %s13995_s11  ;;  %v2169_v58 = vpop.permute.xlu1 %2168  ;;  %v19341_v18 = vld [vmem:[#allocation7_spill] sm:$0xff] }
 0x231   : > { %v4487_v56 = vadd.f32 %v13943_v47, %v4486_v32  ;;  %v19336_v15 = vshrl.u32 %v16459_v33, 16  ;;  %v19337_v30 = vshrl.u32 %v16456_v7, 16  ;;  %v6454_v28 = vsel %vm14230_vm14, %v6449_v45, %v6453_v43  ;;  %v7689_v26 = vld [vmem:[#allocation4 + $0x1c] sm:$0xf]  ;;  %v7690_v63 = vld [vmem:[#allocation4 + $0x20] sm:$0x1]  ;;  %1649 = vrot.lane.b32.xlu0 %v1578_v37, %s13995_s11  ;;  %v2167_v32 = vpop.permute.xlu0 %2166 }
 0x232   : > { %v16801_v17 = vrot.slane %v19335_v44, 5  ;;  %v4776_v5 = vrot.slane %v4774_v21, 7  ;;  %v4777_v47 = vshll.u32 %v12977_v4, 16  ;;  %v4757_v42 = vshrl.u32 %v12975_v48, 16  ;;  %6826 = vst [vmem:[#allocation5 + $0x7c] sm:$0xf] %v6454_v28 }
 0x233   : > { %v16811_v8 = vrot.slane %v19336_v15, 4  ;;  %v16815_v9 = vrot.slane %v19337_v30, 4  ;;  %v12978_v51 = vpack.c.bf16 %v4601_v3, %v4601_v3  ;;  %v4599_v0 = vmax.f32 %v4487_v56, 0.0  ;;  %2239 = vst.msk [vmem:[#allocation3 + $0x50] sm:$0xf] %vm2218_vm8, %v2163_v62  ;;  %v19342_v53 = vld [vmem:[#allocation43_spill] sm:$0xff] }
 0x234   : > { %v19339_v52 = vrot.slane %v19338_v31, 5  ;;  %v16831_v1 = vrot.slane %v3755_v13, 5  ;;  %v4779_v40 = vor.u32 %v4777_v47, %v4776_v5  ;;  %v16833_v10 = vrot.slane %v4757_v42, 7  ;;  %v5061_v20 = vld [vmem:[#allocation4 + $0x24] sm:$0xf]  ;;  %1987 = vrot.lane.b32.xlu1 %v1921_v11, %s13992_s8  ;;  %v2726_v30 = vpop.permute.xlu1 %2725 }
 0x235   : > { %v4760_v43 = vshll.u32 %v12975_v48, 16  ;;  %v4782_v12 = vshrl.u32 %v12978_v51, 16  ;;  %v12976_v4 = vpack.c.bf16 %v4599_v0, %v4599_v0  ;;  %v12573_v25 = vrot.slane %v7688_v46, 9  ;;  %v5072_v45 = vld [vmem:[#allocation4 + $0x38] sm:$0x1]  ;;  %1985 = vrot.lane.b32.xlu0 %v16780_v41, %s13992_s8  ;;  %v19347_v0 = vld [vmem:[#allocation51_spill] sm:$0xff] }
 0x236   : > { %v16825_v7 = vsel %vm14128_vm10, %v19340_v34, %v19339_v52  ;;  %v7786_v29 = vrot.slane %v7689_v26, 5  ;;  %v7789_v33 = vrot.slane %v7690_v63, 5  ;;  %v5069_v13 = vsel %vm16388_vm4, %v4779_v40, %v5068_v57  ;;  %2242 = vst.msk [vmem:[#allocation3 + $0x5c] sm:$0xf] %vm2218_vm8, %v2169_v58  ;;  %v16849_v37 = vld [vmem:[#allocation2 + $0xc4] sm:$0xf] }
 0x237   : > { %v4762_v27 = vor.u32 %v4760_v43, %v16833_v10  ;;  %v4784_v38 = vrot.slane %v4782_v12, 7  ;;  %v4785_v16 = vshll.u32 %v12978_v51, 16  ;;  %5070 = vst [vmem:[#allocation4 + $0x30] sm:$0xf] %v5069_v13  ;;  %v4765_v39 = vshrl.u32 %v12976_v4, 16  ;;  %v2724_v51 = vpop.permute.xlu0 %2723  ;;  %v19369_v63 = vld [vmem:[#allocation49_spill] sm:$0xff] }
 0x238   : > { %v3744_v61 = vor.u32 %v19342_v53, %v19341_v18  ;;  %v7787_v50 = vsel %vm14128_vm10, %v12573_v25, %v7786_v29  ;;  %v7788_v60 = vrot.slane %v7786_v29, 4  ;;  %v4780_v35 = vrot.slane %v4776_v5, 4  ;;  %2241 = vst.msk [vmem:[#allocation3 + $0x58] sm:$0xf] %vm2218_vm8, %v2167_v32  ;;  %v3390_v14 = vld [vmem:[#allocation2 + $0xd4] sm:$0x1]  ;;  %1991 = vrot.lane.b32.xlu1 %v16825_v7, %s13992_s8 }
 0x239   : > { %v5062_v2 = vsel %vm16388_vm4, %v4762_v27, %v5061_v20  ;;  %v4787_v22 = vor.u32 %v4785_v16, %v4784_v38  ;;  %v4789_v49 = vrot.slane %v4784_v38, 4  ;;  %7928 = vst [vmem:[#allocation5 + $0x20] sm:$0xf] %v7787_v50  ;;  %v4767_v55 = vrot.slane %v4765_v39, 7  ;;  %v16861_v48 = vld [vmem:[#allocation2 + $0xc0] sm:$0xe]  ;;  %1989 = vrot.lane.b32.xlu0 %v16793_v6, %s13992_s8 }
 0x23a   : > { %5063 = vst [vmem:[#allocation4 + $0x24] sm:$0xf] %v5062_v2  ;;  %v4768_v19 = vshll.u32 %v12976_v4, 16  ;;  %v3768_v21 = vor.u32 %v16815_v9, %v16801_v17  ;;  %v7790_v3 = vsel %vm14128_vm10, %v7788_v60, %v7789_v33  ;;  %v5065_v15 = vld [vmem:[#allocation4 + $0x2c] sm:$0x1]  ;;  %v3758_v28 = vor.u32 %v16831_v1, %v16811_v8 }
 0x23b   : > { %v4788_v57 = vsel %vm14070_vm5, %v4780_v35, %v4787_v22  ;;  %v5073_v56 = vsel %vm16416_vm11, %v4789_v49, %v5072_v45  ;;  %v4100_v41 = vrot.slane %v16849_v37, 5  ;;  %v16872_v5 = vld [vmem:[#allocation2 + $0xc8] sm:$0x1]  ;;  %7929 = vst [vmem:[#allocation5 + $0x44] sm:$0xf] %v7790_v3  ;;  %v4763_v9 = vrot.slane %v16833_v10, 4  ;;  %v2730_v10 = vpop.permute.xlu1 %2729  ;;  %v2728_v4 = vpop.permute.xlu0 %2727 }
 0x23c   : > { %5071 = vst [vmem:[#allocation4 + $0x34] sm:$0xf] %v4788_v57  ;;  %5074 = vst [vmem:[#allocation4 + $0x38] sm:$0x1] %v5073_v56  ;;  %v4770_v47 = vor.u32 %v4768_v19, %v4767_v55  ;;  %v4772_v42 = vrot.slane %v4767_v55, 4  ;;  %vm19345_vm7 = vcmask 158848  }
 0x23d   : > { %2801 = vst.msk [vmem:[#allocation3 + $0x54] sm:$0xf] %vm19345_vm7, %v2726_v30  ;;  %v3771_v36 = vshll.u32 %v3390_v14, 16  ;;  %vm19346_vm6 = vmmov %vm19345_vm7  ;;  %v16879_v8 = vrot.slane %v3734_v59, 4  ;;  %v16881_v46 = vrot.slane %v3744_v61, 4  ;;  %v19348_v62 = vshll.u32 %v19347_v0, 16 }
 0x23e   : > { %2800 = vst.msk [vmem:[#allocation3 + $0x50] sm:$0xf] %vm19346_vm6, %v2724_v51  ;;  %v12435_v52 = vrot.slane %v16861_v48, 9  ;;  %v4771_v34 = vsel %vm14070_vm5, %v4763_v9, %v4770_v47  ;;  %v5066_v1 = vsel %vm16416_vm11, %v4772_v42, %v5065_v15  ;;  %v2086_v7 = vld [vmem:[#allocation2 + $0xb4] sm:$0xf]  ;;  %v16894_v26 = vrot.slane %v3768_v21, 4  ;;  %vm19349_vm2 = vmmov %vm19346_vm6 }
 0x23f   : > { %v16885_v31 = vrot.slane %v19348_v62, 5  ;;  %v2087_v59 = vld [vmem:[#allocation2 + $0xb8] sm:$0xf]  ;;  %v5178_v40 = vld [vmem:[#allocation4 + $0x30] sm:$0x2]  ;;  %v16902_v6 = vrot.slane %v3758_v28, 4  ;;  %vm19350_vm7 = vmmov %vm19349_vm2  ;;  %2178 = vrot.lane.b32.xlu0 %v2086_v7, %s13991_s30  ;;  %v3063_v35 = vpop.permute.xlu1 %3062  ;;  %v3061_v55 = vpop.permute.xlu0 %3060 }
 0x240   : > { %5064 = vst [vmem:[#allocation4 + $0x28] sm:$0xf] %v4771_v34  ;;  %5067 = vst [vmem:[#allocation4 + $0x2c] sm:$0x1] %v5066_v1  ;;  %v16897_v43 = vld [vmem:[#allocation2 + $0xcc] sm:$0xe]  ;;  %2180 = vrot.lane.b32.xlu1 %v2087_v59, %s13991_s30 }
 0x241   : > { %v16899_v12 = vld [vmem:[#allocation2 + $0xd0] sm:$0xf]  ;;  %v12509_v20 = vrot.slane %v5178_v40, 9  ;;  %2803 = vst.msk [vmem:[#allocation3 + $0x5c] sm:$0xf] %vm19349_vm2, %v2730_v10  ;;  %v16904_v29 = vrot.slane %v3771_v36, 5 }
 0x242   : > { %v2089_v25 = vld [vmem:[#allocation2 + $0xc4] sm:$0xf]  ;;  %v16908_v33 = vrot.slane %v4100_v41, 4  ;;  %v5276_v13 = vld [vmem:[#allocation4 + $0x30] sm:$0x1]  ;;  %v19355_v10 = vld [vmem:[#allocation11_spill] sm:$0xff] }
 0x243   : > { %v5177_v27 = vld [vmem:[#allocation4 + $0x24] sm:$0x2]  ;;  %2802 = vst.msk [vmem:[#allocation3 + $0x58] sm:$0xf] %vm19350_vm7, %v2728_v4  ;;  %v2088_v38 = vld [vmem:[#allocation2 + $0xc0] sm:$0xf]  ;;  %v5277_v58 = vsel %vm16416_vm11, %v12509_v20, %v5276_v13  ;;  %v3067_v59 = vpop.permute.xlu1 %3066 }
 0x244   : > { %v16912_v16 = vld [vmem:[#allocation4 + $0x30] sm:$0xe]  ;;  %v12508_v45 = vrot.slane %v5177_v27, 9  ;;  %v7691_v39 = vld [vmem:[#allocation4 + $0x24] sm:$0xe]  ;;  %2184 = vrot.lane.b32.xlu1 %v2089_v25, %s13991_s30  ;;  %2182 = vrot.lane.b32.xlu0 %v2088_v38, %s13991_s30  ;;  %v19352_v47 = vld [vmem:[#allocation36_spill] sm:$0xff]  ;;  %v3065_v25 = vpop.permute.xlu0 %3064 }
 0x245   : > { %5278 = vst [vmem:[#allocation4 + $0x30] sm:$0x1] %v5277_v58  ;;  %v5273_v61 = vld [vmem:[#allocation4 + $0x24] sm:$0x1]  ;;  %v5322_v50 = vld [vmem:[#allocation4 + $0x34] sm:$0x8] }
 0x246   : > { %v5540_v60 = vld [vmem:[#allocation4 + $0x34] sm:$0xf]  ;;  %v5274_v2 = vsel %vm16416_vm11, %v12508_v45, %v5273_v61  ;;  %v12527_v22 = vrot.slane %v5322_v50, 11  ;;  %3138 = vst.msk [vmem:[#allocation3 + $0x54] sm:$0xf] %vm3116_vm12, %v3063_v35  ;;  %v12545_v19 = vrot.slane %v16912_v16, 9 }
 0x247   : > { %v16921_v49 = vld [vmem:[#allocation4 + $0x34] sm:$0xf]  ;;  %5275 = vst [vmem:[#allocation4 + $0x24] sm:$0x1] %v5274_v2  ;;  %v12574_v21 = vrot.slane %v7691_v39, 9  ;;  %v5685_v57 = vshrl.u32 %v5540_v60, 16 }
 0x248   : > { %v7199_v14 = vld [vmem:[#allocation4 + $0x34] sm:$0xf]  ;;  %v5421_v3 = vld [vmem:[#allocation4 + $0x38] sm:$0x1]  ;;  %3137 = vst.msk [vmem:[#allocation3 + $0x50] sm:$0xf] %vm3116_vm12, %v3061_v55 }
 0x249   : > { %v6302_v56 = vld [vmem:[#allocation4 + $0x34] sm:$0xf]  ;;  %v5422_v30 = vsel %vm16481_vm9, %v12527_v22, %v5421_v3  ;;  %v7302_v28 = vshrl.u32 %v7199_v14, 16  ;;  %v5321_v9 = vld [vmem:[#allocation4 + $0x28] sm:$0x8]  ;;  %v5681_v0 = vshll.u32 %v5540_v60, 16 }
 0x24a   : > { %v19353_v42 = vld [vmem:[#allocation48_spill] sm:$0xff]  ;;  %v6032_v36 = vld [vmem:[#allocation4 + $0x24] sm:$0xe]  ;;  %6334 = vst [vmem:[#allocation5 + $0x108] sm:$0xf] %v6302_v56  ;;  %v12526_v34 = vrot.slane %v5321_v9, 11 }
 0x24b   : > { %v2658_v51 = vsel %vm14230_vm14, %v19353_v42, %v19352_v47  ;;  %5423 = vst [vmem:[#allocation4 + $0x38] sm:$0x1] %v5422_v30  ;;  %v5418_v1 = vld [vmem:[#allocation4 + $0x2c] sm:$0x1]  ;;  %v7692_v7 = vld [vmem:[#allocation4 + $0x28] sm:$0xf]  ;;  %v3257_v30 = vpop.permute.xlu1 %3256 }
 0x24c   : > { %v19354_v40 = vld [vmem:[#allocation37_spill] sm:$0xff]  ;;  %v7793_v4 = vrot.slane %v7692_v7, 5  ;;  %3140 = vst.msk [vmem:[#allocation3 + $0x5c] sm:$0xf] %vm3116_vm12, %v3067_v59  ;;  %v6300_v13 = vld [vmem:[#allocation4 + $0x28] sm:$0xf]  ;;  %v5419_v45 = vsel %vm16481_vm9, %v12526_v34, %v5418_v1  ;;  %2741 = vrot.lane.b32.xlu1 %v2658_v51, %s13996_s12 }
 0x24d   : > { %v2648_v20 = vsel %vm14230_vm14, %v19355_v10, %v19354_v40  ;;  %v6033_v27 = vld [vmem:[#allocation4 + $0x28] sm:$0xf]  ;;  %v7298_v38 = vshll.u32 %v7199_v14, 16  ;;  %v16940_v58 = vrot.slane %v5685_v57, 4  ;;  %3139 = vst.msk [vmem:[#allocation3 + $0x58] sm:$0xf] %vm3116_vm12, %v3065_v25  ;;  %v3255_v40 = vpop.permute.xlu0 %3254 }
 0x24e   : > { %6332 = vst [vmem:[#allocation5 + $0xc0] sm:$0xf] %v6300_v13  ;;  %v12544_v39 = vrot.slane %v6032_v36, 9  ;;  %v6142_v61 = vrot.slane %v6033_v27, 5  ;;  %v16946_v50 = vld [vmem:[#allocation4 + $0x24] sm:$0xe]  ;;  %v7794_v22 = vsel %vm14128_vm10, %v12574_v21, %v7793_v4  ;;  %2739 = vrot.lane.b32.xlu0 %v2648_v20, %s13996_s12 }
 0x24f   : > { %v16948_v60 = vld [vmem:[#allocation4 + $0x30] sm:$0xf]  ;;  %v16952_v2 = vrot.slane %v7302_v28, 4  ;;  %5420 = vst [vmem:[#allocation4 + $0x2c] sm:$0x1] %v5419_v45  ;;  %v19356_v14 = vld [vmem:[#allocation8_spill] sm:$0xff] }
 0x250   : > { %v16950_v35 = vld [vmem:[#allocation4 + $0x30] sm:$0xf]  ;;  %v16961_v57 = vrot.slane %v5681_v0, 5  ;;  %7930 = vst [vmem:[#allocation5 + $0x68] sm:$0xf] %v7794_v22  ;;  %v19358_v9 = vld [vmem:[#allocation32_spill] sm:$0xff]  ;;  %v6143_v27 = vsel %vm14128_vm10, %v12544_v39, %v6142_v61 }
 0x251   : > { %v19357_v55 = vld [vmem:[#allocation13_spill] sm:$0xff]  ;;  %v19359_v28 = vld [vmem:[#allocation40_spill] sm:$0xff]  ;;  %v19362_v51 = vld [vmem:[#allocation15_spill] sm:$0xff]  ;;  %3332 = vst.msk [vmem:[#allocation3 + $0x54] sm:$0xf] %vm3310_vm13, %v3257_v30  ;;  %v16985_v45 = vrot.slane %v7298_v38, 5 }
 0x252   : > { %v2682_v3 = vsel %vm14230_vm14, %v19357_v55, %v19356_v14  ;;  %v16963_v56 = vld [vmem:[#allocation4 + $0x30] sm:$0xf]  ;;  %v2672_v47 = vsel %vm14230_vm14, %v19359_v28, %v19358_v9  ;;  %v19363_v36 = vrot.slane %v19362_v51, 9  ;;  %v6036_v7 = vld [vmem:[#allocation4 + $0x34] sm:$0xf]  ;;  %v19364_v10 = vld [vmem:[#allocation47_spill] sm:$0xff] }
 0x253   : > { %v19360_v42 = vld [vmem:[#allocation9_spill] sm:$0xff]  ;;  %v5536_v0 = vld [vmem:[#allocation4 + $0x24] sm:$0xf]  ;;  %v19365_v20 = vrot.slane %v19364_v10, 5  ;;  %v5672_v14 = vshrl.u32 %v16948_v60, 16  ;;  %v5675_v55 = vshll.u32 %v16948_v60, 16  ;;  %2745 = vrot.lane.b32.xlu1 %v2682_v3, %s13996_s12  ;;  %2743 = vrot.lane.b32.xlu0 %v2672_v47, %s13996_s12 }
 0x254   : > { %v19361_v21 = vrot.slane %v19360_v42, 5  ;;  %v6301_v1 = vld [vmem:[#allocation4 + $0x30] sm:$0xf]  ;;  %v16975_v59 = vld [vmem:[#allocation4 + $0x24] sm:$0xf]  ;;  %v5648_v9 = vshrl.u32 %v5536_v0, 16 }
 0x255   : > { %v19366_v25 = vld [vmem:[#allocation39_spill] sm:$0xff]  ;;  %6333 = vst [vmem:[#allocation5 + $0xe4] sm:$0xf] %v6301_v1  ;;  %3331 = vst.msk [vmem:[#allocation3 + $0x50] sm:$0xf] %vm3310_vm13, %v3255_v40  ;;  %v7289_v39 = vshrl.u32 %v16963_v56, 16 }
 0x256   : > { %v3009_v34 = vsel %vm14128_vm10, %v19363_v36, %v19361_v21  ;;  %v3012_v13 = vsel %vm14128_vm10, %v19366_v25, %v19365_v20  ;;  %v16991_v28 = vld [vmem:[#allocation4 + $0x24] sm:$0xf]  ;;  %6269 = vst [vmem:[#allocation5 + $0xe0] sm:$0xf] %v6143_v27  ;;  %v7292_v38 = vshll.u32 %v16963_v56, 16  ;;  %v5651_v42 = vshll.u32 %v5536_v0, 16  ;;  %v3261_v20 = vpop.permute.xlu1 %3260  ;;  %v3259_v25 = vpop.permute.xlu0 %3258 }
 0x257   : > { %v6456_v21 = vshrl.u32 %v16975_v59, 16  ;;  %v6299_v51 = vld [vmem:[#allocation4 + $0x24] sm:$0xf]  ;;  %v7265_v1 = vshrl.u32 %v16991_v28, 16  ;;  %v7795_v10 = vrot.slane %v7793_v4, 4  ;;  %v6149_v3 = vrot.slane %v6036_v7, 5  ;;  %3078 = vrot.lane.b32.xlu1 %v3012_v13, %s13994_s10  ;;  %3076 = vrot.lane.b32.xlu0 %v3009_v34, %s13994_s10 }
 0x258   : > { %6331 = vst [vmem:[#allocation5 + $0x9c] sm:$0xf] %v6299_v51  ;;  %v6037_v40 = vld [vmem:[#allocation4 + $0x38] sm:$0x1]  ;;  %3334 = vst.msk [vmem:[#allocation3 + $0x5c] sm:$0xf] %vm3310_vm13, %v3261_v20 }
 0x259   : > { %v6144_v27 = vrot.slane %v6142_v61, 4  ;;  %v6152_v32 = vrot.slane %v6037_v40, 5  ;;  %v5469_v0 = vld [vmem:[#allocation4 + $0x24] sm:$0xf]  ;;  %v5650_v62 = vrot.slane %v5648_v9, 4  ;;  %v19367_v47 = vld [vmem:[#allocation38_spill] sm:$0xff]  ;;  %v6150_v61 = vsel %vm14128_vm10, %v12545_v19, %v6149_v3 }
 0x25a   : > { %v7693_v30 = vld [vmem:[#allocation4 + $0x2c] sm:$0x1]  ;;  %3333 = vst.msk [vmem:[#allocation3 + $0x58] sm:$0xf] %vm3310_vm13, %v3259_v25  ;;  %v19368_v53 = vrot.slane %v19367_v47, 5  ;;  %v19370_v4 = vrot.slane %v19369_v63, 9  ;;  %v5688_v19 = vor.u32 %v16940_v58, %v16961_v57 }
 0x25b   : > { %v6034_v7 = vld [vmem:[#allocation4 + $0x2c] sm:$0x1]  ;;  %v6151_v20 = vrot.slane %v6149_v3, 4  ;;  %v13706_v9 = vld [vmem:[%s18953_s3 + $0x78] sm:$0xff]   ;;  %5501 = vst [vmem:[#allocation5 + $0xd8] sm:$0xf] %v5469_v0  ;;  %v3818_v3 = vpop.permute.xlu1 %3817 }
 0x25c   : > { %v3016_v51 = vsel %vm14128_vm10, %v19370_v4, %v19368_v53  ;;  %v7796_v13 = vrot.slane %v7693_v30, 5  ;;  %v19371_v40 = vld [vmem:[#allocation16_spill] sm:$0xff]  ;;  %v19373_v25 = vld [vmem:[#allocation17_spill] sm:$0xff]  ;;  %v6145_v47 = vrot.slane %v6034_v7, 5  ;;  %6271 = vst [vmem:[#allocation5 + $0x128] sm:$0xf] %v6150_v61  ;;  %13022 = vmatprep.subr.bf16.mxu1 %v13706_v9  ;;  %v3816_v61 = vpop.permute.xlu0 %3815 }
 0x25d   : > { %v19372_v63 = vrot.slane %v19371_v40, 5  ;;  %v5470_v16 = vld [vmem:[#allocation4 + $0x28] sm:$0xf]  ;;  %v6153_v0 = vsel %vm14128_vm10, %v6151_v20, %v6152_v32  ;;  %v5538_v34 = vld [vmem:[#allocation4 + $0x2c] sm:$0x1]  ;;  %v5653_v30 = vrot.slane %v5651_v42, 5  ;;  %3080 = vrot.lane.b32.xlu0 %v3016_v51, %s13994_s10 }
 0x25e   : > { %v5537_v4 = vld [vmem:[#allocation4 + $0x28] sm:$0xf]  ;;  %5502 = vst [vmem:[#allocation5 + $0xfc] sm:$0xf] %v5470_v16  ;;  %v7268_v36 = vshll.u32 %v16991_v28, 16  ;;  %v7797_v7 = vsel %vm14128_vm10, %v7795_v10, %v7796_v13  ;;  %v6146_v58 = vsel %vm14128_vm10, %v6144_v27, %v6145_v47  ;;  %v5667_v32 = vshll.u32 %v5538_v34, 16 }
 0x25f   : > { %v3019_v53 = vsel %vm14128_vm10, %v19373_v25, %v19372_v63  ;;  %v5657_v40 = vshll.u32 %v5537_v4, 16  ;;  %v5661_v22 = vshrl.u32 %v5537_v4, 16  ;;  %3893 = vst.msk [vmem:[#allocation3 + $0x54] sm:$0xf] %vm3871_vm15, %v3818_v3  ;;  %v3179_v63 = vld [vmem:[#allocation2 + $0xc4] sm:$0xf]  ;;  %v5654_v27 = vor.u32 %v5653_v30, %v5650_v62  ;;  %v3822_v34 = vpop.permute.xlu1 %3821 }
 0x260   : > { %6272 = vst [vmem:[#allocation5 + $0x14c] sm:$0xf] %v6153_v0  ;;  %v5471_v20 = vld [vmem:[#allocation4 + $0x30] sm:$0xf]  ;;  %v5472_v9 = vld [vmem:[#allocation4 + $0x34] sm:$0xf]  ;;  %3082 = vrot.lane.b32.xlu1 %v3019_v53, %s13994_s10  ;;  %v3740_v3 = vsel %vm14230_vm14, %v16879_v8, %v19341_v18  ;;  %v3750_v0 = vsel %vm14230_vm14, %v16881_v46, %v16885_v31 }
 0x261   : > { %7931 = vst [vmem:[#allocation5 + $0x8c] sm:$0xf] %v7797_v7  ;;  %3892 = vst.msk [vmem:[#allocation3 + $0x50] sm:$0xf] %vm3871_vm15, %v3816_v61  ;;  %v3178_v42 = vld [vmem:[#allocation2 + $0xc0] sm:$0xf]  ;;  %v3820_v61 = vpop.permute.xlu0 %3819 }
 0x262   : > { %6270 = vst [vmem:[#allocation5 + $0x104] sm:$0xf] %v6146_v58  ;;  %v13707_v10 = vld [vmem:[%s18953_s3 + $0x38] sm:$0xff]   ;;  %v13708_v13 = vld [vmem:[%s18953_s3 + $0x70] sm:$0xff]   ;;  %v5659_v25 = vrot.slane %v5657_v40, 5  ;;  %v5663_v47 = vrot.slane %v5661_v22, 4  ;;  %3270 = vrot.lane.b32.xlu0 %v3178_v42, %s13993_s9 }
 0x263   : > { %5503 = vst [vmem:[#allocation5 + $0x120] sm:$0xf] %v5471_v20  ;;  %5504 = vst [vmem:[#allocation5 + $0x144] sm:$0xf] %v5472_v9  ;;  %v5541_v16 = vld [vmem:[#allocation4 + $0x38] sm:$0x1]  ;;  %13023 = vmatpush3.bf16.msra.mxu1 %v13707_v10 }
 0x264   : > { %v13692_v4 = vld [vmem:[#allocation5 + $0x9c] ss:$36 sps:$4 sm:$0xff]   ;;  %v5669_v62 = vrot.slane %v5667_v32, 5  ;;  %v5655_v22 = vrot.slane %v5654_v27, 4  ;;  %v5664_v30 = vor.u32 %v5663_v47, %v5659_v25  ;;  %v5674_v51 = vrot.slane %v5672_v14, 4  ;;  %13024 = vmatprep.subr.bf16.mxu1 %v13708_v13  ;;  %3272 = vrot.lane.b32.xlu1 %v3179_v63, %s13993_s9  ;;  %v13720_v18 = vld [vmem:[%s18953_s3 + $0x18] sm:$0xff]  }
 0x265   : > { %v13694_v53 = vld [vmem:[#allocation5 + $0x98] ss:$36 sps:$4 sm:$0xff]   ;;  %v5677_v40 = vrot.slane %v5675_v55, 5  ;;  %v7130_v7 = vld [vmem:[#allocation4 + $0x24] sm:$0xf]  ;;  %9648 = vmatprep.mubr.bf16.mxu0 %v13692_v4  ;;  %v17061_v32 = vsel %vm14128_vm10, %v12435_v52, %v4100_v41  ;;  %v5689_v20 = vrot.slane %v5688_v19, 4  ;;  %v7305_v55 = vor.u32 %v16952_v2, %v16985_v45 }
 0x266   : > { %3895 = vst.msk [vmem:[#allocation3 + $0x5c] sm:$0xf] %vm3871_vm15, %v3822_v34  ;;  %v3181_v58 = vld [vmem:[#allocation2 + $0xd0] sm:$0xf]  ;;  %v5691_v14 = vshll.u32 %v5541_v16, 16  ;;  %9649 = vmatmul.mubr.bf16.gmra.mxu0 %v13694_v53  ;;  %v13713_v41 = vld [vmem:[%s18953_s3 + $0x68] sm:$0xff]   ;;  %v5660_v52 = vsel %vm14230_vm14, %v5655_v22, %v5659_v25  ;;  %v4155_v53 = vpop.permute.xlu1 %4154  ;;  %v3774_v25 = vsel %vm14230_vm14, %v16894_v26, %v16904_v29 }
 0x267   : > { %v7131_v9 = vld [vmem:[#allocation4 + $0x28] sm:$0xf]  ;;  %7162 = vst [vmem:[#allocation5 + $0x60] sm:$0xf] %v7130_v7  ;;  %3894 = vst.msk [vmem:[#allocation3 + $0x58] sm:$0xf] %vm3871_vm15, %v3820_v61  ;;  %v5678_v10 = vor.u32 %v5677_v40, %v5674_v51 }
 0x268   : > { %v7196_v60 = vld [vmem:[#allocation4 + $0x28] sm:$0xf]  ;;  %v3180_v37 = vld [vmem:[#allocation2 + $0xcc] sm:$0xf]  ;;  %v13709_v48 = vld [vmem:[%s18953_s3 + $0x30] sm:$0xff]   ;;  %v5665_v19 = vrot.slane %v5664_v30, 4  ;;  %v4153_v30 = vpop.permute.xlu0 %4152  ;;  %3276 = vrot.lane.b32.xlu1 %v3181_v58, %s13993_s9 }
 0x269   : > { %7163 = vst [vmem:[#allocation5 + $0x84] sm:$0xf] %v7131_v9  ;;  %v7197_v2 = vld [vmem:[#allocation4 + $0x2c] sm:$0x1]  ;;  %v7267_v13 = vrot.slane %v7265_v1, 4  ;;  %v5693_v63 = vrot.slane %v5691_v14, 5  ;;  %13025 = vmatpush3.bf16.msra.mxu1 %v13709_v48  ;;  %3274 = vrot.lane.b32.xlu0 %v3180_v37, %s13993_s9 }
 0x26a   : > { %5997 = vst [vmem:[#allocation5 + $0xdc] sm:$0xf] %v5660_v52  ;;  %v7270_v27 = vrot.slane %v7268_v36, 5  ;;  %v7274_v47 = vshll.u32 %v7196_v60, 16  ;;  %v7278_v16 = vshrl.u32 %v7196_v60, 16  ;;  %v5670_v34 = vsel %vm14230_vm14, %v5665_v19, %v5669_v62  ;;  %v7991_v36 = vld [vmem:[#allocation5 + $0xe0] sm:$0xff]  ;;  %13026 = vmatprep.subr.bf16.mxu1 %v13713_v41 }
 0x26b   : > { %v7132_v4 = vld [vmem:[#allocation4 + $0x30] sm:$0xf]  ;;  %v5679_v28 = vrot.slane %v5678_v10, 4  ;;  %v7284_v1 = vshll.u32 %v7197_v2, 16  ;;  %v7133_v22 = vld [vmem:[#allocation4 + $0x34] sm:$0xf]  ;;  %v5694_v7 = vsel %vm14230_vm14, %v5689_v20, %v5693_v63 }
 0x26c   : > { %7164 = vst [vmem:[#allocation5 + $0xa8] sm:$0xf] %v7132_v4  ;;  %v7200_v42 = vld [vmem:[#allocation4 + $0x38] sm:$0x1]  ;;  %4230 = vst.msk [vmem:[#allocation3 + $0x54] sm:$0xf] %vm4208_vm0, %v4155_v53  ;;  %v7271_v61 = vor.u32 %v7270_v27, %v7267_v13  ;;  %v4159_v27 = vpop.permute.xlu1 %4158  ;;  %v4157_v53 = vpop.permute.xlu0 %4156  ;;  %3833 = vrot.lane.b32.xlu1 %v3750_v0, %s13997_s13 }
 0x26d   : > { %v7996_v51 = vld [vmem:[#allocation5 + $0x104] sm:$0xff]  ;;  %5998 = vst [vmem:[#allocation5 + $0x100] sm:$0xf] %v5670_v34  ;;  %v7276_v14 = vrot.slane %v7274_v47, 5  ;;  %v7280_v9 = vrot.slane %v7278_v16, 4  ;;  %v13714_v60 = vld [vmem:[%s18953_s3 + $0x28] sm:$0xff]   ;;  %v5684_v20 = vsel %vm14230_vm14, %v5679_v28, %v16961_v57  ;;  %3831 = vrot.lane.b32.xlu0 %v3740_v3, %s13997_s13 }
 0x26e   : > { %v13695_v40 = vld [vmem:[#allocation5 + $0xe4] ss:$36 sps:$4 sm:$0xff]   ;;  %7165 = vst [vmem:[#allocation5 + $0xcc] sm:$0xf] %v7133_v22  ;;  %4229 = vst.msk [vmem:[#allocation3 + $0x50] sm:$0xf] %vm4208_vm0, %v4153_v30  ;;  %v12619_v62 = vcombine.low %v7991_v36, %v7996_v51  ;;  %13027 = vmatpush3.bf16.msra.mxu1 %v13714_v60 }
 0x26f   : > { %v13715_v48 = vld [vmem:[%s18953_s3 + $0x60] sm:$0xff]   ;;  %6000 = vst [vmem:[#allocation5 + $0x148] sm:$0xf] %v5694_v7  ;;  %v7286_v41 = vrot.slane %v7284_v1, 5  ;;  %v7291_v52 = vrot.slane %v7289_v39, 4  ;;  %9656 = vmatprep.mubr.bf16.mxu0 %v13695_v40  ;;  %v7272_v58 = vrot.slane %v7271_v61, 4  ;;  %v7281_v10 = vor.u32 %v7280_v9, %v7276_v14 }
 0x270   : > { %v6366_v19 = vld [vmem:[#allocation4 + $0x28] sm:$0xf]  ;;  %5999 = vst [vmem:[#allocation5 + $0x124] sm:$0xf] %v5684_v20  ;;  %v7294_v2 = vrot.slane %v7292_v38, 5  ;;  %v7306_v13 = vrot.slane %v7305_v55, 4  ;;  %13028 = vmatprep.subr.bf16.mxu1 %v13715_v48  ;;  %9657 = vmatmul.mubr.bf16.gmra.mxu0 %v12619_v62  ;;  %v1640_v7 = vpop.permute.xlu1 %1639  ;;  %v3764_v61 = vsel %vm14230_vm14, %v16902_v6, %v16801_v17  ;;  %v1638_v9 = vpop.permute.xlu0 %1637 }
 0x271   : > { %v6367_v63 = vld [vmem:[#allocation4 + $0x2c] sm:$0x1]  ;;  %v7308_v57 = vshll.u32 %v7200_v42, 16  ;;  %v6458_v47 = vrot.slane %v6456_v21, 4  ;;  %v19374_v39 = vshll.u32 %v16975_v59, 16  ;;  %v6465_v4 = vshll.u32 %v6366_v19, 16  ;;  %3837 = vrot.lane.b32.xlu1 %v3774_v25, %s13997_s13  ;;  %3835 = vrot.lane.b32.xlu0 %v3764_v61, %s13997_s13 }
 0x272   : > { %v6862_v37 = vld [vmem:[#allocation4 + $0x28] sm:$0xf]  ;;  %4232 = vst.msk [vmem:[#allocation3 + $0x5c] sm:$0xf] %vm4208_vm0, %v4159_v27  ;;  %v7277_v56 = vsel %vm14230_vm14, %v7272_v58, %v7276_v14  ;;  %v7282_v38 = vrot.slane %v7281_v10, 4  ;;  %v7295_v55 = vor.u32 %v7294_v2, %v7291_v52  ;;  %v6469_v34 = vshrl.u32 %v6366_v19, 16 }
 0x273   : > { %v6461_v16 = vrot.slane %v19374_v39, 5  ;;  %4231 = vst.msk [vmem:[#allocation3 + $0x58] sm:$0xf] %vm4208_vm0, %v4157_v53  ;;  %v17117_v59 = vld [vmem:[#allocation2 + $0xd4] sm:$0x1]  ;;  %v13718_v21 = vld [vmem:[%s18953_s3 + $0x20] sm:$0xff]  }
 0x274   : > { %v13719_v28 = vld [vmem:[%s18953_s3 + $0x58] sm:$0xff]   ;;  %7658 = vst [vmem:[#allocation5 + $0x64] sm:$0xf] %v7277_v56  ;;  %v7310_v1 = vrot.slane %v7308_v57, 5  ;;  %v6467_v42 = vrot.slane %v6465_v4, 5  ;;  %v6475_v30 = vshll.u32 %v6367_v63, 16  ;;  %v7287_v46 = vsel %vm14230_vm14, %v7282_v38, %v7286_v41  ;;  %13029 = vmatpush3.bf16.msra.mxu1 %v13718_v21  ;;  %v1644_v57 = vpop.permute.xlu1 %1643  ;;  %v13527_v21 = vpop.f32.mrf.mxu0 }
 0x275   : > { %v6462_v22 = vor.u32 %v6461_v16, %v6458_v47  ;;  %v7296_v31 = vrot.slane %v7295_v55, 4  ;;  %v6471_v0 = vrot.slane %v6469_v34, 4  ;;  %v6863_v36 = vld [vmem:[#allocation4 + $0x2c] sm:$0x1]  ;;  %v6967_v51 = vrot.slane %v6862_v37, 5  ;;  %v13697_v62 = vld [vmem:[#allocation3 + $0x50] sm:$0xff]   ;;  %13030 = vmatprep.subr.bf16.mxu1 %v13719_v28  ;;  %v1642_v37 = vpop.permute.xlu0 %1641  ;;  %4168 = vrot.lane.b32.xlu0 %v17061_v32, %s13998_s14 }
 0x276   : > { %v6483_v40 = vshll.u32 %v16950_v35, 16  ;;  %7659 = vst [vmem:[#allocation5 + $0x88] sm:$0xf] %v7287_v46  ;;  %v7311_v8 = vsel %vm14230_vm14, %v7306_v13, %v7310_v1  ;;  %v6864_v14 = vld [vmem:[#allocation4 + $0x30] sm:$0xe]  ;;  %v6477_v60 = vrot.slane %v6475_v30, 5  ;;  %13537 = vmatprep.mubr.msk.bf16.mxu1 %vm4380_vm3, %v13697_v62  ;;  %v4499_v61 = vpop.f32.mrf.mxu0 }
 0x277   : > { %v6463_v3 = vrot.slane %v6462_v22, 4  ;;  %1711 = vst.msk [vmem:[#allocation3 + $0x64] sm:$0xf] %vm1685_vm1, %v1640_v7  ;;  %v7301_v17 = vsel %vm14230_vm14, %v7296_v31, %v16985_v45  ;;  %7661 = vst [vmem:[#allocation5 + $0xd0] sm:$0xf] %v7311_v8  ;;  %v6472_v6 = vor.u32 %v6471_v0, %v6467_v42  ;;  %v19375_v48 = vrot.slane %v16946_v50, 9 }
 0x278   : > { %v6370_v41 = vld [vmem:[#allocation4 + $0x38] sm:$0x1]  ;;  %1710 = vst.msk [vmem:[#allocation3 + $0x60] sm:$0xf] %vm1685_vm1, %v1638_v9  ;;  %v19376_v45 = vrot.slane %v16872_v5, 5  ;;  %v6969_v19 = vrot.slane %v6967_v51, 4  ;;  %13031 = vmatpush3.bf16.msra.mxu1 %v13720_v18  ;;  %v1980_v31 = vpop.permute.xlu1 %1979  ;;  %v13528_v9 = vpop.f32.mrf.mxu0 }
 0x279   : > { %v6968_v20 = vsel %vm14128_vm10, %v19375_v48, %v6967_v51  ;;  %7660 = vst [vmem:[#allocation5 + $0xac] sm:$0xf] %v7301_v17  ;;  %v6468_v50 = vsel %vm14230_vm14, %v6463_v3, %v6467_v42  ;;  %v6970_v58 = vrot.slane %v6863_v36, 5  ;;  %v6865_v10 = vld [vmem:[#allocation4 + $0x34] sm:$0xf]  ;;  %v19377_v26 = vrot.slane %v16899_v12, 5  ;;  %v1978_v7 = vpop.permute.xlu0 %1977 }
 0x27a   : > { %v4104_v52 = vsel %vm14128_vm10, %v16908_v33, %v19376_v45  ;;  %7099 = vst [vmem:[#allocation5 + $0xa4] sm:$0xf] %v6968_v20  ;;  %v4110_v5 = vrot.slane %v17117_v59, 5  ;;  %v13722_v33 = vld [vmem:[%s18953_s3 + $0x50] sm:$0xff]   ;;  %v6473_v25 = vrot.slane %v6472_v6, 4  ;;  %v19378_v2 = vshrl.u32 %v16950_v35, 16 }
 0x27b   : > { %v4109_v29 = vrot.slane %v19377_v26, 4  ;;  %6827 = vst [vmem:[#allocation5 + $0xa0] sm:$0xf] %v6468_v50  ;;  %v19379_v63 = vshrl.u32 %v16921_v49, 16  ;;  %v13723_v47 = vld [vmem:[%s18953_s3 + $0x10] sm:$0xff]   ;;  %v6971_v39 = vsel %vm14128_vm10, %v6969_v19, %v6970_v58  ;;  %v6485_v16 = vrot.slane %v6483_v40, 5  ;;  %13032 = vmatprep.subr.bf16.mxu1 %v13722_v33  ;;  %4170 = vrot.lane.b32.xlu1 %v4104_v52, %s13998_s14  ;;  %v4502_v50 = vpop.f32.mrf.mxu0 }
 0x27c   : > { %v6482_v13 = vrot.slane %v19378_v2, 4  ;;  %v6489_v4 = vshll.u32 %v16921_v49, 16  ;;  %1713 = vst.msk [vmem:[#allocation3 + $0x6c] sm:$0xf] %vm1685_vm1, %v1644_v57  ;;  %v13698_v35 = vld [vmem:[#allocation3 + $0x58] sm:$0xff]   ;;  %v6478_v53 = vsel %vm14230_vm14, %v6473_v25, %v6477_v60  ;;  %v6499_v56 = vshll.u32 %v6370_v41, 16  ;;  %13033 = vmatpush3.bf16.msra.mxu1 %v13723_v47  ;;  %v1984_v41 = vpop.permute.xlu1 %1983 }
 0x27d   : > { %v6495_v27 = vrot.slane %v19379_v63, 4  ;;  %7100 = vst [vmem:[#allocation5 + $0xc8] sm:$0xf] %v6971_v39  ;;  %v12560_v38 = vrot.slane %v6864_v14, 9  ;;  %v6974_v55 = vrot.slane %v6865_v10, 5  ;;  %13538 = vmatmul.mubr.msk.bf16.gmra.mxu1 %vm4380_vm3, %v13698_v35  ;;  %v4111_v28 = vsel %vm14128_vm10, %v4109_v29, %v4110_v5  ;;  %v1982_v52 = vpop.permute.xlu0 %1981 }
 0x27e   : > { %1712 = vst.msk [vmem:[#allocation3 + $0x68] sm:$0xf] %vm1685_vm1, %v1642_v37  ;;  %6828 = vst [vmem:[#allocation5 + $0xc4] sm:$0xf] %v6478_v53  ;;  %v6486_v34 = vor.u32 %v6485_v16, %v6482_v13  ;;  %v6491_v59 = vrot.slane %v6489_v4, 5  ;;  %v19380_v32 = vmov %v19377_v26  ;;  %v19381_v0 = vrot.slane %v16897_v43, 9 }
 0x27f   : > { %v6866_v49 = vld [vmem:[#allocation4 + $0x38] sm:$0x1]  ;;  %v6975_v1 = vsel %vm14128_vm10, %v12560_v38, %v6974_v55  ;;  %v6976_v22 = vrot.slane %v6974_v55, 4  ;;  %v17198_v30 = vld [vmem:[%s18952_s2] ss:$0 sm:$0xff]  ;;  %vm19382_vm6 = vcmask 93248   ;;  %4174 = vrot.lane.b32.xlu1 %v4111_v28, %s13998_s14 }
 0x280   : > { %v6977_v42 = vrot.slane %v6866_v49, 5  ;;  %v4508_v46 = vadd.f32 %v17198_v30, %v13527_v21  ;;  %v4108_v36 = vsel %vm14128_vm10, %v19381_v0, %v19380_v32  ;;  %v6487_v51 = vrot.slane %v6486_v34, 4  ;;  %7101 = vst [vmem:[#allocation5 + $0xec] sm:$0xf] %v6975_v1  ;;  %2051 = vst.msk [vmem:[#allocation3 + $0x64] sm:$0xf] %vm19382_vm6, %v1980_v31  ;;  %v2173_v47 = vpop.permute.xlu1 %2172 }
 0x281   : > { %v6496_v40 = vor.u32 %v6495_v27, %v6491_v59  ;;  %v6501_v18 = vrot.slane %v6499_v56, 5  ;;  %vm19383_vm2 = vmmov %vm19382_vm6  ;;  %v4500_v43 = vadd.f32 %v17198_v30, %v4499_v61  ;;  %v7694_v14 = vld [vmem:[#allocation4 + $0x30] sm:$0xe]  ;;  %4172 = vrot.lane.b32.xlu0 %v4108_v36, %s13998_s14  ;;  %v7695_v17 = vld [vmem:[#allocation4 + $0x34] sm:$0xf]  ;;  %v4511_v20 = vadd.f32 %v17198_v30, %v13528_v9  ;;  %v2171_v4 = vpop.permute.xlu0 %2170 }
 0x282   : > { %v6978_v8 = vsel %vm14128_vm10, %v6976_v22, %v6977_v42  ;;  %v4604_v3 = vmax.f32 %v4508_v46, 0.0  ;;  %2050 = vst.msk [vmem:[#allocation3 + $0x60] sm:$0xf] %vm19383_vm2, %v1978_v7  ;;  %v6492_v12 = vsel %vm14230_vm14, %v6487_v51, %v6491_v59  ;;  %v7696_v6 = vld [vmem:[#allocation4 + $0x38] sm:$0x1]  ;;  %v7800_v45 = vrot.slane %v7695_v17, 5  ;;  %vm19384_vm7 = vmmov %vm19383_vm2 }
 0x283   : > { %7102 = vst [vmem:[#allocation5 + $0x110] sm:$0xf] %v6978_v8  ;;  %v6497_v62 = vrot.slane %v6496_v40, 4  ;;  %6829 = vst [vmem:[#allocation5 + $0xe8] sm:$0xf] %v6492_v12  ;;  %v4602_v48 = vmax.f32 %v4500_v43, 0.0  ;;  %v4503_v33 = vadd.f32 %v17198_v30, %v4502_v50 }
 0x284   : > { %v12981_v60 = vpack.c.bf16 %v4604_v3, %v4604_v3  ;;  %2053 = vst.msk [vmem:[#allocation3 + $0x6c] sm:$0xf] %vm19384_vm7, %v1984_v41  ;;  %v12575_v58 = vrot.slane %v7694_v14, 9  ;;  %v7803_v10 = vrot.slane %v7696_v6, 5  ;;  %v4605_v5 = vmax.f32 %v4511_v20, 0.0  ;;  %vm19385_vm6 = vmmov %vm19383_vm2  ;;  %v13725_v55 = vld [vmem:[%s18953_s3 + $0x48] sm:$0xff]   ;;  %v2177_v42 = vpop.permute.xlu1 %2176 }
 0x285   : > { %v6502_v19 = vsel %vm14230_vm14, %v6497_v62, %v6501_v18  ;;  %v12979_v29 = vpack.c.bf16 %v4602_v48, %v4602_v48  ;;  %2052 = vst.msk [vmem:[#allocation3 + $0x68] sm:$0xf] %vm19385_vm6, %v1982_v52  ;;  %v7802_v2 = vrot.slane %v7800_v45, 4  ;;  %v5082_v39 = vld [vmem:[#allocation4 + $0x48] sm:$0xf]  ;;  %v4603_v16 = vmax.f32 %v4503_v33, 0.0  ;;  %13034 = vmatprep.subr.bf16.mxu1 %v13725_v55  ;;  %v2175_v32 = vpop.permute.xlu0 %2174 }
 0x286   : > { %v4808_v26 = vshrl.u32 %v12981_v60, 16  ;;  %6830 = vst [vmem:[#allocation5 + $0x10c] sm:$0xf] %v6502_v19  ;;  %v7801_v25 = vsel %vm14128_vm10, %v12575_v58, %v7800_v45  ;;  %v4811_v63 = vshll.u32 %v12981_v60, 16  ;;  %v12982_v57 = vpack.c.bf16 %v4605_v5, %v4605_v5  ;;  %2244 = vst.msk [vmem:[#allocation3 + $0x64] sm:$0xf] %vm2218_vm8, %v2173_v47 }
 0x287   : > { %v4791_v27 = vshrl.u32 %v12979_v29, 16  ;;  %7932 = vst [vmem:[#allocation5 + $0xb0] sm:$0xf] %v7801_v25  ;;  %v7804_v37 = vsel %vm14128_vm10, %v7802_v2, %v7803_v10  ;;  %v4794_v56 = vshll.u32 %v12979_v29, 16  ;;  %2243 = vst.msk [vmem:[#allocation3 + $0x60] sm:$0xf] %vm2218_vm8, %v2171_v4  ;;  %v12980_v59 = vpack.c.bf16 %v4603_v16, %v4603_v16 }
 0x288   : > { %v4810_v13 = vrot.slane %v4808_v26, 7  ;;  %v4816_v38 = vshrl.u32 %v12982_v57, 16  ;;  %7933 = vst [vmem:[#allocation5 + $0xd4] sm:$0xf] %v7804_v37  ;;  %v5075_v34 = vld [vmem:[#allocation4 + $0x3c] sm:$0xf]  ;;  %v2734_v43 = vpop.permute.xlu1 %2733 }
 0x289   : > { %v4793_v53 = vrot.slane %v4791_v27, 7  ;;  %v13726_v49 = vld [vmem:[%s18953_s3 + $0x8] sm:$0xff]   ;;  %v4819_v22 = vshll.u32 %v12982_v57, 16  ;;  %v4799_v31 = vshrl.u32 %v12980_v59, 16  ;;  %2246 = vst.msk [vmem:[#allocation3 + $0x6c] sm:$0xf] %vm2218_vm8, %v2177_v42  ;;  %v2732_v62 = vpop.permute.xlu0 %2731 }
 0x28a   : > { %v4813_v35 = vor.u32 %v4811_v63, %v4810_v13  ;;  %v4818_v1 = vrot.slane %v4816_v38, 7  ;;  %v5086_v46 = vld [vmem:[#allocation4 + $0x50] sm:$0x1]  ;;  %13035 = vmatpush3.bf16.msra.mxu1 %v13726_v49  ;;  %v4814_v0 = vrot.slane %v4810_v13, 4  ;;  %2245 = vst.msk [vmem:[#allocation3 + $0x68] sm:$0xf] %vm2218_vm8, %v2175_v32 }
 0x28b   : > { %v4796_v28 = vor.u32 %v4794_v56, %v4793_v53  ;;  %v4801_v7 = vrot.slane %v4799_v31, 7  ;;  %v4802_v61 = vshll.u32 %v12980_v59, 16  ;;  %v5079_v3 = vld [vmem:[#allocation4 + $0x44] sm:$0x1]  ;;  %v4797_v12 = vrot.slane %v4793_v53, 4  ;;  %v13730_v17 = vld [vmem:[%s18953_s3 + $0x40] sm:$0xff]  }
 0x28c   : > { %v5083_v21 = vsel %vm16388_vm4, %v4813_v35, %v5082_v39  ;;  %v4821_v51 = vor.u32 %v4819_v22, %v4818_v1  ;;  %v4823_v40 = vrot.slane %v4818_v1, 4  ;;  %vm19386_vm2 = vcmask 158848   ;;  %v13731_v6 = vld [vmem:[%s18953_s3] sm:$0xff]   ;;  %13036 = vmatprep.subr.bf16.mxu1 %v13730_v17  ;;  %v2738_v41 = vpop.permute.xlu1 %2737 }
 0x28d   : > { %5084 = vst [vmem:[#allocation4 + $0x48] sm:$0xf] %v5083_v21  ;;  %v5076_v36 = vsel %vm16388_vm4, %v4796_v28, %v5075_v34  ;;  %v4804_v14 = vor.u32 %v4802_v61, %v4801_v7  ;;  %v4806_v9 = vrot.slane %v4801_v7, 4  ;;  %2805 = vst.msk [vmem:[#allocation3 + $0x64] sm:$0xf] %vm19386_vm2, %v2734_v43  ;;  %v2736_v52 = vpop.permute.xlu0 %2735 }
 0x28e   : > { %5077 = vst [vmem:[#allocation4 + $0x3c] sm:$0xf] %v5076_v36  ;;  %v4822_v18 = vsel %vm14070_vm5, %v4814_v0, %v4821_v51  ;;  %v5087_v8 = vsel %vm16416_vm11, %v4823_v40, %v5086_v46  ;;  %vm19387_vm7 = vmmov %vm19386_vm2  ;;  %13037 = vmatpush3.bf16.msra.mxu1 %v13731_v6 }
 0x28f   : > { %5085 = vst [vmem:[#allocation4 + $0x4c] sm:$0xf] %v4822_v18  ;;  %5088 = vst [vmem:[#allocation4 + $0x50] sm:$0x1] %v5087_v8  ;;  %v4805_v60 = vsel %vm14070_vm5, %v4797_v12, %v4804_v14  ;;  %v5080_v48 = vsel %vm16416_vm11, %v4806_v9, %v5079_v3 }
 0x290   : > { %2804 = vst.msk [vmem:[#allocation3 + $0x60] sm:$0xf] %vm19387_vm7, %v2732_v62  ;;  %5078 = vst [vmem:[#allocation4 + $0x40] sm:$0xf] %v4805_v60  ;;  %v3071_v2 = vpop.permute.xlu1 %3070 }
 0x291   : > { %5081 = vst [vmem:[#allocation4 + $0x44] sm:$0x1] %v5080_v48  ;;  %vm19388_vm6 = vmmov %vm19386_vm2  ;;  %v3069_v57 = vpop.permute.xlu0 %3068 }
 0x292   : > { %2807 = vst.msk [vmem:[#allocation3 + $0x6c] sm:$0xf] %vm19388_vm6, %v2738_v41 }
 0x293   : > { %2806 = vst.msk [vmem:[#allocation3 + $0x68] sm:$0xf] %vm19386_vm2, %v2736_v52 }
 0x294   : > { %v5180_v20 = vld [vmem:[#allocation4 + $0x48] sm:$0x2]  ;;  %v5282_v50 = vld [vmem:[#allocation4 + $0x48] sm:$0x1]  ;;  %3142 = vst.msk [vmem:[#allocation3 + $0x64] sm:$0xf] %vm3116_vm12, %v3071_v2  ;;  %v3075_v21 = vpop.permute.xlu1 %3074 }
 0x295   : > { %v12511_v45 = vrot.slane %v5180_v20, 9  ;;  %v5179_v19 = vld [vmem:[#allocation4 + $0x3c] sm:$0x2]  ;;  %v5279_v26 = vld [vmem:[#allocation4 + $0x3c] sm:$0x1]  ;;  %v3073_v22 = vpop.permute.xlu0 %3072 }
 0x296   : > { %v12510_v10 = vrot.slane %v5179_v19, 9  ;;  %v17260_v29 = vld [vmem:[#allocation4 + $0x48] sm:$0xe]  ;;  %v7697_v5 = vld [vmem:[#allocation4 + $0x3c] sm:$0xe] }
 0x297   : > { %v5283_v58 = vsel %vm16416_vm11, %v12511_v45, %v5282_v50  ;;  %v5324_v33 = vld [vmem:[#allocation4 + $0x4c] sm:$0x8]  ;;  %v6038_v47 = vld [vmem:[#allocation4 + $0x3c] sm:$0xe]  ;;  %v5427_v39 = vld [vmem:[#allocation4 + $0x50] sm:$0x1] }
 0x298   : > { %5284 = vst [vmem:[#allocation4 + $0x48] sm:$0x1] %v5283_v58  ;;  %v5546_v25 = vld [vmem:[#allocation4 + $0x4c] sm:$0xf]  ;;  %v5280_v13 = vsel %vm16416_vm11, %v12510_v10, %v5279_v26  ;;  %v12529_v63 = vrot.slane %v5324_v33, 11  ;;  %v12576_v35 = vrot.slane %v7697_v5, 9  ;;  %v3265_v3 = vpop.permute.xlu1 %3264 }
 0x299   : > { %v7205_v27 = vld [vmem:[#allocation4 + $0x4c] sm:$0xf]  ;;  %5281 = vst [vmem:[#allocation4 + $0x3c] sm:$0x1] %v5280_v13  ;;  %v5733_v16 = vshrl.u32 %v5546_v25, 16  ;;  %v12547_v38 = vrot.slane %v17260_v29, 9  ;;  %v3263_v60 = vpop.permute.xlu0 %3262 }
 0x29a   : > { %v7350_v4 = vshrl.u32 %v7205_v27, 16  ;;  %3141 = vst.msk [vmem:[#allocation3 + $0x60] sm:$0xf] %vm3116_vm12, %v3069_v57  ;;  %v6306_v37 = vld [vmem:[#allocation4 + $0x4c] sm:$0xf]  ;;  %v5428_v53 = vsel %vm16481_vm9, %v12529_v63, %v5427_v39  ;;  %v5729_v55 = vshll.u32 %v5546_v25, 16 }
 0x29b   : > { %v5323_v56 = vld [vmem:[#allocation4 + $0x40] sm:$0x8]  ;;  %6338 = vst [vmem:[#allocation5 + $0x198] sm:$0xf] %v6306_v37  ;;  %5429 = vst [vmem:[#allocation4 + $0x50] sm:$0x1] %v5428_v53 }
 0x29c   : > { %v12528_v34 = vrot.slane %v5323_v56, 11  ;;  %v5424_v59 = vld [vmem:[#allocation4 + $0x44] sm:$0x1]  ;;  %v17269_v49 = vld [vmem:[#allocation4 + $0x40] sm:$0xf]  ;;  %v7346_v28 = vshll.u32 %v7205_v27, 16  ;;  %v3269_v13 = vpop.permute.xlu1 %3268 }
 0x29d   : > { %v7807_v1 = vrot.slane %v17269_v49, 5  ;;  %3144 = vst.msk [vmem:[#allocation3 + $0x6c] sm:$0xf] %vm3116_vm12, %v3075_v21  ;;  %v6304_v42 = vld [vmem:[#allocation4 + $0x40] sm:$0xf]  ;;  %v12546_v31 = vrot.slane %v6038_v47, 9  ;;  %v3267_v57 = vpop.permute.xlu0 %3266 }
 0x29e   : > { %v6039_v46 = vld [vmem:[#allocation4 + $0x40] sm:$0xf]  ;;  %v17273_v32 = vrot.slane %v5733_v16, 4  ;;  %v17275_v0 = vrot.slane %v7350_v4, 4  ;;  %v5425_v36 = vsel %vm16481_vm9, %v12528_v34, %v5424_v59  ;;  %3143 = vst.msk [vmem:[#allocation3 + $0x68] sm:$0xf] %vm3116_vm12, %v3073_v22 }
 0x29f   : > { %6336 = vst [vmem:[#allocation5 + $0x150] sm:$0xf] %v6304_v42  ;;  %v6156_v51 = vrot.slane %v6039_v46, 5  ;;  %v17280_v40 = vld [vmem:[#allocation4 + $0x3c] sm:$0xe]  ;;  %v7808_v8 = vsel %vm14128_vm10, %v12576_v35, %v7807_v1  ;;  %v17292_v14 = vrot.slane %v5729_v55, 5 }
 0x2a0   : > { %v17282_v7 = vld [vmem:[#allocation4 + $0x48] sm:$0xf]  ;;  %5426 = vst [vmem:[#allocation4 + $0x44] sm:$0x1] %v5425_v36  ;;  %v6042_v12 = vld [vmem:[#allocation4 + $0x4c] sm:$0xf]  ;;  %v3826_v22 = vpop.permute.xlu1 %3825 }
 0x2a1   : > { %v17284_v61 = vld [vmem:[#allocation4 + $0x48] sm:$0xf]  ;;  %v17294_v9 = vrot.slane %v7346_v28, 5  ;;  %7934 = vst [vmem:[#allocation5 + $0xf8] sm:$0xf] %v7808_v8  ;;  %v5720_v62 = vshrl.u32 %v17282_v7, 16  ;;  %v6157_v48 = vsel %vm14128_vm10, %v12546_v31, %v6156_v51  ;;  %v5736_v55 = vor.u32 %v17273_v32, %v17292_v14 }
 0x2a2   : > { %v17286_v18 = vld [vmem:[#allocation4 + $0x48] sm:$0xf]  ;;  %v5542_v17 = vld [vmem:[#allocation4 + $0x3c] sm:$0xf]  ;;  %3336 = vst.msk [vmem:[#allocation3 + $0x64] sm:$0xf] %vm3310_vm13, %v3265_v3 }
 0x2a3   : > { %v6305_v43 = vld [vmem:[#allocation4 + $0x48] sm:$0xf]  ;;  %v17297_v6 = vld [vmem:[#allocation4 + $0x3c] sm:$0xf]  ;;  %v12561_v20 = vrot.slane %v17280_v40, 9  ;;  %v5723_v41 = vshll.u32 %v17282_v7, 16 }
 0x2a4   : > { %6337 = vst [vmem:[#allocation5 + $0x174] sm:$0xf] %v6305_v43  ;;  %v6528_v45 = vshrl.u32 %v17284_v61, 16  ;;  %v7337_v52 = vshrl.u32 %v17286_v18, 16  ;;  %v5696_v50 = vshrl.u32 %v5542_v17, 16  ;;  %v7340_v58 = vshll.u32 %v17286_v18, 16 }
 0x2a5   : > { %v17306_v19 = vld [vmem:[#allocation4 + $0x3c] sm:$0xf]  ;;  %3335 = vst.msk [vmem:[#allocation3 + $0x60] sm:$0xf] %vm3310_vm13, %v3263_v60  ;;  %6273 = vst [vmem:[#allocation5 + $0x170] sm:$0xf] %v6157_v48 }
 0x2a6   : > { %v5699_v10 = vshll.u32 %v5542_v17, 16  ;;  %v6504_v26 = vshrl.u32 %v17297_v6, 16  ;;  %v6303_v29 = vld [vmem:[#allocation4 + $0x3c] sm:$0xf]  ;;  %v6163_v5 = vrot.slane %v6042_v12, 5  ;;  %v6507_v33 = vshll.u32 %v17297_v6, 16 }
 0x2a7   : > { %v7313_v25 = vshrl.u32 %v17306_v19, 16  ;;  %v7316_v2 = vshll.u32 %v17306_v19, 16  ;;  %6335 = vst [vmem:[#allocation5 + $0x12c] sm:$0xf] %v6303_v29  ;;  %v6158_v63 = vrot.slane %v6156_v51, 4  ;;  %v5698_v37 = vrot.slane %v5696_v50, 4  ;;  %v3824_v51 = vpop.permute.xlu0 %3823 }
 0x2a8   : > { %v6043_v27 = vld [vmem:[#allocation4 + $0x50] sm:$0x1]  ;;  %3338 = vst.msk [vmem:[#allocation3 + $0x6c] sm:$0xf] %vm3310_vm13, %v3269_v13  ;;  %v6164_v47 = vsel %vm14128_vm10, %v12547_v38, %v6163_v5  ;;  %v6165_v39 = vrot.slane %v6163_v5, 4  ;;  %v5701_v21 = vrot.slane %v5699_v10, 5  ;;  %v7353_v13 = vor.u32 %v17275_v0, %v17294_v9 }
 0x2a9   : > { %v6166_v16 = vrot.slane %v6043_v27, 5  ;;  %v5473_v4 = vld [vmem:[#allocation4 + $0x3c] sm:$0xf]  ;;  %3337 = vst.msk [vmem:[#allocation3 + $0x68] sm:$0xf] %vm3310_vm13, %v3267_v57  ;;  %v5722_v43 = vrot.slane %v5720_v62, 4 }
 0x2aa   : > { %v6040_v35 = vld [vmem:[#allocation4 + $0x44] sm:$0x1]  ;;  %6275 = vst [vmem:[#allocation5 + $0x1b8] sm:$0xf] %v6164_v47  ;;  %v5474_v53 = vld [vmem:[#allocation4 + $0x40] sm:$0xf]  ;;  %v5702_v7 = vor.u32 %v5701_v21, %v5698_v37 }
 0x2ab   : > { %5505 = vst [vmem:[#allocation5 + $0x168] sm:$0xf] %v5473_v4  ;;  %v5543_v56 = vld [vmem:[#allocation4 + $0x40] sm:$0xf]  ;;  %v6159_v34 = vrot.slane %v6040_v35, 5  ;;  %v6167_v59 = vsel %vm14128_vm10, %v6165_v39, %v6166_v16  ;;  %v5725_v60 = vrot.slane %v5723_v41, 5  ;;  %v3828_v4 = vpop.permute.xlu0 %3827 }
 0x2ac   : > { %5506 = vst [vmem:[#allocation5 + $0x18c] sm:$0xf] %v5474_v53  ;;  %v5544_v38 = vld [vmem:[#allocation4 + $0x44] sm:$0x1]  ;;  %v5705_v28 = vshll.u32 %v5543_v56, 16  ;;  %v5709_v42 = vshrl.u32 %v5543_v56, 16 }
 0x2ad   : > { %6276 = vst [vmem:[#allocation5 + $0x1dc] sm:$0xf] %v6167_v59  ;;  %v5715_v46 = vshll.u32 %v5544_v38, 16  ;;  %v5475_v31 = vld [vmem:[#allocation4 + $0x48] sm:$0xf]  ;;  %v6160_v32 = vsel %vm14128_vm10, %v6158_v63, %v6159_v34  ;;  %v5737_v48 = vrot.slane %v5736_v55, 4  ;;  %v3830_v63 = vpop.permute.xlu1 %3829  ;;  %v5726_v57 = vor.u32 %v5725_v60, %v5722_v43 }
 0x2ae   : > { %v5476_v36 = vld [vmem:[#allocation4 + $0x4c] sm:$0xf]  ;;  %3897 = vst.msk [vmem:[#allocation3 + $0x64] sm:$0xf] %vm3871_vm15, %v3826_v22  ;;  %v5707_v8 = vrot.slane %v5705_v28, 5  ;;  %v5711_v12 = vrot.slane %v5709_v42, 4 }
 0x2af   : > { %5507 = vst [vmem:[#allocation5 + $0x1b0] sm:$0xf] %v5475_v31  ;;  %5508 = vst [vmem:[#allocation5 + $0x1d4] sm:$0xf] %v5476_v36  ;;  %v5547_v3 = vld [vmem:[#allocation4 + $0x50] sm:$0x1] }
 0x2b0   : > { %3896 = vst.msk [vmem:[#allocation3 + $0x60] sm:$0xf] %vm3871_vm15, %v3824_v51  ;;  %6274 = vst [vmem:[#allocation5 + $0x194] sm:$0xf] %v6160_v32  ;;  %v5717_v17 = vrot.slane %v5715_v46, 5  ;;  %v5703_v5 = vrot.slane %v5702_v7, 4  ;;  %v5712_v27 = vor.u32 %v5711_v12, %v5707_v8 }
 0x2b1   : > { %v7134_v50 = vld [vmem:[#allocation4 + $0x3c] sm:$0xf]  ;;  %v13699_v10 = vld [vmem:[#allocation5 + $0x12c] ss:$36 sps:$4 sm:$0xff]   ;;  %v5739_v47 = vshll.u32 %v5547_v3, 16  ;;  %v7315_v16 = vrot.slane %v7313_v25, 4  ;;  %v4163_v46 = vpop.permute.xlu1 %4162 }
 0x2b2   : > { %v13701_v29 = vld [vmem:[#allocation5 + $0x128] ss:$36 sps:$4 sm:$0xff]   ;;  %7166 = vst [vmem:[#allocation5 + $0xf0] sm:$0xf] %v7134_v50  ;;  %3899 = vst.msk [vmem:[#allocation3 + $0x6c] sm:$0xf] %vm3871_vm15, %v3830_v63  ;;  %9664 = vmatprep.mubr.bf16.mxu0 %v13699_v10  ;;  %v5708_v41 = vsel %vm14230_vm14, %v5703_v5, %v5707_v8  ;;  %v4161_v8 = vpop.permute.xlu0 %4160 }
 0x2b3   : > { %v7135_v62 = vld [vmem:[#allocation4 + $0x40] sm:$0xf]  ;;  %v7203_v37 = vld [vmem:[#allocation4 + $0x44] sm:$0x1]  ;;  %v7318_v35 = vrot.slane %v7316_v2, 5  ;;  %9665 = vmatmul.mubr.bf16.gmra.mxu0 %v13701_v29  ;;  %v5713_v56 = vrot.slane %v5712_v27, 4 }
 0x2b4   : > { %v7202_v39 = vld [vmem:[#allocation4 + $0x40] sm:$0xf]  ;;  %7167 = vst [vmem:[#allocation5 + $0x114] sm:$0xf] %v7135_v62  ;;  %3898 = vst.msk [vmem:[#allocation3 + $0x68] sm:$0xf] %vm3871_vm15, %v3828_v4 }
 0x2b5   : > { %v7322_v0 = vshll.u32 %v7202_v39, 16  ;;  %v7326_v53 = vshrl.u32 %v7202_v39, 16  ;;  %6001 = vst [vmem:[#allocation5 + $0x16c] sm:$0xf] %v5708_v41  ;;  %v5727_v25 = vrot.slane %v5726_v57, 4  ;;  %v5741_v55 = vrot.slane %v5739_v47, 5 }
 0x2b6   : > { %v7332_v34 = vshll.u32 %v7203_v37, 16  ;;  %v7136_v59 = vld [vmem:[#allocation4 + $0x48] sm:$0xf]  ;;  %v7319_v38 = vor.u32 %v7318_v35, %v7315_v16  ;;  %v7137_v22 = vld [vmem:[#allocation4 + $0x4c] sm:$0xf]  ;;  %v5718_v2 = vsel %vm14230_vm14, %v5713_v56, %v5717_v17  ;;  %v7342_v60 = vrot.slane %v7340_v58, 5  ;;  %v4167_v58 = vpop.permute.xlu1 %4166  ;;  %v4165_v16 = vpop.permute.xlu0 %4164 }
 0x2b7   : > { %v7324_v21 = vrot.slane %v7322_v0, 5  ;;  %v7328_v28 = vrot.slane %v7326_v53, 4  ;;  %7168 = vst [vmem:[#allocation5 + $0x138] sm:$0xf] %v7136_v59  ;;  %v7206_v42 = vld [vmem:[#allocation4 + $0x50] sm:$0x1]  ;;  %v5732_v31 = vsel %vm14230_vm14, %v5727_v25, %v17292_v14  ;;  %v5742_v36 = vsel %vm14230_vm14, %v5737_v48, %v5741_v55 }
 0x2b8   : > { %v8011_v19 = vld [vmem:[#allocation5 + $0x170] sm:$0xff]  ;;  %v7334_v51 = vrot.slane %v7332_v34, 5  ;;  %7169 = vst [vmem:[#allocation5 + $0x15c] sm:$0xf] %v7137_v22  ;;  %v6372_v32 = vld [vmem:[#allocation4 + $0x40] sm:$0xf] }
 0x2b9   : > { %v6373_v7 = vld [vmem:[#allocation4 + $0x44] sm:$0x1]  ;;  %4234 = vst.msk [vmem:[#allocation3 + $0x64] sm:$0xf] %vm4208_vm0, %v4163_v46  ;;  %v8016_v3 = vld [vmem:[#allocation5 + $0x194] sm:$0xff]  ;;  %v7320_v12 = vrot.slane %v7319_v38, 4  ;;  %v7329_v17 = vor.u32 %v7328_v28, %v7324_v21 }
 0x2ba   : > { %v13702_v43 = vld [vmem:[#allocation5 + $0x174] ss:$36 sps:$4 sm:$0xff]   ;;  %6002 = vst [vmem:[#allocation5 + $0x190] sm:$0xf] %v5718_v2  ;;  %6003 = vst [vmem:[#allocation5 + $0x1b4] sm:$0xf] %v5732_v31  ;;  %v12637_v48 = vcombine.low %v8011_v19, %v8016_v3  ;;  %v1648_v28 = vpop.permute.xlu1 %1647  ;;  %v1646_v2 = vpop.permute.xlu0 %1645 }
 0x2bb   : > { %6004 = vst [vmem:[#allocation5 + $0x1d8] sm:$0xf] %v5742_v36  ;;  %v7339_v14 = vrot.slane %v7337_v52, 4  ;;  %4233 = vst.msk [vmem:[#allocation3 + $0x60] sm:$0xf] %vm4208_vm0, %v4161_v8  ;;  %v7354_v50 = vrot.slane %v7353_v13, 4  ;;  %9672 = vmatprep.mubr.bf16.mxu0 %v13702_v43  ;;  %v7325_v63 = vsel %vm14230_vm14, %v7320_v12, %v7324_v21 }
 0x2bc   : > { %v7356_v10 = vshll.u32 %v7206_v42, 16  ;;  %v6506_v29 = vrot.slane %v6504_v26, 4  ;;  %v6868_v5 = vld [vmem:[#allocation4 + $0x40] sm:$0xf]  ;;  %v7330_v27 = vrot.slane %v7329_v17, 4  ;;  %v6509_v52 = vrot.slane %v6507_v33, 5  ;;  %9673 = vmatmul.mubr.bf16.gmra.mxu0 %v12637_v48 }
 0x2bd   : > { %v7343_v57 = vor.u32 %v7342_v60, %v7339_v14  ;;  %v17353_v18 = vld [vmem:[#allocation4 + $0x4c] sm:$0xf]  ;;  %7662 = vst [vmem:[#allocation5 + $0xf4] sm:$0xf] %v7325_v63  ;;  %v6513_v13 = vshll.u32 %v6372_v32, 16  ;;  %v6517_v62 = vshrl.u32 %v6372_v32, 16 }
 0x2be   : > { %v7358_v47 = vrot.slane %v7356_v10, 5  ;;  %v6523_v39 = vshll.u32 %v6373_v7, 16  ;;  %4236 = vst.msk [vmem:[#allocation3 + $0x6c] sm:$0xf] %vm4208_vm0, %v4167_v58  ;;  %v7335_v26 = vsel %vm14230_vm14, %v7330_v27, %v7334_v51  ;;  %v6510_v41 = vor.u32 %v6509_v52, %v6506_v29  ;;  %v6869_v37 = vld [vmem:[#allocation4 + $0x44] sm:$0x1]  ;;  %v1652_v12 = vpop.permute.xlu1 %1651  ;;  %v1650_v48 = vpop.permute.xlu0 %1649 }
 0x2bf   : > { %v7344_v4 = vrot.slane %v7343_v57, 4  ;;  %v6981_v35 = vrot.slane %v6868_v5, 5  ;;  %v6531_v6 = vshll.u32 %v17284_v61, 16  ;;  %4235 = vst.msk [vmem:[#allocation3 + $0x68] sm:$0xf] %vm4208_vm0, %v4165_v16  ;;  %v6515_v0 = vrot.slane %v6513_v13, 5 }
 0x2c0   : > { %7663 = vst [vmem:[#allocation5 + $0x118] sm:$0xf] %v7335_v26  ;;  %v7359_v33 = vsel %vm14230_vm14, %v7354_v50, %v7358_v47  ;;  %v6519_v53 = vrot.slane %v6517_v62, 4  ;;  %v6376_v56 = vld [vmem:[#allocation4 + $0x50] sm:$0x1]  ;;  %v6541_v55 = vshrl.u32 %v17353_v18, 16 }
 0x2c1   : > { %v6870_v25 = vld [vmem:[#allocation4 + $0x48] sm:$0xe]  ;;  %v7349_v34 = vsel %vm14230_vm14, %v7344_v4, %v17294_v9  ;;  %7665 = vst [vmem:[#allocation5 + $0x160] sm:$0xf] %v7359_v33  ;;  %v6511_v59 = vrot.slane %v6510_v41, 4  ;;  %v6982_v38 = vsel %vm14128_vm10, %v12561_v20, %v6981_v35  ;;  %v6525_v42 = vrot.slane %v6523_v39, 5 }
 0x2c2   : > { %v6871_v21 = vld [vmem:[#allocation4 + $0x4c] sm:$0xf]  ;;  %7664 = vst [vmem:[#allocation5 + $0x13c] sm:$0xf] %v7349_v34  ;;  %v6520_v22 = vor.u32 %v6519_v53, %v6515_v0  ;;  %v6983_v46 = vrot.slane %v6981_v35, 4  ;;  %v6984_v19 = vrot.slane %v6869_v37, 5  ;;  %v1988_v16 = vpop.permute.xlu1 %1987  ;;  %v1986_v37 = vpop.permute.xlu0 %1985 }
 0x2c3   : > { %7103 = vst [vmem:[#allocation5 + $0x134] sm:$0xf] %v6982_v38  ;;  %1715 = vst.msk [vmem:[#allocation3 + $0x74] sm:$0xf] %vm1685_vm1, %v1648_v28  ;;  %v13704_v31 = vld [vmem:[#allocation3 + $0x60] sm:$0xff]   ;;  %v6516_v9 = vsel %vm14230_vm14, %v6511_v59, %v6515_v0  ;;  %v6530_v40 = vrot.slane %v6528_v45, 4 }
 0x2c4   : > { %v6872_v36 = vld [vmem:[#allocation4 + $0x50] sm:$0x1]  ;;  %1714 = vst.msk [vmem:[#allocation3 + $0x70] sm:$0xf] %vm1685_vm1, %v1646_v2  ;;  %v6521_v20 = vrot.slane %v6520_v22, 4  ;;  %v6985_v51 = vsel %vm14128_vm10, %v6983_v46, %v6984_v19  ;;  %v6533_v32 = vrot.slane %v6531_v6, 5  ;;  %13541 = vmatprep.mubr.msk.bf16.mxu1 %vm4380_vm3, %v13704_v31 }
 0x2c5   : > { %6831 = vst [vmem:[#allocation5 + $0x130] sm:$0xf] %v6516_v9  ;;  %v6543_v7 = vrot.slane %v6541_v55, 4  ;;  %7104 = vst [vmem:[#allocation5 + $0x158] sm:$0xf] %v6985_v51  ;;  %v6537_v8 = vshll.u32 %v17353_v18, 16  ;;  %v13531_v18 = vpop.f32.mrf.mxu0 }
 0x2c6   : > { %v6547_v3 = vshll.u32 %v6376_v56, 16  ;;  %v12562_v43 = vrot.slane %v6870_v25, 9  ;;  %v6526_v61 = vsel %vm14230_vm14, %v6521_v20, %v6525_v42  ;;  %v6534_v45 = vor.u32 %v6533_v32, %v6530_v40  ;;  %v7699_v60 = vld [vmem:[#allocation4 + $0x44] sm:$0x1]  ;;  %1717 = vst.msk [vmem:[#allocation3 + $0x7c] sm:$0xf] %vm1685_vm1, %v1652_v12  ;;  %v1992_v28 = vpop.permute.xlu1 %1991  ;;  %v1990_v22 = vpop.permute.xlu0 %1989 }
 0x2c7   : > { %v6988_v17 = vrot.slane %v6871_v21, 5  ;;  %v6991_v14 = vrot.slane %v6872_v36, 5  ;;  %v13705_v50 = vld [vmem:[#allocation3 + $0x68] sm:$0xff]   ;;  %6832 = vst [vmem:[#allocation5 + $0x154] sm:$0xf] %v6526_v61  ;;  %v6539_v10 = vrot.slane %v6537_v8, 5  ;;  %v4524_v39 = vadd.f32 %v17198_v30, %v13531_v18  ;;  %v4515_v35 = vpop.f32.mrf.mxu0 }
 0x2c8   : > { %v7700_v29 = vld [vmem:[#allocation4 + $0x48] sm:$0xe]  ;;  %1716 = vst.msk [vmem:[#allocation3 + $0x78] sm:$0xf] %vm1685_vm1, %v1650_v48  ;;  %v6535_v5 = vrot.slane %v6534_v45, 4  ;;  %13542 = vmatmul.mubr.msk.bf16.gmra.mxu1 %vm4380_vm3, %v13705_v50  ;;  %v6549_v47 = vrot.slane %v6547_v3, 5  ;;  %v4516_v53 = vadd.f32 %v17198_v30, %v4515_v35 }
 0x2c9   : > { %v6989_v63 = vsel %vm14128_vm10, %v12562_v43, %v6988_v17  ;;  %v6990_v27 = vrot.slane %v6988_v17, 4  ;;  %v7701_v57 = vld [vmem:[#allocation4 + $0x4c] sm:$0xf]  ;;  %v7702_v52 = vld [vmem:[#allocation4 + $0x50] sm:$0x1]  ;;  %v6544_v58 = vor.u32 %v6543_v7, %v6539_v10  ;;  %v7809_v13 = vrot.slane %v7807_v1, 4  ;;  %v13532_v56 = vpop.f32.mrf.mxu0 }
 0x2ca   : > { %7105 = vst [vmem:[#allocation5 + $0x17c] sm:$0xf] %v6989_v63  ;;  %v7810_v62 = vrot.slane %v7699_v60, 5  ;;  %v6540_v26 = vsel %vm14230_vm14, %v6535_v5, %v6539_v10  ;;  %v12577_v41 = vrot.slane %v7700_v29, 9  ;;  %vm19389_vm1 = vcmask 93248   ;;  %v2181_v32 = vpop.permute.xlu1 %2180  ;;  %v2179_v3 = vpop.permute.xlu0 %2178 }
 0x2cb   : > { %v6992_v4 = vsel %vm14128_vm10, %v6990_v27, %v6991_v14  ;;  %2055 = vst.msk [vmem:[#allocation3 + $0x74] sm:$0xf] %vm19389_vm1, %v1988_v16  ;;  %v6545_v6 = vrot.slane %v6544_v58, 4  ;;  %6833 = vst [vmem:[#allocation5 + $0x178] sm:$0xf] %v6540_v26  ;;  %v7814_v1 = vrot.slane %v7701_v57, 5  ;;  %v4527_v21 = vadd.f32 %v17198_v30, %v13532_v56  ;;  %v4518_v42 = vpop.f32.mrf.mxu0 }
 0x2cc   : > { %7106 = vst [vmem:[#allocation5 + $0x1a0] sm:$0xf] %v6992_v4  ;;  %v7811_v49 = vsel %vm14128_vm10, %v7809_v13, %v7810_v62  ;;  %v7817_v33 = vrot.slane %v7702_v52, 5  ;;  %v4608_v0 = vmax.f32 %v4524_v39, 0.0  ;;  %vm19390_vm7 = vmmov %vm19389_vm1  ;;  %v4606_v38 = vmax.f32 %v4516_v53, 0.0 }
 0x2cd   : > { %2054 = vst.msk [vmem:[#allocation3 + $0x70] sm:$0xf] %vm19390_vm7, %v1986_v37  ;;  %7935 = vst [vmem:[#allocation5 + $0x11c] sm:$0xf] %v7811_v49  ;;  %v6550_v25 = vsel %vm14230_vm14, %v6545_v6, %v6549_v47  ;;  %v7815_v55 = vsel %vm14128_vm10, %v12577_v41, %v7814_v1  ;;  %v7816_v34 = vrot.slane %v7814_v1, 4  ;;  %v4609_v31 = vmax.f32 %v4527_v21, 0.0 }
 0x2ce   : > { %v12985_v59 = vpack.c.bf16 %v4608_v0, %v4608_v0  ;;  %6834 = vst [vmem:[#allocation5 + $0x19c] sm:$0xf] %v6550_v25  ;;  %7936 = vst [vmem:[#allocation5 + $0x140] sm:$0xf] %v7815_v55  ;;  %v12983_v2 = vpack.c.bf16 %v4606_v38, %v4606_v38  ;;  %v4519_v9 = vadd.f32 %v17198_v30, %v4518_v42  ;;  %v5096_v7 = vld [vmem:[#allocation4 + $0x60] sm:$0xf]  ;;  %v2185_v10 = vpop.permute.xlu1 %2184  ;;  %v2183_v63 = vpop.permute.xlu0 %2182 }
 0x2cf   : > { %vm19391_vm6 = vmmov %vm19389_vm1  ;;  %v7818_v46 = vsel %vm14128_vm10, %v7816_v34, %v7817_v33  ;;  %v12986_v51 = vpack.c.bf16 %v4609_v31, %v4609_v31  ;;  %2248 = vst.msk [vmem:[#allocation3 + $0x74] sm:$0xf] %vm2218_vm8, %v2181_v32  ;;  %v5089_v17 = vld [vmem:[#allocation4 + $0x54] sm:$0xf]  ;;  %v5100_v29 = vld [vmem:[#allocation4 + $0x68] sm:$0x1] }
 0x2d0   : > { %2057 = vst.msk [vmem:[#allocation3 + $0x7c] sm:$0xf] %vm19391_vm6, %v1992_v28  ;;  %v4842_v19 = vshrl.u32 %v12985_v59, 16  ;;  %vm19392_vm2 = vmmov %vm19389_vm1  ;;  %v4845_v36 = vshll.u32 %v12985_v59, 16  ;;  %v4825_v20 = vshrl.u32 %v12983_v2, 16  ;;  %v4607_v8 = vmax.f32 %v4519_v9, 0.0 }
 0x2d1   : > { %2056 = vst.msk [vmem:[#allocation3 + $0x78] sm:$0xf] %vm19392_vm2, %v1990_v22  ;;  %7937 = vst [vmem:[#allocation5 + $0x164] sm:$0xf] %v7818_v46  ;;  %v4828_v61 = vshll.u32 %v12983_v2, 16  ;;  %v4850_v45 = vshrl.u32 %v12986_v51, 16 }
 0x2d2   : > { %v4844_v40 = vrot.slane %v4842_v19, 7  ;;  %v4827_v12 = vrot.slane %v4825_v20, 7  ;;  %2247 = vst.msk [vmem:[#allocation3 + $0x70] sm:$0xf] %vm2218_vm8, %v2179_v3  ;;  %v12984_v14 = vpack.c.bf16 %v4607_v8, %v4607_v8  ;;  %v4853_v50 = vshll.u32 %v12986_v51, 16  ;;  %v2742_v16 = vpop.permute.xlu1 %2741  ;;  %v2740_v37 = vpop.permute.xlu0 %2739 }
 0x2d3   : > { %v4852_v48 = vrot.slane %v4850_v45, 7  ;;  %2250 = vst.msk [vmem:[#allocation3 + $0x7c] sm:$0xf] %vm2218_vm8, %v2185_v10  ;;  %2249 = vst.msk [vmem:[#allocation3 + $0x78] sm:$0xf] %vm2218_vm8, %v2183_v63  ;;  %vm19393_vm1 = vcmask 158848  }
 0x2d4   : > { %v4847_v43 = vor.u32 %v4845_v36, %v4844_v40  ;;  %v4830_v60 = vor.u32 %v4828_v61, %v4827_v12  ;;  %v4833_v5 = vshrl.u32 %v12984_v14, 16  ;;  %v4848_v27 = vrot.slane %v4844_v40, 4  ;;  %v5093_v39 = vld [vmem:[#allocation4 + $0x5c] sm:$0x1]  ;;  %2809 = vst.msk [vmem:[#allocation3 + $0x74] sm:$0xf] %vm19393_vm1, %v2742_v16  ;;  %vm19394_vm8 = vmmov %vm19393_vm1 }
 0x2d5   : > { %v4855_v52 = vor.u32 %v4853_v50, %v4852_v48  ;;  %v4857_v18 = vrot.slane %v4852_v48, 4  ;;  %v4836_v47 = vshll.u32 %v12984_v14, 16  ;;  %v4831_v26 = vrot.slane %v4827_v12, 4  ;;  %2808 = vst.msk [vmem:[#allocation3 + $0x70] sm:$0xf] %vm19394_vm8, %v2740_v37  ;;  %vm19395_vm7 = vmmov %vm19393_vm1 }
 0x2d6   : > { %v5097_v30 = vsel %vm16388_vm4, %v4847_v43, %v5096_v7  ;;  %v5090_v57 = vsel %vm16388_vm4, %v4830_v60, %v5089_v17  ;;  %v4835_v58 = vrot.slane %v4833_v5, 7  ;;  %v2746_v1 = vpop.permute.xlu1 %2745  ;;  %v2744_v53 = vpop.permute.xlu0 %2743  ;;  %vm19396_vm6 = vmmov %vm19393_vm1  ;;  %v13848_v23 = vld [vmem:[#allocation5 + $0xf4] ss:$36 sps:$4 sm:$0xff]  }
 0x2d7   : > { %5098 = vst [vmem:[#allocation4 + $0x60] sm:$0xf] %v5097_v30  ;;  %5091 = vst [vmem:[#allocation4 + $0x54] sm:$0xf] %v5090_v57  ;;  %v4856_v13 = vsel %vm14070_vm5, %v4848_v27, %v4855_v52  ;;  %v5101_v62 = vsel %vm16416_vm11, %v4857_v18, %v5100_v29 }
 0x2d8   : > { %5099 = vst [vmem:[#allocation4 + $0x64] sm:$0xf] %v4856_v13  ;;  %5102 = vst [vmem:[#allocation4 + $0x68] sm:$0x1] %v5101_v62  ;;  %v4838_v4 = vor.u32 %v4836_v47, %v4835_v58  ;;  %v4840_v41 = vrot.slane %v4835_v58, 4 }
 0x2d9   : > { %2811 = vst.msk [vmem:[#allocation3 + $0x7c] sm:$0xf] %vm19395_vm7, %v2746_v1 }
 0x2da   : > { %v4839_v35 = vsel %vm14070_vm5, %v4831_v26, %v4838_v4  ;;  %v5094_v6 = vsel %vm16416_vm11, %v4840_v41, %v5093_v39  ;;  %2810 = vst.msk [vmem:[#allocation3 + $0x78] sm:$0xf] %vm19396_vm6, %v2744_v53  ;;  %v3079_v46 = vpop.permute.xlu1 %3078  ;;  %v3077_v20 = vpop.permute.xlu0 %3076 }
 0x2db   : > { %5092 = vst [vmem:[#allocation4 + $0x58] sm:$0xf] %v4839_v35  ;;  %5095 = vst [vmem:[#allocation4 + $0x5c] sm:$0x1] %v5094_v6 }
 0x2dc   : > { %3146 = vst.msk [vmem:[#allocation3 + $0x74] sm:$0xf] %vm3116_vm12, %v3079_v46  ;;  %3145 = vst.msk [vmem:[#allocation3 + $0x70] sm:$0xf] %vm3116_vm12, %v3077_v20 }
 0x2de   : > { %v5182_v49 = vld [vmem:[#allocation4 + $0x60] sm:$0x2]  ;;  %v5288_v56 = vld [vmem:[#allocation4 + $0x60] sm:$0x1]  ;;  %v5181_v25 = vld [vmem:[#allocation4 + $0x54] sm:$0x2]  ;;  %v3083_v60 = vpop.permute.xlu1 %3082  ;;  %v3081_v29 = vpop.permute.xlu0 %3080 }
 0x2df   : > { %v17427_v33 = vld [vmem:[#allocation4 + $0x60] sm:$0xe]  ;;  %v12513_v0 = vrot.slane %v5182_v49, 9  ;;  %v7703_v55 = vld [vmem:[#allocation4 + $0x54] sm:$0xe]  ;;  %v12512_v59 = vrot.slane %v5181_v25, 9 }
 0x2e0   : > { %v5285_v38 = vld [vmem:[#allocation4 + $0x54] sm:$0x1]  ;;  %v12578_v21 = vrot.slane %v7703_v55, 9  ;;  %v12549_v28 = vrot.slane %v17427_v33, 9  ;;  %v5326_v22 = vld [vmem:[#allocation4 + $0x64] sm:$0x8] }
 0x2e1   : > { %v5289_v34 = vsel %vm16416_vm11, %v12513_v0, %v5288_v56  ;;  %v5552_v42 = vld [vmem:[#allocation4 + $0x64] sm:$0xf]  ;;  %v6044_v19 = vld [vmem:[#allocation4 + $0x54] sm:$0xe]  ;;  %v5286_v2 = vsel %vm16416_vm11, %v12512_v59, %v5285_v38  ;;  %v12531_v31 = vrot.slane %v5326_v22, 11 }
 0x2e2   : > { %5290 = vst [vmem:[#allocation4 + $0x60] sm:$0x1] %v5289_v34  ;;  %v5781_v9 = vshrl.u32 %v5552_v42, 16  ;;  %v17436_v40 = vld [vmem:[#allocation4 + $0x64] sm:$0xf]  ;;  %v5777_v8 = vshll.u32 %v5552_v42, 16  ;;  %v3273_v41 = vpop.permute.xlu1 %3272  ;;  %v3271_v53 = vpop.permute.xlu0 %3270 }
 0x2e3   : > { %v7211_v36 = vld [vmem:[#allocation4 + $0x64] sm:$0xf]  ;;  %5287 = vst [vmem:[#allocation4 + $0x54] sm:$0x1] %v5286_v2  ;;  %v5433_v51 = vld [vmem:[#allocation4 + $0x68] sm:$0x1] }
 0x2e4   : > { %v7398_v32 = vshrl.u32 %v7211_v36, 16  ;;  %v6310_v7 = vld [vmem:[#allocation4 + $0x64] sm:$0xf]  ;;  %v5434_v3 = vsel %vm16481_vm9, %v12531_v31, %v5433_v51  ;;  %v17442_v43 = vrot.slane %v5781_v9, 4  ;;  %v6589_v12 = vshrl.u32 %v17436_v40, 16 }
 0x2e5   : > { %v5325_v61 = vld [vmem:[#allocation4 + $0x58] sm:$0x8]  ;;  %v12548_v45 = vrot.slane %v6044_v19, 9  ;;  %6342 = vst [vmem:[#allocation5 + $0x228] sm:$0xf] %v6310_v7  ;;  %v7394_v48 = vshll.u32 %v7211_v36, 16 }
 0x2e6   : > { %5435 = vst [vmem:[#allocation4 + $0x68] sm:$0x1] %v5434_v3  ;;  %v12530_v17 = vrot.slane %v5325_v61, 11  ;;  %v5430_v14 = vld [vmem:[#allocation4 + $0x5c] sm:$0x1]  ;;  %v17447_v50 = vrot.slane %v7398_v32, 4  ;;  %v3277_v2 = vpop.permute.xlu1 %3276  ;;  %v3275_v20 = vpop.permute.xlu0 %3274 }
 0x2e7   : > { %v17445_v30 = vld [vmem:[#allocation4 + $0x58] sm:$0xf]  ;;  %3148 = vst.msk [vmem:[#allocation3 + $0x7c] sm:$0xf] %vm3116_vm12, %v3083_v60  ;;  %3147 = vst.msk [vmem:[#allocation3 + $0x78] sm:$0xf] %vm3116_vm12, %v3081_v29 }
 0x2e8   : > { %v7821_v10 = vrot.slane %v17445_v30, 5  ;;  %v6308_v5 = vld [vmem:[#allocation4 + $0x58] sm:$0xf]  ;;  %v5431_v27 = vsel %vm16481_vm9, %v12530_v17, %v5430_v14  ;;  %v6048_v52 = vld [vmem:[#allocation4 + $0x64] sm:$0xf]  ;;  %v17454_v58 = vrot.slane %v5777_v8, 5 }
 0x2e9   : > { %v6045_v63 = vld [vmem:[#allocation4 + $0x58] sm:$0xf]  ;;  %6340 = vst [vmem:[#allocation5 + $0x1e0] sm:$0xf] %v6308_v5  ;;  %v17456_v47 = vld [vmem:[#allocation4 + $0x60] sm:$0xf] }
 0x2ea   : > { %v6170_v57 = vrot.slane %v6045_v63, 5  ;;  %v5478_v18 = vld [vmem:[#allocation4 + $0x58] sm:$0xf]  ;;  %v17458_v13 = vld [vmem:[#allocation4 + $0x60] sm:$0xf]  ;;  %v7822_v39 = vsel %vm14128_vm10, %v12578_v21, %v7821_v10  ;;  %v5768_v16 = vshrl.u32 %v17456_v47, 16  ;;  %v5784_v60 = vor.u32 %v17442_v43, %v17454_v58  ;;  %v3834_v63 = vpop.permute.xlu1 %3833 }
 0x2eb   : > { %v17460_v62 = vld [vmem:[#allocation4 + $0x60] sm:$0xf]  ;;  %5432 = vst [vmem:[#allocation4 + $0x5c] sm:$0x1] %v5431_v27  ;;  %5510 = vst [vmem:[#allocation5 + $0x21c] sm:$0xf] %v5478_v18 }
 0x2ec   : > { %v5771_v26 = vshll.u32 %v17456_v47, 16  ;;  %v6576_v4 = vshrl.u32 %v17458_v13, 16  ;;  %v6309_v37 = vld [vmem:[#allocation4 + $0x60] sm:$0xf]  ;;  %v17469_v35 = vrot.slane %v7394_v48, 5  ;;  %v6579_v6 = vshll.u32 %v17458_v13, 16 }
 0x2ed   : > { %7938 = vst [vmem:[#allocation5 + $0x188] sm:$0xf] %v7822_v39  ;;  %v7385_v49 = vshrl.u32 %v17460_v62, 16  ;;  %v5548_v1 = vld [vmem:[#allocation4 + $0x54] sm:$0xf]  ;;  %v6171_v56 = vsel %vm14128_vm10, %v12548_v45, %v6170_v57  ;;  %v7388_v25 = vshll.u32 %v17460_v62, 16 }
 0x2ee   : > { %v17473_v0 = vld [vmem:[#allocation4 + $0x54] sm:$0xf]  ;;  %3340 = vst.msk [vmem:[#allocation3 + $0x74] sm:$0xf] %vm3310_vm13, %v3273_v41  ;;  %6341 = vst [vmem:[#allocation5 + $0x204] sm:$0xf] %v6309_v37  ;;  %v3832_v41 = vpop.permute.xlu0 %3831 }
 0x2ef   : > { %v5744_v55 = vshrl.u32 %v5548_v1, 16  ;;  %v5747_v34 = vshll.u32 %v5548_v1, 16  ;;  %v6552_v59 = vshrl.u32 %v17473_v0, 16  ;;  %v17480_v38 = vld [vmem:[#allocation4 + $0x54] sm:$0xf]  ;;  %v6555_v21 = vshll.u32 %v17473_v0, 16 }
 0x2f0   : > { %3339 = vst.msk [vmem:[#allocation3 + $0x70] sm:$0xf] %vm3310_vm13, %v3271_v53  ;;  %6277 = vst [vmem:[#allocation5 + $0x200] sm:$0xf] %v6171_v56  ;;  %v7361_v22 = vshrl.u32 %v17480_v38, 16  ;;  %v6172_v46 = vrot.slane %v6170_v57, 4 }
 0x2f1   : > { %v6307_v42 = vld [vmem:[#allocation4 + $0x54] sm:$0xf]  ;;  %v6177_v19 = vrot.slane %v6048_v52, 5  ;;  %v6049_v31 = vld [vmem:[#allocation4 + $0x68] sm:$0x1]  ;;  %v5746_v8 = vrot.slane %v5744_v55, 4 }
 0x2f2   : > { %6339 = vst [vmem:[#allocation5 + $0x1bc] sm:$0xf] %v6307_v42  ;;  %v5477_v9 = vld [vmem:[#allocation4 + $0x54] sm:$0xf]  ;;  %v5549_v36 = vld [vmem:[#allocation4 + $0x58] sm:$0xf] }
 0x2f3   : > { %3342 = vst.msk [vmem:[#allocation3 + $0x7c] sm:$0xf] %vm3310_vm13, %v3277_v2  ;;  %v6178_v51 = vsel %vm14128_vm10, %v12549_v28, %v6177_v19  ;;  %v6179_v32 = vrot.slane %v6177_v19, 4  ;;  %v6180_v7 = vrot.slane %v6049_v31, 5  ;;  %5509 = vst [vmem:[#allocation5 + $0x1f8] sm:$0xf] %v5477_v9 }
 0x2f4   : > { %v5479_v3 = vld [vmem:[#allocation4 + $0x60] sm:$0xf]  ;;  %3341 = vst.msk [vmem:[#allocation3 + $0x78] sm:$0xf] %vm3310_vm13, %v3275_v20  ;;  %v6046_v61 = vld [vmem:[#allocation4 + $0x5c] sm:$0x1]  ;;  %v7401_v20 = vor.u32 %v17447_v50, %v17469_v35 }
 0x2f5   : > { %6279 = vst [vmem:[#allocation5 + $0x248] sm:$0xf] %v6178_v51  ;;  %v5550_v45 = vld [vmem:[#allocation4 + $0x5c] sm:$0x1]  ;;  %v5749_v17 = vrot.slane %v5747_v34, 5  ;;  %v5753_v14 = vshll.u32 %v5549_v36, 16  ;;  %v6181_v28 = vsel %vm14128_vm10, %v6179_v32, %v6180_v7  ;;  %v3836_v51 = vpop.permute.xlu0 %3835 }
 0x2f6   : > { %5511 = vst [vmem:[#allocation5 + $0x240] sm:$0xf] %v5479_v3  ;;  %v6173_v33 = vrot.slane %v6046_v61, 5  ;;  %v5757_v48 = vshrl.u32 %v5549_v36, 16  ;;  %v5763_v29 = vshll.u32 %v5550_v45, 16  ;;  %v5770_v18 = vrot.slane %v5768_v16, 4 }
 0x2f7   : > { %v5480_v5 = vld [vmem:[#allocation4 + $0x64] sm:$0xf]  ;;  %6280 = vst [vmem:[#allocation5 + $0x26c] sm:$0xf] %v6181_v28  ;;  %v5750_v27 = vor.u32 %v5749_v17, %v5746_v8  ;;  %v5755_v57 = vrot.slane %v5753_v14, 5  ;;  %v5773_v47 = vrot.slane %v5771_v26, 5 }
 0x2f8   : > { %5512 = vst [vmem:[#allocation5 + $0x264] sm:$0xf] %v5480_v5  ;;  %v5553_v52 = vld [vmem:[#allocation4 + $0x68] sm:$0x1]  ;;  %v7364_v39 = vshll.u32 %v17480_v38, 16  ;;  %v6174_v43 = vsel %vm14128_vm10, %v6172_v46, %v6173_v33  ;;  %v5759_v37 = vrot.slane %v5757_v48, 4  ;;  %v3838_v38 = vpop.permute.xlu1 %3837 }
 0x2f9   : > { %3901 = vst.msk [vmem:[#allocation3 + $0x74] sm:$0xf] %vm3871_vm15, %v3834_v63  ;;  %v5765_v1 = vrot.slane %v5763_v29, 5  ;;  %3900 = vst.msk [vmem:[#allocation3 + $0x70] sm:$0xf] %vm3871_vm15, %v3832_v41  ;;  %v5751_v53 = vrot.slane %v5750_v27, 4  ;;  %v5774_v56 = vor.u32 %v5773_v47, %v5770_v18 }
 0x2fa   : > { %6278 = vst [vmem:[#allocation5 + $0x224] sm:$0xf] %v6174_v43  ;;  %v5785_v55 = vrot.slane %v5784_v60, 4  ;;  %v5787_v34 = vshll.u32 %v5553_v52, 16  ;;  %v13710_v42 = vld [vmem:[#allocation5 + $0x1bc] ss:$36 sps:$4 sm:$0xff]   ;;  %v5760_v26 = vor.u32 %v5759_v37, %v5755_v57 }
 0x2fb   : > { %v13712_v16 = vld [vmem:[#allocation5 + $0x1b8] ss:$36 sps:$4 sm:$0xff]   ;;  %v7363_v19 = vrot.slane %v7361_v22, 4  ;;  %v5756_v2 = vsel %vm14230_vm14, %v5751_v53, %v5755_v57  ;;  %v5775_v31 = vrot.slane %v5774_v56, 4  ;;  %v7139_v36 = vld [vmem:[#allocation4 + $0x58] sm:$0xf]  ;;  %9680 = vmatprep.mubr.bf16.mxu0 %v13710_v42 }
 0x2fc   : > { %v5789_v9 = vrot.slane %v5787_v34, 5  ;;  %v7138_v46 = vld [vmem:[#allocation4 + $0x54] sm:$0xf]  ;;  %3903 = vst.msk [vmem:[#allocation3 + $0x7c] sm:$0xf] %vm3871_vm15, %v3838_v38  ;;  %v5761_v32 = vrot.slane %v5760_v26, 4  ;;  %9681 = vmatmul.mubr.bf16.gmra.mxu0 %v13712_v16  ;;  %v4171_v63 = vpop.permute.xlu1 %4170 }
 0x2fd   : > { %6005 = vst [vmem:[#allocation5 + $0x1fc] sm:$0xf] %v5756_v2  ;;  %7170 = vst [vmem:[#allocation5 + $0x180] sm:$0xf] %v7138_v46  ;;  %v7208_v22 = vld [vmem:[#allocation4 + $0x58] sm:$0xf]  ;;  %v5780_v3 = vsel %vm14230_vm14, %v5775_v31, %v17454_v58 }
 0x2fe   : > { %7171 = vst [vmem:[#allocation5 + $0x1a4] sm:$0xf] %v7139_v36  ;;  %v7209_v7 = vld [vmem:[#allocation4 + $0x5c] sm:$0x1]  ;;  %v7366_v8 = vrot.slane %v7364_v39, 5  ;;  %v5790_v50 = vsel %vm14230_vm14, %v5785_v55, %v5789_v9  ;;  %v7370_v61 = vshll.u32 %v7208_v22, 16  ;;  %v5766_v33 = vsel %vm14230_vm14, %v5761_v32, %v5765_v1  ;;  %v4169_v39 = vpop.permute.xlu0 %4168 }
 0x2ff   : > { %3902 = vst.msk [vmem:[#allocation3 + $0x78] sm:$0xf] %vm3871_vm15, %v3836_v51  ;;  %v7374_v45 = vshrl.u32 %v7208_v22, 16  ;;  %v7140_v17 = vld [vmem:[#allocation4 + $0x60] sm:$0xf]  ;;  %v8031_v60 = vld [vmem:[#allocation5 + $0x200] sm:$0xff] }
 0x300   : > { %v7141_v14 = vld [vmem:[#allocation4 + $0x64] sm:$0xf]  ;;  %6007 = vst [vmem:[#allocation5 + $0x244] sm:$0xf] %v5780_v3  ;;  %6008 = vst [vmem:[#allocation5 + $0x268] sm:$0xf] %v5790_v50  ;;  %v7367_v28 = vor.u32 %v7366_v8, %v7363_v19  ;;  %v4175_v38 = vpop.permute.xlu1 %4174 }
 0x301   : > { %v7380_v48 = vshll.u32 %v7209_v7, 16  ;;  %7172 = vst [vmem:[#allocation5 + $0x1c8] sm:$0xf] %v7140_v17  ;;  %7173 = vst [vmem:[#allocation5 + $0x1ec] sm:$0xf] %v7141_v14  ;;  %v7387_v58 = vrot.slane %v7385_v49, 4  ;;  %v13150_v49 = vpop.f32.mrf.mxu0 }
 0x302   : > { %v7212_v29 = vld [vmem:[#allocation4 + $0x68] sm:$0x1]  ;;  %v6378_v5 = vld [vmem:[#allocation4 + $0x58] sm:$0xf]  ;;  %6006 = vst [vmem:[#allocation5 + $0x220] sm:$0xf] %v5766_v33 }
 0x303   : > { %v7372_v27 = vrot.slane %v7370_v61, 5  ;;  %v7376_v57 = vrot.slane %v7374_v45, 4  ;;  %v7390_v52 = vrot.slane %v7388_v25, 5  ;;  %v7402_v18 = vrot.slane %v7401_v20, 4  ;;  %v6379_v47 = vld [vmem:[#allocation4 + $0x5c] sm:$0x1]  ;;  %v13151_v2 = vpop.f32.mrf.mxu0  ;;  %v4173_v20 = vpop.permute.xlu0 %4172 }
 0x304   : > { %4238 = vst.msk [vmem:[#allocation3 + $0x74] sm:$0xf] %vm4208_vm0, %v4171_v63  ;;  %v8036_v41 = vld [vmem:[#allocation5 + $0x224] sm:$0xff]  ;;  %v7368_v37 = vrot.slane %v7367_v28, 4  ;;  %v7382_v1 = vrot.slane %v7380_v48, 5  ;;  %v7404_v53 = vshll.u32 %v7212_v29, 16 }
 0x305   : > { %v13716_v43 = vld [vmem:[#allocation5 + $0x204] ss:$36 sps:$4 sm:$0xff]   ;;  %4237 = vst.msk [vmem:[#allocation3 + $0x70] sm:$0xf] %vm4208_vm0, %v4169_v39  ;;  %v12655_v56 = vcombine.low %v8031_v60, %v8036_v41  ;;  %v7377_v55 = vor.u32 %v7376_v57, %v7372_v27  ;;  %v7391_v34 = vor.u32 %v7390_v52, %v7387_v58  ;;  %v6554_v62 = vrot.slane %v6552_v59, 4  ;;  %v17531_v7 = vpop.f32.mrf.mxu0 }
 0x306   : > { %9688 = vmatprep.mubr.bf16.mxu0 %v13716_v43  ;;  %v7373_v25 = vsel %vm14230_vm14, %v7368_v37, %v7372_v27  ;;  %v7406_v42 = vrot.slane %v7404_v53, 5  ;;  %v6557_v16 = vrot.slane %v6555_v21, 5  ;;  %v6561_v26 = vshll.u32 %v6378_v5, 16  ;;  %v6873_v19 = vld [vmem:[#allocation4 + $0x54] sm:$0xe] }
 0x307   : > { %v7378_v31 = vrot.slane %v7377_v55, 4  ;;  %7666 = vst [vmem:[#allocation5 + $0x184] sm:$0xf] %v7373_v25  ;;  %v7392_v9 = vrot.slane %v7391_v34, 4  ;;  %v6565_v46 = vshrl.u32 %v6378_v5, 16  ;;  %v6571_v36 = vshll.u32 %v6379_v47, 16  ;;  %9689 = vmatmul.mubr.bf16.gmra.mxu0 %v12655_v56  ;;  %v17538_v28 = vpop.f32.mrf.mxu0 }
 0x308   : > { %4240 = vst.msk [vmem:[#allocation3 + $0x7c] sm:$0xf] %vm4208_vm0, %v4175_v38  ;;  %v17526_v59 = vadd.f32 %v13151_v2, %v13150_v49  ;;  %v7407_v51 = vsel %vm14230_vm14, %v7402_v18, %v7406_v42  ;;  %v6558_v32 = vor.u32 %v6557_v16, %v6554_v62  ;;  %v6563_v0 = vrot.slane %v6561_v26, 5  ;;  %v6874_v21 = vld [vmem:[#allocation4 + $0x58] sm:$0xf]  ;;  %v13778_v42 = vld [vmem:[%s18953_s3 + $0x178] sm:$0xff]  }
 0x309   : > { %v6875_v22 = vld [vmem:[#allocation4 + $0x5c] sm:$0x1]  ;;  %4239 = vst.msk [vmem:[#allocation3 + $0x78] sm:$0xf] %vm4208_vm0, %v4173_v20  ;;  %v7383_v8 = vsel %vm14230_vm14, %v7378_v31, %v7382_v1  ;;  %v7397_v3 = vsel %vm14230_vm14, %v7392_v9, %v17469_v35  ;;  %7669 = vst [vmem:[#allocation5 + $0x1f0] sm:$0xf] %v7407_v51  ;;  %v13156_v18 = vpop.f32.mrf.mxu0  ;;  %13246 = vmatprep.subr.bf16.mxu1 %v13778_v42 }
 0x30a   : > { %v6567_v50 = vrot.slane %v6565_v46, 4  ;;  %v12563_v61 = vrot.slane %v6873_v19, 9  ;;  %v6382_v45 = vld [vmem:[#allocation4 + $0x68] sm:$0x1]  ;;  %v6876_v17 = vld [vmem:[#allocation4 + $0x60] sm:$0xe]  ;;  %v13535_v46 = vpop.f32.mrf.mxu1 }
 0x30b   : > { %7667 = vst [vmem:[#allocation5 + $0x1a8] sm:$0xf] %v7383_v8  ;;  %7668 = vst [vmem:[#allocation5 + $0x1cc] sm:$0xf] %v7397_v3  ;;  %v6559_v14 = vrot.slane %v6558_v32, 4  ;;  %v6573_v29 = vrot.slane %v6571_v36, 5 }
 0x30c   : > { %v6877_v60 = vld [vmem:[#allocation4 + $0x64] sm:$0xf]  ;;  %v6878_v33 = vld [vmem:[#allocation4 + $0x68] sm:$0x1]  ;;  %v6568_v48 = vor.u32 %v6567_v50, %v6563_v0  ;;  %v6995_v58 = vrot.slane %v6874_v21, 5  ;;  %v6998_v5 = vrot.slane %v6875_v22, 5  ;;  %v4531_v50 = vpop.f32.mrf.mxu1 }
 0x30d   : > { %v6591_v63 = vrot.slane %v6589_v12, 4  ;;  %v13721_v35 = vld [vmem:[#allocation3 + $0x70] sm:$0xff]   ;;  %v6564_v27 = vsel %vm14230_vm14, %v6559_v14, %v6563_v0  ;;  %v6578_v57 = vrot.slane %v6576_v4, 4  ;;  %v6581_v52 = vrot.slane %v6579_v6, 5  ;;  %v13157_v4 = vpop.f32.mrf.mxu0  ;;  %v13729_v49 = vld [vmem:[#allocation5 + $0x4] ss:$36 sps:$4 sm:$0xff]  }
 0x30e   : > { %v6569_v47 = vrot.slane %v6568_v48, 4  ;;  %6835 = vst [vmem:[#allocation5 + $0x1c0] sm:$0xf] %v6564_v27  ;;  %v6996_v39 = vsel %vm14128_vm10, %v12563_v61, %v6995_v58  ;;  %v6997_v41 = vrot.slane %v6995_v58, 4  ;;  %v6585_v43 = vshll.u32 %v17436_v40, 16  ;;  %13545 = vmatprep.mubr.msk.bf16.mxu1 %vm4380_vm3, %v13721_v35  ;;  %v13779_v19 = vld [vmem:[%s18953_s3 + $0x1f8] sm:$0xff]  }
 0x30f   : > { %7107 = vst [vmem:[#allocation5 + $0x1c4] sm:$0xf] %v6996_v39  ;;  %v6582_v12 = vor.u32 %v6581_v52, %v6578_v57  ;;  %v6595_v37 = vshll.u32 %v6382_v45, 16  ;;  %v12564_v1 = vrot.slane %v6876_v17, 9  ;;  %v7002_v53 = vrot.slane %v6877_v60, 5  ;;  %v13782_v36 = vld [vmem:[%s18953_s3 + $0x1b8] sm:$0xff]   ;;  %13358 = vmatprep.subr.bf16.mxu0 %v13779_v19 }
 0x310   : > { %v6574_v13 = vsel %vm14230_vm14, %v6569_v47, %v6573_v29  ;;  %v6999_v6 = vsel %vm14128_vm10, %v6997_v41, %v6998_v5  ;;  %v6587_v56 = vrot.slane %v6585_v43, 5  ;;  %v7005_v55 = vrot.slane %v6878_v33, 5  ;;  %v7705_v34 = vld [vmem:[#allocation4 + $0x5c] sm:$0x1]  ;;  %v7706_v62 = vld [vmem:[#allocation4 + $0x60] sm:$0xe]  ;;  %13359 = vmatpush3.bf16.msra.mxu0 %v13782_v36  ;;  %v13536_v33 = vpop.f32.mrf.mxu1 }
 0x311   : > { %v17556_v40 = vadd.f32 %v13157_v4, %v13156_v18  ;;  %v13724_v25 = vld [vmem:[#allocation3 + $0x78] sm:$0xff]   ;;  %6836 = vst [vmem:[#allocation5 + $0x1e4] sm:$0xf] %v6574_v13  ;;  %7108 = vst [vmem:[#allocation5 + $0x1e8] sm:$0xf] %v6999_v6  ;;  %v6583_v16 = vrot.slane %v6582_v12, 4  ;;  %v7003_v26 = vsel %vm14128_vm10, %v12564_v1, %v7002_v53 }
 0x312   : > { %v6592_v38 = vor.u32 %v6591_v63, %v6587_v56  ;;  %v6597_v2 = vrot.slane %v6595_v37, 5  ;;  %v7004_v31 = vrot.slane %v7002_v53, 4  ;;  %7109 = vst [vmem:[#allocation5 + $0x20c] sm:$0xf] %v7003_v26  ;;  %v7707_v9 = vld [vmem:[#allocation4 + $0x64] sm:$0xf]  ;;  %13546 = vmatmul.mubr.msk.bf16.gmra.mxu1 %vm4380_vm3, %v13724_v25  ;;  %v4534_v57 = vpop.f32.mrf.mxu1 }
 0x313   : > { %v6588_v20 = vsel %vm14230_vm14, %v6583_v16, %v6587_v56  ;;  %v7823_v51 = vrot.slane %v7821_v10, 4  ;;  %v7824_v32 = vrot.slane %v7705_v34, 5  ;;  %v17577_v0 = vld [vmem:[%s18952_s2] ss:$0 sm:$0xff]  ;;  %9471 = vmatprep.mubr.bf16.mxu1 %v13729_v49  ;;  %v12579_v10 = vrot.slane %v7706_v62, 9  ;;  %v13781_v35 = vld [vmem:[%s18953_s3 + $0x138] sm:$0xff]  }
 0x314   : > { %v4540_v21 = vadd.f32 %v17577_v0, %v13535_v46  ;;  %v6593_v22 = vrot.slane %v6592_v38, 4  ;;  %6837 = vst [vmem:[#allocation5 + $0x208] sm:$0xf] %v6588_v20  ;;  %v7006_v8 = vsel %vm14128_vm10, %v7004_v31, %v7005_v55  ;;  %v7708_v3 = vld [vmem:[#allocation4 + $0x68] sm:$0x1]  ;;  %v7828_v61 = vrot.slane %v7707_v9, 5 }
 0x315   : > { %7110 = vst [vmem:[#allocation5 + $0x230] sm:$0xf] %v7006_v8  ;;  %v7825_v30 = vsel %vm14128_vm10, %v7823_v51, %v7824_v32  ;;  %v4532_v17 = vadd.f32 %v17577_v0, %v4531_v50  ;;  %v7831_v60 = vrot.slane %v7708_v3, 5  ;;  %v4543_v63 = vadd.f32 %v17577_v0, %v13536_v33  ;;  %v13727_v27 = vld [vmem:[#allocation5] ss:$36 sps:$4 sm:$0xff]  }
 0x316   : > { %v4612_v45 = vmax.f32 %v4540_v21, 0.0  ;;  %v6598_v14 = vsel %vm14230_vm14, %v6593_v22, %v6597_v2  ;;  %7939 = vst [vmem:[#allocation5 + $0x1ac] sm:$0xf] %v7825_v30  ;;  %v7829_v48 = vsel %vm14128_vm10, %v12579_v10, %v7828_v61  ;;  %v7830_v29 = vrot.slane %v7828_v61, 4  ;;  %v13732_v41 = vld [vmem:[#allocation5 + $0x4c] ss:$36 sps:$4 sm:$0xff]  }
 0x317   : > { %6838 = vst [vmem:[#allocation5 + $0x22c] sm:$0xf] %v6598_v14  ;;  %v4610_v5 = vmax.f32 %v4532_v17, 0.0  ;;  %7940 = vst [vmem:[#allocation5 + $0x1d0] sm:$0xf] %v7829_v48  ;;  %v4613_v39 = vmax.f32 %v4543_v63, 0.0  ;;  %v4535_v43 = vadd.f32 %v17577_v0, %v4534_v57 }
 0x318   : > { %v12989_v58 = vpack.c.bf16 %v4612_v45, %v4612_v45  ;;  %v7832_v52 = vsel %vm14128_vm10, %v7830_v29, %v7831_v60  ;;  %v5110_v4 = vld [vmem:[#allocation4 + $0x78] sm:$0xf]  ;;  %v5103_v34 = vld [vmem:[#allocation4 + $0x6c] sm:$0xf]  ;;  %v13734_v19 = vld [vmem:[#allocation5 + $0x48] ss:$36 sps:$4 sm:$0xff]  }
 0x319   : > { %v12987_v47 = vpack.c.bf16 %v4610_v5, %v4610_v5  ;;  %7941 = vst [vmem:[#allocation5 + $0x1f4] sm:$0xf] %v7832_v52  ;;  %v12990_v53 = vpack.c.bf16 %v4613_v39, %v4613_v39  ;;  %v4611_v49 = vmax.f32 %v4535_v43, 0.0  ;;  %v5114_v38 = vld [vmem:[#allocation4 + $0x80] sm:$0x1]  ;;  %vm19397_vm0 = vcmask 1041408  }
 0x31a   : > { %v4876_v18 = vshrl.u32 %v12989_v58, 16  ;;  %9472 = vmatmul.mubr.bf16.vlgmr.msra.gmra.mxu1 %v13727_v27  ;;  %v4879_v37 = vshll.u32 %v12989_v58, 16  ;;  %v13735_v20 = vld [vmem:[#allocation5 + $0x94] ss:$36 sps:$4 sm:$0xff]   ;;  %v5107_v8 = vld [vmem:[#allocation4 + $0x74] sm:$0x1]  ;;  %vm19405_vm3 = vmmov %vm19397_vm0 }
 0x31b   : > { %v4859_v1 = vshrl.u32 %v12987_v47, 16  ;;  %9479 = vmatprep.mubr.bf16.mxu1 %v13732_v41  ;;  %13247 = vmatpush3.bf16.msra.mxu1 %v13781_v35  ;;  %v4862_v56 = vshll.u32 %v12987_v47, 16  ;;  %v4884_v55 = vshrl.u32 %v12990_v53, 16  ;;  %v12988_v62 = vpack.c.bf16 %v4611_v49, %v4611_v49  ;;  %v13737_v60 = vld [vmem:[#allocation5 + $0x90] ss:$36 sps:$4 sm:$0xff]  }
 0x31c   : > { %v4878_v12 = vrot.slane %v4876_v18, 7  ;;  %v4887_v26 = vshll.u32 %v12990_v53, 16  ;;  %v13738_v33 = vld [vmem:[#allocation5 + $0xdc] ss:$36 sps:$4 sm:$0xff]   ;;  %vm12213_vm15 = vcmask 1043459   ;;  %vm12219_vm12 = vcmask 1046534  }
 0x31d   : > { %v4861_v6 = vrot.slane %v4859_v1, 7  ;;  %v4886_v16 = vrot.slane %v4884_v55, 7  ;;  %v4867_v2 = vshrl.u32 %v12988_v62, 16  ;;  %v4870_v32 = vshll.u32 %v12988_v62, 16 }
 0x31e   : > { %v4881_v13 = vor.u32 %v4879_v37, %v4878_v12  ;;  %v4882_v31 = vrot.slane %v4878_v12, 4  ;;  %vm12221_vm13 = vcmask 1047559  }
 0x31f   : > { %v4864_v42 = vor.u32 %v4862_v56, %v4861_v6  ;;  %v4889_v46 = vor.u32 %v4887_v26, %v4886_v16  ;;  %v4891_v36 = vrot.slane %v4886_v16, 4  ;;  %v4869_v51 = vrot.slane %v4867_v2, 7  ;;  %v13740_v56 = vld [vmem:[#allocation5 + $0xd8] ss:$36 sps:$4 sm:$0xff]   ;;  %v13741_v26 = vld [vmem:[#allocation5 + $0x124] ss:$36 sps:$4 sm:$0xff]  }
 0x320   : > { %v5111_v25 = vsel %vm16388_vm4, %v4881_v13, %v5110_v4  ;;  %v4865_v3 = vrot.slane %v4861_v6, 4 }
 0x321   : > { %5112 = vst [vmem:[#allocation4 + $0x78] sm:$0xf] %v5111_v25  ;;  %v5104_v9 = vsel %vm16388_vm4, %v4864_v42, %v5103_v34  ;;  %v4890_v21 = vsel %vm14070_vm5, %v4882_v31, %v4889_v46  ;;  %v5115_v22 = vsel %vm16416_vm11, %v4891_v36, %v5114_v38  ;;  %v4872_v50 = vor.u32 %v4870_v32, %v4869_v51 }
 0x322   : > { %5105 = vst [vmem:[#allocation4 + $0x6c] sm:$0xf] %v5104_v9  ;;  %9480 = vmatmul.mubr.bf16.gmra.mxu1 %v13734_v19  ;;  %5113 = vst [vmem:[#allocation4 + $0x7c] sm:$0xf] %v4890_v21  ;;  %v4874_v30 = vrot.slane %v4869_v51, 4 }
 0x323   : > { %9487 = vmatprep.mubr.bf16.mxu1 %v13735_v20  ;;  %5116 = vst [vmem:[#allocation4 + $0x80] sm:$0x1] %v5115_v22  ;;  %v4873_v10 = vsel %vm14070_vm5, %v4865_v3, %v4872_v50 }
 0x324   : > { %v5108_v61 = vsel %vm16416_vm11, %v4874_v30, %v5107_v8  ;;  %5106 = vst [vmem:[#allocation4 + $0x70] sm:$0xf] %v4873_v10 }
 0x325   : > { %5109 = vst [vmem:[#allocation4 + $0x74] sm:$0x1] %v5108_v61 }
 0x328   : > { %v5184_v45 = vld [vmem:[#allocation4 + $0x78] sm:$0x2]  ;;  %v5294_v48 = vld [vmem:[#allocation4 + $0x78] sm:$0x1] }
 0x329   : > { %v17608_v17 = vld [vmem:[#allocation4 + $0x78] sm:$0xe]  ;;  %v12515_v14 = vrot.slane %v5184_v45, 9  ;;  %v5183_v29 = vld [vmem:[#allocation4 + $0x6c] sm:$0x2] }
 0x32a   : > { %v7709_v58 = vld [vmem:[#allocation4 + $0x6c] sm:$0xe]  ;;  %v12514_v63 = vrot.slane %v5183_v29, 9  ;;  %v5291_v35 = vld [vmem:[#allocation4 + $0x6c] sm:$0x1]  ;;  %9488 = vmatmul.mubr.bf16.gmra.mxu1 %v13737_v60  ;;  %v12551_v27 = vrot.slane %v17608_v17, 9 }
 0x32b   : > { %v5295_v5 = vsel %vm16416_vm11, %v12515_v14, %v5294_v48  ;;  %v5328_v57 = vld [vmem:[#allocation4 + $0x7c] sm:$0x8]  ;;  %9495 = vmatprep.mubr.bf16.mxu1 %v13738_v33  ;;  %v6050_v18 = vld [vmem:[#allocation4 + $0x6c] sm:$0xe]  ;;  %v12580_v39 = vrot.slane %v7709_v58, 9 }
 0x32c   : > { %5296 = vst [vmem:[#allocation4 + $0x78] sm:$0x1] %v5295_v5  ;;  %v5558_v52 = vld [vmem:[#allocation4 + $0x7c] sm:$0xf]  ;;  %v5292_v47 = vsel %vm16416_vm11, %v12514_v63, %v5291_v35  ;;  %v12533_v41 = vrot.slane %v5328_v57, 11  ;;  %v12550_v55 = vrot.slane %v6050_v18, 9 }
 0x32d   : > { %v5829_v43 = vshrl.u32 %v5558_v52, 16  ;;  %v7217_v12 = vld [vmem:[#allocation4 + $0x7c] sm:$0xf]  ;;  %5293 = vst [vmem:[#allocation4 + $0x6c] sm:$0x1] %v5292_v47  ;;  %v5825_v4 = vshll.u32 %v5558_v52, 16 }
 0x32e   : > { %v5439_v37 = vld [vmem:[#allocation4 + $0x80] sm:$0x1]  ;;  %v7446_v1 = vshrl.u32 %v7217_v12, 16  ;;  %v6314_v53 = vld [vmem:[#allocation4 + $0x7c] sm:$0xf]  ;;  %v7442_v34 = vshll.u32 %v7217_v12, 16 }
 0x32f   : > { %v5440_v49 = vsel %vm16481_vm9, %v12533_v41, %v5439_v37  ;;  %v17617_v13 = vrot.slane %v5829_v43, 4  ;;  %v5327_v6 = vld [vmem:[#allocation4 + $0x70] sm:$0x8]  ;;  %6346 = vst [vmem:[#allocation5 + $0x2b8] sm:$0xf] %v6314_v53  ;;  %v17624_v31 = vrot.slane %v5825_v4, 5 }
 0x330   : > { %5441 = vst [vmem:[#allocation4 + $0x80] sm:$0x1] %v5440_v49  ;;  %v17619_v62 = vrot.slane %v7446_v1, 4  ;;  %v12532_v25 = vrot.slane %v5327_v6, 11  ;;  %v5436_v42 = vld [vmem:[#allocation4 + $0x74] sm:$0x1] }
 0x331   : > { %v17621_v16 = vld [vmem:[#allocation4 + $0x70] sm:$0xf]  ;;  %v17628_v51 = vrot.slane %v7442_v34, 5  ;;  %v5832_v29 = vor.u32 %v17617_v13, %v17624_v31  ;;  %v13743_v47 = vld [vmem:[#allocation5 + $0x120] ss:$36 sps:$4 sm:$0xff]  }
 0x332   : > { %v7835_v19 = vrot.slane %v17621_v16, 5  ;;  %v6312_v38 = vld [vmem:[#allocation4 + $0x70] sm:$0xf]  ;;  %v5437_v9 = vsel %vm16481_vm9, %v12532_v25, %v5436_v42  ;;  %9496 = vmatmul.mubr.bf16.gmra.mxu1 %v13740_v56  ;;  %v13744_v12 = vld [vmem:[#allocation5 + $0x16c] ss:$36 sps:$4 sm:$0xff]   ;;  %v13785_v17 = vld [vmem:[%s18953_s3 + $0x130] sm:$0xff]  }
 0x333   : > { %v6051_v2 = vld [vmem:[#allocation4 + $0x70] sm:$0xf]  ;;  %6344 = vst [vmem:[#allocation5 + $0x270] sm:$0xf] %v6312_v38  ;;  %v5557_v32 = vld [vmem:[#allocation4 + $0x78] sm:$0xf]  ;;  %9503 = vmatprep.mubr.bf16.mxu1 %v13741_v26 }
 0x334   : > { %v6184_v46 = vrot.slane %v6051_v2, 5  ;;  %v5482_v36 = vld [vmem:[#allocation4 + $0x70] sm:$0xf]  ;;  %v17630_v21 = vld [vmem:[#allocation4 + $0x78] sm:$0xf]  ;;  %v7836_v8 = vsel %vm14128_vm10, %v12580_v39, %v7835_v19  ;;  %v5816_v3 = vshrl.u32 %v5557_v32, 16 }
 0x335   : > { %v5555_v20 = vld [vmem:[#allocation4 + $0x70] sm:$0xf]  ;;  %v17632_v22 = vld [vmem:[#allocation4 + $0x78] sm:$0xf]  ;;  %5438 = vst [vmem:[#allocation4 + $0x74] sm:$0x1] %v5437_v9 }
 0x336   : > { %5514 = vst [vmem:[#allocation5 + $0x2ac] sm:$0xf] %v5482_v36  ;;  %v5819_v50 = vshll.u32 %v5557_v32, 16  ;;  %v6624_v30 = vshrl.u32 %v17630_v21, 16  ;;  %v6627_v10 = vshll.u32 %v17630_v21, 16  ;;  %v7433_v45 = vshrl.u32 %v17632_v22, 16 }
 0x337   : > { %v6313_v61 = vld [vmem:[#allocation4 + $0x78] sm:$0xf]  ;;  %7942 = vst [vmem:[#allocation5 + $0x218] sm:$0xf] %v7836_v8  ;;  %v7436_v14 = vshll.u32 %v17632_v22, 16  ;;  %v6185_v48 = vsel %vm14128_vm10, %v12550_v55, %v6184_v46  ;;  %v6186_v41 = vrot.slane %v6184_v46, 4  ;;  %v7449_v21 = vor.u32 %v17619_v62, %v17628_v51 }
 0x338   : > { %v5554_v60 = vld [vmem:[#allocation4 + $0x6c] sm:$0xf]  ;;  %6345 = vst [vmem:[#allocation5 + $0x294] sm:$0xf] %v6313_v61  ;;  %6281 = vst [vmem:[#allocation5 + $0x290] sm:$0xf] %v6185_v48 }
 0x339   : > { %v17642_v33 = vld [vmem:[#allocation4 + $0x6c] sm:$0xf]  ;;  %v5792_v58 = vshrl.u32 %v5554_v60, 16  ;;  %v5795_v5 = vshll.u32 %v5554_v60, 16  ;;  %v5801_v43 = vshll.u32 %v5555_v20, 16  ;;  %v5805_v4 = vshrl.u32 %v5555_v20, 16  ;;  %v17657_v20 = vpop.f32.mrf.mxu0 }
 0x33a   : > { %v6600_v63 = vshrl.u32 %v17642_v33, 16  ;;  %v6603_v35 = vshll.u32 %v17642_v33, 16  ;;  %v17650_v57 = vld [vmem:[#allocation4 + $0x6c] sm:$0xf]  ;;  %v5818_v49 = vrot.slane %v5816_v3, 4  ;;  %v5821_v26 = vrot.slane %v5819_v50, 5  ;;  %9504 = vmatmul.mubr.bf16.gmra.mxu1 %v13743_v47 }
 0x33b   : > { %v7409_v52 = vshrl.u32 %v17650_v57, 16  ;;  %v7412_v18 = vshll.u32 %v17650_v57, 16  ;;  %v6311_v39 = vld [vmem:[#allocation4 + $0x6c] sm:$0xf]  ;;  %v5794_v1 = vrot.slane %v5792_v58, 4  ;;  %v5797_v53 = vrot.slane %v5795_v5, 5  ;;  %9511 = vmatprep.mubr.bf16.mxu1 %v13744_v12 }
 0x33c   : > { %6343 = vst [vmem:[#allocation5 + $0x24c] sm:$0xf] %v6311_v39  ;;  %v5481_v37 = vld [vmem:[#allocation4 + $0x6c] sm:$0xf]  ;;  %v5803_v13 = vrot.slane %v5801_v43, 5  ;;  %v5807_v42 = vrot.slane %v5805_v4, 4  ;;  %v5822_v3 = vor.u32 %v5821_v26, %v5818_v49 }
 0x33d   : > { %5513 = vst [vmem:[#allocation5 + $0x288] sm:$0xf] %v5481_v37  ;;  %v5483_v6 = vld [vmem:[#allocation4 + $0x78] sm:$0xf]  ;;  %v5484_v56 = vld [vmem:[#allocation4 + $0x7c] sm:$0xf]  ;;  %v5798_v25 = vor.u32 %v5797_v53, %v5794_v1 }
 0x33e   : > { %v6052_v55 = vld [vmem:[#allocation4 + $0x74] sm:$0x1]  ;;  %5515 = vst [vmem:[#allocation5 + $0x2d0] sm:$0xf] %v5483_v6  ;;  %5516 = vst [vmem:[#allocation5 + $0x2f4] sm:$0xf] %v5484_v56  ;;  %v5808_v8 = vor.u32 %v5807_v42, %v5803_v13  ;;  %v17672_v56 = vpop.f32.mrf.mxu0 }
 0x33f   : > { %v5556_v34 = vld [vmem:[#allocation4 + $0x74] sm:$0x1]  ;;  %v6187_v38 = vrot.slane %v6052_v55, 5  ;;  %v5559_v9 = vld [vmem:[#allocation4 + $0x80] sm:$0x1]  ;;  %v5833_v46 = vrot.slane %v5832_v29, 4 }
 0x340   : > { %v5811_v2 = vshll.u32 %v5556_v34, 16  ;;  %v13783_v36 = vld [vmem:[%s18953_s3 + $0x170] sm:$0xff]   ;;  %v5799_v32 = vrot.slane %v5798_v25, 4  ;;  %v5835_v61 = vshll.u32 %v5559_v9, 16  ;;  %v6055_v48 = vld [vmem:[#allocation4 + $0x80] sm:$0x1] }
 0x341   : > { %v6054_v60 = vld [vmem:[#allocation4 + $0x7c] sm:$0xf]  ;;  %v6188_v50 = vsel %vm14128_vm10, %v6186_v41, %v6187_v38  ;;  %v6194_v47 = vrot.slane %v6055_v48, 5  ;;  %13248 = vmatprep.subr.bf16.mxu1 %v13783_v36  ;;  %v5809_v43 = vrot.slane %v5808_v8, 4  ;;  %v5823_v12 = vrot.slane %v5822_v3, 4  ;;  %v13787_v26 = vld [vmem:[%s18953_s3 + $0x168] sm:$0xff]   ;;  %v13162_v36 = vpop.f32.mrf.mxu0 }
 0x342   : > { %v5813_v58 = vrot.slane %v5811_v2, 5  ;;  %v6191_v5 = vrot.slane %v6054_v60, 5  ;;  %v17661_v29 = vld [vmem:[#allocation4 + $0x7c] sm:$0xf]  ;;  %6282 = vst [vmem:[#allocation5 + $0x2b4] sm:$0xf] %v6188_v50  ;;  %v5804_v39 = vsel %vm14230_vm14, %v5799_v32, %v5803_v13  ;;  %13249 = vmatpush3.bf16.msra.mxu1 %v13785_v17 }
 0x343   : > { %v5837_v37 = vrot.slane %v5835_v61, 5  ;;  %v13784_v1 = vld [vmem:[%s18953_s3 + $0x1f0] sm:$0xff]   ;;  %v13746_v53 = vld [vmem:[#allocation5 + $0x24c] ss:$36 sps:$4 sm:$0xff]   ;;  %6009 = vst [vmem:[#allocation5 + $0x28c] sm:$0xf] %v5804_v39  ;;  %v5828_v34 = vsel %vm14230_vm14, %v5823_v12, %v17624_v31  ;;  %13250 = vmatprep.subr.bf16.mxu1 %v13787_v26 }
 0x344   : > { %v13748_v4 = vld [vmem:[#allocation5 + $0x248] ss:$36 sps:$4 sm:$0xff]   ;;  %v6192_v49 = vsel %vm14128_vm10, %v12551_v27, %v6191_v5  ;;  %v6193_v6 = vrot.slane %v6191_v5, 4  ;;  %v13750_v13 = vld [vmem:[#allocation5 + $0x1b4] ss:$36 sps:$4 sm:$0xff]   ;;  %v5814_v55 = vsel %vm14230_vm14, %v5809_v43, %v5813_v58  ;;  %13360 = vmatprep.subr.bf16.mxu0 %v13784_v1  ;;  %v13786_v27 = vld [vmem:[%s18953_s3 + $0x1b0] sm:$0xff]   ;;  %9696 = vmatprep.mubr.bf16.mxu0 %v13746_v53 }
 0x345   : > { %v13749_v41 = vld [vmem:[#allocation5 + $0x168] ss:$36 sps:$4 sm:$0xff]   ;;  %v5838_v25 = vsel %vm14230_vm14, %v5833_v46, %v5837_v37  ;;  %6283 = vst [vmem:[#allocation5 + $0x2d8] sm:$0xf] %v6192_v49  ;;  %v7411_v42 = vrot.slane %v7409_v52, 4  ;;  %v13788_v38 = vld [vmem:[%s18953_s3 + $0x1e8] sm:$0xff]   ;;  %9697 = vmatmul.mubr.bf16.gmra.mxu0 %v13748_v4 }
 0x346   : > { %6010 = vst [vmem:[#allocation5 + $0x2b0] sm:$0xf] %v5814_v55  ;;  %6011 = vst [vmem:[#allocation5 + $0x2d4] sm:$0xf] %v5828_v34  ;;  %v6195_v31 = vsel %vm14128_vm10, %v6193_v6, %v6194_v47  ;;  %v7414_v2 = vrot.slane %v7412_v18, 5  ;;  %v7435_v52 = vrot.slane %v7433_v45, 4  ;;  %9512 = vmatmul.mubr.bf16.gmra.mxu1 %v13749_v41  ;;  %13361 = vmatpush3.bf16.msra.mxu0 %v13786_v27 }
 0x347   : > { %6012 = vst [vmem:[#allocation5 + $0x2f8] sm:$0xf] %v5838_v25  ;;  %v7438_v9 = vrot.slane %v7436_v14, 5  ;;  %v6637_v46 = vshrl.u32 %v17661_v29, 16  ;;  %6284 = vst [vmem:[#allocation5 + $0x2fc] sm:$0xf] %v6195_v31  ;;  %9519 = vmatprep.mubr.bf16.mxu1 %v13750_v13  ;;  %13362 = vmatprep.subr.bf16.mxu0 %v13788_v38 }
 0x348   : > { %v13789_v32 = vld [vmem:[%s18953_s3 + $0x128] sm:$0xff]   ;;  %v6602_v45 = vrot.slane %v6600_v63, 4  ;;  %v6605_v22 = vrot.slane %v6603_v35, 5  ;;  %v13794_v14 = vld [vmem:[%s18953_s3 + $0x160] sm:$0xff]   ;;  %v7415_v3 = vor.u32 %v7414_v2, %v7411_v42  ;;  %v6626_v63 = vrot.slane %v6624_v30, 4  ;;  %v13163_v35 = vpop.f32.mrf.mxu0 }
 0x349   : > { %v13790_v57 = vld [vmem:[%s18953_s3 + $0x1a8] sm:$0xff]   ;;  %v13795_v18 = vld [vmem:[%s18953_s3 + $0x1e0] sm:$0xff]   ;;  %v7439_v61 = vor.u32 %v7438_v9, %v7435_v52  ;;  %v6629_v33 = vrot.slane %v6627_v10, 5  ;;  %v17726_v5 = vadd.f32 %v13163_v35, %v13162_v36  ;;  %13251 = vmatpush3.bf16.msra.mxu1 %v13789_v32  ;;  %v7144_v53 = vld [vmem:[#allocation4 + $0x78] sm:$0xf]  ;;  %v17738_v55 = vrot.slane %v6637_v46, 4 }
 0x34a   : > { %v7142_v8 = vld [vmem:[#allocation4 + $0x6c] sm:$0xf]  ;;  %v7143_v48 = vld [vmem:[#allocation4 + $0x70] sm:$0xf]  ;;  %v7215_v58 = vld [vmem:[#allocation4 + $0x74] sm:$0x1]  ;;  %v6606_v10 = vor.u32 %v6605_v22, %v6602_v45  ;;  %v17733_v43 = vpop.f32.mrf.mxu0  ;;  %13363 = vmatpush3.bf16.msra.mxu0 %v13790_v57  ;;  %13252 = vmatprep.subr.bf16.mxu1 %v13794_v14 }
 0x34b   : > { %v17720_v60 = vld [vmem:[#allocation4 + $0x6c] sm:$0xe]  ;;  %7174 = vst [vmem:[#allocation5 + $0x210] sm:$0xf] %v7142_v8  ;;  %v7214_v50 = vld [vmem:[#allocation4 + $0x70] sm:$0xf]  ;;  %v6630_v4 = vor.u32 %v6629_v33, %v6626_v63  ;;  %13364 = vmatprep.subr.bf16.mxu0 %v13795_v18 }
 0x34c   : > { %v13752_v47 = vld [vmem:[#allocation5 + $0x294] ss:$36 sps:$4 sm:$0xff]   ;;  %7175 = vst [vmem:[#allocation5 + $0x234] sm:$0xf] %v7143_v48  ;;  %v7416_v30 = vrot.slane %v7415_v3, 4  ;;  %v7418_v12 = vshll.u32 %v7214_v50, 16  ;;  %v17740_v34 = vpop.f32.mrf.mxu0 }
 0x34d   : > { %v13796_v39 = vld [vmem:[%s18953_s3 + $0x120] sm:$0xff]   ;;  %v7422_v37 = vshrl.u32 %v7214_v50, 16  ;;  %v7428_v1 = vshll.u32 %v7215_v58, 16  ;;  %9704 = vmatprep.mubr.bf16.mxu0 %v13752_v47  ;;  %v7145_v6 = vld [vmem:[#allocation4 + $0x7c] sm:$0xf]  ;;  %v7440_v62 = vrot.slane %v7439_v61, 4 }
 0x34e   : > { %v13755_v41 = vld [vmem:[#allocation5 + $0x1b0] ss:$36 sps:$4 sm:$0xff]   ;;  %7176 = vst [vmem:[#allocation5 + $0x258] sm:$0xf] %v7144_v53  ;;  %v7218_v13 = vld [vmem:[#allocation4 + $0x80] sm:$0x1]  ;;  %v13168_v52 = vpop.f32.mrf.mxu0  ;;  %13253 = vmatpush3.bf16.msra.mxu1 %v13796_v39 }
 0x34f   : > { %v13797_v49 = vld [vmem:[%s18953_s3 + $0x1a0] sm:$0xff]   ;;  %v13756_v17 = vld [vmem:[#allocation5 + $0x1fc] ss:$36 sps:$4 sm:$0xff]   ;;  %v7420_v27 = vrot.slane %v7418_v12, 5  ;;  %7177 = vst [vmem:[#allocation5 + $0x27c] sm:$0xf] %v7145_v6  ;;  %v7445_v26 = vsel %vm14230_vm14, %v7440_v62, %v17628_v51  ;;  %9520 = vmatmul.mubr.bf16.gmra.mxu1 %v13755_v41 }
 0x350   : > { %v13754_v25 = vld [vmem:[#allocation5 + $0x290] ss:$36 sps:$4 sm:$0xff]   ;;  %v12565_v42 = vrot.slane %v17720_v60, 9  ;;  %v7424_v31 = vrot.slane %v7422_v37, 4  ;;  %v7450_v38 = vrot.slane %v7449_v21, 4  ;;  %v6607_v2 = vrot.slane %v6606_v10, 4  ;;  %13365 = vmatpush3.bf16.msra.mxu0 %v13797_v49  ;;  %v13169_v3 = vpop.f32.mrf.mxu0  ;;  %9527 = vmatprep.mubr.bf16.mxu1 %v13756_v17 }
 0x351   : > { %9705 = vmatmul.mubr.bf16.gmra.mxu0 %v13754_v25  ;;  %v7421_v9 = vsel %vm14230_vm14, %v7416_v30, %v7420_v27  ;;  %v7430_v46 = vrot.slane %v7428_v1, 5  ;;  %v7452_v36 = vshll.u32 %v7218_v13, 16  ;;  %7672 = vst [vmem:[#allocation5 + $0x25c] sm:$0xf] %v7445_v26  ;;  %v6384_v32 = vld [vmem:[#allocation4 + $0x70] sm:$0xf]  ;;  %v17751_v48 = vadd.f32 %v13169_v3, %v13168_v52 }
 0x352   : > { %v17748_v57 = vrot.slane %v6630_v4, 4  ;;  %v7425_v45 = vor.u32 %v7424_v31, %v7420_v27  ;;  %7670 = vst [vmem:[#allocation5 + $0x214] sm:$0xf] %v7421_v9  ;;  %v6385_v22 = vld [vmem:[#allocation4 + $0x74] sm:$0x1]  ;;  %v6609_v51 = vshll.u32 %v6384_v32, 16 }
 0x353   : > { %v6613_v14 = vshrl.u32 %v6384_v32, 16  ;;  %v6880_v18 = vld [vmem:[#allocation4 + $0x70] sm:$0xf]  ;;  %v6882_v8 = vld [vmem:[#allocation4 + $0x78] sm:$0xe]  ;;  %v7454_v61 = vrot.slane %v7452_v36, 5 }
 0x354   : > { %v6619_v60 = vshll.u32 %v6385_v22, 16  ;;  %v6881_v63 = vld [vmem:[#allocation4 + $0x74] sm:$0x1]  ;;  %v7009_v33 = vrot.slane %v6880_v18, 5  ;;  %v6633_v35 = vshll.u32 %v17661_v29, 16  ;;  %v7426_v50 = vrot.slane %v7425_v45, 4 }
 0x355   : > { %v6611_v58 = vrot.slane %v6609_v51, 5  ;;  %v6615_v47 = vrot.slane %v6613_v14, 4  ;;  %v6388_v39 = vld [vmem:[#allocation4 + $0x80] sm:$0x1]  ;;  %v7455_v30 = vsel %vm14230_vm14, %v7450_v38, %v7454_v61  ;;  %v6883_v37 = vld [vmem:[#allocation4 + $0x7c] sm:$0xf]  ;;  %v13539_v51 = vpop.f32.mrf.mxu1 }
 0x356   : > { %v6621_v21 = vrot.slane %v6619_v60, 5  ;;  %v7010_v10 = vsel %vm14128_vm10, %v12565_v42, %v7009_v33  ;;  %v7011_v12 = vrot.slane %v7009_v33, 4  ;;  %v6884_v1 = vld [vmem:[#allocation4 + $0x80] sm:$0x1]  ;;  %v13758_v53 = vld [vmem:[#allocation5 + $0x1f8] ss:$36 sps:$4 sm:$0xff]   ;;  %v7431_v29 = vsel %vm14230_vm14, %v7426_v50, %v7430_v46 }
 0x357   : > { %7673 = vst [vmem:[#allocation5 + $0x280] sm:$0xf] %v7455_v30  ;;  %v6612_v4 = vsel %vm14230_vm14, %v6607_v2, %v6611_v58  ;;  %v6616_v41 = vor.u32 %v6615_v47, %v6611_v58  ;;  %v7012_v49 = vrot.slane %v6881_v63, 5  ;;  %7111 = vst [vmem:[#allocation5 + $0x254] sm:$0xf] %v7010_v10  ;;  %v6635_v62 = vrot.slane %v6633_v35, 5  ;;  %9528 = vmatmul.mubr.bf16.gmra.mxu1 %v13758_v53  ;;  %v4547_v35 = vpop.f32.mrf.mxu1 }
 0x358   : > { %v7711_v6 = vld [vmem:[#allocation4 + $0x74] sm:$0x1]  ;;  %v7712_v13 = vld [vmem:[#allocation4 + $0x78] sm:$0xe]  ;;  %7671 = vst [vmem:[#allocation5 + $0x238] sm:$0xf] %v7431_v29  ;;  %v4556_v61 = vadd.f32 %v17577_v0, %v13539_v51  ;;  %v4548_v47 = vadd.f32 %v17577_v0, %v4547_v35 }
 0x359   : > { %6839 = vst [vmem:[#allocation5 + $0x250] sm:$0xf] %v6612_v4  ;;  %v6643_v25 = vshll.u32 %v6388_v39, 16  ;;  %v12566_v17 = vrot.slane %v6882_v8, 9  ;;  %v7016_v27 = vrot.slane %v6883_v37, 5  ;;  %v13805_v31 = vld [vmem:[%s18953_s3 + $0x158] sm:$0xff]   ;;  %v7013_v2 = vsel %vm14128_vm10, %v7011_v12, %v7012_v49 }
 0x35a   : > { %v7713_v42 = vld [vmem:[#allocation4 + $0x7c] sm:$0xf]  ;;  %v13806_v26 = vld [vmem:[%s18953_s3 + $0x1d8] sm:$0xff]   ;;  %v6617_v38 = vrot.slane %v6616_v41, 4  ;;  %v7019_v52 = vrot.slane %v6884_v1, 5  ;;  %v6636_v46 = vsel %vm14230_vm14, %v17748_v57, %v6635_v62  ;;  %v6640_v36 = vor.u32 %v17738_v55, %v6635_v62  ;;  %13254 = vmatprep.subr.bf16.mxu1 %v13805_v31 }
 0x35b   : > { %v13759_v9 = vld [vmem:[#allocation5 + $0x244] ss:$36 sps:$4 sm:$0xff]   ;;  %7112 = vst [vmem:[#allocation5 + $0x278] sm:$0xf] %v7013_v2  ;;  %v6645_v32 = vrot.slane %v6643_v25, 5  ;;  %v7017_v45 = vsel %vm14128_vm10, %v12566_v17, %v7016_v27  ;;  %v7018_v55 = vrot.slane %v7016_v27, 4  ;;  %13366 = vmatprep.subr.bf16.mxu0 %v13806_v26 }
 0x35c   : > { %v7714_v22 = vld [vmem:[#allocation4 + $0x80] sm:$0x1]  ;;  %v6622_v57 = vsel %vm14230_vm14, %v6617_v38, %v6621_v21  ;;  %6841 = vst [vmem:[#allocation5 + $0x298] sm:$0xf] %v6636_v46  ;;  %7113 = vst [vmem:[#allocation5 + $0x29c] sm:$0xf] %v7017_v45  ;;  %9535 = vmatprep.mubr.bf16.mxu1 %v13759_v9  ;;  %v13540_v21 = vpop.f32.mrf.mxu1 }
 0x35d   : > { %v13808_v14 = vld [vmem:[%s18953_s3 + $0x118] sm:$0xff]   ;;  %v7837_v8 = vrot.slane %v7835_v19, 4  ;;  %v7838_v3 = vrot.slane %v7711_v6, 5  ;;  %6840 = vst [vmem:[#allocation5 + $0x274] sm:$0xf] %v6622_v57  ;;  %v6641_v60 = vrot.slane %v6640_v36, 4  ;;  %v7020_v50 = vsel %vm14128_vm10, %v7018_v55, %v7019_v52 }
 0x35e   : > { %v13809_v18 = vld [vmem:[%s18953_s3 + $0x198] sm:$0xff]   ;;  %v12581_v63 = vrot.slane %v7712_v13, 9  ;;  %v7842_v33 = vrot.slane %v7713_v42, 5  ;;  %13255 = vmatpush3.bf16.msra.mxu1 %v13808_v14  ;;  %v7845_v16 = vrot.slane %v7714_v22, 5  ;;  %v4616_v19 = vmax.f32 %v4556_v61, 0.0  ;;  %v4550_v53 = vpop.f32.mrf.mxu1 }
 0x35f   : > { %13367 = vmatpush3.bf16.msra.mxu0 %v13809_v18  ;;  %v7839_v58 = vsel %vm14128_vm10, %v7837_v8, %v7838_v3  ;;  %v6646_v39 = vsel %vm14230_vm14, %v6641_v60, %v6645_v32  ;;  %7114 = vst [vmem:[#allocation5 + $0x2c0] sm:$0xf] %v7020_v50  ;;  %v4614_v37 = vmax.f32 %v4548_v47, 0.0  ;;  %v4559_v1 = vadd.f32 %v17577_v0, %v13540_v21  ;;  %v13761_v29 = vld [vmem:[#allocation5 + $0x240] ss:$36 sps:$4 sm:$0xff]  }
 0x360   : > { %7943 = vst [vmem:[#allocation5 + $0x23c] sm:$0xf] %v7839_v58  ;;  %v7843_v30 = vsel %vm14128_vm10, %v12581_v63, %v7842_v33  ;;  %6842 = vst [vmem:[#allocation5 + $0x2bc] sm:$0xf] %v6646_v39  ;;  %v7844_v10 = vrot.slane %v7842_v33, 4  ;;  %v12993_v12 = vpack.c.bf16 %v4616_v19, %v4616_v19  ;;  %v4551_v62 = vadd.f32 %v17577_v0, %v4550_v53 }
 0x361   : > { %7944 = vst [vmem:[#allocation5 + $0x260] sm:$0xf] %v7843_v30  ;;  %v12991_v49 = vpack.c.bf16 %v4614_v37, %v4614_v37  ;;  %v4617_v6 = vmax.f32 %v4559_v1, 0.0  ;;  %v13762_v13 = vld [vmem:[#allocation5 + $0x28c] ss:$36 sps:$4 sm:$0xff]   ;;  %9536 = vmatmul.mubr.bf16.gmra.mxu1 %v13761_v29 }
 0x362   : > { %v7846_v4 = vsel %vm14128_vm10, %v7844_v10, %v7845_v16  ;;  %v4910_v41 = vshrl.u32 %v12993_v12, 16  ;;  %v4913_v17 = vshll.u32 %v12993_v12, 16  ;;  %9543 = vmatprep.mubr.bf16.mxu1 %v13762_v13  ;;  %v5124_v31 = vld [vmem:[#allocation4 + $0x90] sm:$0xf]  ;;  %v4615_v26 = vmax.f32 %v4551_v62, 0.0 }
 0x363   : > { %7945 = vst [vmem:[#allocation5 + $0x284] sm:$0xf] %v7846_v4  ;;  %v4893_v27 = vshrl.u32 %v12991_v49, 16  ;;  %v12994_v42 = vpack.c.bf16 %v4617_v6, %v4617_v6  ;;  %v4896_v52 = vshll.u32 %v12991_v49, 16  ;;  %v5117_v46 = vld [vmem:[#allocation4 + $0x84] sm:$0xf] }
 0x364   : > { %v4912_v25 = vrot.slane %v4910_v41, 7  ;;  %v12992_v36 = vpack.c.bf16 %v4615_v26, %v4615_v26  ;;  %v5128_v51 = vld [vmem:[#allocation4 + $0x98] sm:$0x1]  ;;  %v13764_v18 = vld [vmem:[#allocation5 + $0x288] ss:$36 sps:$4 sm:$0xff]  }
 0x365   : > { %v4895_v2 = vrot.slane %v4893_v27, 7  ;;  %v4918_v9 = vshrl.u32 %v12994_v42, 16  ;;  %v4921_v0 = vshll.u32 %v12994_v42, 16  ;;  %v13765_v61 = vld [vmem:[#allocation5 + $0x2d4] ss:$36 sps:$4 sm:$0xff]  }
 0x366   : > { %v4915_v38 = vor.u32 %v4913_v17, %v4912_v25  ;;  %v4901_v14 = vshrl.u32 %v12992_v36, 16  ;;  %v4916_v57 = vrot.slane %v4912_v25, 4  ;;  %v4904_v63 = vshll.u32 %v12992_v36, 16  ;;  %v5121_v50 = vld [vmem:[#allocation4 + $0x8c] sm:$0x1] }
 0x367   : > { %v4898_v45 = vor.u32 %v4896_v52, %v4895_v2  ;;  %v4920_v22 = vrot.slane %v4918_v9, 7  ;;  %v4899_v58 = vrot.slane %v4895_v2, 4  ;;  %v13767_v12 = vld [vmem:[#allocation5 + $0x2d0] ss:$36 sps:$4 sm:$0xff]  }
 0x368   : > { %v5125_v32 = vsel %vm16388_vm4, %v4915_v38, %v5124_v31  ;;  %v4903_v60 = vrot.slane %v4901_v14, 7 }
 0x369   : > { %5126 = vst [vmem:[#allocation4 + $0x90] sm:$0xf] %v5125_v32  ;;  %v5118_v55 = vsel %vm16388_vm4, %v4898_v45, %v5117_v46  ;;  %v4923_v8 = vor.u32 %v4921_v0, %v4920_v22  ;;  %v4925_v3 = vrot.slane %v4920_v22, 4  ;;  %9544 = vmatmul.mubr.bf16.gmra.mxu1 %v13764_v18 }
 0x36a   : > { %5119 = vst [vmem:[#allocation4 + $0x84] sm:$0xf] %v5118_v55  ;;  %9551 = vmatprep.mubr.bf16.mxu1 %v13765_v61  ;;  %v4906_v16 = vor.u32 %v4904_v63, %v4903_v60  ;;  %v4908_v19 = vrot.slane %v4903_v60, 4 }
 0x36b   : > { %v4924_v33 = vsel %vm14070_vm5, %v4916_v57, %v4923_v8  ;;  %v5129_v35 = vsel %vm16416_vm11, %v4925_v3, %v5128_v51 }
 0x36c   : > { %5127 = vst [vmem:[#allocation4 + $0x94] sm:$0xf] %v4924_v33  ;;  %5130 = vst [vmem:[#allocation4 + $0x98] sm:$0x1] %v5129_v35  ;;  %v4907_v47 = vsel %vm14070_vm5, %v4899_v58, %v4906_v16  ;;  %v5122_v39 = vsel %vm16416_vm11, %v4908_v19, %v5121_v50 }
 0x36d   : > { %5120 = vst [vmem:[#allocation4 + $0x88] sm:$0xf] %v4907_v47  ;;  %5123 = vst [vmem:[#allocation4 + $0x8c] sm:$0x1] %v5122_v39 }
 0x370   : > { %v5186_v30 = vld [vmem:[#allocation4 + $0x90] sm:$0x2]  ;;  %v5300_v37 = vld [vmem:[#allocation4 + $0x90] sm:$0x1] }
 0x371   : > { %v17811_v21 = vld [vmem:[#allocation4 + $0x90] sm:$0xe]  ;;  %v12517_v10 = vrot.slane %v5186_v30, 9  ;;  %v5185_v1 = vld [vmem:[#allocation4 + $0x84] sm:$0x2]  ;;  %9552 = vmatmul.mubr.bf16.gmra.mxu1 %v13767_v12 }
 0x372   : > { %v12516_v29 = vrot.slane %v5185_v1, 9  ;;  %v7715_v4 = vld [vmem:[#allocation4 + $0x84] sm:$0xe]  ;;  %v12553_v41 = vrot.slane %v17811_v21, 9  ;;  %v5297_v49 = vld [vmem:[#allocation4 + $0x84] sm:$0x1] }
 0x373   : > { %v5301_v53 = vsel %vm16416_vm11, %v12517_v10, %v5300_v37  ;;  %v5330_v6 = vld [vmem:[#allocation4 + $0x94] sm:$0x8]  ;;  %v12582_v31 = vrot.slane %v7715_v4, 9  ;;  %v5445_v26 = vld [vmem:[#allocation4 + $0x98] sm:$0x1] }
 0x374   : > { %5302 = vst [vmem:[#allocation4 + $0x90] sm:$0x1] %v5301_v53  ;;  %v5564_v13 = vld [vmem:[#allocation4 + $0x94] sm:$0xf]  ;;  %v5298_v62 = vsel %vm16416_vm11, %v12516_v29, %v5297_v49  ;;  %v12535_v25 = vrot.slane %v5330_v6, 11 }
 0x375   : > { %v5877_v17 = vshrl.u32 %v5564_v13, 16  ;;  %v17818_v27 = vld [vmem:[#allocation4 + $0x94] sm:$0xf]  ;;  %5299 = vst [vmem:[#allocation4 + $0x84] sm:$0x1] %v5298_v62  ;;  %v5873_v2 = vshll.u32 %v5564_v13, 16 }
 0x376   : > { %v17820_v42 = vld [vmem:[#allocation4 + $0x94] sm:$0xf]  ;;  %v5446_v52 = vsel %vm16481_vm9, %v12535_v25, %v5445_v26  ;;  %v6685_v9 = vshrl.u32 %v17818_v27, 16  ;;  %v5329_v36 = vld [vmem:[#allocation4 + $0x88] sm:$0x8] }
 0x377   : > { %v6318_v38 = vld [vmem:[#allocation4 + $0x94] sm:$0xf]  ;;  %v7494_v46 = vshrl.u32 %v17820_v42, 16  ;;  %v6056_v32 = vld [vmem:[#allocation4 + $0x84] sm:$0xe]  ;;  %v17826_v45 = vrot.slane %v5877_v17, 4 }
 0x378   : > { %6350 = vst [vmem:[#allocation5 + $0x348] sm:$0xf] %v6318_v38  ;;  %5447 = vst [vmem:[#allocation4 + $0x98] sm:$0x1] %v5446_v52  ;;  %v12534_v22 = vrot.slane %v5329_v36, 11  ;;  %v17831_v55 = vrot.slane %v5873_v2, 5 }
 0x379   : > { %v5442_v0 = vld [vmem:[#allocation4 + $0x8c] sm:$0x1]  ;;  %v17828_v51 = vld [vmem:[#allocation4 + $0x88] sm:$0xf]  ;;  %v12552_v3 = vrot.slane %v6056_v32, 9  ;;  %v7490_v30 = vshll.u32 %v17820_v42, 16 }
 0x37a   : > { %v7849_v14 = vrot.slane %v17828_v51, 5  ;;  %v6316_v18 = vld [vmem:[#allocation4 + $0x88] sm:$0xf]  ;;  %v5443_v8 = vsel %vm16481_vm9, %v12534_v22, %v5442_v0  ;;  %v5880_v29 = vor.u32 %v17826_v45, %v17831_v55  ;;  %v17887_v21 = vrot.slane %v6685_v9, 4  ;;  %v13817_v42 = vld [vmem:[%s18953_s3 + $0x188] sm:$0xff]  }
 0x37b   : > { %v6057_v57 = vld [vmem:[#allocation4 + $0x88] sm:$0xf]  ;;  %6348 = vst [vmem:[#allocation5 + $0x300] sm:$0xf] %v6316_v18  ;;  %v5563_v33 = vld [vmem:[#allocation4 + $0x90] sm:$0xf] }
 0x37c   : > { %v6198_v61 = vrot.slane %v6057_v57, 5  ;;  %v5486_v60 = vld [vmem:[#allocation4 + $0x88] sm:$0xf]  ;;  %v17835_v35 = vld [vmem:[#allocation4 + $0x90] sm:$0xf]  ;;  %v7850_v58 = vsel %vm14128_vm10, %v12582_v31, %v7849_v14  ;;  %v5864_v16 = vshrl.u32 %v5563_v33, 16 }
 0x37d   : > { %v5561_v63 = vld [vmem:[#allocation4 + $0x88] sm:$0xf]  ;;  %v17837_v50 = vld [vmem:[#allocation4 + $0x90] sm:$0xf]  ;;  %5444 = vst [vmem:[#allocation4 + $0x8c] sm:$0x1] %v5443_v8 }
 0x37e   : > { %5518 = vst [vmem:[#allocation5 + $0x33c] sm:$0xf] %v5486_v60  ;;  %v5867_v19 = vshll.u32 %v5563_v33, 16  ;;  %v6672_v47 = vshrl.u32 %v17835_v35, 16  ;;  %v6317_v39 = vld [vmem:[#allocation4 + $0x90] sm:$0xf]  ;;  %v6199_v53 = vsel %vm14128_vm10, %v12552_v3, %v6198_v61 }
 0x37f   : > { %7946 = vst [vmem:[#allocation5 + $0x2a8] sm:$0xf] %v7850_v58  ;;  %v6675_v10 = vshll.u32 %v17835_v35, 16  ;;  %v7481_v12 = vshrl.u32 %v17837_v50, 16  ;;  %v5560_v37 = vld [vmem:[#allocation4 + $0x84] sm:$0xf] }
 0x380   : > { %v17847_v1 = vld [vmem:[#allocation4 + $0x84] sm:$0xf]  ;;  %6349 = vst [vmem:[#allocation5 + $0x324] sm:$0xf] %v6317_v39  ;;  %v7484_v4 = vshll.u32 %v17837_v50, 16  ;;  %v5840_v49 = vshrl.u32 %v5560_v37, 16 }
 0x381   : > { %v5843_v6 = vshll.u32 %v5560_v37, 16  ;;  %v6648_v13 = vshrl.u32 %v17847_v1, 16  ;;  %v17855_v62 = vld [vmem:[#allocation4 + $0x84] sm:$0xf]  ;;  %6285 = vst [vmem:[#allocation5 + $0x320] sm:$0xf] %v6199_v53 }
 0x382   : > { %v7457_v25 = vshrl.u32 %v17855_v62, 16  ;;  %v7460_v17 = vshll.u32 %v17855_v62, 16  ;;  %v6315_v31 = vld [vmem:[#allocation4 + $0x84] sm:$0xf]  ;;  %v6200_v26 = vrot.slane %v6198_v61, 4  ;;  %v5849_v38 = vshll.u32 %v5561_v63, 16 }
 0x383   : > { %6347 = vst [vmem:[#allocation5 + $0x2dc] sm:$0xf] %v6315_v31  ;;  %v5485_v2 = vld [vmem:[#allocation4 + $0x84] sm:$0xf]  ;;  %v5842_v52 = vrot.slane %v5840_v49, 4  ;;  %v5845_v36 = vrot.slane %v5843_v6, 5 }
 0x384   : > { %v5853_v32 = vshrl.u32 %v5561_v63, 16  ;;  %v5866_v45 = vrot.slane %v5864_v16, 4  ;;  %5517 = vst [vmem:[#allocation5 + $0x318] sm:$0xf] %v5485_v2  ;;  %v5851_v22 = vrot.slane %v5849_v38, 5  ;;  %v5869_v33 = vrot.slane %v5867_v19, 5  ;;  %v17862_v16 = vpop.f32.mrf.mxu0 }
 0x385   : > { %v5487_v0 = vld [vmem:[#allocation4 + $0x90] sm:$0xf]  ;;  %v5488_v18 = vld [vmem:[#allocation4 + $0x94] sm:$0xf]  ;;  %v6058_v57 = vld [vmem:[#allocation4 + $0x8c] sm:$0x1]  ;;  %v5846_v3 = vor.u32 %v5845_v36, %v5842_v52 }
 0x386   : > { %v5562_v8 = vld [vmem:[#allocation4 + $0x8c] sm:$0x1]  ;;  %v5855_v60 = vrot.slane %v5853_v32, 4  ;;  %5519 = vst [vmem:[#allocation5 + $0x360] sm:$0xf] %v5487_v0  ;;  %v6201_v58 = vrot.slane %v6058_v57, 5  ;;  %v5870_v6 = vor.u32 %v5869_v33, %v5866_v45  ;;  %v17875_v33 = vpop.f32.mrf.mxu0 }
 0x387   : > { %5520 = vst [vmem:[#allocation5 + $0x384] sm:$0xf] %v5488_v18  ;;  %v5859_v61 = vshll.u32 %v5562_v8, 16  ;;  %v5565_v39 = vld [vmem:[#allocation4 + $0x98] sm:$0x1]  ;;  %v5881_v37 = vrot.slane %v5880_v29, 4 }
 0x388   : > { %v13810_v63 = vld [vmem:[%s18953_s3 + $0x150] sm:$0xff]   ;;  %v5847_v53 = vrot.slane %v5846_v3, 4  ;;  %v5856_v49 = vor.u32 %v5855_v60, %v5851_v22  ;;  %v5883_v31 = vshll.u32 %v5565_v39, 16  ;;  %v6060_v38 = vld [vmem:[#allocation4 + $0x94] sm:$0xf]  ;;  %v6202_v52 = vsel %vm14128_vm10, %v6200_v26, %v6201_v58 }
 0x389   : > { %v6061_v2 = vld [vmem:[#allocation4 + $0x98] sm:$0x1]  ;;  %v5861_v19 = vrot.slane %v5859_v61, 5  ;;  %v6205_v36 = vrot.slane %v6060_v38, 5  ;;  %13256 = vmatprep.subr.bf16.mxu1 %v13810_v63  ;;  %6286 = vst [vmem:[#allocation5 + $0x344] sm:$0xf] %v6202_v52 }
 0x38a   : > { %v6208_v32 = vrot.slane %v6061_v2, 5  ;;  %v5852_v29 = vsel %vm14230_vm14, %v5847_v53, %v5851_v22  ;;  %v5857_v0 = vrot.slane %v5856_v49, 4  ;;  %v5871_v18 = vrot.slane %v5870_v6, 4  ;;  %v13811_v45 = vld [vmem:[%s18953_s3 + $0x1d0] sm:$0xff]   ;;  %v13770_v3 = vld [vmem:[#allocation5 + $0x2d8] ss:$36 sps:$4 sm:$0xff]   ;;  %v13174_v49 = vpop.f32.mrf.mxu0 }
 0x38b   : > { %v5885_v57 = vrot.slane %v5883_v31, 5  ;;  %v13768_v8 = vld [vmem:[#allocation5 + $0x2dc] ss:$36 sps:$4 sm:$0xff]   ;;  %6013 = vst [vmem:[#allocation5 + $0x31c] sm:$0xf] %v5852_v29  ;;  %v6206_v26 = vsel %vm14128_vm10, %v12553_v41, %v6205_v36  ;;  %v6207_v60 = vrot.slane %v6205_v36, 4  ;;  %13368 = vmatprep.subr.bf16.mxu0 %v13811_v45 }
 0x38c   : > { %v6651_v22 = vshll.u32 %v17847_v1, 16  ;;  %v5862_v58 = vsel %vm14230_vm14, %v5857_v0, %v5861_v19  ;;  %v5876_v61 = vsel %vm14230_vm14, %v5871_v18, %v17831_v55  ;;  %6287 = vst [vmem:[#allocation5 + $0x368] sm:$0xf] %v6206_v26  ;;  %9712 = vmatprep.mubr.bf16.mxu0 %v13768_v8  ;;  %v13812_v55 = vld [vmem:[%s18953_s3 + $0x110] sm:$0xff]   ;;  %v7459_v63 = vrot.slane %v7457_v25, 4  ;;  %v13814_v6 = vld [vmem:[%s18953_s3 + $0x148] sm:$0xff]   ;;  %v13175_v50 = vpop.f32.mrf.mxu0 }
 0x38d   : > { %v5886_v39 = vsel %vm14230_vm14, %v5881_v37, %v5885_v57  ;;  %6014 = vst [vmem:[#allocation5 + $0x340] sm:$0xf] %v5862_v58  ;;  %6015 = vst [vmem:[#allocation5 + $0x364] sm:$0xf] %v5876_v61  ;;  %v6209_v41 = vsel %vm14128_vm10, %v6207_v60, %v6208_v32  ;;  %v13813_v37 = vld [vmem:[%s18953_s3 + $0x190] sm:$0xff]   ;;  %v7462_v9 = vrot.slane %v7460_v17, 5  ;;  %9713 = vmatmul.mubr.bf16.gmra.mxu0 %v13770_v3  ;;  %13257 = vmatpush3.bf16.msra.mxu1 %v13812_v55 }
 0x38e   : > { %6016 = vst [vmem:[#allocation5 + $0x388] sm:$0xf] %v5886_v39  ;;  %v17903_v53 = vrot.slane %v7494_v46, 4  ;;  %6288 = vst [vmem:[#allocation5 + $0x38c] sm:$0xf] %v6209_v41  ;;  %v13815_v31 = vld [vmem:[%s18953_s3 + $0x1c8] sm:$0xff]   ;;  %13369 = vmatpush3.bf16.msra.mxu0 %v13813_v37  ;;  %13258 = vmatprep.subr.bf16.mxu1 %v13814_v6  ;;  %v17936_v29 = vadd.f32 %v13175_v50, %v13174_v49  ;;  %v17942_v3 = vpop.f32.mrf.mxu0 }
 0x38f   : > { %v7483_v25 = vrot.slane %v7481_v12, 4  ;;  %v7486_v62 = vrot.slane %v7484_v4, 5  ;;  %v17917_v46 = vrot.slane %v7490_v30, 5  ;;  %v13816_v17 = vld [vmem:[%s18953_s3 + $0x108] sm:$0xff]   ;;  %v7146_v38 = vld [vmem:[#allocation4 + $0x84] sm:$0xf]  ;;  %v7463_v52 = vor.u32 %v7462_v9, %v7459_v63  ;;  %13370 = vmatprep.subr.bf16.mxu0 %v13815_v31 }
 0x390   : > { %v7147_v2 = vld [vmem:[#allocation4 + $0x88] sm:$0xf]  ;;  %v6650_v19 = vrot.slane %v6648_v13, 4  ;;  %v17924_v12 = vld [vmem:[#allocation4 + $0x84] sm:$0xe]  ;;  %v8071_v4 = vld [vmem:[#allocation5 + $0x320] sm:$0xff] }
 0x391   : > { %v13821_v30 = vld [vmem:[%s18953_s3 + $0x140] sm:$0xff]   ;;  %7178 = vst [vmem:[#allocation5 + $0x2a0] sm:$0xf] %v7146_v38  ;;  %7179 = vst [vmem:[#allocation5 + $0x2c4] sm:$0xf] %v7147_v2  ;;  %v7487_v36 = vor.u32 %v7486_v62, %v7483_v25  ;;  %v6653_v32 = vrot.slane %v6651_v22, 5  ;;  %13259 = vmatpush3.bf16.msra.mxu1 %v13816_v17  ;;  %v7497_v50 = vor.u32 %v17903_v53, %v17917_v46 }
 0x392   : > { %v6674_v1 = vrot.slane %v6672_v47, 4  ;;  %v6677_v13 = vrot.slane %v6675_v10, 5  ;;  %v8076_v0 = vld [vmem:[#allocation5 + $0x344] sm:$0xff]  ;;  %v13822_v57 = vld [vmem:[%s18953_s3 + $0x1c0] sm:$0xff]   ;;  %v7464_v45 = vrot.slane %v7463_v52, 4  ;;  %v6681_v8 = vshll.u32 %v17818_v27, 16  ;;  %v17949_v27 = vpop.f32.mrf.mxu0  ;;  %13371 = vmatpush3.bf16.msra.mxu0 %v13817_v42  ;;  %13260 = vmatprep.subr.bf16.mxu1 %v13821_v30 }
 0x393   : > { %v13771_v18 = vld [vmem:[#allocation5 + $0x324] ss:$36 sps:$4 sm:$0xff]   ;;  %v12691_v26 = vcombine.low %v8071_v4, %v8076_v0  ;;  %v13823_v47 = vld [vmem:[%s18953_s3 + $0x100] sm:$0xff]   ;;  %v7488_v60 = vrot.slane %v7487_v36, 4  ;;  %v6654_v22 = vor.u32 %v6653_v32, %v6650_v19  ;;  %v7148_v55 = vld [vmem:[#allocation4 + $0x90] sm:$0xf]  ;;  %13372 = vmatprep.subr.bf16.mxu0 %v13822_v57 }
 0x394   : > { %v7220_v35 = vld [vmem:[#allocation4 + $0x88] sm:$0xf]  ;;  %v7221_v10 = vld [vmem:[#allocation4 + $0x8c] sm:$0x1]  ;;  %v6678_v58 = vor.u32 %v6677_v13, %v6674_v1  ;;  %9720 = vmatprep.mubr.bf16.mxu0 %v13771_v18  ;;  %v17947_v37 = vrot.slane %v6681_v8, 5  ;;  %v12567_v6 = vrot.slane %v17924_v12, 9  ;;  %v13180_v38 = vpop.f32.mrf.mxu0 }
 0x395   : > { %v7466_v61 = vshll.u32 %v7220_v35, 16  ;;  %v7470_v39 = vshrl.u32 %v7220_v35, 16  ;;  %v7476_v41 = vshll.u32 %v7221_v10, 16  ;;  %v13773_v63 = vld [vmem:[#allocation5 + $0x31c] ss:$36 sps:$4 sm:$0xff]   ;;  %v7493_v49 = vsel %vm14230_vm14, %v7488_v60, %v17917_v46  ;;  %v13824_v31 = vld [vmem:[%s18953_s3 + $0x180] sm:$0xff]   ;;  %9721 = vmatmul.mubr.bf16.gmra.mxu0 %v12691_v26  ;;  %13261 = vmatpush3.bf16.msra.mxu1 %v13823_v47 }
 0x396   : > { %v13775_v9 = vld [vmem:[#allocation5 + $0x318] ss:$36 sps:$4 sm:$0xff]   ;;  %7180 = vst [vmem:[#allocation5 + $0x2e8] sm:$0xf] %v7148_v55  ;;  %7676 = vst [vmem:[#allocation5 + $0x2ec] sm:$0xf] %v7493_v49  ;;  %9559 = vmatprep.mubr.bf16.mxu1 %v13773_v63  ;;  %v6688_v1 = vor.u32 %v17887_v21, %v17947_v37  ;;  %v13181_v13 = vpop.f32.mrf.mxu0  ;;  %13373 = vmatpush3.bf16.msra.mxu0 %v13824_v31 }
 0x397   : > { %v7468_v25 = vrot.slane %v7466_v61, 5  ;;  %v7472_v62 = vrot.slane %v7470_v39, 4  ;;  %v6655_v17 = vrot.slane %v6654_v22, 4  ;;  %v13776_v2 = vld [vmem:[#allocation5 + $0x364] ss:$36 sps:$4 sm:$0xff]   ;;  %v7478_v52 = vrot.slane %v7476_v41, 5  ;;  %9560 = vmatmul.mubr.bf16.gmra.mxu1 %v13775_v9 }
 0x398   : > { %v7149_v19 = vld [vmem:[#allocation4 + $0x94] sm:$0xf]  ;;  %v6679_v4 = vrot.slane %v6678_v58, 4  ;;  %v7224_v30 = vld [vmem:[#allocation4 + $0x98] sm:$0x1]  ;;  %9567 = vmatprep.mubr.bf16.mxu1 %v13776_v2  ;;  %v17964_v26 = vadd.f32 %v13181_v13, %v13180_v38  ;;  %v7498_v22 = vrot.slane %v7497_v50, 4  ;;  %v13543_v13 = vpop.f32.mrf.mxu1 }
 0x399   : > { %v7469_v12 = vsel %vm14230_vm14, %v7464_v45, %v7468_v25  ;;  %v7473_v42 = vor.u32 %v7472_v62, %v7468_v25  ;;  %7181 = vst [vmem:[#allocation5 + $0x30c] sm:$0xf] %v7149_v19  ;;  %v6390_v36 = vld [vmem:[#allocation4 + $0x88] sm:$0xf]  ;;  %v6391_v32 = vld [vmem:[#allocation4 + $0x8c] sm:$0x1] }
 0x39a   : > { %7674 = vst [vmem:[#allocation5 + $0x2a4] sm:$0xf] %v7469_v12  ;;  %v7500_v0 = vshll.u32 %v7224_v30, 16  ;;  %v6657_v18 = vshll.u32 %v6390_v36, 16  ;;  %v6661_v53 = vshrl.u32 %v6390_v36, 16  ;;  %v6667_v46 = vshll.u32 %v6391_v32, 16 }
 0x39b   : > { %v6886_v57 = vld [vmem:[#allocation4 + $0x88] sm:$0xf]  ;;  %v6888_v8 = vld [vmem:[#allocation4 + $0x90] sm:$0xe]  ;;  %v7474_v45 = vrot.slane %v7473_v42, 4  ;;  %v6684_v21 = vsel %vm14230_vm14, %v6679_v4, %v17947_v37 }
 0x39c   : > { %v6887_v35 = vld [vmem:[#allocation4 + $0x8c] sm:$0x1]  ;;  %v7023_v10 = vrot.slane %v6886_v57, 5  ;;  %v6394_v60 = vld [vmem:[#allocation4 + $0x98] sm:$0x1]  ;;  %v7502_v47 = vrot.slane %v7500_v0, 5 }
 0x39d   : > { %v6659_v58 = vrot.slane %v6657_v18, 5  ;;  %v6663_v61 = vrot.slane %v6661_v53, 4  ;;  %6845 = vst [vmem:[#allocation5 + $0x328] sm:$0xf] %v6684_v21  ;;  %v6889_v39 = vld [vmem:[#allocation4 + $0x94] sm:$0xf]  ;;  %v7479_v55 = vsel %vm14230_vm14, %v7474_v45, %v7478_v52 }
 0x39e   : > { %v7718_v41 = vld [vmem:[#allocation4 + $0x90] sm:$0xe]  ;;  %v7024_v63 = vsel %vm14128_vm10, %v12567_v6, %v7023_v10  ;;  %v7025_v9 = vrot.slane %v7023_v10, 4  ;;  %v7026_v49 = vrot.slane %v6887_v35, 5  ;;  %v6890_v31 = vld [vmem:[#allocation4 + $0x98] sm:$0x1]  ;;  %v7503_v37 = vsel %vm14230_vm14, %v7498_v22, %v7502_v47  ;;  %v4563_v10 = vpop.f32.mrf.mxu1 }
 0x39f   : > { %v7717_v25 = vld [vmem:[#allocation4 + $0x8c] sm:$0x1]  ;;  %7675 = vst [vmem:[#allocation5 + $0x2c8] sm:$0xf] %v7479_v55  ;;  %v6660_v62 = vsel %vm14230_vm14, %v6655_v17, %v6659_v58  ;;  %v6664_v38 = vor.u32 %v6663_v61, %v6659_v58  ;;  %v6669_v2 = vrot.slane %v6667_v46, 5  ;;  %v6689_v52 = vrot.slane %v6688_v1, 4 }
 0x3a0   : > { %7115 = vst [vmem:[#allocation5 + $0x2e4] sm:$0xf] %v7024_v63  ;;  %v7719_v19 = vld [vmem:[#allocation4 + $0x94] sm:$0xf]  ;;  %v13780_v50 = vld [vmem:[#allocation5 + $0x360] ss:$36 sps:$4 sm:$0xff]   ;;  %v7027_v6 = vsel %vm14128_vm10, %v7025_v9, %v7026_v49  ;;  %v13544_v55 = vpop.f32.mrf.mxu1 }
 0x3a1   : > { %7677 = vst [vmem:[#allocation5 + $0x310] sm:$0xf] %v7503_v37  ;;  %6843 = vst [vmem:[#allocation5 + $0x2e0] sm:$0xf] %v6660_v62  ;;  %v6691_v4 = vshll.u32 %v6394_v60, 16  ;;  %v12568_v12 = vrot.slane %v6888_v8, 9  ;;  %9568 = vmatmul.mubr.bf16.gmra.mxu1 %v13780_v50 }
 0x3a2   : > { %v6665_v42 = vrot.slane %v6664_v38, 4  ;;  %7116 = vst [vmem:[#allocation5 + $0x308] sm:$0xf] %v7027_v6  ;;  %v7030_v30 = vrot.slane %v6889_v39, 5  ;;  %v7033_v36 = vrot.slane %v6890_v31, 5  ;;  %v7851_v17 = vrot.slane %v7849_v14, 4 }
 0x3a3   : > { %v7720_v32 = vld [vmem:[#allocation4 + $0x98] sm:$0x1]  ;;  %v6693_v0 = vrot.slane %v6691_v4, 5  ;;  %v7852_v18 = vrot.slane %v7717_v25, 5  ;;  %v12583_v53 = vrot.slane %v7718_v41, 9  ;;  %v7856_v46 = vrot.slane %v7719_v19, 5  ;;  %v4566_v25 = vpop.f32.mrf.mxu1 }
 0x3a4   : > { %v17984_v1 = vld [vmem:[%s18952_s2] ss:$0 sm:$0xff]  ;;  %v13836_v8 = vld [vmem:[%s18953_s3 + $0x238] sm:$0xff]   ;;  %v6670_v14 = vsel %vm14230_vm14, %v6665_v42, %v6669_v2  ;;  %v7031_v45 = vsel %vm14128_vm10, %v12568_v12, %v7030_v30  ;;  %v7032_v35 = vrot.slane %v7030_v30, 4  ;;  %v7859_v41 = vrot.slane %v7720_v32, 5 }
 0x3a5   : > { %v4572_v57 = vadd.f32 %v17984_v1, %v13543_v13  ;;  %v17993_v51 = vld [vmem:[%s18955_s5] sm:$0x3]  ;;  %6844 = vst [vmem:[#allocation5 + $0x304] sm:$0xf] %v6670_v14  ;;  %v6694_v60 = vsel %vm14230_vm14, %v6689_v52, %v6693_v0  ;;  %7117 = vst [vmem:[#allocation5 + $0x32c] sm:$0xf] %v7031_v45  ;;  %v7853_v21 = vsel %vm14128_vm10, %v7851_v17, %v7852_v18  ;;  %13549 = vmatprep.subr.bf16.mxu1 %v13836_v8 }
 0x3a6   : > { %13639 = vmatprep.subr.msk.bf16.mxu0 %vm19397_vm0, %v17993_v51  ;;  %v7857_v22 = vsel %vm14128_vm10, %v12583_v53, %v7856_v46  ;;  %v7858_v47 = vrot.slane %v7856_v46, 4  ;;  %v4564_v61 = vadd.f32 %v17984_v1, %v4563_v10  ;;  %6846 = vst [vmem:[#allocation5 + $0x34c] sm:$0xf] %v6694_v60  ;;  %v7034_v39 = vsel %vm14128_vm10, %v7032_v35, %v7033_v36  ;;  %v5138_v4 = vld [vmem:[#allocation4 + $0xa8] sm:$0xf] }
 0x3a7   : > { %v4620_v58 = vmax.f32 %v4572_v57, 0.0  ;;  %7947 = vst [vmem:[#allocation5 + $0x2cc] sm:$0xf] %v7853_v21  ;;  %7948 = vst [vmem:[#allocation5 + $0x2f0] sm:$0xf] %v7857_v22  ;;  %v4575_v49 = vadd.f32 %v17984_v1, %v13544_v55  ;;  %v4567_v2 = vadd.f32 %v17984_v1, %v4566_v25 }
 0x3a8   : > { %7118 = vst [vmem:[#allocation5 + $0x350] sm:$0xf] %v7034_v39  ;;  %v4618_v9 = vmax.f32 %v4564_v61, 0.0  ;;  %v7860_v31 = vsel %vm14128_vm10, %v7858_v47, %v7859_v41  ;;  %v5131_v32 = vld [vmem:[#allocation4 + $0x9c] sm:$0xf] }
 0x3a9   : > { %v12997_v63 = vpack.c.bf16 %v4620_v58, %v4620_v58  ;;  %7949 = vst [vmem:[#allocation5 + $0x314] sm:$0xf] %v7860_v31  ;;  %v4621_v38 = vmax.f32 %v4575_v49, 0.0  ;;  %v4619_v12 = vmax.f32 %v4567_v2, 0.0  ;;  %v5142_v57 = vld [vmem:[#allocation4 + $0xb0] sm:$0x1] }
 0x3aa   : > { %v12995_v62 = vpack.c.bf16 %v4618_v9, %v4618_v9  ;;  %v5135_v58 = vld [vmem:[#allocation4 + $0xa4] sm:$0x1] }
 0x3ab   : > { %v4944_v37 = vshrl.u32 %v12997_v63, 16  ;;  %v4947_v50 = vshll.u32 %v12997_v63, 16  ;;  %v12998_v52 = vpack.c.bf16 %v4621_v38, %v4621_v38  ;;  %v12996_v13 = vpack.c.bf16 %v4619_v12, %v4619_v12 }
 0x3ac   : > { %v4927_v6 = vshrl.u32 %v12995_v62, 16  ;;  %v4930_v36 = vshll.u32 %v12995_v62, 16 }
 0x3ad   : > { %v4946_v19 = vrot.slane %v4944_v37, 7  ;;  %v4952_v17 = vshrl.u32 %v12998_v52, 16  ;;  %v4955_v46 = vshll.u32 %v12998_v52, 16  ;;  %v4935_v8 = vshrl.u32 %v12996_v13, 16 }
 0x3ae   : > { %v4929_v30 = vrot.slane %v4927_v6, 7  ;;  %v4938_v21 = vshll.u32 %v12996_v13, 16 }
 0x3af   : > { %v4949_v42 = vor.u32 %v4947_v50, %v4946_v19  ;;  %v4954_v53 = vrot.slane %v4952_v17, 7  ;;  %v4950_v14 = vrot.slane %v4946_v19, 4  ;;  %v4937_v60 = vrot.slane %v4935_v8, 7 }
 0x3b0   : > { %v4932_v18 = vor.u32 %v4930_v36, %v4929_v30  ;;  %v4933_v61 = vrot.slane %v4929_v30, 4 }
 0x3b1   : > { %v5139_v0 = vsel %vm16388_vm4, %v4949_v42, %v5138_v4  ;;  %v4957_v35 = vor.u32 %v4955_v46, %v4954_v53  ;;  %v4959_v10 = vrot.slane %v4954_v53, 4  ;;  %v4940_v39 = vor.u32 %v4938_v21, %v4937_v60 }
 0x3b2   : > { %5140 = vst [vmem:[#allocation4 + $0xa8] sm:$0xf] %v5139_v0  ;;  %v5132_v45 = vsel %vm16388_vm4, %v4932_v18, %v5131_v32  ;;  %v4942_v41 = vrot.slane %v4937_v60, 4 }
 0x3b3   : > { %5133 = vst [vmem:[#allocation4 + $0x9c] sm:$0xf] %v5132_v45  ;;  %v4958_v22 = vsel %vm14070_vm5, %v4950_v14, %v4957_v35  ;;  %v5143_v47 = vsel %vm16416_vm11, %v4959_v10, %v5142_v57  ;;  %v4941_v55 = vsel %vm14070_vm5, %v4933_v61, %v4940_v39 }
 0x3b4   : > { %5141 = vst [vmem:[#allocation4 + $0xac] sm:$0xf] %v4958_v22  ;;  %5144 = vst [vmem:[#allocation4 + $0xb0] sm:$0x1] %v5143_v47  ;;  %v5136_v63 = vsel %vm16416_vm11, %v4942_v41, %v5135_v58 }
 0x3b5   : > { %5134 = vst [vmem:[#allocation4 + $0xa0] sm:$0xf] %v4941_v55  ;;  %5137 = vst [vmem:[#allocation4 + $0xa4] sm:$0x1] %v5136_v63 }
 0x3b9   : > { %v5188_v9 = vld [vmem:[#allocation4 + $0xa8] sm:$0x2]  ;;  %v5306_v25 = vld [vmem:[#allocation4 + $0xa8] sm:$0x1] }
 0x3ba   : > { %v18026_v49 = vld [vmem:[#allocation4 + $0xa8] sm:$0xe]  ;;  %v12519_v31 = vrot.slane %v5188_v9, 9  ;;  %v5187_v37 = vld [vmem:[#allocation4 + $0x9c] sm:$0x2] }
 0x3bb   : > { %v5303_v62 = vld [vmem:[#allocation4 + $0x9c] sm:$0x1]  ;;  %v12518_v2 = vrot.slane %v5187_v37, 9  ;;  %v7721_v19 = vld [vmem:[#allocation4 + $0x9c] sm:$0xe]  ;;  %v12555_v6 = vrot.slane %v18026_v49, 9 }
 0x3bc   : > { %v5307_v38 = vsel %vm16416_vm11, %v12519_v31, %v5306_v25  ;;  %v6062_v50 = vld [vmem:[#allocation4 + $0x9c] sm:$0xe]  ;;  %v5332_v52 = vld [vmem:[#allocation4 + $0xac] sm:$0x8]  ;;  %v5451_v4 = vld [vmem:[#allocation4 + $0xb0] sm:$0x1] }
 0x3bd   : > { %5308 = vst [vmem:[#allocation4 + $0xa8] sm:$0x1] %v5307_v38  ;;  %v5570_v12 = vld [vmem:[#allocation4 + $0xac] sm:$0xf]  ;;  %v5304_v42 = vsel %vm16416_vm11, %v12518_v2, %v5303_v62  ;;  %v12537_v30 = vrot.slane %v5332_v52, 11  ;;  %v12584_v13 = vrot.slane %v7721_v19, 9 }
 0x3be   : > { %v5925_v36 = vshrl.u32 %v5570_v12, 16  ;;  %v18033_v17 = vld [vmem:[#allocation4 + $0xac] sm:$0xf]  ;;  %5305 = vst [vmem:[#allocation4 + $0x9c] sm:$0x1] %v5304_v42  ;;  %v5921_v46 = vshll.u32 %v5570_v12, 16 }
 0x3bf   : > { %v7229_v32 = vld [vmem:[#allocation4 + $0xac] sm:$0xf]  ;;  %v6733_v0 = vshrl.u32 %v18033_v17, 16  ;;  %v5452_v57 = vsel %vm16481_vm9, %v12537_v30, %v5451_v4  ;;  %v5331_v14 = vld [vmem:[#allocation4 + $0xa0] sm:$0x8]  ;;  %v12554_v45 = vrot.slane %v6062_v50, 9 }
 0x3c0   : > { %v7542_v18 = vshrl.u32 %v7229_v32, 16  ;;  %v6322_v53 = vld [vmem:[#allocation4 + $0xac] sm:$0xf]  ;;  %v18038_v8 = vrot.slane %v5925_v36, 4  ;;  %v7538_v35 = vshll.u32 %v7229_v32, 16  ;;  %v12536_v60 = vrot.slane %v5331_v14, 11 }
 0x3c1   : > { %6354 = vst [vmem:[#allocation5 + $0x3d8] sm:$0xf] %v6322_v53  ;;  %5453 = vst [vmem:[#allocation4 + $0xb0] sm:$0x1] %v5452_v57  ;;  %v18040_v10 = vrot.slane %v6733_v0, 4  ;;  %v18045_v39 = vrot.slane %v5921_v46, 5 }
 0x3c2   : > { %v5448_v21 = vld [vmem:[#allocation4 + $0xa4] sm:$0x1]  ;;  %v18042_v22 = vld [vmem:[#allocation4 + $0xa0] sm:$0xf]  ;;  %v18047_v41 = vrot.slane %v7542_v18, 4  ;;  %v18051_v31 = vrot.slane %v7538_v35, 5 }
 0x3c3   : > { %v19036_v47 = vrot.slane %v18042_v22, 5  ;;  %v6320_v58 = vld [vmem:[#allocation4 + $0xa0] sm:$0xf]  ;;  %v5449_v55 = vsel %vm16481_vm9, %v12536_v60, %v5448_v21  ;;  %v5928_v32 = vor.u32 %v18038_v8, %v18045_v39 }
 0x3c4   : > { %v6063_v61 = vld [vmem:[#allocation4 + $0xa0] sm:$0xf]  ;;  %6352 = vst [vmem:[#allocation5 + $0x390] sm:$0xf] %v6320_v58  ;;  %v5569_v25 = vld [vmem:[#allocation4 + $0xa8] sm:$0xf] }
 0x3c5   : > { %v6212_v63 = vrot.slane %v6063_v61, 5  ;;  %v5490_v9 = vld [vmem:[#allocation4 + $0xa0] sm:$0xf]  ;;  %v18053_v37 = vld [vmem:[#allocation4 + $0xa8] sm:$0xf]  ;;  %v7864_v38 = vsel %vm14128_vm10, %v12584_v13, %v19036_v47  ;;  %v5912_v2 = vshrl.u32 %v5569_v25, 16 }
 0x3c6   : > { %v18055_v62 = vld [vmem:[#allocation4 + $0xa8] sm:$0xf]  ;;  %5450 = vst [vmem:[#allocation4 + $0xa4] sm:$0x1] %v5449_v55  ;;  %5522 = vst [vmem:[#allocation5 + $0x3cc] sm:$0xf] %v5490_v9 }
 0x3c7   : > { %v5915_v19 = vshll.u32 %v5569_v25, 16  ;;  %v6321_v50 = vld [vmem:[#allocation4 + $0xa8] sm:$0xf]  ;;  %v5567_v52 = vld [vmem:[#allocation4 + $0xa0] sm:$0xf]  ;;  %v6213_v36 = vsel %vm14128_vm10, %v12554_v45, %v6212_v63  ;;  %v5914_v55 = vrot.slane %v5912_v2, 4 }
 0x3c8   : > { %7950 = vst [vmem:[#allocation5 + $0x338] sm:$0xf] %v7864_v38  ;;  %v5566_v42 = vld [vmem:[#allocation4 + $0x9c] sm:$0xf]  ;;  %6353 = vst [vmem:[#allocation5 + $0x3b4] sm:$0xf] %v6321_v50 }
 0x3c9   : > { %v18063_v30 = vld [vmem:[#allocation4 + $0x9c] sm:$0xf]  ;;  %v5888_v18 = vshrl.u32 %v5566_v42, 16  ;;  %v5891_v53 = vshll.u32 %v5566_v42, 16  ;;  %6289 = vst [vmem:[#allocation5 + $0x3b0] sm:$0xf] %v6213_v36 }
 0x3ca   : > { %v18071_v46 = vld [vmem:[#allocation4 + $0x9c] sm:$0xf]  ;;  %v5897_v60 = vshll.u32 %v5567_v52, 16  ;;  %v5901_v61 = vshrl.u32 %v5567_v52, 16  ;;  %v5491_v25 = vld [vmem:[#allocation4 + $0xa8] sm:$0xf] }
 0x3cb   : > { %v7505_v14 = vshrl.u32 %v18071_v46, 16  ;;  %v6319_v45 = vld [vmem:[#allocation4 + $0x9c] sm:$0xf]  ;;  %v5890_v8 = vrot.slane %v5888_v18, 4  ;;  %v5893_v58 = vrot.slane %v5891_v53, 5  ;;  %v5917_v12 = vrot.slane %v5915_v19, 5  ;;  %v18076_v18 = vpop.f32.mrf.mxu0 }
 0x3cc   : > { %6351 = vst [vmem:[#allocation5 + $0x36c] sm:$0xf] %v6319_v45  ;;  %v5489_v21 = vld [vmem:[#allocation4 + $0x9c] sm:$0xf]  ;;  %v5899_v9 = vrot.slane %v5897_v60, 5  ;;  %v5903_v47 = vrot.slane %v5901_v61, 4 }
 0x3cd   : > { %5521 = vst [vmem:[#allocation5 + $0x3a8] sm:$0xf] %v5489_v21  ;;  %v5492_v38 = vld [vmem:[#allocation4 + $0xac] sm:$0xf]  ;;  %v6064_v50 = vld [vmem:[#allocation4 + $0xa4] sm:$0x1]  ;;  %v5894_v36 = vor.u32 %v5893_v58, %v5890_v8  ;;  %v5918_v53 = vor.u32 %v5917_v12, %v5914_v55 }
 0x3ce   : > { %v5568_v42 = vld [vmem:[#allocation4 + $0xa4] sm:$0x1]  ;;  %5523 = vst [vmem:[#allocation5 + $0x3f0] sm:$0xf] %v5491_v25  ;;  %5524 = vst [vmem:[#allocation5 + $0x414] sm:$0xf] %v5492_v38  ;;  %v5904_v2 = vor.u32 %v5903_v47, %v5899_v9 }
 0x3cf   : > { %v6214_v4 = vrot.slane %v6212_v63, 4  ;;  %v6215_v57 = vrot.slane %v6064_v50, 5  ;;  %v5907_v0 = vshll.u32 %v5568_v42, 16  ;;  %v5571_v45 = vld [vmem:[#allocation4 + $0xb0] sm:$0x1]  ;;  %v5929_v13 = vrot.slane %v5928_v32, 4 }
 0x3d0   : > { %v5895_v52 = vrot.slane %v5894_v36, 4  ;;  %v5931_v60 = vshll.u32 %v5571_v45, 16  ;;  %v6066_v21 = vld [vmem:[#allocation4 + $0xac] sm:$0xf]  ;;  %v6067_v35 = vld [vmem:[#allocation4 + $0xb0] sm:$0x1] }
 0x3d1   : > { %v6216_v8 = vsel %vm14128_vm10, %v6214_v4, %v6215_v57  ;;  %v5909_v58 = vrot.slane %v5907_v0, 5  ;;  %v6219_v61 = vrot.slane %v6066_v21, 5  ;;  %v6222_v25 = vrot.slane %v6067_v35, 5  ;;  %v7150_v19 = vld [vmem:[#allocation4 + $0x9c] sm:$0xf]  ;;  %v18088_v35 = vpop.f32.mrf.mxu0 }
 0x3d2   : > { %6290 = vst [vmem:[#allocation5 + $0x3d4] sm:$0xf] %v6216_v8  ;;  %v5900_v63 = vsel %vm14230_vm14, %v5895_v52, %v5899_v9  ;;  %v5905_v32 = vrot.slane %v5904_v2, 4  ;;  %v5919_v38 = vrot.slane %v5918_v53, 4  ;;  %v5933_v50 = vrot.slane %v5931_v60, 5 }
 0x3d3   : > { %v7151_v42 = vld [vmem:[#allocation4 + $0xa0] sm:$0xf]  ;;  %7182 = vst [vmem:[#allocation5 + $0x330] sm:$0xf] %v7150_v19  ;;  %v13791_v47 = vld [vmem:[#allocation5 + $0x36c] ss:$36 sps:$4 sm:$0xff]   ;;  %v6220_v4 = vsel %vm14128_vm10, %v12555_v6, %v6219_v61  ;;  %v7545_v57 = vor.u32 %v18047_v41, %v18051_v31 }
 0x3d4   : > { %v13793_v12 = vld [vmem:[#allocation5 + $0x368] ss:$36 sps:$4 sm:$0xff]   ;;  %6017 = vst [vmem:[#allocation5 + $0x3ac] sm:$0xf] %v5900_v63  ;;  %v6221_v0 = vrot.slane %v6219_v61, 4  ;;  %v5910_v55 = vsel %vm14230_vm14, %v5905_v32, %v5909_v58  ;;  %v5924_v9 = vsel %vm14230_vm14, %v5919_v38, %v18045_v39  ;;  %v5934_v49 = vsel %vm14230_vm14, %v5929_v13, %v5933_v50  ;;  %9728 = vmatprep.mubr.bf16.mxu0 %v13791_v47  ;;  %v13186_v13 = vpop.f32.mrf.mxu0 }
 0x3d5   : > { %7183 = vst [vmem:[#allocation5 + $0x354] sm:$0xf] %v7151_v42  ;;  %6291 = vst [vmem:[#allocation5 + $0x3f8] sm:$0xf] %v6220_v4  ;;  %v7226_v36 = vld [vmem:[#allocation4 + $0xa0] sm:$0xf]  ;;  %9729 = vmatmul.mubr.bf16.gmra.mxu0 %v13793_v12 }
 0x3d6   : > { %v7227_v6 = vld [vmem:[#allocation4 + $0xa4] sm:$0x1]  ;;  %v7507_v45 = vrot.slane %v7505_v14, 4  ;;  %6018 = vst [vmem:[#allocation5 + $0x3d0] sm:$0xf] %v5910_v55  ;;  %v6223_v41 = vsel %vm14128_vm10, %v6221_v0, %v6222_v25  ;;  %v19398_v52 = vshll.u32 %v18071_v46, 16  ;;  %v13187_v32 = vpop.f32.mrf.mxu0 }
 0x3d7   : > { %6019 = vst [vmem:[#allocation5 + $0x3f4] sm:$0xf] %v5924_v9  ;;  %6020 = vst [vmem:[#allocation5 + $0x418] sm:$0xf] %v5934_v49  ;;  %v7514_v53 = vshll.u32 %v7226_v36, 16  ;;  %v7518_v60 = vshrl.u32 %v7226_v36, 16  ;;  %v18106_v55 = vadd.f32 %v13187_v32, %v13186_v13 }
 0x3d8   : > { %v7510_v2 = vrot.slane %v19398_v52, 5  ;;  %v7152_v39 = vld [vmem:[#allocation4 + $0xa8] sm:$0xf]  ;;  %v6699_v21 = vshll.u32 %v18063_v30, 16  ;;  %6292 = vst [vmem:[#allocation5 + $0x41c] sm:$0xf] %v6223_v41 }
 0x3d9   : > { %v7524_v8 = vshll.u32 %v7227_v6, 16  ;;  %v7153_v14 = vld [vmem:[#allocation4 + $0xac] sm:$0xf]  ;;  %7184 = vst [vmem:[#allocation5 + $0x378] sm:$0xf] %v7152_v39  ;;  %v7516_v19 = vrot.slane %v7514_v53, 5  ;;  %v18110_v53 = vpop.f32.mrf.mxu0 }
 0x3da   : > { %v7230_v58 = vld [vmem:[#allocation4 + $0xb0] sm:$0x1]  ;;  %v7511_v61 = vor.u32 %v7510_v2, %v7507_v45  ;;  %v7520_v63 = vrot.slane %v7518_v60, 4  ;;  %7185 = vst [vmem:[#allocation5 + $0x39c] sm:$0xf] %v7153_v14  ;;  %v19399_v25 = vshrl.u32 %v18055_v62, 16 }
 0x3db   : > { %v7526_v38 = vrot.slane %v7524_v8, 5  ;;  %v19400_v50 = vshll.u32 %v18055_v62, 16  ;;  %v7546_v47 = vrot.slane %v7545_v57, 4  ;;  %v7548_v4 = vshll.u32 %v7230_v58, 16  ;;  %v6396_v12 = vld [vmem:[#allocation4 + $0xa0] sm:$0xf] }
 0x3dc   : > { %v7531_v46 = vrot.slane %v19399_v25, 4  ;;  %v6891_v0 = vld [vmem:[#allocation4 + $0x9c] sm:$0xe]  ;;  %v8091_v9 = vld [vmem:[#allocation5 + $0x3b0] sm:$0xff]  ;;  %v7512_v6 = vrot.slane %v7511_v61, 4  ;;  %v7521_v45 = vor.u32 %v7520_v63, %v7516_v19  ;;  %v19401_v52 = vshrl.u32 %v18063_v30, 16  ;;  %v18114_v63 = vpop.f32.mrf.mxu0 }
 0x3dd   : > { %v7534_v42 = vrot.slane %v19400_v50, 5  ;;  %v8096_v49 = vld [vmem:[#allocation5 + $0x3d4] sm:$0xff]  ;;  %v6397_v41 = vld [vmem:[#allocation4 + $0xa4] sm:$0x1]  ;;  %v7550_v39 = vrot.slane %v7548_v4, 5  ;;  %v6701_v57 = vrot.slane %v6699_v21, 5 }
 0x3de   : > { %v13798_v36 = vld [vmem:[#allocation5 + $0x3b4] ss:$36 sps:$4 sm:$0xff]   ;;  %v6698_v2 = vrot.slane %v19401_v52, 4  ;;  %v12709_v60 = vcombine.low %v8091_v9, %v8096_v49  ;;  %v6892_v8 = vld [vmem:[#allocation4 + $0xa0] sm:$0xf]  ;;  %v7517_v13 = vsel %vm14230_vm14, %v7512_v6, %v7516_v19  ;;  %v7522_v14 = vrot.slane %v7521_v45, 4 }
 0x3df   : > { %v7535_v62 = vor.u32 %v7534_v42, %v7531_v46  ;;  %9736 = vmatprep.mubr.bf16.mxu0 %v13798_v36  ;;  %v6705_v58 = vshll.u32 %v6396_v12, 16  ;;  %v6709_v25 = vshrl.u32 %v6396_v12, 16  ;;  %v6893_v61 = vld [vmem:[#allocation4 + $0xa4] sm:$0x1]  ;;  %7678 = vst [vmem:[#allocation5 + $0x334] sm:$0xf] %v7517_v13  ;;  %v7551_v46 = vsel %vm14230_vm14, %v7546_v47, %v7550_v39  ;;  %v13192_v12 = vpop.f32.mrf.mxu0 }
 0x3e0   : > { %v13800_v32 = vld [vmem:[#allocation5 + $0x3ac] ss:$36 sps:$4 sm:$0xff]   ;;  %v6702_v42 = vor.u32 %v6701_v57, %v6698_v2  ;;  %v7527_v21 = vsel %vm14230_vm14, %v7522_v14, %v7526_v38  ;;  %7681 = vst [vmem:[#allocation5 + $0x3a0] sm:$0xf] %v7551_v46  ;;  %v12569_v9 = vrot.slane %v6891_v0, 9  ;;  %9737 = vmatmul.mubr.bf16.gmra.mxu0 %v12709_v60  ;;  %v6715_v47 = vshll.u32 %v6397_v41, 16 }
 0x3e1   : > { %v13802_v30 = vld [vmem:[#allocation5 + $0x3a8] ss:$36 sps:$4 sm:$0xff]   ;;  %v7536_v50 = vrot.slane %v7535_v62, 4  ;;  %v6707_v4 = vrot.slane %v6705_v58, 5  ;;  %v6711_v19 = vrot.slane %v6709_v25, 4  ;;  %9575 = vmatprep.mubr.bf16.mxu1 %v13800_v32  ;;  %v7037_v52 = vrot.slane %v6892_v8, 5  ;;  %v13193_v13 = vpop.f32.mrf.mxu0 }
 0x3e2   : > { %v6894_v49 = vld [vmem:[#allocation4 + $0xa8] sm:$0xe]  ;;  %v13803_v36 = vld [vmem:[#allocation5 + $0x3f4] ss:$36 sps:$4 sm:$0xff]   ;;  %7679 = vst [vmem:[#allocation5 + $0x358] sm:$0xf] %v7527_v21  ;;  %9576 = vmatmul.mubr.bf16.gmra.mxu1 %v13802_v30 }
 0x3e3   : > { %v7541_v6 = vsel %vm14230_vm14, %v7536_v50, %v18051_v31  ;;  %v6703_v45 = vrot.slane %v6702_v42, 4  ;;  %v6712_v38 = vor.u32 %v6711_v19, %v6707_v4  ;;  %v7040_v2 = vrot.slane %v6893_v61, 5  ;;  %v6400_v62 = vld [vmem:[#allocation4 + $0xb0] sm:$0x1]  ;;  %9583 = vmatprep.mubr.bf16.mxu1 %v13803_v36  ;;  %v6895_v58 = vld [vmem:[#allocation4 + $0xac] sm:$0xf] }
 0x3e4   : > { %7680 = vst [vmem:[#allocation5 + $0x37c] sm:$0xf] %v7541_v6  ;;  %v19402_v0 = vshrl.u32 %v18053_v37, 16  ;;  %v19403_v57 = vshll.u32 %v18053_v37, 16  ;;  %v6717_v31 = vrot.slane %v6715_v47, 5  ;;  %v7038_v41 = vsel %vm14128_vm10, %v12569_v9, %v7037_v52 }
 0x3e5   : > { %v6708_v14 = vsel %vm14230_vm14, %v6703_v45, %v6707_v4  ;;  %v7039_v8 = vrot.slane %v7037_v52, 4  ;;  %v6896_v25 = vld [vmem:[#allocation4 + $0xb0] sm:$0x1]  ;;  %v18131_v61 = vadd.f32 %v13193_v13, %v13192_v12  ;;  %v6713_v32 = vrot.slane %v6712_v38, 4  ;;  %7119 = vst [vmem:[#allocation5 + $0x374] sm:$0xf] %v7038_v41 }
 0x3e6   : > { %v6722_v39 = vrot.slane %v19402_v0, 4  ;;  %v6725_v60 = vrot.slane %v19403_v57, 5  ;;  %6847 = vst [vmem:[#allocation5 + $0x370] sm:$0xf] %v6708_v14  ;;  %v6729_v37 = vshll.u32 %v18033_v17, 16  ;;  %v6739_v42 = vshll.u32 %v6400_v62, 16  ;;  %v13547_v14 = vpop.f32.mrf.mxu1 }
 0x3e7   : > { %v7724_v50 = vld [vmem:[#allocation4 + $0xa8] sm:$0xe]  ;;  %v7041_v46 = vsel %vm14128_vm10, %v7039_v8, %v7040_v2  ;;  %v12570_v21 = vrot.slane %v6894_v49, 9  ;;  %v7044_v4 = vrot.slane %v6895_v58, 5  ;;  %v7723_v19 = vld [vmem:[#allocation4 + $0xa4] sm:$0x1]  ;;  %v6718_v9 = vsel %vm14230_vm14, %v6713_v32, %v6717_v31 }
 0x3e8   : > { %v6726_v30 = vor.u32 %v6725_v60, %v6722_v39  ;;  %7120 = vst [vmem:[#allocation5 + $0x398] sm:$0xf] %v7041_v46  ;;  %v6731_v36 = vrot.slane %v6729_v37, 5  ;;  %v7047_v6 = vrot.slane %v6896_v25, 5  ;;  %v7725_v45 = vld [vmem:[#allocation4 + $0xac] sm:$0xf] }
 0x3e9   : > { %6848 = vst [vmem:[#allocation5 + $0x394] sm:$0xf] %v6718_v9  ;;  %v6741_v47 = vrot.slane %v6739_v42, 5  ;;  %v7045_v17 = vsel %vm14128_vm10, %v12570_v21, %v7044_v4  ;;  %v7046_v52 = vrot.slane %v7044_v4, 4  ;;  %v7726_v38 = vld [vmem:[#allocation4 + $0xb0] sm:$0x1] }
 0x3ea   : > { %v6727_v12 = vrot.slane %v6726_v30, 4  ;;  %v13807_v2 = vld [vmem:[#allocation5 + $0x3f0] ss:$36 sps:$4 sm:$0xff]   ;;  %v6736_v62 = vor.u32 %v18040_v10, %v6731_v36  ;;  %7121 = vst [vmem:[#allocation5 + $0x3bc] sm:$0xf] %v7045_v17  ;;  %v19404_v0 = vrot.slane %v18042_v22, 5  ;;  %v4588_v10 = vadd.f32 %v17984_v1, %v13547_v14  ;;  %v4579_v22 = vpop.f32.mrf.mxu1 }
 0x3eb   : > { %v7866_v57 = vrot.slane %v7723_v19, 5  ;;  %v7048_v60 = vsel %vm14128_vm10, %v7046_v52, %v7047_v6  ;;  %v12585_v13 = vrot.slane %v7724_v50, 9  ;;  %9584 = vmatmul.mubr.bf16.gmra.mxu1 %v13807_v2  ;;  %v7870_v8 = vrot.slane %v7725_v45, 5 }
 0x3ec   : > { %v6732_v49 = vsel %vm14230_vm14, %v6727_v12, %v6731_v36  ;;  %v7865_v39 = vrot.slane %v19404_v0, 4  ;;  %v6737_v31 = vrot.slane %v6736_v62, 4  ;;  %7122 = vst [vmem:[#allocation5 + $0x3e0] sm:$0xf] %v7048_v60  ;;  %v7873_v58 = vrot.slane %v7726_v38, 5  ;;  %v13548_v46 = vpop.f32.mrf.mxu1 }
 0x3ed   : > { %6849 = vst [vmem:[#allocation5 + $0x3b8] sm:$0xf] %v6732_v49  ;;  %v7871_v32 = vsel %vm14128_vm10, %v12585_v13, %v7870_v8  ;;  %v7872_v30 = vrot.slane %v7870_v8, 4  ;;  %v4624_v37 = vmax.f32 %v4588_v10, 0.0  ;;  %v4580_v50 = vadd.f32 %v17984_v1, %v4579_v22  ;;  %v5152_v49 = vld [vmem:[#allocation4 + $0xc0] sm:$0xf] }
 0x3ee   : > { %v7867_v41 = vsel %vm14128_vm10, %v7865_v39, %v7866_v57  ;;  %v6742_v25 = vsel %vm14230_vm14, %v6737_v31, %v6741_v47  ;;  %7952 = vst [vmem:[#allocation5 + $0x380] sm:$0xf] %v7871_v32  ;;  %v4591_v19 = vadd.f32 %v17984_v1, %v13548_v46  ;;  %v4582_v9 = vpop.f32.mrf.mxu1  ;;  %v18162_v0 = vld [vmem:[%s18954_s4] ss:$0 sm:$0xff]  ;;  %v5145_v31 = vld [vmem:[#allocation4 + $0xb4] sm:$0xf] }
 0x3ef   : > { %7951 = vst [vmem:[#allocation5 + $0x35c] sm:$0xf] %v7867_v41  ;;  %6850 = vst [vmem:[#allocation5 + $0x3dc] sm:$0xf] %v6742_v25  ;;  %v7874_v42 = vsel %vm14128_vm10, %v7872_v30, %v7873_v58  ;;  %v13001_v21 = vpack.c.bf16 %v4624_v37, %v4624_v37  ;;  %v4622_v4 = vmax.f32 %v4580_v50, 0.0  ;;  %v4583_v45 = vadd.f32 %v17984_v1, %v4582_v9 }
 0x3f0   : > { %7953 = vst [vmem:[#allocation5 + $0x3a4] sm:$0xf] %v7874_v42  ;;  %v4625_v6 = vmax.f32 %v4591_v19, 0.0  ;;  %v13038_v47 = vpop.f32.mrf.mxu1  ;;  %v5167_v41 = vld [vmem:[#allocation4 + $0xcc] sm:$0xf] }
 0x3f1   : > { %v4978_v12 = vshrl.u32 %v13001_v21, 16  ;;  %v12999_v36 = vpack.c.bf16 %v4622_v4, %v4622_v4  ;;  %v4981_v52 = vshll.u32 %v13001_v21, 16  ;;  %v4623_v62 = vmax.f32 %v4583_v45, 0.0  ;;  %v5156_v37 = vld [vmem:[#allocation4 + $0xc8] sm:$0x1] }
 0x3f2   : > { %v13002_v2 = vpack.c.bf16 %v4625_v6, %v4625_v6  ;;  %v13039_v39 = vpop.f32.mrf.mxu1 }
 0x3f3   : > { %v4980_v17 = vrot.slane %v4978_v12, 7  ;;  %v4961_v38 = vshrl.u32 %v12999_v36, 16  ;;  %v4964_v13 = vshll.u32 %v12999_v36, 16  ;;  %v13000_v1 = vpack.c.bf16 %v4623_v62, %v4623_v62 }
 0x3f4   : > { %v4986_v14 = vshrl.u32 %v13002_v2, 16  ;;  %v13040_v8 = vadd.f32 %v13039_v39, %v13038_v47  ;;  %v13041_v58 = vpop.f32.mrf.mxu1  ;;  %v4989_v32 = vshll.u32 %v13002_v2, 16  ;;  %v5171_v2 = vld [vmem:[#allocation4 + $0xd4] sm:$0x1] }
 0x3f5   : > { %v4983_v57 = vor.u32 %v4981_v52, %v4980_v17  ;;  %v4963_v60 = vrot.slane %v4961_v38, 7  ;;  %v4984_v30 = vrot.slane %v4980_v17, 4  ;;  %v4969_v50 = vshrl.u32 %v13000_v1, 16  ;;  %v5149_v38 = vld [vmem:[#allocation4 + $0xbc] sm:$0x1] }
 0x3f6   : > { %v4988_v25 = vrot.slane %v4986_v14, 7  ;;  %v9474_v46 = vadd.f32 %v13040_v8, %v18162_v0  ;;  %v13042_v42 = vpop.f32.mrf.mxu1  ;;  %v4972_v36 = vshll.u32 %v13000_v1, 16  ;;  %v13155_v17 = vadd.f32 %v17538_v28, %v17531_v7 }
 0x3f7   : > { %v5153_v10 = vsel %vm16388_vm4, %v4983_v57, %v5152_v49  ;;  %v4966_v22 = vor.u32 %v4964_v13, %v4963_v60  ;;  %v4971_v12 = vrot.slane %v4969_v50, 7  ;;  %v13043_v6 = vadd.f32 %v13042_v42, %v13041_v58 }
 0x3f8   : > { %5154 = vst [vmem:[#allocation4 + $0xc0] sm:$0xf] %v5153_v10  ;;  %v4991_v19 = vor.u32 %v4989_v32, %v4988_v25  ;;  %v4993_v9 = vrot.slane %v4988_v25, 4  ;;  %v13044_v45 = vpop.f32.mrf.mxu1  ;;  %v18172_v47 = vadd.f32 %v17526_v59, %v9474_v46  ;;  %v4967_v49 = vrot.slane %v4963_v60, 4 }
 0x3f9   : > { %v5146_v21 = vsel %vm16388_vm4, %v4966_v22, %v5145_v31  ;;  %v5168_v4 = vsel %vm16388_vm4, %v4966_v22, %v5167_v41  ;;  %v4974_v62 = vor.u32 %v4972_v36, %v4971_v12  ;;  %v4976_v39 = vrot.slane %v4971_v12, 4 }
 0x3fa   : > { %5147 = vst [vmem:[#allocation4 + $0xb4] sm:$0xf] %v5146_v21  ;;  %5169 = vst [vmem:[#allocation4 + $0xcc] sm:$0xf] %v5168_v4  ;;  %v4992_v52 = vsel %vm14070_vm5, %v4984_v30, %v4991_v19  ;;  %v5157_v54 = vsel %vm16416_vm11, %v4993_v9, %v5156_v37  ;;  %v9477_v57 = vadd.f32 %v13043_v6, %v18162_v0  ;;  %v13045_v59 = vpop.f32.mrf.mxu1  ;;  %v18194_v30 = vsel %vm19405_vm3, %v17993_v51, 0  ;;  %v18287_v37 = vpop.f32.mrf.mxu0 }
 0x3fb   : > { %5155 = vst [vmem:[#allocation4 + $0xc4] sm:$0xf] %v4992_v52  ;;  %5158 = vst [vmem:[#allocation4 + $0xc8] sm:$0x1] %v5157_v54  ;;  %v13046_v13 = vadd.f32 %v13045_v59, %v13044_v45  ;;  %v4975_v7 = vsel %vm14070_vm5, %v4967_v49, %v4974_v62  ;;  %v5150_v28 = vsel %vm16416_vm11, %v4976_v39, %v5149_v38  ;;  %vm10332_vm5 = vcmask 31744  }
 0x3fc   : > { %v5172_v14 = vsel %vm16416_vm11, %v4976_v39, %v5171_v2  ;;  %v13047_v31 = vpop.f32.mrf.mxu1  ;;  %v18187_v41 = vadd.f32 %v13155_v17, %v9477_v57  ;;  %5148 = vst [vmem:[#allocation4 + $0xb8] sm:$0xf] %v4975_v7  ;;  %5151 = vst [vmem:[#allocation4 + $0xbc] sm:$0x1] %v5150_v28  ;;  %v13161_v12 = vadd.f32 %v17672_v56, %v17657_v20  ;;  %vm12215_vm4 = vcmask 1044484  }
 0x3fd   : > { %5170 = vst [vmem:[#allocation4 + $0xd0] sm:$0xf] %v4975_v7  ;;  %5173 = vst [vmem:[#allocation4 + $0xd4] sm:$0x1] %v5172_v14  ;;  %v9482_v1 = vadd.f32 %v13046_v13, %v18162_v0 }
 0x3fe   : > { %v13048_v10 = vpop.f32.mrf.mxu1 }
 0x3ff   : > { %v5190_v60 = vld [vmem:[#allocation4 + $0xc0] sm:$0x2]  ;;  %v5312_v58 = vld [vmem:[#allocation4 + $0xc0] sm:$0x1]  ;;  %v13049_v32 = vadd.f32 %v13048_v10, %v13047_v31  ;;  %v18198_v50 = vadd.f32 %v17556_v40, %v9482_v1 }
 0x400   : > { %v18190_v8 = vld [vmem:[#allocation4 + $0xc0] sm:$0xe]  ;;  %v12521_v44 = vrot.slane %v5190_v60, 9  ;;  %v13050_v9 = vpop.f32.mrf.mxu1 }
 0x401   : > { %v5189_v22 = vld [vmem:[#allocation4 + $0xb4] sm:$0x2]  ;;  %v5191_v25 = vld [vmem:[#allocation4 + $0xcc] sm:$0x2]  ;;  %v5309_v4 = vld [vmem:[#allocation4 + $0xb4] sm:$0x1]  ;;  %v9485_v45 = vadd.f32 %v13049_v32, %v18162_v0 }
 0x402   : > { %v5313_v46 = vsel %vm16416_vm11, %v12521_v44, %v5312_v58  ;;  %v12520_v42 = vrot.slane %v5189_v22, 9  ;;  %v12522_v21 = vrot.slane %v5191_v25, 9  ;;  %v18202_v19 = vld [vmem:[#allocation4 + $0xb4] sm:$0xe]  ;;  %v5315_v51 = vld [vmem:[#allocation4 + $0xcc] sm:$0x1]  ;;  %v13051_v2 = vpop.f32.mrf.mxu1 }
 0x403   : > { %5314 = vst [vmem:[#allocation4 + $0xc0] sm:$0x1] %v5313_v46  ;;  %v7733_v36 = vld [vmem:[#allocation4 + $0xcc] sm:$0xe]  ;;  %v5334_v6 = vld [vmem:[#allocation4 + $0xc4] sm:$0x8]  ;;  %v13052_v49 = vadd.f32 %v13051_v2, %v13050_v9  ;;  %v18216_v39 = vadd.f32 %v13161_v12, %v9485_v45 }
 0x404   : > { %v5310_v40 = vsel %vm16416_vm11, %v12520_v42, %v5309_v4  ;;  %v5316_v17 = vsel %vm16416_vm11, %v12522_v21, %v5315_v51  ;;  %v12586_v52 = vrot.slane %v18202_v19, 9  ;;  %v12539_v54 = vrot.slane %v5334_v6, 11  ;;  %v18212_v38 = vld [vmem:[#allocation4 + $0xc4] sm:$0xf]  ;;  %v5457_v20 = vld [vmem:[#allocation4 + $0xc8] sm:$0x1]  ;;  %v13053_v28 = vpop.f32.mrf.mxu1 }
 0x405   : > { %5311 = vst [vmem:[#allocation4 + $0xb4] sm:$0x1] %v5310_v40  ;;  %5317 = vst [vmem:[#allocation4 + $0xcc] sm:$0x1] %v5316_v17  ;;  %v7235_v56 = vld [vmem:[#allocation4 + $0xc4] sm:$0xf]  ;;  %v9490_v44 = vadd.f32 %v13052_v49, %v18162_v0 }
 0x406   : > { %v18214_v62 = vld [vmem:[#allocation4 + $0xb4] sm:$0xe]  ;;  %v12588_v57 = vrot.slane %v7733_v36, 9  ;;  %v5458_v11 = vsel %vm16481_vm9, %v12539_v54, %v5457_v20  ;;  %v7590_v59 = vshrl.u32 %v7235_v56, 16  ;;  %v5333_v13 = vld [vmem:[#allocation4 + $0xb8] sm:$0x8]  ;;  %v13054_v22 = vpop.f32.mrf.mxu1 }
 0x407   : > { %v5335_v7 = vld [vmem:[#allocation4 + $0xd0] sm:$0x8]  ;;  %5459 = vst [vmem:[#allocation4 + $0xc8] sm:$0x1] %v5458_v11  ;;  %v12538_v31 = vrot.slane %v5333_v13, 11  ;;  %v12556_v25 = vrot.slane %v18214_v62, 9  ;;  %v13055_v19 = vadd.f32 %v13054_v22, %v13053_v28  ;;  %v18240_v15 = vadd.f32 %v17726_v5, %v9490_v44 }
 0x408   : > { %v12540_v60 = vrot.slane %v5335_v7, 11  ;;  %v5454_v1 = vld [vmem:[#allocation4 + $0xbc] sm:$0x1]  ;;  %v5460_v58 = vld [vmem:[#allocation4 + $0xd4] sm:$0x1]  ;;  %v7586_v32 = vshll.u32 %v7235_v56, 16  ;;  %v13056_v45 = vpop.f32.mrf.mxu1  ;;  %v13167_v56 = vadd.f32 %v17740_v34, %v17733_v43 }
 0x409   : > { %v18222_v10 = vld [vmem:[#allocation4 + $0xb8] sm:$0xf]  ;;  %v5455_v46 = vsel %vm16481_vm9, %v12538_v31, %v5454_v1  ;;  %v18229_v21 = vld [vmem:[#allocation4 + $0xd0] sm:$0xf]  ;;  %v18236_v36 = vrot.slane %v7590_v59, 4  ;;  %v9493_v5 = vadd.f32 %v13055_v19, %v18162_v0  ;;  %vm12280_vm11 = vcmask 64512  }
 0x40a   : > { %v5461_v42 = vsel %vm16481_vm9, %v12540_v60, %v5460_v58  ;;  %v19038_v4 = vrot.slane %v18222_v10, 5  ;;  %v6324_v9 = vld [vmem:[#allocation4 + $0xb8] sm:$0xf]  ;;  %v18232_v12 = vld [vmem:[#allocation4 + $0xc0] sm:$0xf]  ;;  %v19037_v6 = vrot.slane %v18229_v21, 5  ;;  %v13057_v13 = vpop.f32.mrf.mxu1 }
 0x40b   : > { %v18234_v51 = vld [vmem:[#allocation4 + $0xc0] sm:$0xf]  ;;  %5456 = vst [vmem:[#allocation4 + $0xbc] sm:$0x1] %v5455_v46  ;;  %5462 = vst [vmem:[#allocation4 + $0xd4] sm:$0x1] %v5461_v42  ;;  %v13058_v46 = vadd.f32 %v13057_v13, %v13056_v45 }
 0x40c   : > { %6356 = vst [vmem:[#allocation5 + $0x420] sm:$0xf] %v6324_v9  ;;  %v7577_v54 = vshrl.u32 %v18234_v51, 16  ;;  %v6069_v2 = vld [vmem:[#allocation4 + $0xb8] sm:$0xf]  ;;  %v18245_v20 = vrot.slane %v7586_v32, 5  ;;  %v7878_v7 = vsel %vm14128_vm10, %v12586_v52, %v19038_v4  ;;  %v7892_v28 = vsel %vm14128_vm10, %v12588_v57, %v19037_v6  ;;  %v13059_v32 = vpop.f32.mrf.mxu1 }
 0x40d   : > { %v5572_v49 = vld [vmem:[#allocation4 + $0xb4] sm:$0xf]  ;;  %v7580_v43 = vshll.u32 %v18234_v51, 16  ;;  %v18264_v1 = vld [vmem:[#allocation4 + $0xcc] sm:$0xf]  ;;  %v6226_v42 = vrot.slane %v6069_v2, 5  ;;  %v18270_v6 = vadd.f32 %v13167_v56, %v9493_v5  ;;  %v9498_v56 = vadd.f32 %v13058_v46, %v18162_v0 }
 0x40e   : > { %v18249_v11 = vld [vmem:[#allocation4 + $0xb4] sm:$0xf]  ;;  %v5936_v34 = vshrl.u32 %v5572_v49, 16  ;;  %v5939_v31 = vshll.u32 %v5572_v49, 16  ;;  %7954 = vst [vmem:[#allocation5 + $0x3c8] sm:$0xf] %v7878_v7  ;;  %v13173_v7 = vadd.f32 %v17875_v33, %v17862_v16  ;;  %v13060_v4 = vpop.f32.mrf.mxu1 }
 0x40f   : > { %v18251_v59 = vld [vmem:[#allocation4 + $0xb4] sm:$0xf]  ;;  %v6744_v60 = vshrl.u32 %v18249_v11, 16  ;;  %7958 = vst [vmem:[#allocation5 + $0x458] sm:$0xf] %v7892_v28  ;;  %v18276_v28 = vadd.f32 %v17949_v27, %v17942_v3  ;;  %v13061_v5 = vadd.f32 %v13060_v4, %v13059_v32  ;;  %v6227_v16 = vsel %vm14128_vm10, %v12556_v25, %v6226_v42 }
 0x410   : > { %v7553_v58 = vshrl.u32 %v18251_v59, 16  ;;  %v7556_v52 = vshll.u32 %v18251_v59, 16  ;;  %v6323_v57 = vld [vmem:[#allocation4 + $0xb4] sm:$0xf]  ;;  %v6325_v19 = vld [vmem:[#allocation4 + $0xc0] sm:$0xf]  ;;  %v18280_v59 = vadd.f32 %v18088_v35, %v18076_v18  ;;  %v13062_v27 = vpop.f32.mrf.mxu1 }
 0x411   : > { %6355 = vst [vmem:[#allocation5 + $0x3fc] sm:$0xf] %v6323_v57  ;;  %v6326_v9 = vld [vmem:[#allocation4 + $0xc4] sm:$0xf]  ;;  %v5938_v49 = vrot.slane %v5936_v34, 4  ;;  %v6228_v33 = vrot.slane %v6226_v42, 4  ;;  %v9501_v4 = vadd.f32 %v13061_v5, %v18162_v0  ;;  %v18291_v42 = vadd.f32 %v17751_v48, %v9498_v56 }
 0x412   : > { %6357 = vst [vmem:[#allocation5 + $0x444] sm:$0xf] %v6325_v19  ;;  %6358 = vst [vmem:[#allocation5 + $0x468] sm:$0xf] %v6326_v9  ;;  %v5493_v45 = vld [vmem:[#allocation4 + $0xb4] sm:$0xf] }
 0x413   : > { %v5494_v2 = vld [vmem:[#allocation4 + $0xb8] sm:$0xf]  ;;  %v6070_v34 = vld [vmem:[#allocation4 + $0xbc] sm:$0x1]  ;;  %5525 = vst [vmem:[#allocation5 + $0x438] sm:$0xf] %v5493_v45  ;;  %v13063_v45 = vpop.f32.mrf.mxu1 }
 0x414   : > { %v5573_v13 = vld [vmem:[#allocation4 + $0xb8] sm:$0xf]  ;;  %5526 = vst [vmem:[#allocation5 + $0x45c] sm:$0xf] %v5494_v2  ;;  %v5574_v3 = vld [vmem:[#allocation4 + $0xbc] sm:$0x1]  ;;  %v13064_v14 = vadd.f32 %v13063_v45, %v13062_v27 }
 0x415   : > { %v6229_v18 = vrot.slane %v6070_v34, 5  ;;  %6293 = vst [vmem:[#allocation5 + $0x440] sm:$0xf] %v6227_v16  ;;  %v5941_v35 = vrot.slane %v5939_v31, 5  ;;  %v5945_v57 = vshll.u32 %v5573_v13, 16  ;;  %v5949_v19 = vshrl.u32 %v5573_v13, 16 }
 0x416   : > { %v7154_v9 = vld [vmem:[#allocation4 + $0xb4] sm:$0xf]  ;;  %v5955_v32 = vshll.u32 %v5574_v3, 16  ;;  %v7155_v62 = vld [vmem:[#allocation4 + $0xb8] sm:$0xf]  ;;  %v7555_v25 = vrot.slane %v7553_v58, 4  ;;  %v13065_v58 = vpop.f32.mrf.mxu1 }
 0x417   : > { %7186 = vst [vmem:[#allocation5 + $0x3c0] sm:$0xf] %v7154_v9  ;;  %v7232_v46 = vld [vmem:[#allocation4 + $0xb8] sm:$0xf]  ;;  %v6230_v2 = vsel %vm14128_vm10, %v6228_v33, %v6229_v18  ;;  %v5942_v31 = vor.u32 %v5941_v35, %v5938_v49  ;;  %v5947_v34 = vrot.slane %v5945_v57, 5  ;;  %v5951_v13 = vrot.slane %v5949_v19, 4  ;;  %v18299_v18 = vpop.f32.mrf.mxu0 }
 0x418   : > { %7187 = vst [vmem:[#allocation5 + $0x3e4] sm:$0xf] %v7155_v62  ;;  %v7233_v16 = vld [vmem:[#allocation4 + $0xbc] sm:$0x1]  ;;  %v7156_v17 = vld [vmem:[#allocation4 + $0xc0] sm:$0xf]  ;;  %v7593_v49 = vor.u32 %v18236_v36, %v18245_v20  ;;  %v18297_v33 = vadd.f32 %v13173_v7, %v9501_v4  ;;  %v18307_v7 = vadd.f32 %v13064_v14, %v18162_v0 }
 0x419   : > { %6294 = vst [vmem:[#allocation5 + $0x464] sm:$0xf] %v6230_v2  ;;  %v5957_v5 = vrot.slane %v5955_v32, 5  ;;  %v7558_v3 = vrot.slane %v7556_v52, 5  ;;  %v7562_v9 = vshll.u32 %v7232_v46, 16  ;;  %v5943_v22 = vrot.slane %v5942_v31, 4  ;;  %v13198_v4 = vpop.f32.mrf.mxu0 }
 0x41a   : > { %v7157_v40 = vld [vmem:[#allocation4 + $0xc4] sm:$0xf]  ;;  %7188 = vst [vmem:[#allocation5 + $0x408] sm:$0xf] %v7156_v17  ;;  %v13818_v48 = vld [vmem:[#allocation5 + $0x3fc] ss:$36 sps:$4 sm:$0xff]   ;;  %v5952_v44 = vor.u32 %v5951_v13, %v5947_v34  ;;  %v13066_v17 = vpop.f32.mrf.mxu1 }
 0x41b   : > { %v13820_v56 = vld [vmem:[#allocation5 + $0x3f8] ss:$36 sps:$4 sm:$0xff]   ;;  %7189 = vst [vmem:[#allocation5 + $0x42c] sm:$0xf] %v7157_v40  ;;  %v7604_v27 = vshll.u32 %v18264_v1, 16  ;;  %v7559_v35 = vor.u32 %v7558_v3, %v7555_v25  ;;  %v7564_v52 = vrot.slane %v7562_v9, 5  ;;  %9744 = vmatprep.mubr.bf16.mxu0 %v13818_v48  ;;  %v5948_v32 = vsel %vm14230_vm14, %v5943_v22, %v5947_v34 }
 0x41c   : > { %v7566_v57 = vshrl.u32 %v7232_v46, 16  ;;  %v7236_v19 = vld [vmem:[#allocation4 + $0xc8] sm:$0x1]  ;;  %v5953_v62 = vrot.slane %v5952_v44, 4  ;;  %v7572_v40 = vshll.u32 %v7233_v16, 16  ;;  %v7579_v36 = vrot.slane %v7577_v54, 4  ;;  %9745 = vmatmul.mubr.bf16.gmra.mxu0 %v13820_v56  ;;  %v13068_v31 = vpop.f32.mrf.mxu1  ;;  %v13199_v16 = vpop.f32.mrf.mxu0 }
 0x41d   : > { %6021 = vst [vmem:[#allocation5 + $0x43c] sm:$0xf] %v5948_v32  ;;  %v7560_v25 = vrot.slane %v7559_v35, 4  ;;  %v7582_v46 = vrot.slane %v7580_v43, 5  ;;  %v13067_v2 = vadd.f32 %v13066_v17, %v13065_v58  ;;  %v7596_v34 = vshll.u32 %v7236_v19, 16  ;;  %v8111_v14 = vld [vmem:[#allocation5 + $0x440] sm:$0xff] }
 0x41e   : > { %v7568_v45 = vrot.slane %v7566_v57, 4  ;;  %v5958_v44 = vsel %vm14230_vm14, %v5953_v62, %v5957_v5  ;;  %v7574_v22 = vrot.slane %v7572_v40, 5  ;;  %v6402_v13 = vld [vmem:[#allocation4 + $0xb8] sm:$0xf]  ;;  %v6403_v54 = vld [vmem:[#allocation4 + $0xbc] sm:$0x1]  ;;  %v18315_v58 = vadd.f32 %v13199_v16, %v13198_v4  ;;  %v13069_v35 = vpop.f32.mrf.mxu1  ;;  %v18321_v40 = vpop.f32.mrf.mxu0 }
 0x41f   : > { %6022 = vst [vmem:[#allocation5 + $0x460] sm:$0xf] %v5958_v44  ;;  %v7565_v3 = vsel %vm14230_vm14, %v7560_v25, %v7564_v52  ;;  %v7583_v48 = vor.u32 %v7582_v46, %v7579_v36  ;;  %v7594_v56 = vrot.slane %v7593_v49, 4  ;;  %v7158_v51 = vld [vmem:[#allocation4 + $0xcc] sm:$0xf]  ;;  %v7598_v19 = vrot.slane %v7596_v34, 5 }
 0x420   : > { %v7569_v9 = vor.u32 %v7568_v45, %v7564_v52  ;;  %v7159_v43 = vld [vmem:[#allocation4 + $0xd0] sm:$0xf]  ;;  %v8116_v57 = vld [vmem:[#allocation5 + $0x464] sm:$0xff]  ;;  %7682 = vst [vmem:[#allocation5 + $0x3c4] sm:$0xf] %v7565_v3  ;;  %v6746_v17 = vrot.slane %v6744_v60, 4  ;;  %v13070_v52 = vadd.f32 %v13069_v35, %v13068_v31  ;;  %v13071_v25 = vpop.f32.mrf.mxu1  ;;  %v18326_v3 = vadd.f32 %v13067_v2, %v18162_v0  ;;  %v18328_v31 = vpop.f32.mrf.mxu0 }
 0x421   : > { %v13825_v5 = vld [vmem:[#allocation5 + $0x444] ss:$36 sps:$4 sm:$0xff]   ;;  %v19406_v32 = vshll.u32 %v18249_v11, 16  ;;  %7190 = vst [vmem:[#allocation5 + $0x450] sm:$0xf] %v7158_v51  ;;  %v12727_v49 = vcombine.low %v8111_v14, %v8116_v57  ;;  %v7584_v4 = vrot.slane %v7583_v48, 4  ;;  %v7599_v46 = vsel %vm14230_vm14, %v7594_v56, %v7598_v19 }
 0x422   : > { %7191 = vst [vmem:[#allocation5 + $0x474] sm:$0xf] %v7159_v43  ;;  %v7570_v36 = vrot.slane %v7569_v9, 4  ;;  %9752 = vmatprep.mubr.bf16.mxu0 %v13825_v5  ;;  %v13832_v45 = vld [vmem:[#allocation5 + $0x1c] ss:$36 sps:$4 sm:$0xff]   ;;  %v6753_v34 = vshll.u32 %v6402_v13, 16  ;;  %v13072_v43 = vpop.f32.mrf.mxu1  ;;  %v13204_v19 = vpop.f32.mrf.mxu0 }
 0x423   : > { %v6749_v62 = vrot.slane %v19406_v32, 5  ;;  %v6757_v60 = vshrl.u32 %v6402_v13, 16  ;;  %v6897_v16 = vld [vmem:[#allocation4 + $0xb4] sm:$0xe]  ;;  %v6898_v11 = vld [vmem:[#allocation4 + $0xb8] sm:$0xf]  ;;  %v7589_v9 = vsel %vm14230_vm14, %v7584_v4, %v18245_v20  ;;  %v9514_v13 = vadd.f32 %v13070_v52, %v18162_v0 }
 0x424   : > { %v7575_v14 = vsel %vm14230_vm14, %v7570_v36, %v7574_v22  ;;  %7685 = vst [vmem:[#allocation5 + $0x430] sm:$0xf] %v7599_v46  ;;  %v6763_v48 = vshll.u32 %v6403_v54, 16  ;;  %v6899_v56 = vld [vmem:[#allocation4 + $0xbc] sm:$0x1]  ;;  %v6755_v35 = vrot.slane %v6753_v34, 5  ;;  %v13073_v5 = vadd.f32 %v13072_v43, %v13071_v25  ;;  %9753 = vmatmul.mubr.bf16.gmra.mxu0 %v12727_v49  ;;  %v13074_v54 = vpop.f32.mrf.mxu1  ;;  %v13205_v49 = vpop.f32.mrf.mxu0 }
 0x425   : > { %v6750_v44 = vor.u32 %v6749_v62, %v6746_v17  ;;  %v7238_v51 = vld [vmem:[#allocation4 + $0xd0] sm:$0xf]  ;;  %7683 = vst [vmem:[#allocation5 + $0x3e8] sm:$0xf] %v7575_v14  ;;  %7684 = vst [vmem:[#allocation5 + $0x40c] sm:$0xf] %v7589_v9  ;;  %9954 = vmatprep.mubr.bf16.mxu0 %v13832_v45 }
 0x426   : > { %v6759_v57 = vrot.slane %v6757_v60, 4  ;;  %v6765_v22 = vrot.slane %v6763_v48, 5  ;;  %v12571_v17 = vrot.slane %v6897_v16, 9  ;;  %v7051_v32 = vrot.slane %v6898_v11, 5  ;;  %v7239_v62 = vld [vmem:[#allocation4 + $0xd4] sm:$0x1]  ;;  %v13075_v9 = vpop.f32.mrf.mxu1 }
 0x427   : > { %v6751_v2 = vrot.slane %v6750_v44, 4  ;;  %v13827_v20 = vld [vmem:[#allocation5 + $0x43c] ss:$36 sps:$4 sm:$0xff]   ;;  %v7054_v46 = vrot.slane %v6899_v56, 5  ;;  %v18340_v44 = vadd.f32 %v17936_v29, %v18307_v7  ;;  %v9517_v25 = vadd.f32 %v13073_v5, %v18162_v0  ;;  %v13835_v14 = vld [vmem:[#allocation5 + $0x14] ss:$36 sps:$4 sm:$0xff]  }
 0x428   : > { %v13829_v36 = vld [vmem:[#allocation5 + $0x438] ss:$36 sps:$4 sm:$0xff]   ;;  %v6760_v4 = vor.u32 %v6759_v57, %v6755_v35  ;;  %v7052_v34 = vsel %vm14128_vm10, %v12571_v17, %v7051_v32  ;;  %v7053_v60 = vrot.slane %v7051_v32, 4  ;;  %v19407_v45 = vshrl.u32 %v18264_v1, 16  ;;  %9591 = vmatprep.mubr.bf16.mxu1 %v13827_v20  ;;  %v13077_v5 = vpop.f32.mrf.mxu1  ;;  %v6406_v1 = vld [vmem:[#allocation4 + $0xc8] sm:$0x1] }
 0x429   : > { %v6756_v52 = vsel %vm14230_vm14, %v6751_v2, %v6755_v35  ;;  %v18347_v11 = vadd.f32 %v13205_v49, %v13204_v19  ;;  %7123 = vst [vmem:[#allocation5 + $0x404] sm:$0xf] %v7052_v34  ;;  %v7606_v29 = vrot.slane %v7604_v27, 5  ;;  %v7610_v7 = vshll.u32 %v7238_v51, 16  ;;  %9592 = vmatmul.mubr.bf16.gmra.mxu1 %v13829_v36  ;;  %v13830_v56 = vld [vmem:[#allocation5 + $0x18] ss:$36 sps:$4 sm:$0xff]  }
 0x42a   : > { %6851 = vst [vmem:[#allocation5 + $0x400] sm:$0xf] %v6756_v52  ;;  %v7603_v16 = vrot.slane %v19407_v45, 4  ;;  %v6761_v48 = vrot.slane %v6760_v4, 4  ;;  %v13076_v43 = vadd.f32 %v13075_v9, %v13074_v54  ;;  %v7055_v2 = vsel %vm14128_vm10, %v7053_v60, %v7054_v46  ;;  %9793 = vmatprep.mubr.bf16.mxu1 %v13835_v14  ;;  %v13837_v19 = vld [vmem:[#allocation5 + $0x64] ss:$36 sps:$4 sm:$0xff]   ;;  %v13078_v60 = vpop.f32.mrf.mxu1 }
 0x42b   : > { %v7614_v35 = vshrl.u32 %v7238_v51, 16  ;;  %v7620_v57 = vshll.u32 %v7239_v62, 16  ;;  %7124 = vst [vmem:[#allocation5 + $0x428] sm:$0xf] %v7055_v2  ;;  %v7612_v20 = vrot.slane %v7610_v7, 5  ;;  %v6777_v27 = vshll.u32 %v18212_v38, 16 }
 0x42c   : > { %v6766_v17 = vsel %vm14230_vm14, %v6761_v48, %v6765_v22  ;;  %v7607_v32 = vor.u32 %v7606_v29, %v7603_v16  ;;  %v18356_v36 = vld [vmem:[#allocation5 + $0x60] sm:$0xff]  ;;  %v19408_v52 = vshrl.u32 %v18232_v12, 16  ;;  %v6901_v62 = vld [vmem:[#allocation4 + $0xc4] sm:$0xf]  ;;  %v18362_v4 = vadd.f32 %v18276_v28, %v18326_v3  ;;  %v6902_v14 = vld [vmem:[#allocation4 + $0xc8] sm:$0x1]  ;;  %9955 = vmatmul.mubr.bf16.vlgmr.msra.gmra.mxu0 %v13830_v56 }
 0x42d   : > { %6852 = vst [vmem:[#allocation5 + $0x424] sm:$0xf] %v6766_v17  ;;  %v7616_v54 = vrot.slane %v7614_v35, 4  ;;  %v18365_v22 = vadd.f32 %v17964_v26, %v9514_v13  ;;  %v19409_v46 = vshrl.u32 %v18212_v38, 16  ;;  %v9522_v34 = vadd.f32 %v13076_v43, %v18162_v0  ;;  %v18370_v45 = vld [vmem:[#allocation5 + $0x84] sm:$0xff]  ;;  %9962 = vmatprep.mubr.bf16.mxu0 %v13837_v19  ;;  %13598 = vmatpush3.bf16.msra.mxu0 %v18194_v30  ;;  %v13080_v38 = vpop.f32.mrf.mxu1 }
 0x42e   : > { %v6770_v51 = vrot.slane %v19408_v52, 4  ;;  %v7608_v16 = vrot.slane %v7607_v32, 4  ;;  %v18373_v9 = vadd.f32 %v18280_v59, %v9517_v25  ;;  %v13079_v48 = vadd.f32 %v13078_v60, %v13077_v5  ;;  %v13833_v29 = vld [vmem:[#allocation5 + $0x10] ss:$36 sps:$4 sm:$0xff]   ;;  %v13839_v59 = vld [vmem:[#allocation5 + $0x5c] ss:$36 sps:$4 sm:$0xff]  }
 0x42f   : > { %v6783_v49 = vrot.slane %v19409_v46, 4  ;;  %v7617_v28 = vor.u32 %v7616_v54, %v7612_v20  ;;  %v7622_v3 = vrot.slane %v7620_v57, 5  ;;  %v19410_v26 = vshll.u32 %v18232_v12, 16  ;;  %v13846_v12 = vld [vmem:[%s18953_s3 + $0x230] sm:$0xff]   ;;  %v13081_v30 = vpop.f32.mrf.mxu1  ;;  %v7730_v54 = vld [vmem:[#allocation4 + $0xc0] sm:$0xe] }
 0x430   : > { %v7613_v7 = vsel %vm14230_vm14, %v7608_v16, %v7612_v20  ;;  %v6779_v43 = vrot.slane %v6777_v27, 5  ;;  %v6787_v2 = vshll.u32 %v6406_v1, 16  ;;  %v7058_v35 = vrot.slane %v6901_v62, 5  ;;  %v7729_v27 = vld [vmem:[#allocation4 + $0xbc] sm:$0x1]  ;;  %v13947_v60 = vld [vmem:[%s18953_s3 + $0x238] sm:$0xff]  }
 0x431   : > { %v6773_v13 = vrot.slane %v19410_v26, 5  ;;  %v12605_v25 = vcombine.low %v18356_v36, %v18370_v45  ;;  %v7618_v56 = vrot.slane %v7617_v28, 4  ;;  %7686 = vst [vmem:[#allocation5 + $0x454] sm:$0xf] %v7613_v7  ;;  %v7061_v5 = vrot.slane %v6902_v14, 5  ;;  %9794 = vmatmul.mubr.bf16.vlgmr.msra.gmra.mxu1 %v13833_v29  ;;  %v13083_v45 = vpop.f32.mrf.mxu1 }
 0x432   : > { %v6784_v19 = vor.u32 %v6783_v49, %v6779_v43  ;;  %v6789_v17 = vrot.slane %v6787_v2, 5  ;;  %v19411_v32 = vrot.slane %v18190_v8, 9  ;;  %v7060_v1 = vrot.slane %v7058_v35, 4  ;;  %v7731_v46 = vld [vmem:[#allocation4 + $0xc4] sm:$0xf]  ;;  %13550 = vmatpush3.bf16.msra.mxu1 %v13947_v60  ;;  %9801 = vmatprep.mubr.bf16.mxu1 %v13839_v59 }
 0x433   : > { %v6774_v57 = vor.u32 %v6773_v13, %v6770_v51  ;;  %v9525_v36 = vadd.f32 %v13079_v48, %v18162_v0  ;;  %v13082_v52 = vadd.f32 %v13081_v30, %v13080_v38  ;;  %v7623_v62 = vsel %vm14230_vm14, %v7618_v56, %v7622_v3  ;;  %v7732_v49 = vld [vmem:[#allocation4 + $0xc8] sm:$0x1]  ;;  %v7735_v48 = vld [vmem:[#allocation4 + $0xd4] sm:$0x1]  ;;  %13551 = vmatprep.subr.bf16.mxu1 %v13846_v12  ;;  %v13084_v38 = vpop.f32.mrf.mxu1 }
 0x434   : > { %v7059_v20 = vsel %vm14128_vm10, %v19411_v32, %v7058_v35  ;;  %v13191_v8 = vadd.f32 %v18114_v63, %v18110_v53  ;;  %7687 = vst [vmem:[#allocation5 + $0x478] sm:$0xf] %v7623_v62  ;;  %v6785_v16 = vrot.slane %v6784_v19, 4  ;;  %v7062_v14 = vsel %vm14128_vm10, %v7060_v1, %v7061_v5  ;;  %v13857_v53 = vld [vmem:[%s18953_s3 + $0x228] sm:$0xff]   ;;  %v13842_v7 = vld [vmem:[#allocation5 + $0xac] ss:$36 sps:$4 sm:$0xff]   ;;  %9963 = vmatmul.mubr.bf16.gmra.mxu0 %v12605_v25 }
 0x435   : > { %v6775_v51 = vrot.slane %v6774_v57, 4  ;;  %7125 = vst [vmem:[#allocation5 + $0x44c] sm:$0xf] %v7059_v20  ;;  %v18400_v28 = vadd.f32 %v18106_v55, %v9522_v34  ;;  %v9530_v3 = vadd.f32 %v13082_v52, %v18162_v0  ;;  %7126 = vst [vmem:[#allocation5 + $0x470] sm:$0xf] %v7062_v14  ;;  %v19412_v26 = vrot.slane %v18222_v10, 5  ;;  %9970 = vmatprep.mubr.bf16.mxu0 %v13842_v7  ;;  %v13086_v10 = vpop.f32.mrf.mxu1 }
 0x436   : > { %v12587_v29 = vrot.slane %v7730_v54, 9  ;;  %v6790_v55 = vsel %vm14230_vm14, %v6785_v16, %v6789_v17  ;;  %v7880_v34 = vrot.slane %v7729_v27, 5  ;;  %v7884_v2 = vrot.slane %v7731_v46, 5  ;;  %13552 = vmatpush3.bf16.msra.mxu1 %v13846_v12  ;;  %v13841_v32 = vld [vmem:[#allocation5 + $0x58] ss:$36 sps:$4 sm:$0xff]   ;;  %v13868_v12 = vld [vmem:[%s18953_s3 + $0x220] sm:$0xff]  }
 0x437   : > { %v6780_v63 = vsel %vm14230_vm14, %v6775_v51, %v6779_v43  ;;  %v7879_v13 = vrot.slane %v19412_v26, 4  ;;  %v7887_v35 = vrot.slane %v7732_v49, 5  ;;  %v13085_v59 = vadd.f32 %v13084_v38, %v13083_v45  ;;  %6854 = vst [vmem:[#allocation5 + $0x46c] sm:$0xf] %v6790_v55  ;;  %13553 = vmatprep.subr.bf16.mxu1 %v13857_v53  ;;  %v7983_v1 = vld [vmem:[#allocation5 + $0xa8] sm:$0xff]  ;;  %v13087_v54 = vpop.f32.mrf.mxu1  ;;  %v7993_v26 = vld [vmem:[#allocation5 + $0xf0] sm:$0xff] }
 0x438   : > { %6853 = vst [vmem:[#allocation5 + $0x448] sm:$0xf] %v6780_v63  ;;  %v19413_v56 = vrot.slane %v18229_v21, 5  ;;  %v7894_v57 = vrot.slane %v7735_v48, 5  ;;  %v18414_v5 = vadd.f32 %v13191_v8, %v9525_v36  ;;  %v7885_v30 = vsel %vm14128_vm10, %v12587_v29, %v7884_v2  ;;  %v7988_v27 = vld [vmem:[#allocation5 + $0xcc] sm:$0xff]  ;;  %v13207_v63 = vpop.f32.mrf.mxu0  ;;  %v13907_v55 = vld [vmem:[%s18953_s3 + $0x208] sm:$0xff]  }
 0x439   : > { %v7881_v24 = vsel %vm14128_vm10, %v7879_v13, %v7880_v34  ;;  %v7886_v19 = vrot.slane %v7884_v2, 4  ;;  %v18421_v17 = vadd.f32 %v18131_v61, %v9530_v3  ;;  %v13197_v21 = vadd.f32 %v18299_v18, %v18287_v37  ;;  %7956 = vst [vmem:[#allocation5 + $0x410] sm:$0xf] %v7885_v30  ;;  %v13844_v61 = vld [vmem:[#allocation5 + $0xa4] ss:$36 sps:$4 sm:$0xff]   ;;  %9802 = vmatmul.mubr.bf16.gmra.mxu1 %v13841_v32  ;;  %v13089_v52 = vpop.f32.mrf.mxu1  ;;  %v7998_v13 = vld [vmem:[#allocation5 + $0x114] sm:$0xff] }
 0x43a   : > { %v7893_v43 = vrot.slane %v19413_v56, 4  ;;  %v9533_v25 = vadd.f32 %v13085_v59, %v18162_v0  ;;  %7955 = vst [vmem:[#allocation5 + $0x3ec] sm:$0xf] %v7881_v24  ;;  %v13088_v18 = vadd.f32 %v13087_v54, %v13086_v10  ;;  %9809 = vmatprep.mubr.bf16.mxu1 %v13844_v61  ;;  %13554 = vmatpush3.bf16.msra.mxu1 %v13857_v53  ;;  %v13881_v46 = vld [vmem:[%s18953_s3 + $0x218] sm:$0xff]   ;;  %v13847_v45 = vld [vmem:[#allocation5 + $0xa0] ss:$36 sps:$4 sm:$0xff]   ;;  %v13208_v34 = vpop.f32.mrf.mxu0 }
 0x43b   : > { %v7888_v37 = vsel %vm14128_vm10, %v7886_v19, %v7887_v35  ;;  %v12614_v51 = vcombine.low %v7983_v1, %v7988_v27  ;;  %13555 = vmatprep.subr.bf16.mxu1 %v13868_v12  ;;  %v13090_v49 = vpop.f32.mrf.mxu1  ;;  %v13203_v14 = vadd.f32 %v18328_v31, %v18321_v40  ;;  %v13850_v3 = vld [vmem:[#allocation5 + $0xec] ss:$36 sps:$4 sm:$0xff]   ;;  %v13894_v53 = vld [vmem:[%s18953_s3 + $0x210] sm:$0xff]   ;;  %v12623_v31 = vcombine.low %v7993_v26, %v7998_v13  ;;  %v8003_v19 = vld [vmem:[#allocation5 + $0x138] sm:$0xff] }
 0x43c   : > { %v7895_v20 = vsel %vm14128_vm10, %v7893_v43, %v7894_v57  ;;  %7957 = vst [vmem:[#allocation5 + $0x434] sm:$0xf] %v7888_v37  ;;  %v18433_v36 = vadd.f32 %v13197_v21, %v9533_v25  ;;  %v9538_v62 = vadd.f32 %v13088_v18, %v18162_v0  ;;  %v13091_v8 = vadd.f32 %v13090_v49, %v13089_v52  ;;  %v13853_v35 = vld [vmem:[#allocation5 + $0x13c] ss:$36 sps:$4 sm:$0xff]   ;;  %v13852_v24 = vld [vmem:[#allocation5 + $0xe8] ss:$36 sps:$4 sm:$0xff]  }
 0x43d   : > { %7959 = vst [vmem:[#allocation5 + $0x47c] sm:$0xf] %v7895_v20  ;;  %9971 = vmatmul.mubr.bf16.gmra.mxu0 %v12614_v51  ;;  %v13092_v16 = vpop.f32.mrf.mxu1  ;;  %v13209_v57 = vadd.f32 %v13208_v34, %v13207_v63  ;;  %v13920_v30 = vld [vmem:[%s18953_s3 + $0x200] sm:$0xff]   ;;  %v8008_v21 = vld [vmem:[#allocation5 + $0x15c] sm:$0xff]  ;;  %v13859_v1 = vld [vmem:[#allocation5 + $0x184] ss:$36 sps:$4 sm:$0xff]  }
 0x43e   : > { %v18440_v60 = vadd.f32 %v18315_v58, %v9538_v62  ;;  %9978 = vmatprep.mubr.bf16.mxu0 %v13848_v23  ;;  %13556 = vmatpush3.bf16.msra.mxu1 %v13868_v12  ;;  %v9541_v48 = vadd.f32 %v13091_v8, %v18162_v0  ;;  %v13855_v25 = vld [vmem:[#allocation5 + $0x134] ss:$36 sps:$4 sm:$0xff]   ;;  %v12632_v20 = vcombine.low %v8003_v19, %v8008_v21  ;;  %v8013_v27 = vld [vmem:[#allocation5 + $0x180] sm:$0xff]  ;;  %v13864_v18 = vld [vmem:[#allocation5 + $0x1cc] ss:$36 sps:$4 sm:$0xff]   ;;  %vm12209_vm10 = vcmask 1041409  }
 0x43f   : > { %13557 = vmatprep.subr.bf16.mxu1 %v13881_v46  ;;  %v13093_v58 = vpop.f32.mrf.mxu1  ;;  %v8018_v61 = vld [vmem:[#allocation5 + $0x1a4] sm:$0xff]  ;;  %v13861_v54 = vld [vmem:[#allocation5 + $0x17c] ss:$36 sps:$4 sm:$0xff]   ;;  %v8028_v51 = vld [vmem:[#allocation5 + $0x1ec] sm:$0xff]  ;;  %vm12211_vm14 = vcmask 1042434   ;;  %vm12217_vm9 = vcmask 1045509  }
 0x440   : > { %v13094_v29 = vadd.f32 %v13093_v58, %v13092_v16  ;;  %v18448_v38 = vadd.f32 %v13203_v14, %v9541_v48  ;;  %v12641_v37 = vcombine.low %v8013_v27, %v8018_v61  ;;  %v13863_v52 = vld [vmem:[#allocation5 + $0x178] ss:$36 sps:$4 sm:$0xff]   ;;  %v8023_v62 = vld [vmem:[#allocation5 + $0x1c8] sm:$0xff]  ;;  %v13869_v14 = vld [vmem:[#allocation5 + $0x1c0] ss:$36 sps:$4 sm:$0xff]  }
 0x441   : > { %9810 = vmatmul.mubr.bf16.gmra.mxu1 %v13847_v45  ;;  %v13095_v7 = vpop.f32.mrf.mxu1  ;;  %v12650_v23 = vcombine.low %v8023_v62, %v8028_v51  ;;  %v13870_v8 = vld [vmem:[#allocation5 + $0x214] ss:$36 sps:$4 sm:$0xff]   ;;  %v13884_v61 = vld [vmem:[#allocation5 + $0x2a4] ss:$36 sps:$4 sm:$0xff]  }
 0x442   : > { %9817 = vmatprep.mubr.bf16.mxu1 %v13850_v3  ;;  %13558 = vmatpush3.bf16.msra.mxu1 %v13881_v46  ;;  %v9546_v40 = vadd.f32 %v13094_v29, %v18162_v0  ;;  %v13866_v46 = vld [vmem:[#allocation5 + $0x1c4] ss:$36 sps:$4 sm:$0xff]   ;;  %v18466_v3 = vld [vmem:[%s18954_s4] ss:$0 sm:$0xff]  ;;  %v8038_v13 = vld [vmem:[#allocation5 + $0x234] sm:$0xff] }
 0x443   : > { %13559 = vmatprep.subr.bf16.mxu1 %v13894_v53  ;;  %v13096_v2 = vpop.f32.mrf.mxu1  ;;  %v8033_v26 = vld [vmem:[#allocation5 + $0x210] sm:$0xff] }
 0x444   : > { %v13097_v59 = vadd.f32 %v13096_v2, %v13095_v7  ;;  %v18455_v56 = vadd.f32 %v18347_v11, %v9546_v40  ;;  %v13872_v29 = vld [vmem:[#allocation5 + $0x20c] ss:$36 sps:$4 sm:$0xff]   ;;  %v13880_v19 = vld [vmem:[#allocation5 + $0x254] ss:$36 sps:$4 sm:$0xff]  }
 0x445   : > { %9979 = vmatmul.mubr.bf16.gmra.mxu0 %v12623_v31  ;;  %v13098_v43 = vpop.f32.mrf.mxu1 }
 0x446   : > { %9986 = vmatprep.mubr.bf16.mxu0 %v13853_v35  ;;  %13560 = vmatpush3.bf16.msra.mxu1 %v13894_v53  ;;  %v9549_v10 = vadd.f32 %v13097_v59, %v18162_v0  ;;  %v13858_v0 = vld [vmem:[#allocation5 + $0x130] ss:$36 sps:$4 sm:$0xff]   ;;  %v13877_v35 = vld [vmem:[#allocation5 + $0x25c] ss:$36 sps:$4 sm:$0xff]  }
 0x447   : > { %13561 = vmatprep.subr.bf16.mxu1 %v13907_v55  ;;  %v13099_v32 = vpop.f32.mrf.mxu1 }
 0x448   : > { %v13100_v12 = vadd.f32 %v13099_v32, %v13098_v43  ;;  %v18461_v11 = vadd.f32 %v13209_v57, %v9549_v10  ;;  %v13874_v10 = vld [vmem:[#allocation5 + $0x208] ss:$36 sps:$4 sm:$0xff]  }
 0x449   : > { %9818 = vmatmul.mubr.bf16.gmra.mxu1 %v13852_v24  ;;  %v13101_v49 = vpop.f32.mrf.mxu1 }
 0x44a   : > { %9825 = vmatprep.mubr.bf16.mxu1 %v13855_v25  ;;  %13562 = vmatpush3.bf16.msra.mxu1 %v13907_v55  ;;  %v9554_v53 = vadd.f32 %v18466_v3, %v13100_v12  ;;  %v12659_v55 = vcombine.low %v8033_v26, %v8038_v13  ;;  %v13893_v26 = vld [vmem:[#allocation5 + $0x2e4] ss:$36 sps:$4 sm:$0xff]  }
 0x44b   : > { %13563 = vmatprep.subr.bf16.mxu1 %v13920_v30  ;;  %v13102_v45 = vpop.f32.mrf.mxu1  ;;  %v13888_v13 = vld [vmem:[#allocation5 + $0x2e8] ss:$36 sps:$4 sm:$0xff]  }
 0x44c   : > { %v13103_v63 = vadd.f32 %v13102_v45, %v13101_v49 }
 0x44d   : > { %9987 = vmatmul.mubr.bf16.gmra.mxu0 %v12632_v20  ;;  %v13210_v16 = vpop.f32.mrf.mxu0  ;;  %v13875_v20 = vld [vmem:[#allocation5 + $0x258] ss:$36 sps:$4 sm:$0xff]  }
 0x44e   : > { %9994 = vmatprep.mubr.bf16.mxu0 %v13859_v1  ;;  %13564 = vmatpush3.bf16.msra.mxu1 %v13920_v30  ;;  %v9557_v34 = vadd.f32 %v18466_v3, %v13103_v63  ;;  %v13885_v63 = vld [vmem:[#allocation5 + $0x298] ss:$36 sps:$4 sm:$0xff]  }
 0x44f   : > { %v13211_v48 = vpop.f32.mrf.mxu0 }
 0x450   : > { %v13212_v58 = vadd.f32 %v13211_v48, %v13210_v16  ;;  %v13882_v16 = vld [vmem:[#allocation5 + $0x2a0] ss:$36 sps:$4 sm:$0xff]   ;;  %v13890_v48 = vld [vmem:[#allocation5 + $0x2ec] ss:$36 sps:$4 sm:$0xff]  }
 0x451   : > { %9826 = vmatmul.mubr.bf16.gmra.mxu1 %v13858_v0  ;;  %v13213_v7 = vpop.f32.mrf.mxu0 }
 0x452   : > { %9833 = vmatprep.mubr.bf16.mxu1 %v13861_v54  ;;  %v18469_v40 = vadd.f32 %v13212_v58, %v9554_v53  ;;  %v13897_v58 = vld [vmem:[#allocation5 + $0x334] ss:$36 sps:$4 sm:$0xff]  }
 0x453   : > { %v13214_v31 = vpop.f32.mrf.mxu0 }
 0x454   : > { %v13215_v2 = vadd.f32 %v13214_v31, %v13213_v7  ;;  %v13900_v7 = vld [vmem:[#allocation5 + $0x32c] ss:$36 sps:$4 sm:$0xff]  }
 0x455   : > { %9995 = vmatmul.mubr.bf16.gmra.mxu0 %v12641_v37  ;;  %v13216_v59 = vpop.f32.mrf.mxu0  ;;  %v13895_v31 = vld [vmem:[#allocation5 + $0x330] ss:$36 sps:$4 sm:$0xff]  }
 0x456   : > { %10002 = vmatprep.mubr.bf16.mxu0 %v13864_v18  ;;  %v18472_v43 = vadd.f32 %v13215_v2, %v9557_v34  ;;  %v13898_v34 = vld [vmem:[#allocation5 + $0x328] ss:$36 sps:$4 sm:$0xff]   ;;  %v13906_v2 = vld [vmem:[#allocation5 + $0x374] ss:$36 sps:$4 sm:$0xff]  }
 0x457   : > { %v13104_v57 = vpop.f32.mrf.mxu1  ;;  %v13217_v24 = vpop.f32.mrf.mxu0 }
 0x458   : > { %v13218_v30 = vadd.f32 %v13217_v24, %v13216_v59  ;;  %v13910_v59 = vld [vmem:[#allocation5 + $0x3c4] ss:$36 sps:$4 sm:$0xff]  }
 0x459   : > { %9834 = vmatmul.mubr.bf16.gmra.mxu1 %v13863_v52  ;;  %v13105_v21 = vpop.f32.mrf.mxu1  ;;  %v13219_v32 = vpop.f32.mrf.mxu0  ;;  %v13878_v52 = vld [vmem:[#allocation5 + $0x250] ss:$36 sps:$4 sm:$0xff]   ;;  %v13908_v24 = vld [vmem:[#allocation5 + $0x3c0] ss:$36 sps:$4 sm:$0xff]  }
 0x45a   : > { %9841 = vmatprep.mubr.bf16.mxu1 %v13866_v46  ;;  %v13106_v25 = vadd.f32 %v13105_v21, %v13104_v57  ;;  %v13887_v46 = vld [vmem:[#allocation5 + $0x29c] ss:$36 sps:$4 sm:$0xff]   ;;  %v13904_v57 = vld [vmem:[#allocation5 + $0x370] ss:$36 sps:$4 sm:$0xff]   ;;  %v13919_v21 = vld [vmem:[#allocation5 + $0x404] ss:$36 sps:$4 sm:$0xff]  }
 0x45b   : > { %v13107_v12 = vpop.f32.mrf.mxu1  ;;  %v13220_v0 = vpop.f32.mrf.mxu0 }
 0x45c   : > { %v9562_v1 = vadd.f32 %v18466_v3, %v13106_v25  ;;  %v13221_v62 = vadd.f32 %v13220_v0, %v13219_v32  ;;  %v13914_v25 = vld [vmem:[#allocation5 + $0x408] ss:$36 sps:$4 sm:$0xff]   ;;  %v13923_v32 = vld [vmem:[#allocation5 + $0x454] ss:$36 sps:$4 sm:$0xff]  }
 0x45d   : > { %10003 = vmatmul.mubr.bf16.gmra.mxu0 %v12650_v23  ;;  %v13108_v27 = vpop.f32.mrf.mxu1 }
 0x45e   : > { %10010 = vmatprep.mubr.bf16.mxu0 %v13870_v8  ;;  %v13109_v54 = vadd.f32 %v13108_v27, %v13107_v12  ;;  %v18475_v37 = vadd.f32 %v13218_v30, %v9562_v1  ;;  %v13916_v30 = vld [vmem:[#allocation5 + $0x40c] ss:$36 sps:$4 sm:$0xff]  }
 0x460   : > { %v9565_v51 = vadd.f32 %v18466_v3, %v13109_v54 }
 0x461   : > { %9842 = vmatmul.mubr.bf16.gmra.mxu1 %v13869_v14  ;;  %v13110_v18 = vpop.f32.mrf.mxu1 }
 0x462   : > { %9849 = vmatprep.mubr.bf16.mxu1 %v13872_v29  ;;  %v18478_v8 = vadd.f32 %v13221_v62, %v9565_v51  ;;  %v13891_v29 = vld [vmem:[#allocation5 + $0x2e0] ss:$36 sps:$4 sm:$0xff]   ;;  %v13950_v62 = vld [vmem:[%s14054_s29 + $0x4] sm:$0xf] }
 0x463   : > { %v13111_v49 = vpop.f32.mrf.mxu1 }
 0x464   : > { %v13112_v23 = vadd.f32 %v13111_v49, %v13110_v18 }
 0x465   : > { %10011 = vmatmul.mubr.bf16.gmra.mxu0 %v12659_v55  ;;  %v13113_v45 = vpop.f32.mrf.mxu1  ;;  %v13903_v55 = vld [vmem:[#allocation5 + $0x37c] ss:$36 sps:$4 sm:$0xff]  }
 0x466   : > { %10018 = vmatprep.mubr.bf16.mxu0 %v13877_v35  ;;  %v13901_v35 = vld [vmem:[#allocation5 + $0x378] ss:$36 sps:$4 sm:$0xff]   ;;  %v9570_v0 = vadd.f32 %v18466_v3, %v13112_v23 }
 0x467   : > { %v13114_v14 = vpop.f32.mrf.mxu1 }
 0x468   : > { %v13115_v53 = vadd.f32 %v13114_v14, %v13113_v45 }
 0x469   : > { %9850 = vmatmul.mubr.bf16.gmra.mxu1 %v13874_v10  ;;  %v13913_v10 = vld [vmem:[#allocation5 + $0x3bc] ss:$36 sps:$4 sm:$0xff]  }
 0x46a   : > { %9857 = vmatprep.mubr.bf16.mxu1 %v13880_v19  ;;  %v13911_v19 = vld [vmem:[#allocation5 + $0x3b8] ss:$36 sps:$4 sm:$0xff]   ;;  %v9573_v45 = vadd.f32 %v18466_v3, %v13115_v53 }
 0x46b   : > { %v13951_v53 = vld [vmem:[%s14054_s29 + $0x8] sm:$0xf] }
 0x46d   : > { %10019 = vmatmul.mubr.bf16.gmra.mxu0 %v13875_v20  ;;  %v13917_v20 = vld [vmem:[#allocation5 + $0x400] ss:$36 sps:$4 sm:$0xff]  }
 0x46e   : > { %10026 = vmatprep.mubr.bf16.mxu0 %v13884_v61  ;;  %v13926_v61 = vld [vmem:[#allocation5 + $0x44c] ss:$36 sps:$4 sm:$0xff]  }
 0x471   : > { %9858 = vmatmul.mubr.bf16.gmra.mxu1 %v13878_v52  ;;  %v13949_v52 = vld [vmem:[%s14054_s29] sm:$0xf] }
 0x472   : > { %9865 = vmatprep.mubr.bf16.mxu1 %v13887_v46  ;;  %v12807_v51 = vcombine.low %v13949_v52, %v13950_v62  ;;  %v13921_v46 = vld [vmem:[#allocation5 + $0x450] ss:$36 sps:$4 sm:$0xff]  }
 0x475   : > { %10027 = vmatmul.mubr.bf16.gmra.mxu0 %v13882_v16 }
 0x476   : > { %10034 = vmatprep.mubr.bf16.mxu0 %v13890_v48 }
 0x479   : > { %9866 = vmatmul.mubr.bf16.gmra.mxu1 %v13885_v63  ;;  %v13924_v63 = vld [vmem:[#allocation5 + $0x448] ss:$36 sps:$4 sm:$0xff]  }
 0x47a   : > { %9873 = vmatprep.mubr.bf16.mxu1 %v13893_v26 }
 0x47d   : > { %10035 = vmatmul.mubr.bf16.gmra.mxu0 %v13888_v13 }
 0x47e   : > { %10042 = vmatprep.mubr.bf16.mxu0 %v13897_v58  ;;  %v13927_v58 = vld [vmem:[#allocation5 + $0x20] ss:$36 sps:$4 sm:$0xff]  }
 0x481   : > { %9874 = vmatmul.mubr.bf16.gmra.mxu1 %v13891_v29 }
 0x482   : > { %9881 = vmatprep.mubr.bf16.mxu1 %v13900_v7 }
 0x485   : > { %10043 = vmatmul.mubr.bf16.gmra.mxu0 %v13895_v31 }
 0x486   : > { %10050 = vmatprep.mubr.bf16.mxu0 %v13903_v55  ;;  %v13952_v55 = vld [vmem:[%s14054_s29 + $0xc] sm:$0xf] }
 0x489   : > { %9882 = vmatmul.mubr.bf16.gmra.mxu1 %v13898_v34  ;;  %v12808_v34 = vcombine.low %v13951_v53, %v13952_v55  ;;  %v13932_v53 = vld [vmem:[#allocation5 + $0x188] ss:$36 sps:$4 sm:$0xff]   ;;  %v13933_v55 = vld [vmem:[#allocation5 + $0x1d0] ss:$36 sps:$4 sm:$0xff]  }
 0x48a   : > { %9889 = vmatprep.mubr.bf16.mxu1 %v13906_v2 }
 0x48d   : > { %10051 = vmatmul.mubr.bf16.gmra.mxu0 %v13901_v35  ;;  %v13953_v35 = vld [vmem:[%s14054_s29 + $0x10] sm:$0xf] }
 0x48e   : > { %10058 = vmatprep.mubr.bf16.mxu0 %v13910_v59  ;;  %v13954_v59 = vld [vmem:[%s14054_s29 + $0x14] sm:$0xf] }
 0x491   : > { %9890 = vmatmul.mubr.bf16.gmra.mxu1 %v13904_v57  ;;  %v12809_v57 = vcombine.low %v13953_v35, %v13954_v59  ;;  %v13965_v59 = vld [vmem:[%s14054_s29 + $0x40] sm:$0xf] }
 0x492   : > { %9897 = vmatprep.mubr.bf16.mxu1 %v13913_v10 }
 0x495   : > { %10059 = vmatmul.mubr.bf16.gmra.mxu0 %v13908_v24  ;;  %v13222_v12 = vpop.f32.mrf.mxu0 }
 0x496   : > { %10066 = vmatprep.mubr.bf16.mxu0 %v13916_v30 }
 0x497   : > { %v13223_v1 = vpop.f32.mrf.mxu0 }
 0x498   : > { %v13224_v27 = vadd.f32 %v13223_v1, %v13222_v12  ;;  %v13929_v1 = vld [vmem:[#allocation5 + $0xb0] ss:$36 sps:$4 sm:$0xff]  }
 0x499   : > { %9898 = vmatmul.mubr.bf16.gmra.mxu1 %v13911_v19  ;;  %v13225_v54 = vpop.f32.mrf.mxu0 }
 0x49a   : > { %9905 = vmatprep.mubr.bf16.mxu1 %v13919_v21  ;;  %v18481_v18 = vadd.f32 %v13224_v27, %v9570_v0 }
 0x49b   : > { %v13226_v49 = vpop.f32.mrf.mxu0 }
 0x49c   : > { %v13227_v16 = vadd.f32 %v13226_v49, %v13225_v54  ;;  %v13956_v54 = vld [vmem:[%s14054_s29 + $0x1c] sm:$0xf]  ;;  %v13958_v49 = vld [vmem:[%s14054_s29 + $0x24] sm:$0xf] }
 0x49d   : > { %10067 = vmatmul.mubr.bf16.gmra.mxu0 %v13914_v25 }
 0x49e   : > { %10074 = vmatprep.mubr.bf16.mxu0 %v13923_v32  ;;  %v18486_v23 = vadd.f32 %v13227_v16, %v9573_v45 }
 0x4a0   : > { %v13228_v14 = vpop.f32.mrf.mxu0 }
 0x4a1   : > { %9906 = vmatmul.mubr.bf16.gmra.mxu1 %v13917_v20  ;;  %v13928_v20 = vld [vmem:[#allocation5 + $0x68] ss:$36 sps:$4 sm:$0xff]  }
 0x4a2   : > { %9913 = vmatprep.mubr.bf16.mxu1 %v13926_v61  ;;  %v13116_v48 = vpop.f32.mrf.mxu1  ;;  %v13229_v26 = vpop.f32.mrf.mxu0  ;;  %v13955_v61 = vld [vmem:[%s14054_s29 + $0x18] sm:$0xf] }
 0x4a3   : > { %v13230_v13 = vadd.f32 %v13229_v26, %v13228_v14  ;;  %v12810_v52 = vcombine.low %v13955_v61, %v13956_v54  ;;  %v13959_v26 = vld [vmem:[%s14054_s29 + $0x28] sm:$0xf]  ;;  %v13937_v61 = vld [vmem:[#allocation5 + $0x2f0] ss:$36 sps:$4 sm:$0xff]   ;;  %v13971_v54 = vld [vmem:[%s14054_s29 + $0x58] sm:$0xf] }
 0x4a4   : > { %v13117_v29 = vpop.f32.mrf.mxu1  ;;  %v13231_v31 = vpop.f32.mrf.mxu0 }
 0x4a5   : > { %10075 = vmatmul.mubr.bf16.gmra.mxu0 %v13921_v46  ;;  %v13118_v7 = vadd.f32 %v13117_v29, %v13116_v48  ;;  %v13957_v46 = vld [vmem:[%s14054_s29 + $0x20] sm:$0xf]  ;;  %v13930_v48 = vld [vmem:[#allocation5 + $0xf8] ss:$36 sps:$4 sm:$0xff]   ;;  %v13961_v29 = vld [vmem:[%s14054_s29 + $0x30] sm:$0xf] }
 0x4a6   : > { %13599 = vmatprep.mubr.msk.bf16.mxu0 %vm10332_vm5, %v12807_v51  ;;  %v13119_v2 = vpop.f32.mrf.mxu1  ;;  %v13232_v24 = vpop.f32.mrf.mxu0  ;;  %v12811_v45 = vcombine.low %v13957_v46, %v13958_v49  ;;  %v13973_v46 = vld [vmem:[%s14054_s29 + $0x60] sm:$0xf]  ;;  %v13974_v49 = vld [vmem:[%s14054_s29 + $0x64] sm:$0xf] }
 0x4a7   : > { %v9578_v10 = vadd.f32 %v18466_v3, %v13118_v7  ;;  %v13233_v30 = vadd.f32 %v13232_v24, %v13231_v31  ;;  %v13962_v7 = vld [vmem:[%s14054_s29 + $0x34] sm:$0xf]  ;;  %v13934_v24 = vld [vmem:[#allocation5 + $0x218] ss:$36 sps:$4 sm:$0xff]  }
 0x4a8   : > { %v13120_v19 = vpop.f32.mrf.mxu1  ;;  %v12813_v31 = vcombine.low %v13961_v29, %v13962_v7  ;;  %v13978_v29 = vld [vmem:[%s14054_s29 + $0x74] sm:$0xf] }
 0x4a9   : > { %9914 = vmatmul.mubr.bf16.gmra.mxu1 %v13924_v63  ;;  %v13121_v21 = vadd.f32 %v13120_v19, %v13119_v2  ;;  %v18495_v25 = vadd.f32 %v13230_v13, %v9578_v10  ;;  %v13931_v63 = vld [vmem:[#allocation5 + $0x140] ss:$36 sps:$4 sm:$0xff]   ;;  %v13960_v13 = vld [vmem:[%s14054_s29 + $0x2c] sm:$0xf]  ;;  %v13964_v2 = vld [vmem:[%s14054_s29 + $0x3c] sm:$0xf] }
 0x4aa   : > { %13565 = vmatprep.mubr.bf16.mxu1 %v13927_v58  ;;  %v12812_v58 = vcombine.low %v13959_v26, %v13960_v13  ;;  %v13967_v19 = vld [vmem:[%s14054_s29 + $0x48] sm:$0xf]  ;;  %v13976_v26 = vld [vmem:[%s14054_s29 + $0x6c] sm:$0xf] }
 0x4ab   : > { %v13122_v32 = vpop.f32.mrf.mxu1  ;;  %v9581_v12 = vadd.f32 %v18466_v3, %v13121_v21  ;;  %v13968_v21 = vld [vmem:[%s14054_s29 + $0x4c] sm:$0xf] }
 0x4ad   : > { %13600 = vmatmul.mubr.msk.bf16.vlgmr.msra.gmra.mxu0 %vm10332_vm5, %v12808_v34  ;;  %v13123_v0 = vpop.f32.mrf.mxu1  ;;  %v18503_v62 = vadd.f32 %v13233_v30, %v9581_v12  ;;  %v13963_v34 = vld [vmem:[%s14054_s29 + $0x38] sm:$0xf]  ;;  %v13935_v30 = vld [vmem:[#allocation5 + $0x260] ss:$36 sps:$4 sm:$0xff]  }
 0x4ae   : > { %13603 = vmatprep.mubr.msk.bf16.mxu0 %vm10332_vm5, %v12809_v57  ;;  %v18499_v27 = vadd.f32 %v13123_v0, %v13122_v32  ;;  %v12814_v35 = vcombine.low %v13963_v34, %v13964_v2  ;;  %v13966_v57 = vld [vmem:[%s14054_s29 + $0x44] sm:$0xf]  ;;  %v12816_v32 = vcombine.low %v13967_v19, %v13968_v21  ;;  %v13969_v12 = vld [vmem:[%s14054_s29 + $0x50] sm:$0xf]  ;;  %v13936_v0 = vld [vmem:[#allocation5 + $0x2a8] ss:$36 sps:$4 sm:$0xff]  }
 0x4af   : > { %v13125_v51 = vpop.f32.mrf.mxu1  ;;  %v12815_v10 = vcombine.low %v13965_v59, %v13966_v57  ;;  %v13979_v57 = vld [vmem:[%s14054_s29 + $0x78] sm:$0xf] }
 0x4b0   : > { %v9586_v34 = vadd.f32 %v18466_v3, %v18499_v27  ;;  %v13942_v27 = vld [vmem:[#allocation5 + $0x458] ss:$36 sps:$4 sm:$0xff]  }
 0x4b1   : > { %13566 = vmatmul.mubr.bf16.vlgmr.msra.gmra.mxu1 %v13928_v20  ;;  %v13126_v16 = vpop.f32.mrf.mxu1  ;;  %v13970_v20 = vld [vmem:[%s14054_s29 + $0x54] sm:$0xf] }
 0x4b2   : > { %13569 = vmatprep.mubr.bf16.mxu1 %v13929_v1  ;;  %v18507_v14 = vadd.f32 %v13126_v16, %v13125_v51  ;;  %v12817_v1 = vcombine.low %v13969_v12, %v13970_v20  ;;  %v13938_v16 = vld [vmem:[#allocation5 + $0x338] ss:$36 sps:$4 sm:$0xff]  }
 0x4b4   : > { %v9589_v21 = vadd.f32 %v18466_v3, %v18507_v14 }
 0x4b5   : > { %13604 = vmatmul.mubr.msk.bf16.gmra.mxu0 %vm10332_vm5, %v12810_v52  ;;  %v13972_v52 = vld [vmem:[%s14054_s29 + $0x5c] sm:$0xf] }
 0x4b6   : > { %13607 = vmatprep.mubr.msk.bf16.mxu0 %vm10332_vm5, %v12811_v45  ;;  %v12818_v51 = vcombine.low %v13971_v54, %v13972_v52  ;;  %v12819_v45 = vcombine.low %v13973_v46, %v13974_v49 }
 0x4b9   : > { %13570 = vmatmul.mubr.bf16.gmra.mxu1 %v13930_v48  ;;  %v13939_v48 = vld [vmem:[#allocation5 + $0x380] ss:$36 sps:$4 sm:$0xff]  }
 0x4ba   : > { %13573 = vmatprep.mubr.bf16.mxu1 %v13931_v63  ;;  %v13975_v63 = vld [vmem:[%s14054_s29 + $0x68] sm:$0xf] }
 0x4bb   : > { %v12820_v13 = vcombine.low %v13975_v63, %v13976_v26 }
 0x4bd   : > { %13608 = vmatmul.mubr.msk.bf16.gmra.mxu0 %vm10332_vm5, %v12812_v58  ;;  %v13977_v58 = vld [vmem:[%s14054_s29 + $0x70] sm:$0xf] }
 0x4be   : > { %13611 = vmatprep.mubr.msk.bf16.mxu0 %vm10332_vm5, %v12813_v31  ;;  %v12821_v7 = vcombine.low %v13977_v58, %v13978_v29 }
 0x4c1   : > { %13574 = vmatmul.mubr.bf16.gmra.mxu1 %v13932_v53  ;;  %v13940_v53 = vld [vmem:[#allocation5 + $0x3c8] ss:$36 sps:$4 sm:$0xff]  }
 0x4c2   : > { %13577 = vmatprep.mubr.bf16.mxu1 %v13933_v55 }
 0x4c5   : > { %13612 = vmatmul.mubr.msk.bf16.gmra.mxu0 %vm10332_vm5, %v12814_v35  ;;  %v13941_v35 = vld [vmem:[#allocation5 + $0x410] ss:$36 sps:$4 sm:$0xff]  }
 0x4c6   : > { %13615 = vmatprep.mubr.msk.bf16.mxu0 %vm10332_vm5, %v12815_v10  ;;  %v13980_v10 = vld [vmem:[%s14054_s29 + $0x7c] sm:$0xf] }
 0x4c9   : > { %13578 = vmatmul.mubr.bf16.gmra.mxu1 %v13934_v24  ;;  %v12822_v24 = vcombine.low %v13979_v57, %v13980_v10 }
 0x4ca   : > { %13581 = vmatprep.mubr.bf16.mxu1 %v13935_v30 }
 0x4cd   : > { %13616 = vmatmul.mubr.msk.bf16.gmra.mxu0 %vm10332_vm5, %v12816_v32 }
 0x4ce   : > { %13619 = vmatprep.mubr.msk.bf16.mxu0 %vm10332_vm5, %v12817_v1 }
 0x4d1   : > { %13582 = vmatmul.mubr.bf16.gmra.mxu1 %v13936_v0 }
 0x4d2   : > { %13585 = vmatprep.mubr.bf16.mxu1 %v13937_v61 }
 0x4d5   : > { %13620 = vmatmul.mubr.msk.bf16.gmra.mxu0 %vm10332_vm5, %v12818_v51 }
 0x4d6   : > { %13623 = vmatprep.mubr.msk.bf16.mxu0 %vm10332_vm5, %v12819_v45 }
 0x4d9   : > { %13586 = vmatmul.mubr.bf16.gmra.mxu1 %v13938_v16 }
 0x4da   : > { %13589 = vmatprep.mubr.bf16.mxu1 %v13939_v48 }
 0x4dc   : > { %v13234_v31 = vpop.f32.mrf.mxu0 }
 0x4dd   : > { %13624 = vmatmul.mubr.msk.bf16.gmra.mxu0 %vm10332_vm5, %v12820_v13 }
 0x4de   : > { %13627 = vmatprep.mubr.msk.bf16.mxu0 %vm10332_vm5, %v12821_v7  ;;  %v13235_v55 = vpop.f32.mrf.mxu0 }
 0x4df   : > { %v13236_v2 = vadd.f32 %v13235_v55, %v13234_v31 }
 0x4e0   : > { %v13237_v59 = vpop.f32.mrf.mxu0 }
 0x4e1   : > { %13590 = vmatmul.mubr.bf16.gmra.mxu1 %v13940_v53  ;;  %v18545_v30 = vadd.f32 %v13236_v2, %v9586_v34 }
 0x4e2   : > { %13593 = vmatprep.mubr.bf16.mxu1 %v13941_v35  ;;  %v13238_v19 = vpop.f32.mrf.mxu0 }
 0x4e3   : > { %v13239_v32 = vadd.f32 %v13238_v19, %v13237_v59 }
 0x4e4   : > { %v13240_v12 = vpop.f32.mrf.mxu0 }
 0x4e5   : > { %13628 = vmatmul.mubr.msk.bf16.gmra.mxu0 %vm10332_vm5, %v12822_v24  ;;  %v18550_v20 = vadd.f32 %v13239_v32, %v9589_v21 }
 0x4e6   : > { %v13241_v1 = vpop.f32.mrf.mxu0 }
 0x4e7   : > { %v13242_v0 = vadd.f32 %v13241_v1, %v13240_v12 }
 0x4e8   : > { %v13243_v54 = vpop.f32.mrf.mxu0 }
 0x4e9   : > { %v13128_v61 = vpop.f32.mrf.mxu1  ;;  %13594 = vmatmul.mubr.bf16.gmra.mxu1 %v13942_v27 }
 0x4ea   : > { %v13244_v51 = vpop.f32.mrf.mxu0 }
 0x4eb   : > { %v13129_v52 = vpop.f32.mrf.mxu1  ;;  %v13245_v49 = vadd.f32 %v13244_v51, %v13243_v54 }
 0x4ec   : > { %v13130_v46 = vadd.f32 %v13129_v52, %v13128_v61  ;;  %v13374_v16 = vpop.f32.mrf.mxu0 }
 0x4ed   : > { %v13131_v45 = vpop.f32.mrf.mxu1 }
 0x4ee   : > { %v9594_v14 = vadd.f32 %v18466_v3, %v13130_v46  ;;  %v13375_v63 = vpop.f32.mrf.mxu0 }
 0x4ef   : > { %v13132_v48 = vpop.f32.mrf.mxu1  ;;  %v13376_v13 = vadd.f32 %v13375_v63, %v13374_v16 }
 0x4f0   : > { %v13133_v26 = vadd.f32 %v13132_v48, %v13131_v45  ;;  %v18553_v58 = vadd.f32 %v13242_v0, %v9594_v14  ;;  %v13377_v7 = vpop.f32.mrf.mxu0 }
 0x4f1   : > { %v13262_v29 = vpop.f32.mrf.mxu1 }
 0x4f2   : > { %v9597_v31 = vadd.f32 %v18466_v3, %v13133_v26  ;;  %v13378_v55 = vpop.f32.mrf.mxu0 }
 0x4f3   : > { %v13263_v53 = vpop.f32.mrf.mxu1  ;;  %v13379_v2 = vadd.f32 %v13378_v55, %v13377_v7 }
 0x4f4   : > { %v13264_v34 = vadd.f32 %v13263_v53, %v13262_v29  ;;  %v18556_v35 = vadd.f32 %v13245_v49, %v9597_v31  ;;  %v13380_v57 = vpop.f32.mrf.mxu0 }
 0x4f5   : > { %v13265_v59 = vpop.f32.mrf.mxu1 }
 0x4f6   : > { %v9796_v10 = vadd.f32 %v13264_v34, %v18172_v47  ;;  %v13381_v19 = vpop.f32.mrf.mxu0 }
 0x4f7   : > { %v13266_v24 = vpop.f32.mrf.mxu1  ;;  %v13382_v32 = vadd.f32 %v13381_v19, %v13380_v57 }
 0x4f8   : > { %v13267_v21 = vadd.f32 %v13266_v24, %v13265_v59  ;;  %v18559_v12 = vadd.f32 %v13376_v13, %v9796_v10  ;;  %v13383_v1 = vpop.f32.mrf.mxu0 }
 0x4f9   : > { %v13268_v27 = vpop.f32.mrf.mxu1 }
 0x4fa   : > { %v9799_v3 = vadd.f32 %v13267_v21, %v18187_v41  ;;  %v13384_v61 = vpop.f32.mrf.mxu0 }
 0x4fb   : > { %v13269_v0 = vpop.f32.mrf.mxu1  ;;  %v13385_v52 = vadd.f32 %v13384_v61, %v13383_v1 }
 0x4fc   : > { %v13270_v54 = vadd.f32 %v13269_v0, %v13268_v27  ;;  %v18562_v51 = vadd.f32 %v13379_v2, %v9799_v3 }
 0x4fd   : > { %v13271_v46 = vpop.f32.mrf.mxu1  ;;  %v13386_v49 = vpop.f32.mrf.mxu0 }
 0x4fe   : > { %v9804_v47 = vadd.f32 %v13270_v54, %v18198_v50 }
 0x4ff   : > { %v13272_v45 = vpop.f32.mrf.mxu1  ;;  %v13387_v16 = vpop.f32.mrf.mxu0 }
 0x500   : > { %v13273_v14 = vadd.f32 %v13272_v45, %v13271_v46  ;;  %v13388_v48 = vadd.f32 %v13387_v16, %v13386_v49  ;;  %v18565_v63 = vadd.f32 %v13382_v32, %v9804_v47 }
 0x501   : > { %v13274_v26 = vpop.f32.mrf.mxu1  ;;  %v13389_v13 = vpop.f32.mrf.mxu0 }
 0x502   : > { %v9807_v41 = vadd.f32 %v13273_v14, %v18216_v39 }
 0x503   : > { %v13275_v29 = vpop.f32.mrf.mxu1  ;;  %v13390_v7 = vpop.f32.mrf.mxu0 }
 0x504   : > { %v13276_v31 = vadd.f32 %v13275_v29, %v13274_v26  ;;  %v13391_v53 = vadd.f32 %v13390_v7, %v13389_v13  ;;  %v18568_v55 = vadd.f32 %v13385_v52, %v9807_v41 }
 0x505   : > { %v13277_v34 = vpop.f32.mrf.mxu1  ;;  %v13392_v2 = vpop.f32.mrf.mxu0 }
 0x506   : > { %v9812_v50 = vadd.f32 %v13276_v31, %v18240_v15 }
 0x507   : > { %v13278_v59 = vpop.f32.mrf.mxu1  ;;  %v13393_v57 = vpop.f32.mrf.mxu0 }
 0x508   : > { %v13279_v10 = vadd.f32 %v13278_v59, %v13277_v34  ;;  %v13394_v24 = vadd.f32 %v13393_v57, %v13392_v2  ;;  %v18571_v19 = vadd.f32 %v13388_v48, %v9812_v50 }
 0x509   : > { %v13280_v21 = vpop.f32.mrf.mxu1  ;;  %v13395_v32 = vpop.f32.mrf.mxu0 }
 0x50a   : > { %v9815_v39 = vadd.f32 %v13279_v10, %v18270_v6 }
 0x50b   : > { %v13281_v27 = vpop.f32.mrf.mxu1  ;;  %v13396_v1 = vpop.f32.mrf.mxu0 }
 0x50c   : > { %v13282_v3 = vadd.f32 %v13281_v27, %v13280_v21  ;;  %v13397_v0 = vadd.f32 %v13396_v1, %v13395_v32  ;;  %v18574_v61 = vadd.f32 %v13391_v53, %v9815_v39 }
 0x50d   : > { %v13283_v54 = vpop.f32.mrf.mxu1  ;;  %v13398_v52 = vpop.f32.mrf.mxu0 }
 0x50e   : > { %v9820_v15 = vadd.f32 %v13282_v3, %v18291_v42 }
 0x50f   : > { %v13284_v46 = vpop.f32.mrf.mxu1  ;;  %v13399_v49 = vpop.f32.mrf.mxu0 }
 0x510   : > { %v13285_v47 = vadd.f32 %v13284_v46, %v13283_v54  ;;  %v13400_v45 = vadd.f32 %v13399_v49, %v13398_v52  ;;  %v18577_v16 = vadd.f32 %v13394_v24, %v9820_v15 }
 0x511   : > { %v13286_v14 = vpop.f32.mrf.mxu1  ;;  %v13401_v48 = vpop.f32.mrf.mxu0 }
 0x512   : > { %v9823_v6 = vadd.f32 %v13285_v47, %v18297_v33 }
 0x513   : > { %v13287_v26 = vpop.f32.mrf.mxu1  ;;  %v13402_v13 = vpop.f32.mrf.mxu0 }
 0x514   : > { %v13288_v41 = vadd.f32 %v13287_v26, %v13286_v14  ;;  %v13403_v29 = vadd.f32 %v13402_v13, %v13401_v48  ;;  %v18580_v7 = vadd.f32 %v13397_v0, %v9823_v6 }
 0x515   : > { %v13289_v31 = vpop.f32.mrf.mxu1  ;;  %v13404_v53 = vpop.f32.mrf.mxu0 }
 0x516   : > { %v9828_v42 = vadd.f32 %v13288_v41, %v18340_v44 }
 0x517   : > { %v13290_v34 = vpop.f32.mrf.mxu1  ;;  %v13405_v2 = vpop.f32.mrf.mxu0 }
 0x518   : > { %v13291_v50 = vadd.f32 %v13290_v34, %v13289_v31  ;;  %v13406_v59 = vadd.f32 %v13405_v2, %v13404_v53  ;;  %v18583_v57 = vadd.f32 %v13400_v45, %v9828_v42 }
 0x519   : > { %v13292_v10 = vpop.f32.mrf.mxu1  ;;  %v13407_v24 = vpop.f32.mrf.mxu0 }
 0x51a   : > { %v9831_v33 = vadd.f32 %v13291_v50, %v18362_v4 }
 0x51b   : > { %v13293_v21 = vpop.f32.mrf.mxu1  ;;  %v13408_v32 = vpop.f32.mrf.mxu0 }
 0x51c   : > { %v13294_v39 = vadd.f32 %v13293_v21, %v13292_v10  ;;  %v13409_v27 = vadd.f32 %v13408_v32, %v13407_v24  ;;  %v18586_v1 = vadd.f32 %v13403_v29, %v9831_v33 }
 0x51d   : > { %v13295_v3 = vpop.f32.mrf.mxu1  ;;  %v13410_v0 = vpop.f32.mrf.mxu0 }
 0x51e   : > { %v9836_v44 = vadd.f32 %v13294_v39, %v18365_v22 }
 0x51f   : > { %v13296_v54 = vpop.f32.mrf.mxu1  ;;  %v13411_v52 = vpop.f32.mrf.mxu0 }
 0x520   : > { %v13297_v15 = vadd.f32 %v13296_v54, %v13295_v3  ;;  %v13412_v46 = vadd.f32 %v13411_v52, %v13410_v0  ;;  %v18589_v49 = vadd.f32 %v13406_v59, %v9836_v44 }
 0x521   : > { %v13298_v47 = vpop.f32.mrf.mxu1  ;;  %v13413_v45 = vpop.f32.mrf.mxu0 }
 0x522   : > { %v9839_v4 = vadd.f32 %v13297_v15, %v18373_v9 }
 0x523   : > { %v13299_v14 = vpop.f32.mrf.mxu1  ;;  %v13414_v48 = vpop.f32.mrf.mxu0 }
 0x524   : > { %v13300_v6 = vadd.f32 %v13299_v14, %v13298_v47  ;;  %v13415_v26 = vadd.f32 %v13414_v48, %v13413_v45  ;;  %v18592_v13 = vadd.f32 %v13409_v27, %v9839_v4 }
 0x525   : > { %v13301_v41 = vpop.f32.mrf.mxu1  ;;  %v13416_v29 = vpop.f32.mrf.mxu0 }
 0x526   : > { %v9844_v22 = vadd.f32 %v13300_v6, %v18400_v28 }
 0x527   : > { %v13302_v31 = vpop.f32.mrf.mxu1  ;;  %v13417_v53 = vpop.f32.mrf.mxu0 }
 0x528   : > { %v13303_v42 = vadd.f32 %v13302_v31, %v13301_v41  ;;  %v13418_v34 = vadd.f32 %v13417_v53, %v13416_v29  ;;  %v18595_v2 = vadd.f32 %v13412_v46, %v9844_v22 }
 0x529   : > { %v13304_v50 = vpop.f32.mrf.mxu1  ;;  %v13419_v59 = vpop.f32.mrf.mxu0 }
 0x52a   : > { %v9847_v9 = vadd.f32 %v13303_v42, %v18414_v5 }
 0x52b   : > { %v13305_v10 = vpop.f32.mrf.mxu1  ;;  %v13420_v24 = vpop.f32.mrf.mxu0 }
 0x52c   : > { %v13306_v33 = vadd.f32 %v13305_v10, %v13304_v50  ;;  %v13421_v21 = vadd.f32 %v13420_v24, %v13419_v59  ;;  %v18598_v32 = vadd.f32 %v13415_v26, %v9847_v9 }
 0x52d   : > { %v13307_v39 = vpop.f32.mrf.mxu1  ;;  %v13422_v27 = vpop.f32.mrf.mxu0 }
 0x52e   : > { %v9852_v28 = vadd.f32 %v13306_v33, %v18421_v17 }
 0x52f   : > { %v13308_v3 = vpop.f32.mrf.mxu1  ;;  %v13423_v0 = vpop.f32.mrf.mxu0 }
 0x530   : > { %v13309_v44 = vadd.f32 %v13308_v3, %v13307_v39  ;;  %v13424_v54 = vadd.f32 %v13423_v0, %v13422_v27  ;;  %v18601_v52 = vadd.f32 %v13418_v34, %v9852_v28 }
 0x531   : > { %v13310_v15 = vpop.f32.mrf.mxu1  ;;  %v13425_v46 = vpop.f32.mrf.mxu0 }
 0x532   : > { %v9855_v5 = vadd.f32 %v13309_v44, %v18433_v36 }
 0x533   : > { %v13311_v47 = vpop.f32.mrf.mxu1  ;;  %v13426_v45 = vpop.f32.mrf.mxu0 }
 0x534   : > { %v13312_v4 = vadd.f32 %v13311_v47, %v13310_v15  ;;  %v13427_v14 = vadd.f32 %v13426_v45, %v13425_v46  ;;  %v18604_v48 = vadd.f32 %v13421_v21, %v9855_v5 }
 0x535   : > { %v13313_v6 = vpop.f32.mrf.mxu1  ;;  %v13428_v26 = vpop.f32.mrf.mxu0 }
 0x536   : > { %v9860_v17 = vadd.f32 %v13312_v4, %v18440_v60 }
 0x537   : > { %v13314_v41 = vpop.f32.mrf.mxu1  ;;  %v13429_v29 = vpop.f32.mrf.mxu0 }
 0x538   : > { %v13315_v22 = vadd.f32 %v13314_v41, %v13313_v6  ;;  %v13430_v31 = vadd.f32 %v13429_v29, %v13428_v26  ;;  %v18607_v53 = vadd.f32 %v13424_v54, %v9860_v17 }
 0x539   : > { %v13316_v42 = vpop.f32.mrf.mxu1  ;;  %v13431_v34 = vpop.f32.mrf.mxu0 }
 0x53a   : > { %v9863_v36 = vadd.f32 %v13315_v22, %v18448_v38 }
 0x53b   : > { %v13317_v50 = vpop.f32.mrf.mxu1  ;;  %v13432_v59 = vpop.f32.mrf.mxu0 }
 0x53c   : > { %v13318_v9 = vadd.f32 %v13317_v50, %v13316_v42  ;;  %v13433_v10 = vadd.f32 %v13432_v59, %v13431_v34  ;;  %v18610_v24 = vadd.f32 %v13427_v14, %v9863_v36 }
 0x53d   : > { %v13319_v33 = vpop.f32.mrf.mxu1  ;;  %v13434_v21 = vpop.f32.mrf.mxu0 }
 0x53e   : > { %v9868_v60 = vadd.f32 %v13318_v9, %v18455_v56 }
 0x53f   : > { %v13320_v39 = vpop.f32.mrf.mxu1  ;;  %v13435_v27 = vpop.f32.mrf.mxu0 }
 0x540   : > { %v13321_v28 = vadd.f32 %v13320_v39, %v13319_v33  ;;  %v13436_v3 = vadd.f32 %v13435_v27, %v13434_v21  ;;  %v18613_v0 = vadd.f32 %v13430_v31, %v9868_v60 }
 0x541   : > { %v13322_v44 = vpop.f32.mrf.mxu1  ;;  %v13437_v54 = vpop.f32.mrf.mxu0 }
 0x542   : > { %v9871_v38 = vadd.f32 %v13321_v28, %v18461_v11 }
 0x543   : > { %v13323_v15 = vpop.f32.mrf.mxu1  ;;  %v13438_v46 = vpop.f32.mrf.mxu0 }
 0x544   : > { %v13324_v5 = vadd.f32 %v13323_v15, %v13322_v44  ;;  %v13439_v47 = vadd.f32 %v13438_v46, %v13437_v54  ;;  %v18616_v45 = vadd.f32 %v13433_v10, %v9871_v38 }
 0x545   : > { %v13325_v4 = vpop.f32.mrf.mxu1  ;;  %v13440_v14 = vpop.f32.mrf.mxu0 }
 0x546   : > { %v9876_v56 = vadd.f32 %v13324_v5, %v18469_v40 }
 0x547   : > { %v13326_v6 = vpop.f32.mrf.mxu1  ;;  %v13441_v26 = vpop.f32.mrf.mxu0 }
 0x548   : > { %v13327_v17 = vadd.f32 %v13326_v6, %v13325_v4  ;;  %v13442_v41 = vadd.f32 %v13441_v26, %v13440_v14  ;;  %v18619_v29 = vadd.f32 %v13436_v3, %v9876_v56 }
 0x549   : > { %v13328_v22 = vpop.f32.mrf.mxu1  ;;  %v13443_v31 = vpop.f32.mrf.mxu0 }
 0x54a   : > { %v9879_v11 = vadd.f32 %v13327_v17, %v18472_v43 }
 0x54b   : > { %v13329_v42 = vpop.f32.mrf.mxu1  ;;  %v13444_v34 = vpop.f32.mrf.mxu0 }
 0x54c   : > { %v13330_v36 = vadd.f32 %v13329_v42, %v13328_v22  ;;  %v13445_v50 = vadd.f32 %v13444_v34, %v13443_v31  ;;  %v18622_v59 = vadd.f32 %v13439_v47, %v9879_v11 }
 0x54d   : > { %v13331_v9 = vpop.f32.mrf.mxu1  ;;  %v13446_v10 = vpop.f32.mrf.mxu0 }
 0x54e   : > { %v9884_v40 = vadd.f32 %v13330_v36, %v18475_v37 }
 0x54f   : > { %v13332_v33 = vpop.f32.mrf.mxu1  ;;  %v13447_v21 = vpop.f32.mrf.mxu0 }
 0x550   : > { %v13333_v60 = vadd.f32 %v13332_v33, %v13331_v9  ;;  %v13448_v39 = vadd.f32 %v13447_v21, %v13446_v10  ;;  %v18625_v27 = vadd.f32 %v13442_v41, %v9884_v40 }
 0x551   : > { %v13334_v28 = vpop.f32.mrf.mxu1  ;;  %v13449_v3 = vpop.f32.mrf.mxu0 }
 0x552   : > { %v9887_v43 = vadd.f32 %v13333_v60, %v18478_v8 }
 0x553   : > { %v13335_v44 = vpop.f32.mrf.mxu1  ;;  %v13450_v54 = vpop.f32.mrf.mxu0 }
 0x554   : > { %v13336_v38 = vadd.f32 %v13335_v44, %v13334_v28  ;;  %v13451_v15 = vadd.f32 %v13450_v54, %v13449_v3  ;;  %v18628_v46 = vadd.f32 %v13445_v50, %v9887_v43 }
 0x555   : > { %v13337_v5 = vpop.f32.mrf.mxu1  ;;  %v13452_v47 = vpop.f32.mrf.mxu0 }
 0x556   : > { %v9892_v37 = vadd.f32 %v13336_v38, %v18481_v18 }
 0x557   : > { %v13338_v4 = vpop.f32.mrf.mxu1  ;;  %v13453_v14 = vpop.f32.mrf.mxu0 }
 0x558   : > { %v13339_v56 = vadd.f32 %v13338_v4, %v13337_v5  ;;  %v13454_v6 = vadd.f32 %v13453_v14, %v13452_v47  ;;  %v18631_v26 = vadd.f32 %v13448_v39, %v9892_v37 }
 0x559   : > { %v13340_v17 = vpop.f32.mrf.mxu1  ;;  %v13455_v41 = vpop.f32.mrf.mxu0 }
 0x55a   : > { %v9895_v8 = vadd.f32 %v13339_v56, %v18486_v23 }
 0x55b   : > { %v13341_v22 = vpop.f32.mrf.mxu1  ;;  %v13456_v31 = vpop.f32.mrf.mxu0 }
 0x55c   : > { %v13342_v11 = vadd.f32 %v13341_v22, %v13340_v17  ;;  %v13457_v42 = vadd.f32 %v13456_v31, %v13455_v41  ;;  %v18634_v34 = vadd.f32 %v13451_v15, %v9895_v8  ;;  %v13999_v8 = vmov 1983009808  }
 0x55d   : > { %v13343_v36 = vpop.f32.mrf.mxu1  ;;  %v13458_v50 = vpop.f32.mrf.mxu0  ;;  %v10643_v22 = vunpack.c.l.s4 %v13999_v8  ;;  %v10645_v31 = vlaneseq }
 0x55e   : > { %v9900_v18 = vadd.f32 %v13342_v11, %v18495_v25 }
 0x55f   : > { %v13344_v9 = vpop.f32.mrf.mxu1  ;;  %v13459_v10 = vpop.f32.mrf.mxu0 }
 0x560   : > { %v13345_v40 = vadd.f32 %v13344_v9, %v13343_v36  ;;  %v13460_v33 = vadd.f32 %v13459_v10, %v13458_v50  ;;  %v18637_v21 = vadd.f32 %v13454_v6, %v9900_v18  ;;  %v18651_v18 = vld [vmem:[%s18956_s6] ss:$0 sm:$0xff] }
 0x561   : > { %v13346_v60 = vpop.f32.mrf.mxu1  ;;  %v13461_v39 = vpop.f32.mrf.mxu0 }
 0x562   : > { %v9903_v23 = vadd.f32 %v13345_v40, %v18503_v62  ;;  %v10646_v40 = vshrl.u32 %v10645_v31, 7 }
 0x563   : > { %v13347_v28 = vpop.f32.mrf.mxu1  ;;  %v13462_v3 = vpop.f32.mrf.mxu0 }
 0x564   : > { %v13348_v43 = vadd.f32 %v13347_v28, %v13346_v60  ;;  %v13463_v44 = vadd.f32 %v13462_v3, %v13461_v39  ;;  %v18640_v54 = vadd.f32 %v13457_v42, %v9903_v23 }
 0x565   : > { %v13349_v38 = vpop.f32.mrf.mxu1  ;;  %v13464_v15 = vpop.f32.mrf.mxu0 }
 0x566   : > { %v9908_v25 = vadd.f32 %v13348_v43, %v18545_v30 }
 0x567   : > { %v13350_v5 = vpop.f32.mrf.mxu1  ;;  %v13465_v47 = vpop.f32.mrf.mxu0 }
 0x568   : > { %v13351_v37 = vadd.f32 %v13350_v5, %v13349_v38  ;;  %v13466_v4 = vadd.f32 %v13465_v47, %v13464_v15  ;;  %v18643_v14 = vadd.f32 %v13460_v33, %v9908_v25 }
 0x569   : > { %v13352_v56 = vpop.f32.mrf.mxu1  ;;  %v13467_v6 = vpop.f32.mrf.mxu0 }
 0x56a   : > { %19414 = vst [vmem:[#allocation42_spill] sm:$0xff] %v18643_v14  ;;  %v9911_v62 = vadd.f32 %v13351_v37, %v18550_v20  ;;  %v10644_v20 = vunpack.c.0.s8 %v10643_v22 }
 0x56b   : > { %v13353_v17 = vpop.f32.mrf.mxu1  ;;  %v13468_v41 = vpop.f32.mrf.mxu0 }
 0x56c   : > { %v13354_v11 = vadd.f32 %v13353_v17, %v13352_v56  ;;  %v13469_v42 = vadd.f32 %v13468_v41, %v13467_v6  ;;  %v18646_v36 = vadd.f32 %v13463_v44, %v9911_v62  ;;  %v18660_v15 = vsub.s32 %v10644_v20, %v10646_v40 }
 0x56d   : > { %v13355_v30 = vpop.f32.mrf.mxu1  ;;  %v13601_v50 = vpop.f32.mrf.mxu0 }
 0x56e   : > { %19415 = vst [vmem:[#allocation41_spill] sm:$0xff] %v18646_v36  ;;  %v9916_v9 = vadd.f32 %v13354_v11, %v18553_v58  ;;  %v10427_v39 = vadd.f32 %v13601_v50, %v18651_v18 }
 0x56f   : > { %v13356_v10 = vpop.f32.mrf.mxu1  ;;  %v10418_v33 = vpop.f32.mrf.mxu0 }
 0x570   : > { %v13357_v60 = vadd.f32 %v13356_v10, %v13355_v30  ;;  %v18655_v23 = vadd.f32 %v13466_v4, %v9916_v9  ;;  %v10419_v38 = vadd.f32 %v18651_v18, %v10418_v33 }
 0x571   : > { %v13567_v28 = vpop.f32.mrf.mxu1  ;;  %v13602_v3 = vpop.f32.mrf.mxu0 }
 0x572   : > { %v9919_v43 = vadd.f32 %v13357_v60, %v18556_v35  ;;  %v10126_v44 = vadd.f32 %v13567_v28, %v18565_v63  ;;  %v10430_v37 = vadd.f32 %v13602_v3, %v18651_v18 }
 0x573   : > { %v10117_v58 = vpop.f32.mrf.mxu1  ;;  %v10421_v25 = vpop.f32.mrf.mxu0 }
 0x574   : > { %v10547_v5 = vadd.f32 %v10427_v39, %v10126_v44  ;;  %v10118_v47 = vadd.f32 %v10117_v58, %v18559_v12  ;;  %v18664_v56 = vadd.f32 %v13469_v42, %v9919_v43  ;;  %v10422_v63 = vadd.f32 %v18651_v18, %v10421_v25 }
 0x575   : > { %v13568_v4 = vpop.f32.mrf.mxu1  ;;  %v13605_v6 = vpop.f32.mrf.mxu0  ;;  %v18669_v12 = vsub.s32 0, %v10646_v40 }
 0x576   : > { %19416 = vst [vmem:[#allocation22_spill] sm:$0xff] %v18664_v56  ;;  %v10579_v62 = vmul.f32 0.25, %v10547_v5  ;;  %v10545_v17 = vadd.f32 %v10419_v38, %v10118_v47  ;;  %v10129_v35 = vadd.f32 %v13568_v4, %v18568_v55  ;;  %v10443_v50 = vadd.f32 %v13605_v6, %v18651_v18 }
 0x577   : > { %v10120_v41 = vpop.f32.mrf.mxu1  ;;  %v10434_v8 = vpop.f32.mrf.mxu0 }
 0x578   : > { %v10675_v22 = vcombine.high %v10579_v62, %v10579_v62  ;;  %v10682_v31 = vrot.slane %v10579_v62, %v18660_v15  ;;  %v10577_v11 = vmul.f32 0.25, %v10545_v17  ;;  %v10548_v30 = vadd.f32 %v10430_v37, %v10129_v35 }
 0x579   : > { %v10121_v42 = vadd.f32 %v10120_v41, %v18562_v51  ;;  %v13571_v9 = vpop.f32.mrf.mxu1  ;;  %v18674_v10 = vadd.f32 %v18651_v18, %v10434_v8 }
 0x57a   : > { %v10689_v55 = vrot.slane %v10675_v22, %v18660_v15  ;;  %v10690_v20 = vcombine.high %v10682_v31, %v10682_v31  ;;  %v12847_v33 = vrot.slane %v10682_v31, 9  ;;  %v10641_v60 = vcombine.high %v10577_v11, %v10577_v11 }
 0x57b   : > { %v10648_v39 = vrot.slane %v10577_v11, %v18660_v15  ;;  %v10580_v28 = vmul.f32 0.25, %v10548_v30  ;;  %v10546_v3 = vadd.f32 %v10422_v63, %v10121_v42  ;;  %v10142_v40 = vadd.f32 %v13571_v9, %v18577_v16  ;;  %v10133_v56 = vpop.f32.mrf.mxu1 }
 0x57c   : > { %v10691_v43 = vcombine.high %v10689_v55, %v10689_v55  ;;  %v12848_v44 = vrot.slane %v10690_v20, 9  ;;  %v12849_v51 = vrot.slane %v10689_v55, 9  ;;  %v11705_v38 = vadd.f32 %v12847_v33, %v10682_v31 }
 0x57d   : > { %v10655_v58 = vrot.slane %v10641_v60, %v18660_v15  ;;  %v10656_v25 = vcombine.high %v10648_v39, %v10648_v39  ;;  %v12839_v5 = vrot.slane %v10648_v39, 9  ;;  %v10692_v47 = vcombine.high %v10580_v28, %v10580_v28 }
 0x57e   : > { %v12850_v37 = vrot.slane %v10691_v43, 9  ;;  %v11706_v4 = vadd.f32 %v12848_v44, %v10690_v20  ;;  %v11707_v6 = vadd.f32 %v12849_v51, %v10689_v55  ;;  %v10699_v62 = vrot.slane %v10580_v28, %v18660_v15 }
 0x57f   : > { %v10657_v17 = vcombine.high %v10655_v58, %v10655_v58  ;;  %v12840_v35 = vrot.slane %v10656_v25, 9  ;;  %v12841_v16 = vrot.slane %v10655_v58, 9  ;;  %v11697_v63 = vadd.f32 %v12839_v5, %v10648_v39 }
 0x580   : > { %v11708_v41 = vadd.f32 %v12850_v37, %v10691_v43  ;;  %v10706_v8 = vrot.slane %v10692_v47, %v18660_v15  ;;  %v10707_v22 = vcombine.high %v10699_v62, %v10699_v62  ;;  %v12851_v31 = vrot.slane %v10699_v62, 9  ;;  %v13606_v37 = vpop.f32.mrf.mxu0 }
 0x581   : > { %v12842_v11 = vrot.slane %v10657_v17, 9  ;;  %v11698_v30 = vadd.f32 %v12840_v35, %v10656_v25  ;;  %v11699_v42 = vadd.f32 %v12841_v16, %v10655_v58  ;;  %v11825_v9 = vadd.f32 %v11705_v38, %v11697_v63 }
 0x582   : > { %v10708_v33 = vcombine.high %v10706_v8, %v10706_v8  ;;  %v12852_v60 = vrot.slane %v10707_v22, 9  ;;  %v12853_v20 = vrot.slane %v10706_v8, 9  ;;  %v11709_v55 = vadd.f32 %v12851_v31, %v10699_v62 }
 0x583   : > { %v11700_v44 = vadd.f32 %v12842_v11, %v10657_v17  ;;  %v11826_v28 = vadd.f32 %v11706_v4, %v11698_v30  ;;  %v11827_v51 = vadd.f32 %v11707_v6, %v11699_v42  ;;  %v11956_v36 = vrot.slane %v11825_v9, %v18669_v12 }
 0x584   : > { %v12854_v39 = vrot.slane %v10708_v33, 9  ;;  %v11710_v43 = vadd.f32 %v12852_v60, %v10707_v22  ;;  %v11711_v5 = vadd.f32 %v12853_v20, %v10706_v8  ;;  %v10578_v47 = vmul.f32 0.25, %v10546_v3  ;;  %v13572_v20 = vpop.f32.mrf.mxu1 }
 0x585   : > { %v11828_v14 = vadd.f32 %v11708_v41, %v11700_v44  ;;  %v11960_v25 = vrot.slane %v11826_v28, %v18669_v12  ;;  %v11964_v38 = vrot.slane %v11827_v51, %v18669_v12  ;;  %v10551_v58 = vadd.f32 %v10443_v50, %v10142_v40 }
 0x586   : > { %v11712_v35 = vadd.f32 %v12854_v39, %v10708_v33  ;;  %v10658_v62 = vcombine.high %v10578_v47, %v10578_v47  ;;  %v10665_v4 = vrot.slane %v10578_v47, %v18660_v15  ;;  %v10134_v6 = vadd.f32 %v10133_v56, %v18571_v19  ;;  %v10437_v47 = vpop.f32.mrf.mxu0 }
 0x587   : > { %v11968_v17 = vrot.slane %v11828_v14, %v18669_v12  ;;  %v12210_v16 = vsel %vm12209_vm10, %v11960_v25, %v11956_v36  ;;  %v10583_v3 = vmul.f32 0.25, %v10551_v58  ;;  %v10446_v63 = vadd.f32 %v13606_v37, %v18651_v18 }
 0x588   : > { %v12212_v41 = vsel %vm12211_vm14, %v11964_v38, %v12210_v16  ;;  %v10672_v8 = vrot.slane %v10658_v62, %v18660_v15  ;;  %v10673_v22 = vcombine.high %v10665_v4, %v10665_v4  ;;  %v12843_v50 = vrot.slane %v10665_v4, 9 }
 0x589   : > { %v12214_v40 = vsel %vm12213_vm15, %v11968_v17, %v12212_v41  ;;  %v10743_v31 = vcombine.high %v10583_v3, %v10583_v3  ;;  %v10750_v19 = vrot.slane %v10583_v3, %v18660_v15  ;;  %v10549_v14 = vadd.f32 %v18674_v10, %v10134_v6 }
 0x58a   : > { %v10674_v36 = vcombine.high %v10672_v8, %v10672_v8  ;;  %v12844_v56 = vrot.slane %v10673_v22, 9  ;;  %v12845_v11 = vrot.slane %v10672_v8, 9  ;;  %v11701_v30 = vadd.f32 %v12843_v50, %v10665_v4  ;;  %v10136_v50 = vpop.f32.mrf.mxu1 }
 0x58b   : > { %v10757_v42 = vrot.slane %v10743_v31, %v18660_v15  ;;  %v10758_v9 = vcombine.high %v10750_v19, %v10750_v19  ;;  %v12863_v33 = vrot.slane %v10750_v19, 9  ;;  %v10581_v60 = vmul.f32 0.25, %v10549_v14  ;;  %v13609_v14 = vpop.f32.mrf.mxu0 }
 0x58c   : > { %v12846_v44 = vrot.slane %v10674_v36, 9  ;;  %v11702_v28 = vadd.f32 %v12844_v56, %v10673_v22  ;;  %v11703_v51 = vadd.f32 %v12845_v11, %v10672_v8  ;;  %v11829_v39 = vadd.f32 %v11709_v55, %v11701_v30 }
 0x58d   : > { %v10759_v37 = vcombine.high %v10757_v42, %v10757_v42  ;;  %v12864_v25 = vrot.slane %v10758_v9, 9  ;;  %v12865_v10 = vrot.slane %v10757_v42, 9  ;;  %v11721_v38 = vadd.f32 %v12863_v33, %v10750_v19 }
 0x58e   : > { %v11704_v58 = vadd.f32 %v12846_v44, %v10674_v36  ;;  %v11830_v62 = vadd.f32 %v11710_v43, %v11702_v28  ;;  %v11831_v4 = vadd.f32 %v11711_v5, %v11703_v51  ;;  %v11972_v6 = vrot.slane %v11829_v39, %v18669_v12  ;;  %v10450_v51 = vpop.f32.mrf.mxu0 }
 0x58f   : > { %v12866_v17 = vrot.slane %v10759_v37, 9  ;;  %v11722_v16 = vadd.f32 %v12864_v25, %v10758_v9  ;;  %v11723_v3 = vadd.f32 %v12865_v10, %v10757_v42  ;;  %v10709_v41 = vcombine.high %v10581_v60, %v10581_v60 }
 0x590   : > { %v11832_v31 = vadd.f32 %v11712_v35, %v11704_v58  ;;  %v11976_v8 = vrot.slane %v11830_v62, %v18669_v12  ;;  %v11980_v55 = vrot.slane %v11831_v4, %v18669_v12  ;;  %v12216_v22 = vsel %vm12215_vm4, %v11972_v6, %v12214_v40 }
 0x591   : > { %v11724_v19 = vadd.f32 %v12866_v17, %v10759_v37  ;;  %v10716_v43 = vrot.slane %v10581_v60, %v18660_v15  ;;  %v10723_v5 = vrot.slane %v10709_v41, %v18660_v15  ;;  %v10145_v36 = vadd.f32 %v13572_v20, %v18580_v7  ;;  %v13575_v7 = vpop.f32.mrf.mxu1 }
 0x592   : > { %v11984_v35 = vrot.slane %v11832_v31, %v18669_v12  ;;  %v12218_v56 = vsel %vm12217_vm9, %v11976_v8, %v12216_v22  ;;  %v10438_v40 = vadd.f32 %v18651_v18, %v10437_v47  ;;  %v10137_v11 = vadd.f32 %v10136_v50, %v18574_v61 }
 0x593   : > { %v12220_v30 = vsel %vm12219_vm12, %v11980_v55, %v12218_v56  ;;  %v10724_v42 = vcombine.high %v10716_v43, %v10716_v43  ;;  %v10725_v9 = vcombine.high %v10723_v5, %v10723_v5  ;;  %v12855_v33 = vrot.slane %v10716_v43, 9 }
 0x594   : > { %v12222_v60 = vsel %vm12221_vm13, %v11984_v35, %v12220_v30  ;;  %v12857_v20 = vrot.slane %v10723_v5, 9  ;;  %v10552_v44 = vadd.f32 %v10446_v63, %v10145_v36  ;;  %v10550_v28 = vadd.f32 %v10438_v40, %v10137_v11  ;;  %v10149_v11 = vpop.f32.mrf.mxu1 }
 0x595   : > { %12281 = vst.msk [vmem:[%s18707_s27] sm:$0xff] %vm12280_vm11, %v12222_v60  ;;  %v12856_v39 = vrot.slane %v10724_v42, 9  ;;  %v12858_v37 = vrot.slane %v10725_v9, 9  ;;  %v11713_v25 = vadd.f32 %v12855_v33, %v10716_v43  ;;  %v10459_v47 = vadd.f32 %v13609_v14, %v18651_v18 }
 0x596   : > { %v11715_v61 = vadd.f32 %v12857_v20, %v10723_v5  ;;  %v10584_v10 = vmul.f32 0.25, %v10552_v44  ;;  %v10582_v58 = vmul.f32 0.25, %v10550_v28  ;;  %v10158_v62 = vadd.f32 %v13575_v7, %v18589_v49 }
 0x597   : > { %v11714_v4 = vadd.f32 %v12856_v39, %v10724_v42  ;;  %v11716_v6 = vadd.f32 %v12858_v37, %v10725_v9  ;;  %v11833_v17 = vadd.f32 %v11721_v38, %v11713_v25  ;;  %v10451_v41 = vadd.f32 %v18651_v18, %v10450_v51  ;;  %v13610_v39 = vpop.f32.mrf.mxu0 }
 0x598   : > { %v11835_v63 = vadd.f32 %v11723_v3, %v11715_v61  ;;  %v10760_v50 = vcombine.high %v10584_v10, %v10584_v10  ;;  %v10767_v31 = vrot.slane %v10584_v10, %v18660_v15  ;;  %v10726_v8 = vcombine.high %v10582_v58, %v10582_v58 }
 0x599   : > { %v11834_v55 = vadd.f32 %v11722_v16, %v11714_v4  ;;  %v11836_v22 = vadd.f32 %v11724_v19, %v11716_v6  ;;  %v11988_v43 = vrot.slane %v11833_v17, %v18669_v12  ;;  %v10733_v14 = vrot.slane %v10582_v58, %v18660_v15  ;;  %v13576_v58 = vpop.f32.mrf.mxu1 }
 0x59a   : > { %v11996_v5 = vrot.slane %v11835_v63, %v18669_v12  ;;  %v10774_v49 = vrot.slane %v10760_v50, %v18660_v15  ;;  %v10775_v36 = vcombine.high %v10767_v31, %v10767_v31  ;;  %v12867_v35 = vrot.slane %v10767_v31, 9 }
 0x59b   : > { %v11992_v38 = vrot.slane %v11834_v55, %v18669_v12  ;;  %v12000_v3 = vrot.slane %v11836_v22, %v18669_v12  ;;  %v10740_v56 = vrot.slane %v10726_v8, %v18660_v15  ;;  %v10741_v40 = vcombine.high %v10733_v14, %v10733_v14 }
 0x59c   : > { %v10776_v16 = vcombine.high %v10774_v49, %v10774_v49  ;;  %v12868_v19 = vrot.slane %v10775_v36, 9  ;;  %v12869_v30 = vrot.slane %v10774_v49, 9  ;;  %v11725_v42 = vadd.f32 %v12867_v35, %v10767_v31 }
 0x59d   : > { %v12223_v9 = vsel %vm12209_vm10, %v11992_v38, %v11988_v43  ;;  %v10742_v33 = vcombine.high %v10740_v56, %v10740_v56  ;;  %v12859_v7 = vrot.slane %v10733_v14, 9  ;;  %v12860_v60 = vrot.slane %v10741_v40, 9 }
 0x59e   : > { %v12224_v20 = vsel %vm12211_vm14, %v11996_v5, %v12223_v9  ;;  %v12870_v44 = vrot.slane %v10776_v16, 9  ;;  %v11726_v28 = vadd.f32 %v12868_v19, %v10775_v36  ;;  %v11727_v51 = vadd.f32 %v12869_v30, %v10774_v49  ;;  %v10453_v36 = vpop.f32.mrf.mxu0 }
 0x59f   : > { %v12861_v37 = vrot.slane %v10740_v56, 9  ;;  %v12862_v25 = vrot.slane %v10742_v33, 9  ;;  %v11717_v61 = vadd.f32 %v12859_v7, %v10733_v14  ;;  %v11718_v10 = vadd.f32 %v12860_v60, %v10741_v40 }
 0x5a0   : > { %v11728_v4 = vadd.f32 %v12870_v44, %v10776_v16  ;;  %v12225_v6 = vsel %vm12213_vm15, %v12000_v3, %v12224_v20  ;;  %v10555_v17 = vadd.f32 %v10459_v47, %v10158_v62  ;;  %v10150_v63 = vadd.f32 %v10149_v11, %v18583_v57  ;;  %v10152_v47 = vpop.f32.mrf.mxu1  ;;  %v13613_v44 = vpop.f32.mrf.mxu0 }
 0x5a1   : > { %v11719_v50 = vadd.f32 %v12861_v37, %v10740_v56  ;;  %v11720_v31 = vadd.f32 %v12862_v25, %v10742_v33  ;;  %v11837_v8 = vadd.f32 %v11725_v42, %v11717_v61  ;;  %v11838_v55 = vadd.f32 %v11726_v28, %v11718_v10 }
 0x5a2   : > { %v10587_v22 = vmul.f32 0.25, %v10555_v17  ;;  %v10553_v43 = vadd.f32 %v10451_v41, %v10150_v63  ;;  %v10462_v5 = vadd.f32 %v13610_v39, %v18651_v18  ;;  %v10161_v49 = vadd.f32 %v13576_v58, %v18592_v13  ;;  %v13579_v28 = vpop.f32.mrf.mxu1 }
 0x5a3   : > { %v11839_v14 = vadd.f32 %v11727_v51, %v11719_v50  ;;  %v11840_v35 = vadd.f32 %v11728_v4, %v11720_v31  ;;  %v12004_v38 = vrot.slane %v11837_v8, %v18669_v12  ;;  %v12008_v3 = vrot.slane %v11838_v55, %v18669_v12 }
 0x5a4   : > { %v10811_v62 = vcombine.high %v10587_v22, %v10587_v22  ;;  %v10818_v57 = vrot.slane %v10587_v22, %v18660_v15  ;;  %v10585_v56 = vmul.f32 0.25, %v10553_v43  ;;  %v10556_v40 = vadd.f32 %v10462_v5, %v10161_v49  ;;  %v10466_v43 = vpop.f32.mrf.mxu0  ;;  %v10165_v5 = vpop.f32.mrf.mxu1 }
 0x5a5   : > { %v12012_v11 = vrot.slane %v11839_v14, %v18669_v12  ;;  %v12016_v41 = vrot.slane %v11840_v35, %v18669_v12  ;;  %v12226_v16 = vsel %vm12215_vm4, %v12004_v38, %v12225_v6  ;;  %v10454_v13 = vadd.f32 %v18651_v18, %v10453_v36 }
 0x5a6   : > { %v12227_v19 = vsel %vm12217_vm9, %v12008_v3, %v12226_v16  ;;  %v10825_v30 = vrot.slane %v10811_v62, %v18660_v15  ;;  %v10826_v42 = vcombine.high %v10818_v57, %v10818_v57  ;;  %v12879_v9 = vrot.slane %v10818_v57, 9 }
 0x5a7   : > { %v12228_v33 = vsel %vm12219_vm12, %v12012_v11, %v12227_v19  ;;  %v10777_v7 = vcombine.high %v10585_v56, %v10585_v56  ;;  %v10784_v60 = vrot.slane %v10585_v56, %v18660_v15  ;;  %v10588_v20 = vmul.f32 0.25, %v10556_v40 }
 0x5a8   : > { %v12229_v51 = vsel %vm12221_vm13, %v12016_v41, %v12228_v33  ;;  %v10827_v39 = vcombine.high %v10825_v30, %v10825_v30  ;;  %v12880_v37 = vrot.slane %v10826_v42, 9  ;;  %v12881_v25 = vrot.slane %v10825_v30, 9  ;;  %v13580_v33 = vpop.f32.mrf.mxu1 }
 0x5a9   : > { %12282 = vst.msk [vmem:[%s18707_s27 + $0x8] sm:$0xff] %vm12280_vm11, %v12229_v51  ;;  %v11737_v61 = vadd.f32 %v12879_v9, %v10818_v57  ;;  %v10791_v10 = vrot.slane %v10777_v7, %v18660_v15  ;;  %v10792_v58 = vcombine.high %v10784_v60, %v10784_v60  ;;  %v12871_v4 = vrot.slane %v10784_v60, 9  ;;  %v13614_v9 = vpop.f32.mrf.mxu0 }
 0x5aa   : > { %v12882_v6 = vrot.slane %v10827_v39, 9  ;;  %v11738_v17 = vadd.f32 %v12880_v37, %v10826_v42  ;;  %v11739_v63 = vadd.f32 %v12881_v25, %v10825_v30  ;;  %v10828_v50 = vcombine.high %v10588_v20, %v10588_v20 }
 0x5ab   : > { %v10793_v31 = vcombine.high %v10791_v10, %v10791_v10  ;;  %v12872_v8 = vrot.slane %v10792_v58, 9  ;;  %v12873_v55 = vrot.slane %v10791_v10, 9  ;;  %v11729_v22 = vadd.f32 %v12871_v4, %v10784_v60 }
 0x5ac   : > { %v11740_v49 = vadd.f32 %v12882_v6, %v10827_v39  ;;  %v10835_v36 = vrot.slane %v10588_v20, %v18660_v15  ;;  %v10842_v14 = vrot.slane %v10828_v50, %v18660_v15  ;;  %v10153_v35 = vadd.f32 %v10152_v47, %v18586_v1  ;;  %v10469_v50 = vpop.f32.mrf.mxu0 }
 0x5ad   : > { %v12874_v38 = vrot.slane %v10793_v31, 9  ;;  %v11730_v3 = vadd.f32 %v12872_v8, %v10792_v58  ;;  %v11731_v62 = vadd.f32 %v12873_v55, %v10791_v10  ;;  %v11841_v57 = vadd.f32 %v11737_v61, %v11729_v22 }
 0x5ae   : > { %v10843_v56 = vcombine.high %v10835_v36, %v10835_v36  ;;  %v10844_v40 = vcombine.high %v10842_v14, %v10842_v14  ;;  %v12883_v11 = vrot.slane %v10835_v36, 9  ;;  %v12885_v41 = vrot.slane %v10842_v14, 9 }
 0x5af   : > { %v11732_v16 = vadd.f32 %v12874_v38, %v10793_v31  ;;  %v11842_v19 = vadd.f32 %v11738_v17, %v11730_v3  ;;  %v11843_v30 = vadd.f32 %v11739_v63, %v11731_v62  ;;  %v12020_v42 = vrot.slane %v11841_v57, %v18669_v12  ;;  %v10168_v31 = vpop.f32.mrf.mxu1 }
 0x5b0   : > { %v12884_v7 = vrot.slane %v10843_v56, 9  ;;  %v12886_v60 = vrot.slane %v10844_v40, 9  ;;  %v11741_v20 = vadd.f32 %v12883_v11, %v10835_v36  ;;  %v11743_v51 = vadd.f32 %v12885_v41, %v10842_v14 }
 0x5b1   : > { %v11844_v1 = vadd.f32 %v11740_v49, %v11732_v16  ;;  %v12024_v47 = vrot.slane %v11842_v19, %v18669_v12  ;;  %v12028_v39 = vrot.slane %v11843_v30, %v18669_v12  ;;  %v10554_v37 = vadd.f32 %v10454_v13, %v10153_v35 }
 0x5b2   : > { %v11742_v25 = vadd.f32 %v12884_v7, %v10843_v56  ;;  %v11744_v61 = vadd.f32 %v12886_v60, %v10844_v40  ;;  %v10475_v10 = vadd.f32 %v13613_v44, %v18651_v18  ;;  %v10174_v58 = vadd.f32 %v13579_v28, %v18601_v52 }
 0x5b3   : > { %v12032_v4 = vrot.slane %v11844_v1, %v18669_v12  ;;  %v12230_v6 = vsel %vm12209_vm10, %v12024_v47, %v12020_v42  ;;  %v10586_v17 = vmul.f32 0.25, %v10554_v37  ;;  %v10467_v63 = vadd.f32 %v18651_v18, %v10466_v43 }
 0x5b4   : > { %v12231_v8 = vsel %vm12211_vm14, %v12028_v39, %v12230_v6  ;;  %v10559_v55 = vadd.f32 %v10475_v10, %v10174_v58  ;;  %v10166_v13 = vadd.f32 %v10165_v5, %v18595_v2  ;;  %v10478_v22 = vadd.f32 %v13614_v9, %v18651_v18 }
 0x5b5   : > { %v10794_v49 = vcombine.high %v10586_v17, %v10586_v17  ;;  %v10801_v44 = vrot.slane %v10586_v17, %v18660_v15  ;;  %v12232_v52 = vsel %vm12213_vm15, %v12032_v4, %v12231_v8  ;;  %v10177_v28 = vadd.f32 %v13580_v33, %v18604_v48 }
 0x5b6   : > { %v10591_v36 = vmul.f32 0.25, %v10559_v55  ;;  %v10557_v14 = vadd.f32 %v10467_v63, %v10166_v13  ;;  %v10470_v43 = vadd.f32 %v18651_v18, %v10469_v50  ;;  %v10169_v35 = vadd.f32 %v10168_v31, %v18598_v32 }
 0x5b7   : > { %v10808_v38 = vrot.slane %v10794_v49, %v18660_v15  ;;  %v10809_v3 = vcombine.high %v10801_v44, %v10801_v44  ;;  %v12875_v62 = vrot.slane %v10801_v44, 9  ;;  %v10560_v2 = vadd.f32 %v10478_v22, %v10177_v28 }
 0x5b8   : > { %v10879_v5 = vcombine.high %v10591_v36, %v10591_v36  ;;  %v10886_v57 = vrot.slane %v10591_v36, %v18660_v15  ;;  %v10589_v56 = vmul.f32 0.25, %v10557_v14  ;;  %v10558_v40 = vadd.f32 %v10470_v43, %v10169_v35  ;;  %v13617_v43 = vpop.f32.mrf.mxu0 }
 0x5b9   : > { %v10810_v11 = vcombine.high %v10808_v38, %v10808_v38  ;;  %v12876_v41 = vrot.slane %v10809_v3, 9  ;;  %v12877_v16 = vrot.slane %v10808_v38, 9  ;;  %v11733_v48 = vadd.f32 %v12875_v62, %v10801_v44 }
 0x5ba   : > { %v10893_v19 = vrot.slane %v10879_v5, %v18660_v15  ;;  %v10894_v30 = vcombine.high %v10886_v57, %v10886_v57  ;;  %v12895_v42 = vrot.slane %v10886_v57, 9  ;;  %v10845_v9 = vcombine.high %v10589_v56, %v10589_v56 }
 0x5bb   : > { %v12878_v32 = vrot.slane %v10810_v11, 9  ;;  %v11734_v33 = vadd.f32 %v12876_v41, %v10809_v3  ;;  %v11735_v7 = vadd.f32 %v12877_v16, %v10808_v38  ;;  %v11845_v60 = vadd.f32 %v11741_v20, %v11733_v48 }
 0x5bc   : > { %v10895_v1 = vcombine.high %v10893_v19, %v10893_v19  ;;  %v12896_v47 = vrot.slane %v10894_v30, 9  ;;  %v12897_v39 = vrot.slane %v10893_v19, 9  ;;  %v11753_v37 = vadd.f32 %v12895_v42, %v10886_v57  ;;  %v10482_v42 = vpop.f32.mrf.mxu0 }
 0x5bd   : > { %v11736_v10 = vadd.f32 %v12878_v32, %v10810_v11  ;;  %v11846_v58 = vadd.f32 %v11742_v25, %v11734_v33  ;;  %v11847_v4 = vadd.f32 %v11743_v51, %v11735_v7  ;;  %v12036_v6 = vrot.slane %v11845_v60, %v18669_v12 }
 0x5be   : > { %v12898_v17 = vrot.slane %v10895_v1, 9  ;;  %v11754_v63 = vadd.f32 %v12896_v47, %v10894_v30  ;;  %v11755_v50 = vadd.f32 %v12897_v39, %v10893_v19  ;;  %v10852_v31 = vrot.slane %v10589_v56, %v18660_v15  ;;  %v13583_v56 = vpop.f32.mrf.mxu1 }
 0x5bf   : > { %v11848_v8 = vadd.f32 %v11744_v61, %v11736_v10  ;;  %v12040_v55 = vrot.slane %v11846_v58, %v18669_v12  ;;  %v12044_v13 = vrot.slane %v11847_v4, %v18669_v12  ;;  %v12233_v20 = vsel %vm12215_vm4, %v12036_v6, %v12232_v52 }
 0x5c0   : > { %v11756_v22 = vadd.f32 %v12898_v17, %v10895_v1  ;;  %v10859_v49 = vrot.slane %v10845_v9, %v18660_v15  ;;  %v10860_v44 = vcombine.high %v10852_v31, %v10852_v31  ;;  %v12887_v51 = vrot.slane %v10852_v31, 9  ;;  %v10181_v10 = vpop.f32.mrf.mxu1 }
 0x5c1   : > { %v12048_v25 = vrot.slane %v11848_v8, %v18669_v12  ;;  %v12234_v28 = vsel %vm12217_vm9, %v12040_v55, %v12233_v20  ;;  %v10592_v36 = vmul.f32 0.25, %v10560_v2  ;;  %v10590_v14 = vmul.f32 0.25, %v10558_v40 }
 0x5c2   : > { %v12235_v61 = vsel %vm12219_vm12, %v12044_v13, %v12234_v28  ;;  %v10861_v35 = vcombine.high %v10859_v49, %v10859_v49  ;;  %v12888_v38 = vrot.slane %v10860_v44, 9  ;;  %v12889_v3 = vrot.slane %v10859_v49, 9  ;;  %v13584_v28 = vpop.f32.mrf.mxu1 }
 0x5c3   : > { %v12236_v52 = vsel %vm12221_vm13, %v12048_v25, %v12235_v61  ;;  %v11745_v62 = vadd.f32 %v12887_v51, %v10852_v31  ;;  %v10896_v5 = vcombine.high %v10592_v36, %v10592_v36  ;;  %v10903_v57 = vrot.slane %v10592_v36, %v18660_v15 }
 0x5c4   : > { %12283 = vst.msk [vmem:[%s18707_s27 + $0x10] sm:$0xff] %vm12280_vm11, %v12236_v52  ;;  %v12890_v11 = vrot.slane %v10861_v35, 9  ;;  %v11746_v41 = vadd.f32 %v12888_v38, %v10860_v44  ;;  %v11747_v16 = vadd.f32 %v12889_v3, %v10859_v49  ;;  %v10862_v2 = vcombine.high %v10590_v14, %v10590_v14 }
 0x5c5   : > { %v11849_v40 = vadd.f32 %v11753_v37, %v11745_v62  ;;  %v10910_v48 = vrot.slane %v10896_v5, %v18660_v15  ;;  %v10911_v19 = vcombine.high %v10903_v57, %v10903_v57  ;;  %v12899_v30 = vrot.slane %v10903_v57, 9 }
 0x5c6   : > { %v11748_v9 = vadd.f32 %v12890_v11, %v10861_v35  ;;  %v11850_v32 = vadd.f32 %v11754_v63, %v11746_v41  ;;  %v11851_v33 = vadd.f32 %v11755_v50, %v11747_v16  ;;  %v10869_v7 = vrot.slane %v10590_v14, %v18660_v15  ;;  %v13618_v50 = vpop.f32.mrf.mxu0 }
 0x5c7   : > { %v12052_v60 = vrot.slane %v11849_v40, %v18669_v12  ;;  %v10912_v1 = vcombine.high %v10910_v48, %v10910_v48  ;;  %v12900_v47 = vrot.slane %v10911_v19, 9  ;;  %v12901_v39 = vrot.slane %v10910_v48, 9 }
 0x5c8   : > { %v11852_v58 = vadd.f32 %v11756_v22, %v11748_v9  ;;  %v12056_v4 = vrot.slane %v11850_v32, %v18669_v12  ;;  %v12060_v37 = vrot.slane %v11851_v33, %v18669_v12  ;;  %v11757_v6 = vadd.f32 %v12899_v30, %v10903_v57  ;;  %v10485_v5 = vpop.f32.mrf.mxu0  ;;  %v10184_v30 = vpop.f32.mrf.mxu1 }
 0x5c9   : > { %v12902_v17 = vrot.slane %v10912_v1, 9  ;;  %v11758_v31 = vadd.f32 %v12900_v47, %v10911_v19  ;;  %v11759_v8 = vadd.f32 %v12901_v39, %v10910_v48  ;;  %v10876_v63 = vrot.slane %v10862_v2, %v18660_v15 }
 0x5ca   : > { %v12064_v55 = vrot.slane %v11852_v58, %v18669_v12  ;;  %v12237_v13 = vsel %vm12209_vm10, %v12056_v4, %v12052_v60  ;;  %v10877_v20 = vcombine.high %v10869_v7, %v10869_v7  ;;  %v12891_v49 = vrot.slane %v10869_v7, 9 }
 0x5cb   : > { %v12238_v44 = vsel %vm12211_vm14, %v12060_v37, %v12237_v13  ;;  %v11760_v22 = vadd.f32 %v12902_v17, %v10912_v1  ;;  %v10878_v51 = vcombine.high %v10876_v63, %v10876_v63  ;;  %v12893_v25 = vrot.slane %v10876_v63, 9 }
 0x5cc   : > { %v12892_v36 = vrot.slane %v10877_v20, 9  ;;  %v11749_v14 = vadd.f32 %v12891_v49, %v10869_v7  ;;  %v12239_v61 = vsel %vm12213_vm15, %v12064_v55, %v12238_v44  ;;  %v10491_v35 = vadd.f32 %v13617_v43, %v18651_v18 }
 0x5cd   : > { %v12894_v38 = vrot.slane %v10878_v51, 9  ;;  %v11751_v3 = vadd.f32 %v12893_v25, %v10876_v63  ;;  %v10190_v52 = vadd.f32 %v13583_v56, %v18613_v0  ;;  %v10483_v62 = vadd.f32 %v18651_v18, %v10482_v42 }
 0x5ce   : > { %v11750_v57 = vadd.f32 %v12892_v36, %v10877_v20  ;;  %v11853_v11 = vadd.f32 %v11757_v6, %v11749_v14  ;;  %v10182_v41 = vadd.f32 %v10181_v10, %v18607_v53  ;;  %v10494_v16 = vadd.f32 %v13618_v50, %v18651_v18 }
 0x5cf   : > { %v11752_v2 = vadd.f32 %v12894_v38, %v10878_v51  ;;  %v11855_v40 = vadd.f32 %v11759_v8, %v11751_v3  ;;  %v10563_v48 = vadd.f32 %v10491_v35, %v10190_v52  ;;  %v10193_v19 = vadd.f32 %v13584_v28, %v18616_v45 }
 0x5d0   : > { %v11854_v43 = vadd.f32 %v11758_v31, %v11750_v57  ;;  %v12068_v9 = vrot.slane %v11853_v11, %v18669_v12  ;;  %v10561_v32 = vadd.f32 %v10483_v62, %v10182_v41  ;;  %v10486_v0 = vadd.f32 %v18651_v18, %v10485_v5  ;;  %v13587_v41 = vpop.f32.mrf.mxu1 }
 0x5d1   : > { %v11856_v56 = vadd.f32 %v11760_v22, %v11752_v2  ;;  %v12076_v42 = vrot.slane %v11855_v40, %v18669_v12  ;;  %v10595_v33 = vmul.f32 0.25, %v10563_v48  ;;  %v10564_v7 = vadd.f32 %v10494_v16, %v10193_v19 }
 0x5d2   : > { %v12072_v53 = vrot.slane %v11854_v43, %v18669_v12  ;;  %v12240_v60 = vsel %vm12215_vm4, %v12068_v9, %v12239_v61  ;;  %v10593_v1 = vmul.f32 0.25, %v10561_v32  ;;  %v10185_v47 = vadd.f32 %v10184_v30, %v18610_v24  ;;  %v13621_v61 = vpop.f32.mrf.mxu0 }
 0x5d3   : > { %v12080_v45 = vrot.slane %v11856_v56, %v18669_v12  ;;  %v10947_v39 = vcombine.high %v10595_v33, %v10595_v33  ;;  %v10954_v10 = vrot.slane %v10595_v33, %v18660_v15  ;;  %v10596_v58 = vmul.f32 0.25, %v10564_v7 }
 0x5d4   : > { %v12241_v4 = vsel %vm12217_vm9, %v12072_v53, %v12240_v60  ;;  %v10913_v37 = vcombine.high %v10593_v1, %v10593_v1  ;;  %v10920_v6 = vrot.slane %v10593_v1, %v18660_v15  ;;  %v10562_v17 = vadd.f32 %v10486_v0, %v10185_v47  ;;  %v10498_v32 = vpop.f32.mrf.mxu0  ;;  %v10197_v47 = vpop.f32.mrf.mxu1 }
 0x5d5   : > { %v12242_v31 = vsel %vm12219_vm12, %v12076_v42, %v12241_v4  ;;  %v10961_v8 = vrot.slane %v10947_v39, %v18660_v15  ;;  %v10962_v63 = vcombine.high %v10954_v10, %v10954_v10  ;;  %v12911_v50 = vrot.slane %v10954_v10, 9 }
 0x5d6   : > { %v12243_v24 = vsel %vm12221_vm13, %v12080_v45, %v12242_v31  ;;  %v10927_v55 = vrot.slane %v10913_v37, %v18660_v15  ;;  %v10928_v13 = vcombine.high %v10920_v6, %v10920_v6  ;;  %v12903_v20 = vrot.slane %v10920_v6, 9  ;;  %v13622_v31 = vpop.f32.mrf.mxu0 }
 0x5d7   : > { %12284 = vst.msk [vmem:[%s18707_s27 + $0x18] sm:$0xff] %vm12280_vm11, %v12243_v24  ;;  %v10963_v49 = vcombine.high %v10961_v8, %v10961_v8  ;;  %v12912_v44 = vrot.slane %v10962_v63, 9  ;;  %v12913_v22 = vrot.slane %v10961_v8, 9  ;;  %v11769_v51 = vadd.f32 %v12911_v50, %v10954_v10 }
 0x5d8   : > { %v10929_v25 = vcombine.high %v10927_v55, %v10927_v55  ;;  %v12904_v28 = vrot.slane %v10928_v13, 9  ;;  %v12905_v36 = vrot.slane %v10927_v55, 9  ;;  %v11761_v14 = vadd.f32 %v12903_v20, %v10920_v6 }
 0x5d9   : > { %v12914_v35 = vrot.slane %v10963_v49, 9  ;;  %v11770_v38 = vadd.f32 %v12912_v44, %v10962_v63  ;;  %v11771_v3 = vadd.f32 %v12913_v22, %v10961_v8  ;;  %v10964_v52 = vcombine.high %v10596_v58, %v10596_v58  ;;  %v13588_v44 = vpop.f32.mrf.mxu1 }
 0x5da   : > { %v12906_v62 = vrot.slane %v10929_v25, 9  ;;  %v11762_v5 = vadd.f32 %v12904_v28, %v10928_v13  ;;  %v11763_v57 = vadd.f32 %v12905_v36, %v10927_v55  ;;  %v11857_v11 = vadd.f32 %v11769_v51, %v11761_v14 }
 0x5db   : > { %v11772_v16 = vadd.f32 %v12914_v35, %v10963_v49  ;;  %v10971_v2 = vrot.slane %v10596_v58, %v18660_v15  ;;  %v10978_v40 = vrot.slane %v10964_v52, %v18660_v15  ;;  %v10594_v48 = vmul.f32 0.25, %v10562_v17 }
 0x5dc   : > { %v11764_v19 = vadd.f32 %v12906_v62, %v10929_v25  ;;  %v11858_v30 = vadd.f32 %v11770_v38, %v11762_v5  ;;  %v11859_v43 = vadd.f32 %v11771_v3, %v11763_v57  ;;  %v12084_v9 = vrot.slane %v11857_v11, %v18669_v12  ;;  %v10501_v3 = vpop.f32.mrf.mxu0  ;;  %v18834_v62 = vld [vmem:[%s18956_s6] ss:$0 sm:$0xff] }
 0x5dd   : > { %v10979_v0 = vcombine.high %v10971_v2, %v10971_v2  ;;  %v10980_v56 = vcombine.high %v10978_v40, %v10978_v40  ;;  %v12915_v42 = vrot.slane %v10971_v2, 9  ;;  %v12917_v33 = vrot.slane %v10978_v40, 9 }
 0x5de   : > { %v11860_v7 = vadd.f32 %v11772_v16, %v11764_v19  ;;  %v12088_v53 = vrot.slane %v11858_v30, %v18669_v12  ;;  %v12092_v60 = vrot.slane %v11859_v43, %v18669_v12  ;;  %v10930_v1 = vcombine.high %v10594_v48, %v10594_v48 }
 0x5df   : > { %v12916_v45 = vrot.slane %v10979_v0, 9  ;;  %v12918_v39 = vrot.slane %v10980_v56, 9  ;;  %v11773_v10 = vadd.f32 %v12915_v42, %v10971_v2  ;;  %v11775_v58 = vadd.f32 %v12917_v33, %v10978_v40  ;;  %v13625_v42 = vpop.f32.mrf.mxu0 }
 0x5e0   : > { %v12096_v4 = vrot.slane %v11860_v7, %v18669_v12  ;;  %v12244_v37 = vsel %vm12209_vm10, %v12088_v53, %v12084_v9  ;;  %v10937_v6 = vrot.slane %v10594_v48, %v18660_v15  ;;  %v10944_v17 = vrot.slane %v10930_v1, %v18660_v15  ;;  %v10200_v9 = vpop.f32.mrf.mxu1 }
 0x5e1   : > { %v12245_v8 = vsel %vm12211_vm14, %v12092_v60, %v12244_v37  ;;  %v11774_v63 = vadd.f32 %v12916_v45, %v10979_v0  ;;  %v11776_v50 = vadd.f32 %v12918_v39, %v10980_v56  ;;  %v10507_v24 = vadd.f32 %v13621_v61, %v18651_v18 }
 0x5e2   : > { %v10945_v55 = vcombine.high %v10937_v6, %v10937_v6  ;;  %v10946_v13 = vcombine.high %v10944_v17, %v10944_v17  ;;  %v12907_v20 = vrot.slane %v10937_v6, 9  ;;  %v12909_v49 = vrot.slane %v10944_v17, 9 }
 0x5e3   : > { %v12246_v22 = vsel %vm12213_vm15, %v12096_v4, %v12245_v8  ;;  %v10206_v51 = vadd.f32 %v13587_v41, %v18625_v27  ;;  %v10499_v25 = vadd.f32 %v18651_v18, %v10498_v32  ;;  %v10198_v28 = vadd.f32 %v10197_v47, %v18619_v29 }
 0x5e4   : > { %v12908_v36 = vrot.slane %v10945_v55, 9  ;;  %v12910_v14 = vrot.slane %v10946_v13, 9  ;;  %v11765_v35 = vadd.f32 %v12907_v20, %v10937_v6  ;;  %v11767_v38 = vadd.f32 %v12909_v49, %v10944_v17  ;;  %v13591_v6 = vpop.f32.mrf.mxu1 }
 0x5e5   : > { %v10567_v52 = vadd.f32 %v10507_v24, %v10206_v51  ;;  %v10565_v61 = vadd.f32 %v10499_v25, %v10198_v28  ;;  %v10510_v5 = vadd.f32 %v18834_v62, %v13622_v31  ;;  %v10209_v27 = vadd.f32 %v13588_v44, %v18628_v46 }
 0x5e6   : > { %v11766_v57 = vadd.f32 %v12908_v36, %v10945_v55  ;;  %v11768_v18 = vadd.f32 %v12910_v14, %v10946_v13  ;;  %v11861_v11 = vadd.f32 %v11773_v10, %v11765_v35  ;;  %v11863_v29 = vadd.f32 %v11775_v58, %v11767_v38  ;;  %v10213_v35 = vpop.f32.mrf.mxu1 }
 0x5e7   : > { %v10599_v41 = vmul.f32 0.25, %v10567_v52  ;;  %v10597_v16 = vmul.f32 0.25, %v10565_v61  ;;  %v10568_v2 = vadd.f32 %v10510_v5, %v10209_v27  ;;  %v18839_v40 = vadd.f32 %v18834_v62, %v10501_v3 }
 0x5e8   : > { %v11862_v48 = vadd.f32 %v11774_v63, %v11766_v57  ;;  %v11864_v19 = vadd.f32 %v11776_v50, %v11768_v18  ;;  %v12100_v30 = vrot.slane %v11861_v11, %v18669_v12  ;;  %v12108_v43 = vrot.slane %v11863_v29, %v18669_v12  ;;  %v10514_v50 = vpop.f32.mrf.mxu0 }
 0x5e9   : > { %v11015_v32 = vcombine.high %v10599_v41, %v10599_v41  ;;  %v11022_v46 = vrot.slane %v10599_v41, %v18660_v15  ;;  %v10981_v0 = vcombine.high %v10597_v16, %v10597_v16  ;;  %v10988_v56 = vrot.slane %v10597_v16, %v18660_v15 }
 0x5ea   : > { %v12104_v33 = vrot.slane %v11862_v48, %v18669_v12  ;;  %v12112_v7 = vrot.slane %v11864_v19, %v18669_v12  ;;  %v12247_v53 = vsel %vm12215_vm4, %v12100_v30, %v12246_v22  ;;  %v10600_v60 = vmul.f32 0.25, %v10568_v2  ;;  %v13626_v5 = vpop.f32.mrf.mxu0 }
 0x5eb   : > { %v11029_v1 = vrot.slane %v11015_v32, %v18660_v15  ;;  %v11030_v47 = vcombine.high %v11022_v46, %v11022_v46  ;;  %v12927_v45 = vrot.slane %v11022_v46, 9  ;;  %v10995_v39 = vrot.slane %v10981_v0, %v18660_v15 }
 0x5ec   : > { %v12248_v10 = vsel %vm12217_vm9, %v12104_v33, %v12247_v53  ;;  %v10996_v58 = vcombine.high %v10988_v56, %v10988_v56  ;;  %v12919_v4 = vrot.slane %v10988_v56, 9  ;;  %v11032_v37 = vcombine.high %v10600_v60, %v10600_v60 }
 0x5ed   : > { %v12249_v17 = vsel %vm12219_vm12, %v12108_v43, %v12248_v10  ;;  %v11031_v31 = vcombine.high %v11029_v1, %v11029_v1  ;;  %v12928_v8 = vrot.slane %v11030_v47, 9  ;;  %v12929_v63 = vrot.slane %v11029_v1, 9  ;;  %v13592_v43 = vpop.f32.mrf.mxu1 }
 0x5ee   : > { %v12250_v24 = vsel %vm12221_vm13, %v12112_v7, %v12249_v17  ;;  %v11785_v55 = vadd.f32 %v12927_v45, %v11022_v46  ;;  %v10997_v13 = vcombine.high %v10995_v39, %v10995_v39  ;;  %v12920_v20 = vrot.slane %v10996_v58, 9 }
 0x5ef   : > { %12285 = vst.msk [vmem:[%s18707_s27 + $0x20] sm:$0xff] %vm12280_vm11, %v12250_v24  ;;  %v12930_v49 = vrot.slane %v11031_v31, 9  ;;  %v11786_v44 = vadd.f32 %v12928_v8, %v11030_v47  ;;  %v11787_v22 = vadd.f32 %v12929_v63, %v11029_v1  ;;  %v12921_v51 = vrot.slane %v10995_v39, 9 }
 0x5f0   : > { %v12922_v25 = vrot.slane %v10997_v13, 9  ;;  %v11777_v28 = vadd.f32 %v12919_v4, %v10988_v56  ;;  %v11778_v36 = vadd.f32 %v12920_v20, %v10996_v58  ;;  %v11039_v14 = vrot.slane %v10600_v60, %v18660_v15  ;;  %v10216_v4 = vpop.f32.mrf.mxu1 }
 0x5f1   : > { %v11788_v38 = vadd.f32 %v12930_v49, %v11031_v31  ;;  %v11779_v3 = vadd.f32 %v12921_v51, %v10995_v39  ;;  %v11046_v52 = vrot.slane %v11032_v37, %v18660_v15  ;;  %v10201_v61 = vadd.f32 %v10200_v9, %v18622_v59  ;;  %v10517_v59 = vpop.f32.mrf.mxu0 }
 0x5f2   : > { %v11780_v27 = vadd.f32 %v12922_v25, %v10997_v13  ;;  %v11865_v57 = vadd.f32 %v11785_v55, %v11777_v28  ;;  %v11866_v18 = vadd.f32 %v11786_v44, %v11778_v36  ;;  %v11047_v11 = vcombine.high %v11039_v14, %v11039_v14 }
 0x5f3   : > { %v11867_v29 = vadd.f32 %v11787_v22, %v11779_v3  ;;  %v11048_v41 = vcombine.high %v11046_v52, %v11046_v52  ;;  %v12931_v16 = vrot.slane %v11039_v14, 9  ;;  %v12933_v2 = vrot.slane %v11046_v52, 9  ;;  %v13629_v8 = vpop.f32.mrf.mxu0 }
 0x5f4   : > { %v11868_v48 = vadd.f32 %v11788_v38, %v11780_v27  ;;  %v12116_v19 = vrot.slane %v11865_v57, %v18669_v12  ;;  %v12120_v30 = vrot.slane %v11866_v18, %v18669_v12  ;;  %v12932_v46 = vrot.slane %v11047_v11, 9 }
 0x5f5   : > { %v12124_v32 = vrot.slane %v11867_v29, %v18669_v12  ;;  %v12934_v0 = vrot.slane %v11048_v41, 9  ;;  %v11789_v33 = vadd.f32 %v12931_v16, %v11039_v14  ;;  %v10566_v7 = vadd.f32 %v18839_v40, %v10201_v61 }
 0x5f6   : > { %v12128_v9 = vrot.slane %v11868_v48, %v18669_v12  ;;  %v12251_v56 = vsel %vm12209_vm10, %v12120_v30, %v12116_v19  ;;  %v11791_v60 = vadd.f32 %v12933_v2, %v11046_v52  ;;  %v10523_v1 = vadd.f32 %v18834_v62, %v13625_v42 }
 0x5f7   : > { %v12252_v53 = vsel %vm12211_vm14, %v12124_v32, %v12251_v56  ;;  %v10222_v47 = vadd.f32 %v13591_v6, %v18637_v21  ;;  %v10598_v45 = vmul.f32 0.25, %v10566_v7  ;;  %v10515_v10 = vadd.f32 %v18834_v62, %v10514_v50 }
 0x5f8   : > { %v12253_v39 = vsel %vm12213_vm15, %v12128_v9, %v12252_v53  ;;  %v10214_v58 = vadd.f32 %v10213_v35, %v18631_v26  ;;  %v11790_v37 = vadd.f32 %v12932_v46, %v11047_v11  ;;  %v10526_v31 = vadd.f32 %v18834_v62, %v13626_v5 }
 0x5f9   : > { %v10571_v17 = vadd.f32 %v10523_v1, %v10222_v47  ;;  %v10225_v40 = vadd.f32 %v13592_v43, %v18640_v54  ;;  %v11792_v63 = vadd.f32 %v12934_v0, %v11048_v41  ;;  %v10998_v24 = vcombine.high %v10598_v45, %v10598_v45 }
 0x5fa   : > { %v11005_v42 = vrot.slane %v10598_v45, %v18660_v15  ;;  %v10569_v21 = vadd.f32 %v10515_v10, %v10214_v58  ;;  %v10518_v13 = vadd.f32 %v18834_v62, %v10517_v59  ;;  %v10217_v50 = vadd.f32 %v10216_v4, %v18634_v34 }
 0x5fb   : > { %v10603_v6 = vmul.f32 0.25, %v10571_v17  ;;  %v10572_v55 = vadd.f32 %v10526_v31, %v10225_v40  ;;  %v11012_v26 = vrot.slane %v10998_v24, %v18660_v15  ;;  %v18877_v44 = vadd.f32 %v18834_v62, %v13629_v8  ;;  %v13595_v31 = vpop.f32.mrf.mxu1 }
 0x5fc   : > { %v11013_v20 = vcombine.high %v11005_v42, %v11005_v42  ;;  %v12923_v49 = vrot.slane %v11005_v42, 9  ;;  %v10601_v51 = vmul.f32 0.25, %v10569_v21  ;;  %v10570_v52 = vadd.f32 %v10518_v13, %v10217_v50 }
 0x5fd   : > { %v11083_v54 = vcombine.high %v10603_v6, %v10603_v6  ;;  %v11090_v22 = vrot.slane %v10603_v6, %v18660_v15  ;;  %v10604_v25 = vmul.f32 0.25, %v10572_v55  ;;  %v11014_v28 = vcombine.high %v11012_v26, %v11012_v26 }
 0x5fe   : > { %v12924_v36 = vrot.slane %v11013_v20, 9  ;;  %v12925_v14 = vrot.slane %v11012_v26, 9  ;;  %v11781_v35 = vadd.f32 %v12923_v49, %v11005_v42  ;;  %v11049_v41 = vcombine.high %v10601_v51, %v10601_v51 }
 0x5ff   : > { %v11097_v38 = vrot.slane %v11083_v54, %v18660_v15  ;;  %v11098_v3 = vcombine.high %v11090_v22, %v11090_v22  ;;  %v12943_v34 = vrot.slane %v11090_v22, 9  ;;  %v12926_v61 = vrot.slane %v11014_v28, 9 }
 0x600   : > { %v11782_v5 = vadd.f32 %v12924_v36, %v11013_v20  ;;  %v11783_v27 = vadd.f32 %v12925_v14, %v11012_v26  ;;  %v11869_v57 = vadd.f32 %v11789_v33, %v11781_v35  ;;  %v11056_v46 = vrot.slane %v10601_v51, %v18660_v15  ;;  %v10530_v51 = vpop.f32.mrf.mxu0 }
 0x601   : > { %v11099_v18 = vcombine.high %v11097_v38, %v11097_v38  ;;  %v12944_v11 = vrot.slane %v11098_v3, 9  ;;  %v12945_v29 = vrot.slane %v11097_v38, 9  ;;  %v11784_v16 = vadd.f32 %v12926_v61, %v11014_v28 }
 0x602   : > { %v11870_v2 = vadd.f32 %v11790_v37, %v11782_v5  ;;  %v11871_v48 = vadd.f32 %v11791_v60, %v11783_v27  ;;  %v12132_v19 = vrot.slane %v11869_v57, %v18669_v12  ;;  %v11801_v43 = vadd.f32 %v12943_v34, %v11090_v22  ;;  %v19417_v57 = vld [vmem:[#allocation42_spill] sm:$0xff] }
 0x603   : > { %v12946_v30 = vrot.slane %v11099_v18, 9  ;;  %v11802_v32 = vadd.f32 %v12944_v11, %v11098_v3  ;;  %v11872_v0 = vadd.f32 %v11792_v63, %v11784_v16  ;;  %v11803_v33 = vadd.f32 %v12945_v29, %v11097_v38 }
 0x604   : > { %v12136_v59 = vrot.slane %v11870_v2, %v18669_v12  ;;  %v12140_v9 = vrot.slane %v11871_v48, %v18669_v12  ;;  %v12254_v56 = vsel %vm12215_vm4, %v12132_v19, %v12253_v39  ;;  %v11063_v7 = vrot.slane %v11049_v41, %v18660_v15 }
 0x605   : > { %v11064_v53 = vcombine.high %v11056_v46, %v11056_v46  ;;  %v12935_v60 = vrot.slane %v11056_v46, 9  ;;  %v12144_v1 = vrot.slane %v11872_v0, %v18669_v12  ;;  %v11100_v45 = vcombine.high %v10604_v25, %v10604_v25 }
 0x606   : > { %v12255_v47 = vsel %vm12217_vm9, %v12136_v59, %v12254_v56  ;;  %v11107_v10 = vrot.slane %v10604_v25, %v18660_v15  ;;  %v11065_v4 = vcombine.high %v11063_v7, %v11063_v7  ;;  %v12937_v17 = vrot.slane %v11063_v7, 9  ;;  %v10229_v25 = vpop.f32.mrf.mxu1 }
 0x607   : > { %v12256_v58 = vsel %vm12219_vm12, %v12140_v9, %v12255_v47  ;;  %v12936_v37 = vrot.slane %v11064_v53, 9  ;;  %v11793_v40 = vadd.f32 %v12935_v60, %v11056_v46  ;;  %v11114_v8 = vrot.slane %v11100_v45, %v18660_v15  ;;  %v13630_v46 = vpop.f32.mrf.mxu0 }
 0x608   : > { %v12257_v39 = vsel %vm12221_vm13, %v12144_v1, %v12256_v58  ;;  %v11115_v63 = vcombine.high %v11107_v10, %v11107_v10  ;;  %v12938_v24 = vrot.slane %v11065_v4, 9  ;;  %v11795_v21 = vadd.f32 %v12937_v17, %v11063_v7  ;;  %v13596_v1 = vpop.f32.mrf.mxu1 }
 0x609   : > { %12286 = vst.msk [vmem:[%s18707_s27 + $0x28] sm:$0xff] %vm12280_vm11, %v12257_v39  ;;  %v11794_v42 = vadd.f32 %v12936_v37, %v11064_v53  ;;  %v12947_v6 = vrot.slane %v11107_v10, 9  ;;  %v11873_v55 = vadd.f32 %v11801_v43, %v11793_v40  ;;  %v11116_v13 = vcombine.high %v11114_v8, %v11114_v8 }
 0x60a   : > { %v12948_v50 = vrot.slane %v11115_v63, 9  ;;  %v10238_v26 = vadd.f32 %v13595_v31, %v18655_v23  ;;  %v11804_v20 = vadd.f32 %v12946_v30, %v11099_v18  ;;  %v11796_v49 = vadd.f32 %v12938_v24, %v11065_v4 }
 0x60b   : > { %v11874_v54 = vadd.f32 %v11802_v32, %v11794_v42  ;;  %v11875_v22 = vadd.f32 %v11803_v33, %v11795_v21  ;;  %v12148_v28 = vrot.slane %v11873_v55, %v18669_v12  ;;  %v12949_v36 = vrot.slane %v11114_v8, 9 }
 0x60c   : > { %v12950_v14 = vrot.slane %v11116_v13, 9  ;;  %v11805_v35 = vadd.f32 %v12947_v6, %v11107_v10  ;;  %v11876_v38 = vadd.f32 %v11804_v20, %v11796_v49  ;;  %v10602_v61 = vmul.f32 0.25, %v10570_v52  ;;  %v10533_v49 = vpop.f32.mrf.mxu0 }
 0x60d   : > { %v12152_v3 = vrot.slane %v11874_v54, %v18669_v12  ;;  %v12156_v34 = vrot.slane %v11875_v22, %v18669_v12  ;;  %v11806_v5 = vadd.f32 %v12948_v50, %v11115_v63  ;;  %v10575_v23 = vadd.f32 %v18877_v44, %v10238_v26  ;;  %v19418_v63 = vld [vmem:[#allocation22_spill] sm:$0xff] }
 0x60e   : > { %v10531_v27 = vadd.f32 %v18834_v62, %v10530_v51  ;;  %v10230_v18 = vadd.f32 %v10229_v25, %v19417_v57  ;;  %v12160_v11 = vrot.slane %v11876_v38, %v18669_v12  ;;  %v11066_v41 = vcombine.high %v10602_v61, %v10602_v61  ;;  %v10232_v38 = vpop.f32.mrf.mxu1 }
 0x60f   : > { %v12258_v29 = vsel %vm12209_vm10, %v12152_v3, %v12148_v28  ;;  %v11073_v16 = vrot.slane %v10602_v61, %v18660_v15  ;;  %v11807_v48 = vadd.f32 %v12949_v36, %v11114_v8  ;;  %v10607_v19 = vmul.f32 0.25, %v10575_v23 }
 0x610   : > { %v12259_v2 = vsel %vm12211_vm14, %v12156_v34, %v12258_v29  ;;  %v10573_v30 = vadd.f32 %v10531_v27, %v10230_v18  ;;  %v11080_v52 = vrot.slane %v11066_v41, %v18660_v15  ;;  %v11808_v0 = vadd.f32 %v12950_v14, %v11116_v13 }
 0x611   : > { %v11081_v43 = vcombine.high %v11073_v16, %v11073_v16  ;;  %v12939_v44 = vrot.slane %v11073_v16, 9  ;;  %v12260_v32 = vsel %vm12213_vm15, %v12160_v11, %v12259_v2  ;;  %v11151_v59 = vcombine.high %v10607_v19, %v10607_v19 }
 0x612   : > { %v11158_v9 = vrot.slane %v10607_v19, %v18660_v15  ;;  %v10605_v56 = vmul.f32 0.25, %v10573_v30  ;;  %v11082_v33 = vcombine.high %v11080_v52, %v11080_v52  ;;  %v12941_v53 = vrot.slane %v11080_v52, 9 }
 0x613   : > { %v12940_v7 = vrot.slane %v11081_v43, 9  ;;  %v11797_v60 = vadd.f32 %v12939_v44, %v11073_v16  ;;  %v11165_v47 = vrot.slane %v11151_v59, %v18660_v15  ;;  %v10542_v58 = vadd.f32 %v18834_v62, %v13630_v46  ;;  %v19419_v16 = vld [vmem:[#allocation41_spill] sm:$0xff] }
 0x614   : > { %v11166_v45 = vcombine.high %v11158_v9, %v11158_v9  ;;  %v12959_v10 = vrot.slane %v11158_v9, 9  ;;  %v12942_v4 = vrot.slane %v11082_v33, 9  ;;  %v11799_v17 = vadd.f32 %v12941_v53, %v11080_v52 }
 0x615   : > { %v11798_v37 = vadd.f32 %v12940_v7, %v11081_v43  ;;  %v11877_v31 = vadd.f32 %v11805_v35, %v11797_v60  ;;  %v11167_v39 = vcombine.high %v11165_v47, %v11165_v47  ;;  %v11117_v8 = vcombine.high %v10605_v56, %v10605_v56 }
 0x616   : > { %v12960_v40 = vrot.slane %v11166_v45, 9  ;;  %v10241_v24 = vadd.f32 %v13596_v1, %v19418_v63  ;;  %v11800_v42 = vadd.f32 %v12942_v4, %v11082_v33  ;;  %v11879_v6 = vadd.f32 %v11807_v48, %v11799_v17 }
 0x617   : > { %v11878_v21 = vadd.f32 %v11806_v5, %v11798_v37  ;;  %v12164_v55 = vrot.slane %v11877_v31, %v18669_v12  ;;  %v12961_v13 = vrot.slane %v11165_v47, 9  ;;  %v12962_v50 = vrot.slane %v11167_v39, 9 }
 0x618   : > { %v11817_v26 = vadd.f32 %v12959_v10, %v11158_v9  ;;  %v11124_v20 = vrot.slane %v10605_v56, %v18660_v15  ;;  %v11880_v54 = vadd.f32 %v11808_v0, %v11800_v42  ;;  %v12172_v51 = vrot.slane %v11879_v6, %v18669_v12 }
 0x619   : > { %v12168_v22 = vrot.slane %v11878_v21, %v18669_v12  ;;  %v12261_v25 = vsel %vm12215_vm4, %v12164_v55, %v12260_v32  ;;  %v11818_v28 = vadd.f32 %v12960_v40, %v11166_v45  ;;  %v11131_v36 = vrot.slane %v11117_v8, %v18660_v15 }
 0x61a   : > { %v11132_v14 = vcombine.high %v11124_v20, %v11124_v20  ;;  %v12951_v35 = vrot.slane %v11124_v20, 9  ;;  %v12176_v3 = vrot.slane %v11880_v54, %v18669_v12  ;;  %v10576_v61 = vadd.f32 %v10542_v58, %v10241_v24 }
 0x61b   : > { %v12262_v34 = vsel %vm12217_vm9, %v12168_v22, %v12261_v25  ;;  %v10534_v5 = vadd.f32 %v18834_v62, %v10533_v49  ;;  %v11133_v27 = vcombine.high %v11131_v36, %v11131_v36  ;;  %v12953_v18 = vrot.slane %v11131_v36, 9 }
 0x61c   : > { %v12263_v23 = vsel %vm12219_vm12, %v12172_v51, %v12262_v34  ;;  %v12952_v57 = vrot.slane %v11132_v14, 9  ;;  %v11809_v29 = vadd.f32 %v12951_v35, %v11124_v20  ;;  %v10608_v41 = vmul.f32 0.25, %v10576_v61 }
 0x61d   : > { %v12264_v11 = vsel %vm12221_vm13, %v12176_v3, %v12263_v23  ;;  %v10233_v2 = vadd.f32 %v10232_v38, %v19419_v16  ;;  %v11819_v48 = vadd.f32 %v12961_v13, %v11165_v47  ;;  %v12954_v19 = vrot.slane %v11133_v27, 9 }
 0x61e   : > { %12287 = vst.msk [vmem:[%s18707_s27 + $0x30] sm:$0xff] %vm12280_vm11, %v12264_v11  ;;  %v11810_v30 = vadd.f32 %v12952_v57, %v11132_v14  ;;  %v11811_v52 = vadd.f32 %v12953_v18, %v11131_v36  ;;  %v11881_v43 = vadd.f32 %v11817_v26, %v11809_v29  ;;  %v11168_v44 = vcombine.high %v10608_v41, %v10608_v41 }
 0x61f   : > { %v11175_v62 = vrot.slane %v10608_v41, %v18660_v15  ;;  %v10574_v32 = vadd.f32 %v10534_v5, %v10233_v2  ;;  %v11820_v46 = vadd.f32 %v12962_v50, %v11167_v39  ;;  %v11812_v0 = vadd.f32 %v12954_v19, %v11133_v27 }
 0x620   : > { %v11882_v59 = vadd.f32 %v11818_v28, %v11810_v30  ;;  %v11883_v9 = vadd.f32 %v11819_v48, %v11811_v52  ;;  %v12180_v56 = vrot.slane %v11881_v43, %v18669_v12  ;;  %v11182_v33 = vrot.slane %v11168_v44, %v18660_v15 }
 0x621   : > { %v11183_v7 = vcombine.high %v11175_v62, %v11175_v62  ;;  %v11884_v53 = vadd.f32 %v11820_v46, %v11812_v0  ;;  %v10606_v47 = vmul.f32 0.25, %v10574_v32  ;;  %v12963_v10 = vrot.slane %v11175_v62, 9 }
 0x622   : > { %v12184_v60 = vrot.slane %v11882_v59, %v18669_v12  ;;  %v12188_v1 = vrot.slane %v11883_v9, %v18669_v12  ;;  %v11184_v45 = vcombine.high %v11182_v33, %v11182_v33  ;;  %v12965_v40 = vrot.slane %v11182_v33, 9 }
 0x623   : > { %v12192_v58 = vrot.slane %v11884_v53, %v18669_v12  ;;  %v11134_v37 = vcombine.high %v10606_v47, %v10606_v47  ;;  %v11141_v17 = vrot.slane %v10606_v47, %v18660_v15  ;;  %v12964_v39 = vrot.slane %v11183_v7, 9 }
 0x624   : > { %v12265_v4 = vsel %vm12209_vm10, %v12184_v60, %v12180_v56  ;;  %v12966_v21 = vrot.slane %v11184_v45, 9  ;;  %v11821_v6 = vadd.f32 %v12963_v10, %v11175_v62  ;;  %v11823_v49 = vadd.f32 %v12965_v40, %v11182_v33 }
 0x625   : > { %v12266_v31 = vsel %vm12211_vm14, %v12188_v1, %v12265_v4  ;;  %v11148_v8 = vrot.slane %v11134_v37, %v18660_v15  ;;  %v11149_v63 = vcombine.high %v11141_v17, %v11141_v17  ;;  %v12955_v24 = vrot.slane %v11141_v17, 9 }
 0x626   : > { %v12267_v42 = vsel %vm12213_vm15, %v12192_v58, %v12266_v31  ;;  %v11822_v20 = vadd.f32 %v12964_v39, %v11183_v7  ;;  %v11824_v28 = vadd.f32 %v12966_v21, %v11184_v45 }
 0x627   : > { %v11150_v55 = vcombine.high %v11148_v8, %v11148_v8  ;;  %v12956_v13 = vrot.slane %v11149_v63, 9  ;;  %v12957_v50 = vrot.slane %v11148_v8, 9  ;;  %v11813_v26 = vadd.f32 %v12955_v24, %v11141_v17 }
 0x629   : > { %v12958_v54 = vrot.slane %v11150_v55, 9  ;;  %v11814_v22 = vadd.f32 %v12956_v13, %v11149_v63  ;;  %v11815_v51 = vadd.f32 %v12957_v50, %v11148_v8  ;;  %v11885_v25 = vadd.f32 %v11821_v6, %v11813_v26 }
 0x62b   : > { %v11816_v36 = vadd.f32 %v12958_v54, %v11150_v55  ;;  %v11886_v15 = vadd.f32 %v11822_v20, %v11814_v22  ;;  %v11887_v14 = vadd.f32 %v11823_v49, %v11815_v51  ;;  %v12196_v35 = vrot.slane %v11885_v25, %v18669_v12 }
 0x62d   : > { %v11888_v38 = vadd.f32 %v11824_v28, %v11816_v36  ;;  %v12200_v3 = vrot.slane %v11886_v15, %v18669_v12  ;;  %v12204_v34 = vrot.slane %v11887_v14, %v18669_v12  ;;  %v12268_v61 = vsel %vm12215_vm4, %v12196_v35, %v12267_v42 }
 0x62f   : > { %v12208_v5 = vrot.slane %v11888_v38, %v18669_v12  ;;  %v12269_v23 = vsel %vm12217_vm9, %v12200_v3, %v12268_v61 }
 0x630   : > { %v12270_v27 = vsel %vm12219_vm12, %v12204_v34, %v12269_v23 }
 0x631   : > { %v12271_v57 = vsel %vm12221_vm13, %v12208_v5, %v12270_v27 }
 0x632   : > { %12288 = vst.msk [vmem:[%s18707_s27 + $0x38] sm:$0xff] %vm12280_vm11, %v12271_v57 }
 0x633 PF: > { %s17_s24 = sadd.s32 1, %s13988_s24  }
 0x634   : > { %p14_p4 = scmp.ge.s32.totalorder %s17_s24, 4  }
 0x636   :  { %16 = sbr.rel (!%p14_p4) target bundleno = 1 (0x1), region = 84 }

</bundles_post_ra>
